<compile_context>
chip_gen: v5e
topology: v5e:2x2
jax: 0.10.0
libtpu: 0.0.40
codegen_flags: <defaults>
</compile_context>

<pallas_src>
import functools
import numpy as np
import jax
import jax.numpy as jnp
from jax import lax
from jax.experimental import pallas as pl
from jax.experimental.pallas import tpu as pltpu

BN_EPS = 1e-5

# Static network geometry (CIFAR10).
CIN, CIN_P = 3, 4          # input channels, padded so 32*CIN_P == 128 lanes
C1, C1_P = 6, 8            # conv1 channels (lane group size 8 -> 32 groups/256)
C2, C2_P = 16, 16          # conv2 channels (lane group size 16 -> 16 groups/256)
H0 = W0 = 32
H1 = W1 = 28               # after conv1 (valid, k=5)
HP1 = 14                   # after pool1
H2 = W2 = 10               # after conv2
HP2 = WP2 = 5              # after pool2
K = 5
LANES = 256                # padded activation lane width (power-of-two groups)
FCP = 128                  # padded FC lane width
FC1, FC2, FC3 = 120, 84, 10


# ----------------------------------------------------------------------------
# In-kernel helpers (operate on traced values, not refs)
# ----------------------------------------------------------------------------
def _lane_group_allreduce(v, cgrp):
    """v:(1, L) with L/cgrp a power of two.  Circular log-fold so every lane
    ends up holding the total over all lane groups at its channel offset
    (reduce + broadcast in one, on the XLU roll slot)."""
    lanes = v.shape[1]
    s = cgrp
    while s < lanes:
        v = v + pltpu.roll(v, s, axis=1)
        s *= 2
    return v


def _bn_relu(y, gamma_l, beta_l, cgrp, count):
    """Training-mode BatchNorm + ReLU on y:(R, LANES).

    Channels live in lane groups of size cgrp; pad lanes of y are exactly zero
    (zero weight columns), so channel sums only see real positions and the
    divisor is the real N*H*W count.  gamma_l/beta_l are pre-replicated per
    lane group.  Conv bias is omitted upstream (cancelled by mean subtraction).
    """
    ch_s = _lane_group_allreduce(jnp.sum(y, axis=0, keepdims=True), cgrp)
    ch_sq = _lane_group_allreduce(jnp.sum(y * y, axis=0, keepdims=True), cgrp)
    inv = 1.0 / float(count)
    mean = ch_s * inv
    var = jnp.maximum(ch_sq * inv - mean * mean, 0.0)        # biased (BN train)
    scale = gamma_l * lax.rsqrt(var + BN_EPS)                # folded affine
    shift = beta_l - mean * scale
    return jnp.maximum(y * scale + shift, 0.0)               # BN + ReLU


def _maxpool_h(y, n):
    """Rows are (h, n); max adjacent h pairs.  n must be a multiple of 8."""
    rows, lanes = y.shape
    hp = rows // (2 * n)
    y3 = y.reshape(hp, 2 * n, lanes)                 # leading-dim split, no data movement
    return jnp.maximum(y3[:, :n, :], y3[:, n:, :]).reshape(hp * n, lanes)


def _maxpool_w_sparse(y, w, cgrp):
    """Pairwise max of adjacent w lane-groups.  Result lane (2k)*cgrp + c holds
    pooled output (k, c); odd-group lanes are don't-care and are ignored by the
    next layer's zero weight rows (w-compaction folded into the weights)."""
    valid = w * cgrp
    return jnp.maximum(y[:, :valid - cgrp], y[:, cgrp:valid])


# ----------------------------------------------------------------------------
# Fused Pallas kernel: whole forward pass
# ----------------------------------------------------------------------------
def fused_cnn_kernel(x_ref, t1_ref, g1_ref, be1_ref, t2_ref, g2_ref, be2_ref,
                     w1_ref, b1_ref, w2_ref, b2_ref, w3_ref, b3_ref, o_ref,
                     *, real_n, n):
    cdt = t1_ref.dtype                  # matmul compute dtype (bf16)
    f32 = jnp.float32

    # --- Conv1: 5 shifted matmuls vs lane-Toeplitz weights (tree-summed) ----
    x = x_ref[...].astype(cdt)                                   # (32n, 128)
    d = [jnp.dot(x[i * n:i * n + H1 * n, :], t1_ref[i],
                 preferred_element_type=f32) for i in range(K)]
    y1 = (d[0] + d[1]) + (d[2] + d[3]) + d[4]                    # (28n, 256)

    a1 = _bn_relu(y1, g1_ref[...], be1_ref[...], C1_P, real_n * H1 * W1)
    a1 = _maxpool_h(a1, n)                                       # (14n, 256)
    a1 = _maxpool_w_sparse(a1, W1, C1_P)                         # (14n, 216)

    if real_n != n:
        # Zero padded-batch rows so conv2 outputs (and BN2 stats) stay exact.
        rows = lax.broadcasted_iota(jnp.int32, (HP1 * n, 1), 0)
        a1 = jnp.where((rows % n) < real_n, a1, 0.0)

    a1 = jnp.concatenate(                                        # clean K=256 tile
        [a1, jnp.zeros((HP1 * n, LANES - a1.shape[1]), f32)], axis=1).astype(cdt)

    # --- Conv2 ---------------------------------------------------------------
    d = [jnp.dot(a1[i * n:i * n + H2 * n, :], t2_ref[i],
                 preferred_element_type=f32) for i in range(K)]
    y2 = (d[0] + d[1]) + (d[2] + d[3]) + d[4]                    # (10n, 256)

    a2 = _bn_relu(y2, g2_ref[...], be2_ref[...], C2_P, real_n * H2 * W2)
    a2 = _maxpool_h(a2, n)                                       # (5n, 256)
    a2 = _maxpool_w_sparse(a2, W2, C2_P)                         # (5n, 144)
    a2 = jnp.concatenate(                                        # clean K=256 tile
        [a2, jnp.zeros((HP2 * n, LANES - a2.shape[1]), f32)], axis=1).astype(cdt)

    # --- Head: fc1 fed directly from a2's (hp, n) row blocks -----------------
    d = [jnp.dot(a2[hp * n:(hp + 1) * n, :], w1_ref[hp],
                 preferred_element_type=f32) for hp in range(HP2)]
    h = (d[0] + d[1]) + (d[2] + d[3]) + d[4] + b1_ref[...]
    h = jnp.maximum(h, 0.0).astype(cdt)
    h = jnp.dot(h, w2_ref[...], preferred_element_type=f32) + b2_ref[...]
    h = jnp.maximum(h, 0.0).astype(cdt)
    o_ref[...] = jnp.dot(h, w3_ref[...], preferred_element_type=f32) + b3_ref[...]


# ----------------------------------------------------------------------------
# Wrapper (boundary relayout + one pallas_call)
# ----------------------------------------------------------------------------
def my_model_forward(x_nchw, prep):
    """MyModel.forward: x (N, 3, 32, 32) -> logits (N, 10)."""
    n = x_nchw.shape[0]
    n_pad = ((n + 7) // 8) * 8                              # 8-aligned batch block
    # NCHW -> rows (h, n_pad), lanes (w, c_pad4); zero-padded batch images give
    # exactly-zero conv1 outputs, so BN statistics remain those of the real batch.
    xt = jnp.transpose(x_nchw.astype(jnp.float32), (2, 0, 3, 1))   # (H, N, W, C)
    xt = jnp.pad(xt, ((0, 0), (0, n_pad - n), (0, 0), (0, CIN_P - CIN)))
    x_wide = xt.reshape(H0 * n_pad, W0 * CIN_P)                    # (32*n_pad, 128)

    vmem = pl.BlockSpec(memory_space=pltpu.MemorySpace.VMEM)
    kernel = functools.partial(fused_cnn_kernel, real_n=n, n=n_pad)
    out = pl.pallas_call(
        kernel,
        out_shape=jax.ShapeDtypeStruct((n_pad, FCP), jnp.float32),
        in_specs=[vmem] * 13,
        out_specs=vmem,
        compiler_params=pltpu.CompilerParams(vmem_limit_bytes=32 * 1024 * 1024),
    )(x_wide,
      prep["t1"], prep["g1"], prep["be1"],
      prep["t2"], prep["g2"], prep["be2"],
      prep["fc1_w"], prep["fc1_b"],
      prep["fc2_w"], prep["fc2_b"],
      prep["fc3_w"], prep["fc3_b"])
    return out[:n, :FC3]


# ----------------------------------------------------------------------------
# Parameter construction (PyTorch layouts) and one-time kernel re-layout
# ----------------------------------------------------------------------------
def init_params(key):
    ks = jax.random.split(key, 10)

    def nrm(k, shape, scale):
        return scale * jax.random.normal(k, shape, dtype=jnp.float32)

    return {
        "c1_w": nrm(ks[0], (C1, CIN, K, K), 0.1), "c1_b": nrm(ks[1], (C1,), 0.01),
        "bn1_g": jnp.ones((C1,), jnp.float32), "bn1_b": jnp.zeros((C1,), jnp.float32),
        "c2_w": nrm(ks[2], (C2, C1, K, K), 0.1), "c2_b": nrm(ks[3], (C2,), 0.01),
        "bn2_g": jnp.ones((C2,), jnp.float32), "bn2_b": jnp.zeros((C2,), jnp.float32),
        "fc1_w": nrm(ks[4], (FC1, C2 * HP2 * WP2), 0.05),          # (120, 400)
        "fc1_b": nrm(ks[5], (FC1,), 0.01),
        "fc2_w": nrm(ks[6], (FC2, FC1), 0.05), "fc2_b": nrm(ks[7], (FC2,), 0.01),
        "fc3_w": nrm(ks[8], (FC3, FC2), 0.05), "fc3_b": nrm(ks[9], (FC3,), 0.01),
    }


def prepare_params(params, compute_dtype=jnp.bfloat16):
    """Re-layout / pad weights for the fused kernel (runs once, outside jit)."""
    c1 = np.asarray(params["c1_w"], np.float32)    # (6, 3, 5, 5)
    c2 = np.asarray(params["c2_w"], np.float32)    # (16, 6, 5, 5)

    # Conv1 lane-Toeplitz: rows (w_in, c_in) [=128], cols (w_out, c_out) [pad 256].
    t1 = np.zeros((K, W0 * CIN_P, LANES), np.float32)
    for i in range(K):
        for wo in range(W1):
            for j in range(K):
                wi = wo + j
                t1[i, wi * CIN_P:wi * CIN_P + CIN,
                   wo * C1_P:wo * C1_P + C1] = c1[:, :, i, j].T

    # Conv2: rows indexed by the *sparse* pooled-lane layout (2*w_pool)*C1_P + c_in
    # (the pool1 w-compaction is folded in here); rows/cols padded to 256.
    t2 = np.zeros((K, LANES, LANES), np.float32)
    for i in range(K):
        for wo in range(W2):
            for j in range(K):
                wj = wo + j
                t2[i, (2 * wj) * C1_P:(2 * wj) * C1_P + C1,
                   wo * C2_P:wo * C2_P + C2] = c2[:, :, i, j].T

    # fc1 split into HP2 row blocks fed straight from a2's sparse pooled-lane
    # layout; PyTorch's NCHW flatten order (c*25 + hp*5 + wp) folded in.
    fc1 = np.asarray(params["fc1_w"], np.float32)                  # (120, 400)
    w1b = np.zeros((HP2, LANES, FCP), np.float32)
    for c in range(C2):
        for hp in range(HP2):
            for wp in range(WP2):
                w1b[hp, (2 * wp) * C2_P + c, :FC1] = \
                    fc1[:, c * (HP2 * WP2) + hp * WP2 + wp]

    wfc2 = np.zeros((FCP, FCP), np.float32)
    wfc2[:FC1, :FC2] = np.asarray(params["fc2_w"], np.float32).T
    wfc3 = np.zeros((FCP, FCP), np.float32)
    wfc3[:FC2, :FC3] = np.asarray(params["fc3_w"], np.float32).T

    def pad_row(v, width):
        out = np.zeros((1, width), np.float32)
        v = np.asarray(v, np.float32)
        out[0, :v.shape[0]] = v
        return out

    def rep_groups(v, cgrp, width):
        # Replicate per-channel BN params across every lane group (hoisted
        # broadcast, so the kernel never builds scale_l/shift_l by concat).
        out = np.zeros((1, width), np.float32)
        v = np.asarray(v, np.float32)
        for g in range(width // cgrp):
            out[0, g * cgrp:g * cgrp + v.shape[0]] = v
        return out

    cd = compute_dtype
    # NOTE: conv biases (c1_b, c2_b) are intentionally dropped: training-mode
    # BatchNorm subtracts the per-channel batch mean, which cancels any
    # per-channel constant exactly (variance is also unchanged).
    return {
        "t1": jnp.asarray(t1, cd), "t2": jnp.asarray(t2, cd),
        "g1": jnp.asarray(rep_groups(params["bn1_g"], C1_P, LANES)),
        "be1": jnp.asarray(rep_groups(params["bn1_b"], C1_P, LANES)),
        "g2": jnp.asarray(rep_groups(params["bn2_g"], C2_P, LANES)),
        "be2": jnp.asarray(rep_groups(params["bn2_b"], C2_P, LANES)),
        "fc1_w": jnp.asarray(w1b, cd), "fc1_b": jnp.asarray(pad_row(params["fc1_b"], FCP)),
        "fc2_w": jnp.asarray(wfc2, cd), "fc2_b": jnp.asarray(pad_row(params["fc2_b"], FCP)),
        "fc3_w": jnp.asarray(wfc3, cd), "fc3_b": jnp.asarray(pad_row(params["fc3_b"], FCP)),
    }


# ----------------------------------------------------------------------------
# Pure-JAX reference (mirrors the PyTorch module, training-mode BN)
# ----------------------------------------------------------------------------
def reference_forward(x, params):
    def conv_bn_relu_pool(a, w, b, gamma, beta):
        y = lax.conv_general_dilated(a, w, (1, 1), "VALID",
                                     dimension_numbers=("NCHW", "OIHW", "NCHW"))
        y = y + b.reshape(1, -1, 1, 1)
        mean = jnp.mean(y, axis=(0, 2, 3), keepdims=True)
        var = jnp.mean((y - mean) ** 2, axis=(0, 2, 3), keepdims=True)
        y = (y - mean) * lax.rsqrt(var + BN_EPS)
        y = y * gamma.reshape(1, -1, 1, 1) + beta.reshape(1, -1, 1, 1)
        y = jnp.maximum(y, 0.0)
        n, c, h, ww = y.shape
        return y.reshape(n, c, h // 2, 2, ww // 2, 2).max(axis=(3, 5))

    a = conv_bn_relu_pool(x, params["c1_w"], params["c1_b"], params["bn1_g"], params["bn1_b"])
    a = conv_bn_relu_pool(a, params["c2_w"], params["c2_b"], params["bn2_g"], params["bn2_b"])
    feat = a.reshape(a.shape[0], -1)
    h = jnp.maximum(feat @ params["fc1_w"].T + params["fc1_b"], 0.0)
    h = jnp.maximum(h @ params["fc2_w"].T + params["fc2_b"], 0.0)
    return h @ params["fc3_w"].T + params["fc3_b"]


if __name__ == "__main__":
    key = jax.random.PRNGKey(0)
    pkey, xkey = jax.random.split(key)
    params = init_params(pkey)
    prep = prepare_params(params)          # hoisted out of the jitted forward

    # CIFAR10-shaped input required by the 16*5*5 flatten: (N, 3, 32, 32) NCHW.
    x = jax.random.normal(xkey, (2, 3, 32, 32), dtype=jnp.float32)

    fwd = jax.jit(my_model_forward)
    logits = fwd(x, prep)
    jax.block_until_ready(logits)

    assert logits.shape == (2, 10), logits.shape
    assert logits.dtype == jnp.float32

    ref = jax.jit(reference_forward)(x, params)
    jax.block_until_ready(ref)
    diff = float(jnp.max(jnp.abs(logits - ref)))
    assert diff < 5e-2, f"kernel/reference mismatch: max|diff|={diff}"

    print("KERNEL_OK")
</pallas_src>

<mosaic_0001>
module attributes {stable_mosaic.version = 11 : i64} {
  func.func @fused_cnn_kernel(%arg0: memref<256x128xf32, #tpu.memory_space<vmem>>, %arg1: memref<5x128x256xbf16, #tpu.memory_space<vmem>>, %arg2: memref<1x256xf32, #tpu.memory_space<vmem>>, %arg3: memref<1x256xf32, #tpu.memory_space<vmem>>, %arg4: memref<5x256x256xbf16, #tpu.memory_space<vmem>>, %arg5: memref<1x256xf32, #tpu.memory_space<vmem>>, %arg6: memref<1x256xf32, #tpu.memory_space<vmem>>, %arg7: memref<5x256x128xbf16, #tpu.memory_space<vmem>>, %arg8: memref<1x128xf32, #tpu.memory_space<vmem>>, %arg9: memref<128x128xbf16, #tpu.memory_space<vmem>>, %arg10: memref<1x128xf32, #tpu.memory_space<vmem>>, %arg11: memref<128x128xbf16, #tpu.memory_space<vmem>>, %arg12: memref<1x128xf32, #tpu.memory_space<vmem>>, %arg13: memref<8x128xf32, #tpu.memory_space<vmem>>) attributes {dimension_semantics = [], scalar_prefetch = 0 : i64, scratch_operands = 0 : i64, tpu.core_type = #tpu.core_type<tc>} {
    %c0 = arith.constant 0 : index
    %c0_0 = arith.constant 0 : index
    %0 = vector.load %arg0[%c0, %c0_0] : memref<256x128xf32, #tpu.memory_space<vmem>>, vector<256x128xf32>
    %1 = arith.truncf %0 : vector<256x128xf32> to vector<256x128xbf16>
    %2 = vector.extract_strided_slice %1 {offsets = [0, 0], sizes = [224, 128], strides = [1, 1]} : vector<256x128xbf16> to vector<224x128xbf16>
    %c0_1 = arith.constant 0 : index
    %c0_2 = arith.constant 0 : index
    %c0_3 = arith.constant 0 : index
    %3 = vector.load %arg1[%c0_1, %c0_2, %c0_3] : memref<5x128x256xbf16, #tpu.memory_space<vmem>>, vector<1x128x256xbf16>
    %4 = vector.shape_cast %3 : vector<1x128x256xbf16> to vector<128x256xbf16>
    %cst = arith.constant dense<0.000000e+00> : vector<224x256xf32>
    %5 = tpu.matmul %2, %4, %cst {dimension_numbers = #tpu.dot_dimension_numbers<[1], [0], [0], [1], [0, 0, 1, 1], [], []>} : vector<224x128xbf16>, vector<128x256xbf16>, vector<224x256xf32> -> vector<224x256xf32>
    %6 = vector.extract_strided_slice %1 {offsets = [8, 0], sizes = [224, 128], strides = [1, 1]} : vector<256x128xbf16> to vector<224x128xbf16>
    %c1 = arith.constant 1 : index
    %c0_4 = arith.constant 0 : index
    %c0_5 = arith.constant 0 : index
    %7 = vector.load %arg1[%c1, %c0_4, %c0_5] : memref<5x128x256xbf16, #tpu.memory_space<vmem>>, vector<1x128x256xbf16>
    %8 = vector.shape_cast %7 : vector<1x128x256xbf16> to vector<128x256xbf16>
    %cst_6 = arith.constant dense<0.000000e+00> : vector<224x256xf32>
    %9 = tpu.matmul %6, %8, %cst_6 {dimension_numbers = #tpu.dot_dimension_numbers<[1], [0], [0], [1], [0, 0, 1, 1], [], []>} : vector<224x128xbf16>, vector<128x256xbf16>, vector<224x256xf32> -> vector<224x256xf32>
    %10 = vector.extract_strided_slice %1 {offsets = [16, 0], sizes = [224, 128], strides = [1, 1]} : vector<256x128xbf16> to vector<224x128xbf16>
    %c2 = arith.constant 2 : index
    %c0_7 = arith.constant 0 : index
    %c0_8 = arith.constant 0 : index
    %11 = vector.load %arg1[%c2, %c0_7, %c0_8] : memref<5x128x256xbf16, #tpu.memory_space<vmem>>, vector<1x128x256xbf16>
    %12 = vector.shape_cast %11 : vector<1x128x256xbf16> to vector<128x256xbf16>
    %cst_9 = arith.constant dense<0.000000e+00> : vector<224x256xf32>
    %13 = tpu.matmul %10, %12, %cst_9 {dimension_numbers = #tpu.dot_dimension_numbers<[1], [0], [0], [1], [0, 0, 1, 1], [], []>} : vector<224x128xbf16>, vector<128x256xbf16>, vector<224x256xf32> -> vector<224x256xf32>
    %14 = vector.extract_strided_slice %1 {offsets = [24, 0], sizes = [224, 128], strides = [1, 1]} : vector<256x128xbf16> to vector<224x128xbf16>
    %c3 = arith.constant 3 : index
    %c0_10 = arith.constant 0 : index
    %c0_11 = arith.constant 0 : index
    %15 = vector.load %arg1[%c3, %c0_10, %c0_11] : memref<5x128x256xbf16, #tpu.memory_space<vmem>>, vector<1x128x256xbf16>
    %16 = vector.shape_cast %15 : vector<1x128x256xbf16> to vector<128x256xbf16>
    %cst_12 = arith.constant dense<0.000000e+00> : vector<224x256xf32>
    %17 = tpu.matmul %14, %16, %cst_12 {dimension_numbers = #tpu.dot_dimension_numbers<[1], [0], [0], [1], [0, 0, 1, 1], [], []>} : vector<224x128xbf16>, vector<128x256xbf16>, vector<224x256xf32> -> vector<224x256xf32>
    %18 = vector.extract_strided_slice %1 {offsets = [32, 0], sizes = [224, 128], strides = [1, 1]} : vector<256x128xbf16> to vector<224x128xbf16>
    %c4 = arith.constant 4 : index
    %c0_13 = arith.constant 0 : index
    %c0_14 = arith.constant 0 : index
    %19 = vector.load %arg1[%c4, %c0_13, %c0_14] : memref<5x128x256xbf16, #tpu.memory_space<vmem>>, vector<1x128x256xbf16>
    %20 = vector.shape_cast %19 : vector<1x128x256xbf16> to vector<128x256xbf16>
    %cst_15 = arith.constant dense<0.000000e+00> : vector<224x256xf32>
    %21 = tpu.matmul %18, %20, %cst_15 {dimension_numbers = #tpu.dot_dimension_numbers<[1], [0], [0], [1], [0, 0, 1, 1], [], []>} : vector<224x128xbf16>, vector<128x256xbf16>, vector<224x256xf32> -> vector<224x256xf32>
    %22 = arith.addf %5, %9 : vector<224x256xf32>
    %23 = arith.addf %13, %17 : vector<224x256xf32>
    %24 = arith.addf %22, %23 : vector<224x256xf32>
    %25 = arith.addf %24, %21 : vector<224x256xf32>
    %c0_16 = arith.constant 0 : index
    %c0_17 = arith.constant 0 : index
    %26 = vector.load %arg2[%c0_16, %c0_17] : memref<1x256xf32, #tpu.memory_space<vmem>>, vector<1x256xf32>
    %c0_18 = arith.constant 0 : index
    %c0_19 = arith.constant 0 : index
    %27 = vector.load %arg3[%c0_18, %c0_19] : memref<1x256xf32, #tpu.memory_space<vmem>>, vector<1x256xf32>
    %cst_20 = arith.constant dense<0.000000e+00> : vector<256xf32>
    %28 = vector.multi_reduction <add>, %25, %cst_20 [0] : vector<224x256xf32> to vector<256xf32>
    %29 = vector.shape_cast %28 : vector<256xf32> to vector<1x256xf32>
    %c8_i32 = arith.constant 8 : i32
    %30 = tpu.dynamic_rotate %29 by %c8_i32 dim 1 : vector<1x256xf32>, i32 -> vector<1x256xf32>
    %31 = arith.addf %29, %30 : vector<1x256xf32>
    %c16_i32 = arith.constant 16 : i32
    %32 = tpu.dynamic_rotate %31 by %c16_i32 dim 1 : vector<1x256xf32>, i32 -> vector<1x256xf32>
    %33 = arith.addf %31, %32 : vector<1x256xf32>
    %c32_i32 = arith.constant 32 : i32
    %34 = tpu.dynamic_rotate %33 by %c32_i32 dim 1 : vector<1x256xf32>, i32 -> vector<1x256xf32>
    %35 = arith.addf %33, %34 : vector<1x256xf32>
    %c64_i32 = arith.constant 64 : i32
    %36 = tpu.dynamic_rotate %35 by %c64_i32 dim 1 : vector<1x256xf32>, i32 -> vector<1x256xf32>
    %37 = arith.addf %35, %36 : vector<1x256xf32>
    %c128_i32 = arith.constant 128 : i32
    %38 = tpu.dynamic_rotate %37 by %c128_i32 dim 1 : vector<1x256xf32>, i32 -> vector<1x256xf32>
    %39 = arith.addf %37, %38 : vector<1x256xf32>
    %40 = arith.mulf %25, %25 : vector<224x256xf32>
    %cst_21 = arith.constant dense<0.000000e+00> : vector<256xf32>
    %41 = vector.multi_reduction <add>, %40, %cst_21 [0] : vector<224x256xf32> to vector<256xf32>
    %42 = vector.shape_cast %41 : vector<256xf32> to vector<1x256xf32>
    %c8_i32_22 = arith.constant 8 : i32
    %43 = tpu.dynamic_rotate %42 by %c8_i32_22 dim 1 : vector<1x256xf32>, i32 -> vector<1x256xf32>
    %44 = arith.addf %42, %43 : vector<1x256xf32>
    %c16_i32_23 = arith.constant 16 : i32
    %45 = tpu.dynamic_rotate %44 by %c16_i32_23 dim 1 : vector<1x256xf32>, i32 -> vector<1x256xf32>
    %46 = arith.addf %44, %45 : vector<1x256xf32>
    %c32_i32_24 = arith.constant 32 : i32
    %47 = tpu.dynamic_rotate %46 by %c32_i32_24 dim 1 : vector<1x256xf32>, i32 -> vector<1x256xf32>
    %48 = arith.addf %46, %47 : vector<1x256xf32>
    %c64_i32_25 = arith.constant 64 : i32
    %49 = tpu.dynamic_rotate %48 by %c64_i32_25 dim 1 : vector<1x256xf32>, i32 -> vector<1x256xf32>
    %50 = arith.addf %48, %49 : vector<1x256xf32>
    %c128_i32_26 = arith.constant 128 : i32
    %51 = tpu.dynamic_rotate %50 by %c128_i32_26 dim 1 : vector<1x256xf32>, i32 -> vector<1x256xf32>
    %52 = arith.addf %50, %51 : vector<1x256xf32>
    %cst_27 = arith.constant 6.37755089E-4 : f32
    %53 = vector.broadcast %cst_27 : f32 to vector<1x256xf32>
    %54 = arith.mulf %39, %53 : vector<1x256xf32>
    %cst_28 = arith.constant 6.37755089E-4 : f32
    %55 = vector.broadcast %cst_28 : f32 to vector<1x256xf32>
    %56 = arith.mulf %52, %55 : vector<1x256xf32>
    %57 = arith.mulf %54, %54 : vector<1x256xf32>
    %58 = arith.subf %56, %57 : vector<1x256xf32>
    %cst_29 = arith.constant 0.000000e+00 : f32
    %59 = vector.broadcast %cst_29 : f32 to vector<1x256xf32>
    %60 = arith.maximumf %58, %59 : vector<1x256xf32>
    %cst_30 = arith.constant 9.99999974E-6 : f32
    %61 = vector.broadcast %cst_30 : f32 to vector<1x256xf32>
    %62 = arith.addf %60, %61 : vector<1x256xf32>
    %63 = math.rsqrt %62 : vector<1x256xf32>
    %64 = arith.mulf %26, %63 : vector<1x256xf32>
    %65 = arith.mulf %54, %64 : vector<1x256xf32>
    %66 = arith.subf %27, %65 : vector<1x256xf32>
    %67 = vector.broadcast %64 : vector<1x256xf32> to vector<224x256xf32>
    %68 = arith.mulf %25, %67 : vector<224x256xf32>
    %69 = vector.broadcast %66 : vector<1x256xf32> to vector<224x256xf32>
    %70 = arith.addf %68, %69 : vector<224x256xf32>
    %cst_31 = arith.constant 0.000000e+00 : f32
    %71 = vector.broadcast %cst_31 : f32 to vector<224x256xf32>
    %72 = arith.maximumf %70, %71 : vector<224x256xf32>
    %73 = vector.shape_cast %72 : vector<224x256xf32> to vector<14x16x256xf32>
    %74 = vector.extract_strided_slice %73 {offsets = [0, 0, 0], sizes = [14, 8, 256], strides = [1, 1, 1]} : vector<14x16x256xf32> to vector<14x8x256xf32>
    %75 = vector.extract_strided_slice %73 {offsets = [0, 8, 0], sizes = [14, 8, 256], strides = [1, 1, 1]} : vector<14x16x256xf32> to vector<14x8x256xf32>
    %76 = arith.maximumf %74, %75 : vector<14x8x256xf32>
    %77 = vector.shape_cast %76 : vector<14x8x256xf32> to vector<112x256xf32>
    %78 = vector.extract_strided_slice %77 {offsets = [0, 0], sizes = [112, 216], strides = [1, 1]} : vector<112x256xf32> to vector<112x216xf32>
    %79 = vector.extract_strided_slice %77 {offsets = [0, 8], sizes = [112, 216], strides = [1, 1]} : vector<112x256xf32> to vector<112x216xf32>
    %80 = arith.maximumf %78, %79 : vector<112x216xf32>
    %81 = tpu.iota {dimensions = array<i32: 0>} : vector<112x1xi32>
    %c8_i32_32 = arith.constant 8 : i32
    %c0_i32 = arith.constant 0 : i32
    %82 = arith.cmpi eq, %c8_i32_32, %c0_i32 : i32
    %c1_i32 = arith.constant 1 : i32
    %83 = arith.select %82, %c1_i32, %c8_i32_32 : i32
    %84 = vector.broadcast %83 : i32 to vector<112x1xi32>
    %85 = arith.remsi %81, %84 : vector<112x1xi32>
    %c0_i32_33 = arith.constant 0 : i32
    %86 = vector.broadcast %c0_i32_33 : i32 to vector<112x1xi32>
    %87 = arith.cmpi ne, %85, %86 : vector<112x1xi32>
    %c0_i32_34 = arith.constant 0 : i32
    %88 = vector.broadcast %c0_i32_34 : i32 to vector<112x1xi32>
    %89 = arith.cmpi slt, %85, %88 : vector<112x1xi32>
    %c0_i32_35 = arith.constant 0 : i32
    %90 = arith.cmpi slt, %83, %c0_i32_35 : i32
    %91 = vector.broadcast %90 : i1 to vector<112x1xi1>
    %92 = vector.broadcast %91 : vector<112x1xi1> to vector<112x1xi1>
    %93 = arith.xori %89, %92 : vector<112x1xi1>
    %94 = arith.andi %93, %87 : vector<112x1xi1>
    %95 = vector.broadcast %83 : i32 to vector<112x1xi32>
    %96 = arith.addi %85, %95 : vector<112x1xi32>
    %97 = arith.select %94, %96, %85 : vector<112x1xi1>, vector<112x1xi32>
    %c2_i32 = arith.constant 2 : i32
    %98 = vector.broadcast %c2_i32 : i32 to vector<112x1xi32>
    %99 = arith.cmpi slt, %97, %98 : vector<112x1xi32>
    %cst_36 = arith.constant 0.000000e+00 : f32
    %100 = vector.shape_cast %99 : vector<112x1xi1> to vector<112x1xi1>
    %101 = vector.broadcast %100 : vector<112x1xi1> to vector<112x216xi1>
    %102 = vector.broadcast %cst_36 : f32 to vector<112x216xf32>
    %103 = arith.select %101, %80, %102 : vector<112x216xi1>, vector<112x216xf32>
    %cst_37 = arith.constant 0.000000e+00 : f32
    %104 = vector.broadcast %cst_37 : f32 to vector<112x40xf32>
    %105 = tpu.concatenate %103, %104 in 1 : vector<112x216xf32>, vector<112x40xf32> -> vector<112x256xf32>
    %106 = arith.truncf %105 : vector<112x256xf32> to vector<112x256xbf16>
    %107 = vector.extract_strided_slice %106 {offsets = [0, 0], sizes = [80, 256], strides = [1, 1]} : vector<112x256xbf16> to vector<80x256xbf16>
    %c0_38 = arith.constant 0 : index
    %c0_39 = arith.constant 0 : index
    %c0_40 = arith.constant 0 : index
    %108 = vector.load %arg4[%c0_38, %c0_39, %c0_40] : memref<5x256x256xbf16, #tpu.memory_space<vmem>>, vector<1x256x256xbf16>
    %109 = vector.shape_cast %108 : vector<1x256x256xbf16> to vector<256x256xbf16>
    %cst_41 = arith.constant dense<0.000000e+00> : vector<80x256xf32>
    %110 = tpu.matmul %107, %109, %cst_41 {dimension_numbers = #tpu.dot_dimension_numbers<[1], [0], [0], [1], [0, 0, 1, 1], [], []>} : vector<80x256xbf16>, vector<256x256xbf16>, vector<80x256xf32> -> vector<80x256xf32>
    %111 = vector.extract_strided_slice %106 {offsets = [8, 0], sizes = [80, 256], strides = [1, 1]} : vector<112x256xbf16> to vector<80x256xbf16>
    %c1_42 = arith.constant 1 : index
    %c0_43 = arith.constant 0 : index
    %c0_44 = arith.constant 0 : index
    %112 = vector.load %arg4[%c1_42, %c0_43, %c0_44] : memref<5x256x256xbf16, #tpu.memory_space<vmem>>, vector<1x256x256xbf16>
    %113 = vector.shape_cast %112 : vector<1x256x256xbf16> to vector<256x256xbf16>
    %cst_45 = arith.constant dense<0.000000e+00> : vector<80x256xf32>
    %114 = tpu.matmul %111, %113, %cst_45 {dimension_numbers = #tpu.dot_dimension_numbers<[1], [0], [0], [1], [0, 0, 1, 1], [], []>} : vector<80x256xbf16>, vector<256x256xbf16>, vector<80x256xf32> -> vector<80x256xf32>
    %115 = vector.extract_strided_slice %106 {offsets = [16, 0], sizes = [80, 256], strides = [1, 1]} : vector<112x256xbf16> to vector<80x256xbf16>
    %c2_46 = arith.constant 2 : index
    %c0_47 = arith.constant 0 : index
    %c0_48 = arith.constant 0 : index
    %116 = vector.load %arg4[%c2_46, %c0_47, %c0_48] : memref<5x256x256xbf16, #tpu.memory_space<vmem>>, vector<1x256x256xbf16>
    %117 = vector.shape_cast %116 : vector<1x256x256xbf16> to vector<256x256xbf16>
    %cst_49 = arith.constant dense<0.000000e+00> : vector<80x256xf32>
    %118 = tpu.matmul %115, %117, %cst_49 {dimension_numbers = #tpu.dot_dimension_numbers<[1], [0], [0], [1], [0, 0, 1, 1], [], []>} : vector<80x256xbf16>, vector<256x256xbf16>, vector<80x256xf32> -> vector<80x256xf32>
    %119 = vector.extract_strided_slice %106 {offsets = [24, 0], sizes = [80, 256], strides = [1, 1]} : vector<112x256xbf16> to vector<80x256xbf16>
    %c3_50 = arith.constant 3 : index
    %c0_51 = arith.constant 0 : index
    %c0_52 = arith.constant 0 : index
    %120 = vector.load %arg4[%c3_50, %c0_51, %c0_52] : memref<5x256x256xbf16, #tpu.memory_space<vmem>>, vector<1x256x256xbf16>
    %121 = vector.shape_cast %120 : vector<1x256x256xbf16> to vector<256x256xbf16>
    %cst_53 = arith.constant dense<0.000000e+00> : vector<80x256xf32>
    %122 = tpu.matmul %119, %121, %cst_53 {dimension_numbers = #tpu.dot_dimension_numbers<[1], [0], [0], [1], [0, 0, 1, 1], [], []>} : vector<80x256xbf16>, vector<256x256xbf16>, vector<80x256xf32> -> vector<80x256xf32>
    %123 = vector.extract_strided_slice %106 {offsets = [32, 0], sizes = [80, 256], strides = [1, 1]} : vector<112x256xbf16> to vector<80x256xbf16>
    %c4_54 = arith.constant 4 : index
    %c0_55 = arith.constant 0 : index
    %c0_56 = arith.constant 0 : index
    %124 = vector.load %arg4[%c4_54, %c0_55, %c0_56] : memref<5x256x256xbf16, #tpu.memory_space<vmem>>, vector<1x256x256xbf16>
    %125 = vector.shape_cast %124 : vector<1x256x256xbf16> to vector<256x256xbf16>
    %cst_57 = arith.constant dense<0.000000e+00> : vector<80x256xf32>
    %126 = tpu.matmul %123, %125, %cst_57 {dimension_numbers = #tpu.dot_dimension_numbers<[1], [0], [0], [1], [0, 0, 1, 1], [], []>} : vector<80x256xbf16>, vector<256x256xbf16>, vector<80x256xf32> -> vector<80x256xf32>
    %127 = arith.addf %110, %114 : vector<80x256xf32>
    %128 = arith.addf %118, %122 : vector<80x256xf32>
    %129 = arith.addf %127, %128 : vector<80x256xf32>
    %130 = arith.addf %129, %126 : vector<80x256xf32>
    %c0_58 = arith.constant 0 : index
    %c0_59 = arith.constant 0 : index
    %131 = vector.load %arg5[%c0_58, %c0_59] : memref<1x256xf32, #tpu.memory_space<vmem>>, vector<1x256xf32>
    %c0_60 = arith.constant 0 : index
    %c0_61 = arith.constant 0 : index
    %132 = vector.load %arg6[%c0_60, %c0_61] : memref<1x256xf32, #tpu.memory_space<vmem>>, vector<1x256xf32>
    %cst_62 = arith.constant dense<0.000000e+00> : vector<256xf32>
    %133 = vector.multi_reduction <add>, %130, %cst_62 [0] : vector<80x256xf32> to vector<256xf32>
    %134 = vector.shape_cast %133 : vector<256xf32> to vector<1x256xf32>
    %c16_i32_63 = arith.constant 16 : i32
    %135 = tpu.dynamic_rotate %134 by %c16_i32_63 dim 1 : vector<1x256xf32>, i32 -> vector<1x256xf32>
    %136 = arith.addf %134, %135 : vector<1x256xf32>
    %c32_i32_64 = arith.constant 32 : i32
    %137 = tpu.dynamic_rotate %136 by %c32_i32_64 dim 1 : vector<1x256xf32>, i32 -> vector<1x256xf32>
    %138 = arith.addf %136, %137 : vector<1x256xf32>
    %c64_i32_65 = arith.constant 64 : i32
    %139 = tpu.dynamic_rotate %138 by %c64_i32_65 dim 1 : vector<1x256xf32>, i32 -> vector<1x256xf32>
    %140 = arith.addf %138, %139 : vector<1x256xf32>
    %c128_i32_66 = arith.constant 128 : i32
    %141 = tpu.dynamic_rotate %140 by %c128_i32_66 dim 1 : vector<1x256xf32>, i32 -> vector<1x256xf32>
    %142 = arith.addf %140, %141 : vector<1x256xf32>
    %143 = arith.mulf %130, %130 : vector<80x256xf32>
    %cst_67 = arith.constant dense<0.000000e+00> : vector<256xf32>
    %144 = vector.multi_reduction <add>, %143, %cst_67 [0] : vector<80x256xf32> to vector<256xf32>
    %145 = vector.shape_cast %144 : vector<256xf32> to vector<1x256xf32>
    %c16_i32_68 = arith.constant 16 : i32
    %146 = tpu.dynamic_rotate %145 by %c16_i32_68 dim 1 : vector<1x256xf32>, i32 -> vector<1x256xf32>
    %147 = arith.addf %145, %146 : vector<1x256xf32>
    %c32_i32_69 = arith.constant 32 : i32
    %148 = tpu.dynamic_rotate %147 by %c32_i32_69 dim 1 : vector<1x256xf32>, i32 -> vector<1x256xf32>
    %149 = arith.addf %147, %148 : vector<1x256xf32>
    %c64_i32_70 = arith.constant 64 : i32
    %150 = tpu.dynamic_rotate %149 by %c64_i32_70 dim 1 : vector<1x256xf32>, i32 -> vector<1x256xf32>
    %151 = arith.addf %149, %150 : vector<1x256xf32>
    %c128_i32_71 = arith.constant 128 : i32
    %152 = tpu.dynamic_rotate %151 by %c128_i32_71 dim 1 : vector<1x256xf32>, i32 -> vector<1x256xf32>
    %153 = arith.addf %151, %152 : vector<1x256xf32>
    %cst_72 = arith.constant 5.000000e-03 : f32
    %154 = vector.broadcast %cst_72 : f32 to vector<1x256xf32>
    %155 = arith.mulf %142, %154 : vector<1x256xf32>
    %cst_73 = arith.constant 5.000000e-03 : f32
    %156 = vector.broadcast %cst_73 : f32 to vector<1x256xf32>
    %157 = arith.mulf %153, %156 : vector<1x256xf32>
    %158 = arith.mulf %155, %155 : vector<1x256xf32>
    %159 = arith.subf %157, %158 : vector<1x256xf32>
    %cst_74 = arith.constant 0.000000e+00 : f32
    %160 = vector.broadcast %cst_74 : f32 to vector<1x256xf32>
    %161 = arith.maximumf %159, %160 : vector<1x256xf32>
    %cst_75 = arith.constant 9.99999974E-6 : f32
    %162 = vector.broadcast %cst_75 : f32 to vector<1x256xf32>
    %163 = arith.addf %161, %162 : vector<1x256xf32>
    %164 = math.rsqrt %163 : vector<1x256xf32>
    %165 = arith.mulf %131, %164 : vector<1x256xf32>
    %166 = arith.mulf %155, %165 : vector<1x256xf32>
    %167 = arith.subf %132, %166 : vector<1x256xf32>
    %168 = vector.broadcast %165 : vector<1x256xf32> to vector<80x256xf32>
    %169 = arith.mulf %130, %168 : vector<80x256xf32>
    %170 = vector.broadcast %167 : vector<1x256xf32> to vector<80x256xf32>
    %171 = arith.addf %169, %170 : vector<80x256xf32>
    %cst_76 = arith.constant 0.000000e+00 : f32
    %172 = vector.broadcast %cst_76 : f32 to vector<80x256xf32>
    %173 = arith.maximumf %171, %172 : vector<80x256xf32>
    %174 = vector.shape_cast %173 : vector<80x256xf32> to vector<5x16x256xf32>
    %175 = vector.extract_strided_slice %174 {offsets = [0, 0, 0], sizes = [5, 8, 256], strides = [1, 1, 1]} : vector<5x16x256xf32> to vector<5x8x256xf32>
    %176 = vector.extract_strided_slice %174 {offsets = [0, 8, 0], sizes = [5, 8, 256], strides = [1, 1, 1]} : vector<5x16x256xf32> to vector<5x8x256xf32>
    %177 = arith.maximumf %175, %176 : vector<5x8x256xf32>
    %178 = vector.shape_cast %177 : vector<5x8x256xf32> to vector<40x256xf32>
    %179 = vector.extract_strided_slice %178 {offsets = [0, 0], sizes = [40, 144], strides = [1, 1]} : vector<40x256xf32> to vector<40x144xf32>
    %180 = vector.extract_strided_slice %178 {offsets = [0, 16], sizes = [40, 144], strides = [1, 1]} : vector<40x256xf32> to vector<40x144xf32>
    %181 = arith.maximumf %179, %180 : vector<40x144xf32>
    %cst_77 = arith.constant 0.000000e+00 : f32
    %182 = vector.broadcast %cst_77 : f32 to vector<40x112xf32>
    %183 = tpu.concatenate %181, %182 in 1 : vector<40x144xf32>, vector<40x112xf32> -> vector<40x256xf32>
    %184 = arith.truncf %183 : vector<40x256xf32> to vector<40x256xbf16>
    %185 = vector.extract_strided_slice %184 {offsets = [0, 0], sizes = [8, 256], strides = [1, 1]} : vector<40x256xbf16> to vector<8x256xbf16>
    %c0_78 = arith.constant 0 : index
    %c0_79 = arith.constant 0 : index
    %c0_80 = arith.constant 0 : index
    %186 = vector.load %arg7[%c0_78, %c0_79, %c0_80] : memref<5x256x128xbf16, #tpu.memory_space<vmem>>, vector<1x256x128xbf16>
    %187 = vector.shape_cast %186 : vector<1x256x128xbf16> to vector<256x128xbf16>
    %cst_81 = arith.constant dense<0.000000e+00> : vector<8x128xf32>
    %188 = tpu.matmul %185, %187, %cst_81 {dimension_numbers = #tpu.dot_dimension_numbers<[1], [0], [0], [1], [0, 0, 1, 1], [], []>} : vector<8x256xbf16>, vector<256x128xbf16>, vector<8x128xf32> -> vector<8x128xf32>
    %189 = vector.extract_strided_slice %184 {offsets = [8, 0], sizes = [8, 256], strides = [1, 1]} : vector<40x256xbf16> to vector<8x256xbf16>
    %c1_82 = arith.constant 1 : index
    %c0_83 = arith.constant 0 : index
    %c0_84 = arith.constant 0 : index
    %190 = vector.load %arg7[%c1_82, %c0_83, %c0_84] : memref<5x256x128xbf16, #tpu.memory_space<vmem>>, vector<1x256x128xbf16>
    %191 = vector.shape_cast %190 : vector<1x256x128xbf16> to vector<256x128xbf16>
    %cst_85 = arith.constant dense<0.000000e+00> : vector<8x128xf32>
    %192 = tpu.matmul %189, %191, %cst_85 {dimension_numbers = #tpu.dot_dimension_numbers<[1], [0], [0], [1], [0, 0, 1, 1], [], []>} : vector<8x256xbf16>, vector<256x128xbf16>, vector<8x128xf32> -> vector<8x128xf32>
    %193 = vector.extract_strided_slice %184 {offsets = [16, 0], sizes = [8, 256], strides = [1, 1]} : vector<40x256xbf16> to vector<8x256xbf16>
    %c2_86 = arith.constant 2 : index
    %c0_87 = arith.constant 0 : index
    %c0_88 = arith.constant 0 : index
    %194 = vector.load %arg7[%c2_86, %c0_87, %c0_88] : memref<5x256x128xbf16, #tpu.memory_space<vmem>>, vector<1x256x128xbf16>
    %195 = vector.shape_cast %194 : vector<1x256x128xbf16> to vector<256x128xbf16>
    %cst_89 = arith.constant dense<0.000000e+00> : vector<8x128xf32>
    %196 = tpu.matmul %193, %195, %cst_89 {dimension_numbers = #tpu.dot_dimension_numbers<[1], [0], [0], [1], [0, 0, 1, 1], [], []>} : vector<8x256xbf16>, vector<256x128xbf16>, vector<8x128xf32> -> vector<8x128xf32>
    %197 = vector.extract_strided_slice %184 {offsets = [24, 0], sizes = [8, 256], strides = [1, 1]} : vector<40x256xbf16> to vector<8x256xbf16>
    %c3_90 = arith.constant 3 : index
    %c0_91 = arith.constant 0 : index
    %c0_92 = arith.constant 0 : index
    %198 = vector.load %arg7[%c3_90, %c0_91, %c0_92] : memref<5x256x128xbf16, #tpu.memory_space<vmem>>, vector<1x256x128xbf16>
    %199 = vector.shape_cast %198 : vector<1x256x128xbf16> to vector<256x128xbf16>
    %cst_93 = arith.constant dense<0.000000e+00> : vector<8x128xf32>
    %200 = tpu.matmul %197, %199, %cst_93 {dimension_numbers = #tpu.dot_dimension_numbers<[1], [0], [0], [1], [0, 0, 1, 1], [], []>} : vector<8x256xbf16>, vector<256x128xbf16>, vector<8x128xf32> -> vector<8x128xf32>
    %201 = vector.extract_strided_slice %184 {offsets = [32, 0], sizes = [8, 256], strides = [1, 1]} : vector<40x256xbf16> to vector<8x256xbf16>
    %c4_94 = arith.constant 4 : index
    %c0_95 = arith.constant 0 : index
    %c0_96 = arith.constant 0 : index
    %202 = vector.load %arg7[%c4_94, %c0_95, %c0_96] : memref<5x256x128xbf16, #tpu.memory_space<vmem>>, vector<1x256x128xbf16>
    %203 = vector.shape_cast %202 : vector<1x256x128xbf16> to vector<256x128xbf16>
    %cst_97 = arith.constant dense<0.000000e+00> : vector<8x128xf32>
    %204 = tpu.matmul %201, %203, %cst_97 {dimension_numbers = #tpu.dot_dimension_numbers<[1], [0], [0], [1], [0, 0, 1, 1], [], []>} : vector<8x256xbf16>, vector<256x128xbf16>, vector<8x128xf32> -> vector<8x128xf32>
    %205 = arith.addf %188, %192 : vector<8x128xf32>
    %206 = arith.addf %196, %200 : vector<8x128xf32>
    %207 = arith.addf %205, %206 : vector<8x128xf32>
    %208 = arith.addf %207, %204 : vector<8x128xf32>
    %c0_98 = arith.constant 0 : index
    %c0_99 = arith.constant 0 : index
    %209 = vector.load %arg8[%c0_98, %c0_99] : memref<1x128xf32, #tpu.memory_space<vmem>>, vector<1x128xf32>
    %210 = vector.broadcast %209 : vector<1x128xf32> to vector<8x128xf32>
    %211 = arith.addf %208, %210 : vector<8x128xf32>
    %cst_100 = arith.constant 0.000000e+00 : f32
    %212 = vector.broadcast %cst_100 : f32 to vector<8x128xf32>
    %213 = arith.maximumf %211, %212 : vector<8x128xf32>
    %214 = arith.truncf %213 : vector<8x128xf32> to vector<8x128xbf16>
    %c0_101 = arith.constant 0 : index
    %c0_102 = arith.constant 0 : index
    %215 = vector.load %arg9[%c0_101, %c0_102] : memref<128x128xbf16, #tpu.memory_space<vmem>>, vector<128x128xbf16>
    %cst_103 = arith.constant dense<0.000000e+00> : vector<8x128xf32>
    %216 = tpu.matmul %214, %215, %cst_103 {dimension_numbers = #tpu.dot_dimension_numbers<[1], [0], [0], [1], [0, 0, 1, 1], [], []>} : vector<8x128xbf16>, vector<128x128xbf16>, vector<8x128xf32> -> vector<8x128xf32>
    %c0_104 = arith.constant 0 : index
    %c0_105 = arith.constant 0 : index
    %217 = vector.load %arg10[%c0_104, %c0_105] : memref<1x128xf32, #tpu.memory_space<vmem>>, vector<1x128xf32>
    %218 = vector.broadcast %217 : vector<1x128xf32> to vector<8x128xf32>
    %219 = arith.addf %216, %218 : vector<8x128xf32>
    %cst_106 = arith.constant 0.000000e+00 : f32
    %220 = vector.broadcast %cst_106 : f32 to vector<8x128xf32>
    %221 = arith.maximumf %219, %220 : vector<8x128xf32>
    %222 = arith.truncf %221 : vector<8x128xf32> to vector<8x128xbf16>
    %c0_107 = arith.constant 0 : index
    %c0_108 = arith.constant 0 : index
    %223 = vector.load %arg11[%c0_107, %c0_108] : memref<128x128xbf16, #tpu.memory_space<vmem>>, vector<128x128xbf16>
    %cst_109 = arith.constant dense<0.000000e+00> : vector<8x128xf32>
    %224 = tpu.matmul %222, %223, %cst_109 {dimension_numbers = #tpu.dot_dimension_numbers<[1], [0], [0], [1], [0, 0, 1, 1], [], []>} : vector<8x128xbf16>, vector<128x128xbf16>, vector<8x128xf32> -> vector<8x128xf32>
    %c0_110 = arith.constant 0 : index
    %c0_111 = arith.constant 0 : index
    %225 = vector.load %arg12[%c0_110, %c0_111] : memref<1x128xf32, #tpu.memory_space<vmem>>, vector<1x128xf32>
    %226 = vector.broadcast %225 : vector<1x128xf32> to vector<8x128xf32>
    %227 = arith.addf %224, %226 : vector<8x128xf32>
    %c0_112 = arith.constant 0 : index
    %c0_113 = arith.constant 0 : index
    %228 = vector.load %arg13[%c0_112, %c0_113] : memref<8x128xf32, #tpu.memory_space<vmem>>, vector<8x128xf32>
    tpu.vector_store %arg13[%c0_112, %c0_113], %227 {strides = array<i32>} : memref<8x128xf32, #tpu.memory_space<vmem>>, vector<8x128xf32>,
    return
  }
}

</mosaic_0001>

<bundles_post_ra>
// kernel: my_model_forward.1
= control target key start
LH: loop header
LB: loop body
LE: loop exit
PB: predicated region body
PF: predicated region fallthrough
CT: control target
= control target key end

     0   :  { %s7737_s17 = smov 16   ;;  %s7738_s18 = smov 32   ;;  %vm1900_vm7 = vcmask 1040384   ;;  %vm2202_vm8 = vcmask 982016   ;;  %vm2526_vm10 = vcmask 719872   ;;  %s12201_s1 = inlined_call_operand.vmem [shape: bf16[5,128,256], index: 1, kind: input, shape index: {}]   ;;  %s12202_s0 = inlined_call_operand.vmem [shape: f32[256,128], index: 0, kind: input, shape index: {}]   ;;  %s12203_s4 = inlined_call_operand.vmem [shape: bf16[5,256,256], index: 4, kind: input, shape index: {}]   ;;  %s12204_s2 = inlined_call_operand.vmem [shape: f32[1,256], index: 2, kind: input, shape index: {}]   ;;  %s12205_s3 = inlined_call_operand.vmem [shape: f32[1,256], index: 3, kind: input, shape index: {}]   ;;  %s12206_s5 = inlined_call_operand.vmem [shape: f32[1,256], index: 5, kind: input, shape index: {}]   ;;  %s12207_s7 = inlined_call_operand.vmem [shape: bf16[5,256,128], index: 7, kind: input, shape index: {}]   ;;  %s12208_s6 = inlined_call_operand.vmem [shape: f32[1,256], index: 6, kind: input, shape index: {}]   ;;  %s12209_s8 = inlined_call_operand.vmem [shape: f32[1,128], index: 8, kind: input, shape index: {}]   ;;  %s12210_s10 = inlined_call_operand.vmem [shape: f32[1,128], index: 10, kind: input, shape index: {}]   ;;  %s12211_s9 = inlined_call_operand.vmem [shape: bf16[128,128], index: 9, kind: input, shape index: {}]   ;;  %s12212_s11 = inlined_call_operand.vmem [shape: bf16[128,128], index: 11, kind: input, shape index: {}]   ;;  %s12213_s12 = inlined_call_operand.vmem [shape: f32[1,128], index: 12, kind: input, shape index: {}]   ;;  %s12214_s13 = inlined_call_operand.vmem [shape: f32[8,128], index: 13, kind: output, shape index: {}]  }
   0x1   :  { %v5702_v0 = vld [vmem:[%s12201_s1 + $0xf0] sm:$0xf]  ;;  %v7323_v1 = vld [vmem:[%s12201_s1 + $0xf4] sm:$0xf0]  ;;  %v7322_v2 = vld [vmem:[%s12201_s1 + $0xf4] sm:$0xf] }
   0x2   :  { %v5703_v3 = vor.u32 %v7323_v1, %v5702_v0  ;;  %v5704_v4 = vld [vmem:[%s12201_s1 + $0xf8] sm:$0xf0]  ;;  %v5798_v5 = vld [vmem:[%s12201_s1 + $0x1f0] sm:$0xf]  ;;  %v7355_v6 = vld [vmem:[%s12201_s1 + $0x1f4] sm:$0xf0] }
   0x3   :  { %v5707_v7 = vor.u32 %v7322_v2, %v5704_v4  ;;  %v5799_v8 = vor.u32 %v7355_v6, %v5798_v5  ;;  %v7354_v9 = vld [vmem:[%s12201_s1 + $0x1f4] sm:$0xf]  ;;  %v5800_v10 = vld [vmem:[%s12201_s1 + $0x1f8] sm:$0xf0]  ;;  %v5694_v11 = vld [vmem:[%s12201_s1 + $0xe0] sm:$0xf] }
   0x4   :  { %305 = vmatpush.bf16.msra.mxu0 %v5703_v3  ;;  %v5803_v12 = vor.u32 %v7354_v9, %v5800_v10  ;;  %v7321_v13 = vld [vmem:[%s12201_s1 + $0xe4] sm:$0xf0]  ;;  %v7320_v14 = vld [vmem:[%s12201_s1 + $0xe4] sm:$0xf]  ;;  %v5696_v15 = vld [vmem:[%s12201_s1 + $0xe8] sm:$0xf0] }
   0x5   :  { %384 = vmatpush.bf16.msra.mxu1 %v5707_v7  ;;  %583 = vmatpush.bf16.msra.mxu2 %v5799_v8  ;;  %v5695_v16 = vor.u32 %v7321_v13, %v5694_v11  ;;  %v5699_v17 = vor.u32 %v7320_v14, %v5696_v15  ;;  %v5790_v18 = vld [vmem:[%s12201_s1 + $0x1e0] sm:$0xf]  ;;  %v7353_v19 = vld [vmem:[%s12201_s1 + $0x1e4] sm:$0xf0]  ;;  %v7352_v20 = vld [vmem:[%s12201_s1 + $0x1e4] sm:$0xf] }
   0x6   :  { %662 = vmatpush.bf16.msra.mxu3 %v5803_v12  ;;  %v5791_v21 = vor.u32 %v7353_v19, %v5790_v18  ;;  %v5792_v22 = vld [vmem:[%s12201_s1 + $0x1e8] sm:$0xf0]  ;;  %v5686_v23 = vld [vmem:[%s12201_s1 + $0xd0] sm:$0xf]  ;;  %v7319_v24 = vld [vmem:[%s12201_s1 + $0xd4] sm:$0xf0] }
   0x7   :  { %v5795_v25 = vor.u32 %v7352_v20, %v5792_v22  ;;  %v7318_v26 = vld [vmem:[%s12201_s1 + $0xd4] sm:$0xf]  ;;  %v5688_v27 = vld [vmem:[%s12201_s1 + $0xd8] sm:$0xf0]  ;;  %v5782_v28 = vld [vmem:[%s12201_s1 + $0x1d0] sm:$0xf]  ;;  %v5687_v29 = vor.u32 %v7319_v24, %v5686_v23 }
   0x8   :  { %306 = vmatpush.bf16.msra.mxu0 %v5695_v16  ;;  %v7351_v30 = vld [vmem:[%s12201_s1 + $0x1d4] sm:$0xf0]  ;;  %v7350_v31 = vld [vmem:[%s12201_s1 + $0x1d4] sm:$0xf]  ;;  %v5784_v32 = vld [vmem:[%s12201_s1 + $0x1d8] sm:$0xf0]  ;;  %v5691_v33 = vor.u32 %v7318_v26, %v5688_v27 }
   0x9   :  { %385 = vmatpush.bf16.msra.mxu1 %v5699_v17  ;;  %584 = vmatpush.bf16.msra.mxu2 %v5791_v21  ;;  %v5783_v34 = vor.u32 %v7351_v30, %v5782_v28  ;;  %v5678_v35 = vld [vmem:[%s12201_s1 + $0xc0] sm:$0xf]  ;;  %v7317_v36 = vld [vmem:[%s12201_s1 + $0xc4] sm:$0xf0]  ;;  %v7316_v37 = vld [vmem:[%s12201_s1 + $0xc4] sm:$0xf]  ;;  %v5787_v38 = vor.u32 %v7350_v31, %v5784_v32 }
   0xa   :  { %663 = vmatpush.bf16.msra.mxu3 %v5795_v25  ;;  %v5680_v39 = vld [vmem:[%s12201_s1 + $0xc8] sm:$0xf0]  ;;  %v5774_v40 = vld [vmem:[%s12201_s1 + $0x1c0] sm:$0xf]  ;;  %v7349_v41 = vld [vmem:[%s12201_s1 + $0x1c4] sm:$0xf0]  ;;  %v5679_v44 = vor.u32 %v7317_v36, %v5678_v35 }
   0xb   :  { %v7348_v42 = vld [vmem:[%s12201_s1 + $0x1c4] sm:$0xf]  ;;  %v5776_v43 = vld [vmem:[%s12201_s1 + $0x1c8] sm:$0xf0]  ;;  %v5683_v45 = vor.u32 %v7316_v37, %v5680_v39  ;;  %v5775_v46 = vor.u32 %v7349_v41, %v5774_v40  ;;  %v5670_v47 = vld [vmem:[%s12201_s1 + $0xb0] sm:$0xf] }
   0xc   :  { %307 = vmatpush.bf16.msra.mxu0 %v5687_v29  ;;  %v7315_v48 = vld [vmem:[%s12201_s1 + $0xb4] sm:$0xf0]  ;;  %v7314_v49 = vld [vmem:[%s12201_s1 + $0xb4] sm:$0xf]  ;;  %v5779_v50 = vor.u32 %v7348_v42, %v5776_v43  ;;  %v5672_v51 = vld [vmem:[%s12201_s1 + $0xb8] sm:$0xf0] }
   0xd   :  { %386 = vmatpush.bf16.msra.mxu1 %v5691_v33  ;;  %585 = vmatpush.bf16.msra.mxu2 %v5783_v34  ;;  %v5766_v52 = vld [vmem:[%s12201_s1 + $0x1b0] sm:$0xf]  ;;  %v7347_v53 = vld [vmem:[%s12201_s1 + $0x1b4] sm:$0xf0]  ;;  %v7346_v54 = vld [vmem:[%s12201_s1 + $0x1b4] sm:$0xf]  ;;  %v5671_v56 = vor.u32 %v7315_v48, %v5670_v47  ;;  %v5675_v57 = vor.u32 %v7314_v49, %v5672_v51 }
   0xe   :  { %664 = vmatpush.bf16.msra.mxu3 %v5787_v38  ;;  %v5768_v55 = vld [vmem:[%s12201_s1 + $0x1b8] sm:$0xf0]  ;;  %v5767_v58 = vor.u32 %v7347_v53, %v5766_v52  ;;  %v5662_v59 = vld [vmem:[%s12201_s1 + $0xa0] sm:$0xf]  ;;  %v7313_v60 = vld [vmem:[%s12201_s1 + $0xa4] sm:$0xf0] }
   0xf   :  { %v7312_v61 = vld [vmem:[%s12201_s1 + $0xa4] sm:$0xf]  ;;  %v5771_v62 = vor.u32 %v7346_v54, %v5768_v55  ;;  %v5664_v63 = vld [vmem:[%s12201_s1 + $0xa8] sm:$0xf0]  ;;  %v5758_v0 = vld [vmem:[%s12201_s1 + $0x1a0] sm:$0xf]  ;;  %v5663_v4 = vor.u32 %v7313_v60, %v5662_v59 }
  0x10   :  { %308 = vmatpush.bf16.msra.mxu0 %v5679_v44  ;;  %v7345_v1 = vld [vmem:[%s12201_s1 + $0x1a4] sm:$0xf0]  ;;  %v7344_v2 = vld [vmem:[%s12201_s1 + $0x1a4] sm:$0xf]  ;;  %v5760_v3 = vld [vmem:[%s12201_s1 + $0x1a8] sm:$0xf0]  ;;  %v5667_v8 = vor.u32 %v7312_v61, %v5664_v63 }
  0x11   :  { %387 = vmatpush.bf16.msra.mxu1 %v5683_v45  ;;  %586 = vmatpush.bf16.msra.mxu2 %v5775_v46  ;;  %v5654_v5 = vld [vmem:[%s12201_s1 + $0x90] sm:$0xf]  ;;  %v7311_v6 = vld [vmem:[%s12201_s1 + $0x94] sm:$0xf0]  ;;  %v7310_v7 = vld [vmem:[%s12201_s1 + $0x94] sm:$0xf]  ;;  %v5759_v9 = vor.u32 %v7345_v1, %v5758_v0  ;;  %v5763_v13 = vor.u32 %v7344_v2, %v5760_v3 }
  0x12   :  { %665 = vmatpush.bf16.msra.mxu3 %v5779_v50  ;;  %v5656_v10 = vld [vmem:[%s12201_s1 + $0x98] sm:$0xf0]  ;;  %v5750_v11 = vld [vmem:[%s12201_s1 + $0x190] sm:$0xf]  ;;  %v7343_v12 = vld [vmem:[%s12201_s1 + $0x194] sm:$0xf0]  ;;  %v5655_v21 = vor.u32 %v7311_v6, %v5654_v5 }
  0x13   :  { %v7342_v14 = vld [vmem:[%s12201_s1 + $0x194] sm:$0xf]  ;;  %v5752_v15 = vld [vmem:[%s12201_s1 + $0x198] sm:$0xf0]  ;;  %v45_v16 = vld [vmem:[%s12202_s0 + $0x8] sm:$0xff]  ;;  %v5659_v28 = vor.u32 %v7310_v7, %v5656_v10  ;;  %v5751_v29 = vor.u32 %v7343_v12, %v5750_v11  ;;  %s7739_s27 = smov 64  }
  0x14   :  { %309 = vmatpush.bf16.msra.mxu0 %v5671_v56  ;;  %v46_v17 = vld [vmem:[%s12202_s0 + $0x10] sm:$0xff]  ;;  %v47_v18 = vld [vmem:[%s12202_s0 + $0x18] sm:$0xff]  ;;  %v77_v19 = vpack.c.bf16 %v45_v16, %v45_v16  ;;  %v48_v20 = vld [vmem:[%s12202_s0 + $0x20] sm:$0xff]  ;;  %v5755_v33 = vor.u32 %v7342_v14, %v5752_v15  ;;  %s7741_s19 = smov 112  }
  0x15   :  { %388 = vmatpush.bf16.msra.mxu1 %v5675_v57  ;;  %587 = vmatpush.bf16.msra.mxu2 %v5767_v58  ;;  %v5646_v22 = vld [vmem:[%s12201_s1 + $0x80] sm:$0xf]  ;;  %v7309_v23 = vld [vmem:[%s12201_s1 + $0x84] sm:$0xf0]  ;;  %v7308_v24 = vld [vmem:[%s12201_s1 + $0x84] sm:$0xf]  ;;  %v78_v25 = vpack.c.bf16 %v46_v17, %v46_v17  ;;  %v79_v26 = vpack.c.bf16 %v47_v18, %v47_v18  ;;  %v80_v27 = vpack.c.bf16 %v48_v20, %v48_v20 }
  0x16   :  { %666 = vmatpush.bf16.msra.mxu3 %v5771_v62  ;;  %v5648_v30 = vld [vmem:[%s12201_s1 + $0x88] sm:$0xf0]  ;;  %v5742_v31 = vld [vmem:[%s12201_s1 + $0x180] sm:$0xf]  ;;  %v7341_v34 = vld [vmem:[%s12201_s1 + $0x184] sm:$0xf0]  ;;  %v8019_v39 = vunpack.c.l.b16 %v77_v19  ;;  %v5647_v44 = vor.u32 %v7309_v23, %v5646_v22 }
  0x17   :  { %v49_v32 = vld [vmem:[%s12202_s0 + $0x28] sm:$0xff]  ;;  %v7340_v35 = vld [vmem:[%s12201_s1 + $0x184] sm:$0xf]  ;;  %v170_v37 = vunpack.c.l.b16 %v78_v25  ;;  %v171_v38 = vunpack.c.l.b16 %v79_v26  ;;  %v5878_v40 = vld [vmem:[%s12201_s1 + $0x270] sm:$0xf]  ;;  %v172_v46 = vunpack.c.l.b16 %v80_v27  ;;  %v5651_v49 = vor.u32 %v7308_v24, %v5648_v30 }
  0x18   :  { %310 = vmatpush.bf16.msra.mxu0 %v5663_v4  ;;  %v5744_v36 = vld [vmem:[%s12201_s1 + $0x188] sm:$0xf0]  ;;  %v7371_v41 = vld [vmem:[%s12201_s1 + $0x274] sm:$0xf0]  ;;  %v50_v42 = vld [vmem:[%s12202_s0 + $0x30] sm:$0xff]  ;;  %v81_v43 = vpack.c.bf16 %v49_v32, %v49_v32  ;;  %v5743_v50 = vor.u32 %v7341_v34, %v5742_v31 }
  0x19   :  { %389 = vmatpush.bf16.msra.mxu1 %v5667_v8  ;;  %588 = vmatpush.bf16.msra.mxu2 %v5759_v9  ;;  %v8030_v45 = vpack.c.b16 %v171_v38, %v170_v37  ;;  %v7370_v47 = vld [vmem:[%s12201_s1 + $0x274] sm:$0xf]  ;;  %v5880_v48 = vld [vmem:[%s12201_s1 + $0x278] sm:$0xf0]  ;;  %v5747_v52 = vor.u32 %v7340_v35, %v5744_v36  ;;  %v5879_v53 = vor.u32 %v7371_v41, %v5878_v40  ;;  %v5870_v59 = vld [vmem:[%s12201_s1 + $0x260] sm:$0xf] }
  0x1a   :  { %667 = vmatpush.bf16.msra.mxu3 %v5763_v13  ;;  %v173_v51 = vunpack.c.l.b16 %v81_v43  ;;  %v82_v54 = vpack.c.bf16 %v50_v42, %v50_v42  ;;  %v51_v55 = vld [vmem:[%s12202_s0 + $0x38] sm:$0xff]  ;;  %v197_v56 = vpack.c.b16 %v170_v37, %v8019_v39  ;;  %v5883_v57 = vor.u32 %v7370_v47, %v5880_v48  ;;  %v7369_v60 = vld [vmem:[%s12201_s1 + $0x264] sm:$0xf0]  ;;  %v7368_v3 = vld [vmem:[%s12201_s1 + $0x264] sm:$0xf] }
  0x1b   :  { %v83_v61 = vpack.c.bf16 %v51_v55, %v51_v55  ;;  %v198_v62 = vpack.c.b16 %v172_v46, %v171_v38  ;;  %v5871_v0 = vor.u32 %v7369_v60, %v5870_v59  ;;  %v5872_v4 = vld [vmem:[%s12201_s1 + $0x268] sm:$0xf0]  ;;  %v52_v6 = vld [vmem:[%s12202_s0 + $0x40] sm:$0xff]  ;;  %v5862_v14 = vld [vmem:[%s12201_s1 + $0x250] sm:$0xf] }
  0x1c   :  { %311 = vmatpush.bf16.msra.mxu0 %v5655_v21  ;;  %v8042_v58 = vpack.c.b16 %v173_v51, %v172_v46  ;;  %v174_v63 = vunpack.c.l.b16 %v82_v54  ;;  %v5875_v5 = vor.u32 %v7368_v3, %v5872_v4  ;;  %v84_v7 = vpack.c.bf16 %v52_v6, %v52_v6  ;;  %v53_v8 = vld [vmem:[%s12202_s0 + $0x48] sm:$0xff]  ;;  %v7367_v15 = vld [vmem:[%s12201_s1 + $0x254] sm:$0xf0]  ;;  %v54_v17 = vld [vmem:[%s12202_s0 + $0x50] sm:$0xff] }
  0x1d   :  { %390 = vmatpush.bf16.msra.mxu1 %v5659_v28  ;;  %589 = vmatpush.bf16.msra.mxu2 %v5751_v29  ;;  %v175_v1 = vunpack.c.l.b16 %v83_v61  ;;  %v85_v9 = vpack.c.bf16 %v53_v8, %v53_v8  ;;  %v5863_v16 = vor.u32 %v7367_v15, %v5862_v14  ;;  %v86_v18 = vpack.c.bf16 %v54_v17, %v54_v17  ;;  %v55_v19 = vld [vmem:[%s12202_s0 + $0x58] sm:$0xff]  ;;  %v7366_v25 = vld [vmem:[%s12201_s1 + $0x254] sm:$0xf]  ;;  %v56_v28 = vld [vmem:[%s12202_s0 + $0x60] sm:$0xff] }
  0x1e   :  { %668 = vmatpush.bf16.msra.mxu3 %v5755_v33  ;;  %v199_v10 = vpack.c.b16 %v174_v63, %v173_v51  ;;  %v176_v11 = vunpack.c.l.b16 %v84_v7  ;;  %v87_v20 = vpack.c.bf16 %v55_v19, %v55_v19  ;;  %v5864_v26 = vld [vmem:[%s12201_s1 + $0x258] sm:$0xf0]  ;;  %v88_v29 = vpack.c.bf16 %v56_v28, %v56_v28  ;;  %v57_v30 = vld [vmem:[%s12202_s0 + $0x68] sm:$0xff]  ;;  %v5854_v36 = vld [vmem:[%s12201_s1 + $0x240] sm:$0xf] }
  0x1f   :  { %v8050_v2 = vpack.c.b16 %v175_v1, %v174_v63  ;;  %v177_v12 = vunpack.c.l.b16 %v85_v9  ;;  %v178_v22 = vunpack.c.l.b16 %v86_v18  ;;  %v5867_v27 = vor.u32 %v7366_v25, %v5864_v26  ;;  %v7365_v37 = vld [vmem:[%s12201_s1 + $0x244] sm:$0xf0]  ;;  %v7364_v38 = vld [vmem:[%s12201_s1 + $0x244] sm:$0xf]  ;;  %v5856_v41 = vld [vmem:[%s12201_s1 + $0x248] sm:$0xf0] }
  0x20   :  { %312 = vmatpush.bf16.msra.mxu0 %v5647_v44  ;;  %v200_v21 = vpack.c.b16 %v176_v11, %v175_v1  ;;  %v179_v23 = vunpack.c.l.b16 %v87_v20  ;;  %v89_v31 = vpack.c.bf16 %v57_v30, %v57_v30  ;;  %v180_v33 = vunpack.c.l.b16 %v88_v29  ;;  %v58_v43 = vld [vmem:[%s12202_s0 + $0x70] sm:$0xff]  ;;  %v59_v46 = vld [vmem:[%s12202_s0 + $0x78] sm:$0xff]  ;;  %v61_v54 = vld [vmem:[%s12202_s0 + $0x88] sm:$0xff] }
  0x21   :  { %391 = vmatpush.bf16.msra.mxu1 %v5651_v49  ;;  %590 = vmatpush.bf16.msra.mxu2 %v5743_v50  ;;  %v8064_v13 = vpack.c.b16 %v177_v12, %v176_v11  ;;  %v201_v32 = vpack.c.b16 %v178_v22, %v177_v12  ;;  %v5855_v40 = vor.u32 %v7365_v37, %v5854_v36  ;;  %v5846_v61 = vld [vmem:[%s12201_s1 + $0x230] sm:$0xf]  ;;  %v7362_v63 = vld [vmem:[%s12201_s1 + $0x234] sm:$0xf]  ;;  %v5848_v1 = vld [vmem:[%s12201_s1 + $0x238] sm:$0xf0] }
  0x22   :  { %669 = vmatpush.bf16.msra.mxu3 %v5747_v52  ;;  %v8078_v24 = vpack.c.b16 %v179_v23, %v178_v22  ;;  %v181_v34 = vunpack.c.l.b16 %v89_v31  ;;  %v5859_v42 = vor.u32 %v7364_v38, %v5856_v41  ;;  %v90_v44 = vpack.c.bf16 %v58_v43, %v58_v43  ;;  %v60_v52 = vld [vmem:[%s12202_s0 + $0x80] sm:$0xff]  ;;  %v62_v4 = vld [vmem:[%s12202_s0 + $0x90] sm:$0xff]  ;;  %v63_v6 = vld [vmem:[%s12202_s0 + $0x98] sm:$0xff] }
  0x23   :  { %313 = vmatmul.bf16.vlgmr.msra.gmra.mxu0 %v197_v56  ;;  %v91_v47 = vpack.c.bf16 %v59_v46, %v59_v46  ;;  %v202_v48 = vpack.c.b16 %v180_v33, %v179_v23  ;;  %v93_v55 = vpack.c.bf16 %v61_v54, %v61_v54  ;;  %v5851_v3 = vor.u32 %v7362_v63, %v5848_v1  ;;  %v64_v12 = vld [vmem:[%s12202_s0 + $0xa0] sm:$0xff]  ;;  %v65_v15 = vld [vmem:[%s12202_s0 + $0xa8] sm:$0xff]  ;;  %v66_v28 = vld [vmem:[%s12202_s0 + $0xb0] sm:$0xff] }
  0x24   :  { %868 = vmatpush.bf16.msrb.mxu0 %v5879_v53  ;;  %392 = vmatmul.bf16.vlgmr.msra.gmra.mxu1 %v197_v56  ;;  %v8092_v35 = vpack.c.b16 %v181_v34, %v180_v33  ;;  %v182_v49 = vunpack.c.l.b16 %v90_v44  ;;  %v92_v53 = vpack.c.bf16 %v60_v52, %v60_v52  ;;  %v95_v7 = vpack.c.bf16 %v63_v6, %v63_v6  ;;  %v5838_v18 = vld [vmem:[%s12201_s1 + $0x220] sm:$0xf]  ;;  %v7361_v19 = vld [vmem:[%s12201_s1 + $0x224] sm:$0xf0]  ;;  %v7360_v25 = vld [vmem:[%s12201_s1 + $0x224] sm:$0xf] }
  0x25   :  { %947 = vmatpush.bf16.msrb.mxu1 %v5883_v57  ;;  %591 = vmatmul.bf16.vlgmr.msra.gmra.mxu2 %v198_v62  ;;  %v183_v50 = vunpack.c.l.b16 %v91_v47  ;;  %v185_v59 = vunpack.c.l.b16 %v93_v55  ;;  %v96_v14 = vpack.c.bf16 %v64_v12, %v64_v12  ;;  %v5839_v20 = vor.u32 %v7361_v19, %v5838_v18  ;;  %v5840_v26 = vld [vmem:[%s12201_s1 + $0x228] sm:$0xf0]  ;;  %v67_v30 = vld [vmem:[%s12202_s0 + $0xb8] sm:$0xff]  ;;  %v5830_v44 = vld [vmem:[%s12201_s1 + $0x210] sm:$0xf] }
  0x26   :  { %670 = vmatmul.bf16.vlgmr.msra.gmra.mxu3 %v198_v62  ;;  %v203_v56 = vpack.c.b16 %v182_v49, %v181_v34  ;;  %v184_v57 = vunpack.c.l.b16 %v92_v53  ;;  %v98_v29 = vpack.c.bf16 %v66_v28, %v66_v28  ;;  %v99_v31 = vpack.c.bf16 %v67_v30, %v67_v30  ;;  %v7359_v46 = vld [vmem:[%s12201_s1 + $0x214] sm:$0xf0]  ;;  %v7358_v63 = vld [vmem:[%s12201_s1 + $0x214] sm:$0xf]  ;;  %v5934_v30 = vld [vmem:[%s12201_s1 + $0x60] sm:$0xf] }
  0x27   :  { %v8112_v51 = vpack.c.b16 %v183_v50, %v182_v49  ;;  %v5831_v47 = vor.u32 %v7359_v46, %v5830_v44  ;;  %v5822_v44 = vld [vmem:[%s12201_s1 + $0x200] sm:$0xf]  ;;  %v7357_v46 = vld [vmem:[%s12201_s1 + $0x204] sm:$0xf0] }
  0x28   :  { %869 = vmatpush.bf16.msrb.mxu0 %v5871_v0  ;;  %v8120_v60 = vpack.c.b16 %v185_v59, %v184_v57  ;;  %v204_v8 = vpack.c.b16 %v184_v57, %v183_v50  ;;  %v190_v36 = vunpack.c.l.b16 %v98_v29  ;;  %v191_v37 = vunpack.c.l.b16 %v99_v31  ;;  %v69_v50 = vld [vmem:[%s12202_s0 + $0xc8] sm:$0xff] }
  0x29   :  { %948 = vmatpush.bf16.msrb.mxu1 %v5875_v5  ;;  %v94_v5 = vpack.c.bf16 %v62_v4, %v62_v4  ;;  %v101_v53 = vpack.c.bf16 %v69_v50, %v69_v50  ;;  %v7305_v31 = vld [vmem:[%s12201_s1 + $0x64] sm:$0xf0]  ;;  %v5823_v50 = vor.u32 %v7357_v46, %v5822_v44  ;;  %v7299_v46 = vld [vmem:[%s12201_s1 + $0x34] sm:$0xf0] }
  0x2a   :  { %v8172_v38 = vpack.c.b16 %v191_v37, %v190_v36 }
  0x2b   :  { %v186_v9 = vunpack.c.l.b16 %v94_v5 }
  0x2c   :  { %870 = vmatpush.bf16.msrb.mxu0 %v5863_v16  ;;  %v97_v16 = vpack.c.bf16 %v65_v15, %v65_v15 }
  0x2d   :  { %949 = vmatpush.bf16.msrb.mxu1 %v5867_v27  ;;  %v205_v17 = vpack.c.b16 %v186_v9, %v185_v59  ;;  %v5843_v27 = vor.u32 %v7360_v25, %v5840_v26 }
  0x2e   :  { %v189_v22 = vunpack.c.l.b16 %v97_v16 }
  0x30   :  { %871 = vmatpush.bf16.msrb.mxu0 %v5855_v40 }
  0x31   :  { %950 = vmatpush.bf16.msrb.mxu1 %v5859_v42 }
  0x33   :  { %318 = vmatmul.bf16.gmra.mxu0 %v198_v62 }
  0x34   :  { %397 = vmatmul.bf16.gmra.mxu1 %v198_v62  ;;  %v7363_v62 = vld [vmem:[%s12201_s1 + $0x234] sm:$0xf0] }
  0x35   :  { %596 = vmatmul.bf16.gmra.mxu2 %v199_v10  ;;  %v5847_v0 = vor.u32 %v7363_v62, %v5846_v61  ;;  %951 = vmatpush.bf16.msrb.mxu1 %v5851_v3  ;;  %v8202_v61 = vunpack.c.l.b16 %v101_v53 }
  0x36   :  { %675 = vmatmul.bf16.gmra.mxu3 %v199_v10 }
  0x37   :  { %872 = vmatpush.bf16.msrb.mxu0 %v5847_v0  ;;  %v5832_v0 = vld [vmem:[%s12201_s1 + $0x218] sm:$0xf0] }
  0x38   :  { %v5835_v1 = vor.u32 %v7358_v63, %v5832_v0  ;;  %v7302_v63 = vld [vmem:[%s12201_s1 + $0x54] sm:$0xf] }
  0x39   :  { %952 = vmatpush.bf16.msrb.mxu1 %v5843_v27  ;;  %v5944_v27 = vld [vmem:[%s12201_s1 + $0x78] sm:$0xf0] }
  0x3b   :  { %873 = vmatpush.bf16.msrb.mxu0 %v5839_v20  ;;  %v5942_v20 = vld [vmem:[%s12201_s1 + $0x70] sm:$0xf] }
  0x3d   :  { %953 = vmatpush.bf16.msrb.mxu1 %v5835_v1  ;;  %v5928_v1 = vld [vmem:[%s12201_s1 + $0x58] sm:$0xf0] }
  0x3f   :  { %874 = vmatpush.bf16.msrb.mxu0 %v5831_v47  ;;  %v5935_v47 = vor.u32 %v7305_v31, %v5934_v30  ;;  %v5920_v30 = vld [vmem:[%s12201_s1 + $0x48] sm:$0xf0] }
  0x43   :  { %323 = vmatmul.bf16.gmra.mxu0 %v199_v10 }
  0x44   :  { %402 = vmatmul.bf16.gmra.mxu1 %v199_v10  ;;  %v187_v10 = vunpack.c.l.b16 %v95_v7  ;;  %v70_v7 = vld [vmem:[%s12202_s0 + $0xd0] sm:$0xff]  ;;  %875 = vmatpush.bf16.msrb.mxu0 %v5823_v50  ;;  %v5912_v50 = vld [vmem:[%s12201_s1 + $0x38] sm:$0xf0] }
  0x45   :  { %601 = vmatmul.bf16.gmra.mxu2 %v200_v21 }
  0x46   :  { %680 = vmatmul.bf16.gmra.mxu3 %v200_v21  ;;  %v8140_v11 = vpack.c.b16 %v187_v10, %v186_v9  ;;  %v71_v9 = vld [vmem:[%s12202_s0 + $0xd8] sm:$0xff] }
  0x47   :  { %v103_v12 = vpack.c.bf16 %v71_v9, %v71_v9  ;;  %v7301_v9 = vld [vmem:[%s12201_s1 + $0x44] sm:$0xf0] }
  0x49   :  { %v8235_v19 = vunpack.c.l.b16 %v103_v12  ;;  %v7300_v12 = vld [vmem:[%s12201_s1 + $0x44] sm:$0xf] }
  0x53   :  { %328 = vmatmul.bf16.gmra.mxu0 %v200_v21 }
  0x54   :  { %407 = vmatmul.bf16.gmra.mxu1 %v200_v21  ;;  %v188_v21 = vunpack.c.l.b16 %v96_v14 }
  0x55   :  { %606 = vmatmul.bf16.gmra.mxu2 %v201_v32 }
  0x56   :  { %685 = vmatmul.bf16.gmra.mxu3 %v201_v32  ;;  %v8154_v23 = vpack.c.b16 %v189_v22, %v188_v21  ;;  %v206_v33 = vpack.c.b16 %v188_v21, %v187_v10  ;;  %v7307_v21 = vld [vmem:[%s12201_s1 + $0x74] sm:$0xf0] }
  0x57   :  { %v5943_v26 = vor.u32 %v7307_v21, %v5942_v20 }
  0x59   :  { %1112 = vmatpush.bf16.msrb.mxu2 %v5943_v26  ;;  %v7356_v26 = vld [vmem:[%s12201_s1 + $0x204] sm:$0xf] }
  0x5d   :  { %1113 = vmatpush.bf16.msrb.mxu2 %v5935_v47  ;;  %v7298_v47 = vld [vmem:[%s12201_s1 + $0x34] sm:$0xf] }
  0x63   :  { %333 = vmatmul.bf16.gmra.mxu0 %v201_v32 }
  0x64   :  { %412 = vmatmul.bf16.gmra.mxu1 %v201_v32 }
  0x65   :  { %611 = vmatmul.bf16.gmra.mxu2 %v202_v48 }
  0x66   :  { %690 = vmatmul.bf16.gmra.mxu3 %v202_v48 }
  0x73   :  { %338 = vmatmul.bf16.gmra.mxu0 %v202_v48 }
  0x74   :  { %417 = vmatmul.bf16.gmra.mxu1 %v202_v48  ;;  %v68_v48 = vld [vmem:[%s12202_s0 + $0xc0] sm:$0xff] }
  0x75   :  { %616 = vmatmul.bf16.gmra.mxu2 %v203_v56  ;;  %v100_v49 = vpack.c.bf16 %v68_v48, %v68_v48  ;;  %v5936_v48 = vld [vmem:[%s12201_s1 + $0x68] sm:$0xf0] }
  0x76   :  { %695 = vmatmul.bf16.gmra.mxu3 %v203_v56 }
  0x77   :  { %v192_v59 = vunpack.c.l.b16 %v100_v49 }
  0x79   :  { %v8205_v62 = vpack.c.b16 %v8202_v61, %v192_v59  ;;  %v208_v16 = vpack.c.b16 %v192_v59, %v191_v37  ;;  %v7303_v59 = vld [vmem:[%s12201_s1 + $0x54] sm:$0xf0] }
  0x83   :  { %343 = vmatmul.bf16.gmra.mxu0 %v203_v56 }
  0x84   :  { %422 = vmatmul.bf16.gmra.mxu1 %v203_v56  ;;  %v207_v56 = vpack.c.b16 %v190_v36, %v189_v22  ;;  %v7306_v22 = vld [vmem:[%s12201_s1 + $0x74] sm:$0xf] }
  0x85   :  { %621 = vmatmul.bf16.gmra.mxu2 %v204_v8  ;;  %v5947_v28 = vor.u32 %v7306_v22, %v5944_v27  ;;  %v5824_v27 = vld [vmem:[%s12201_s1 + $0x208] sm:$0xf0] }
  0x86   :  { %700 = vmatmul.bf16.gmra.mxu3 %v204_v8  ;;  %v5827_v44 = vor.u32 %v7356_v26, %v5824_v27  ;;  %v7295_v26 = vld [vmem:[%s12201_s1 + $0x14] sm:$0xf0] }
  0x87   :  { %1191 = vmatpush.bf16.msrb.mxu3 %v5947_v28 }
  0x88   :  { %954 = vmatpush.bf16.msrb.mxu1 %v5827_v44 }
  0x93   :  { %348 = vmatmul.bf16.gmra.mxu0 %v204_v8 }
  0x94   :  { %427 = vmatmul.bf16.gmra.mxu1 %v204_v8  ;;  %v102_v8 = vpack.c.bf16 %v70_v7, %v70_v7  ;;  %v5931_v7 = vor.u32 %v7302_v63, %v5928_v1  ;;  %v7296_v63 = vld [vmem:[%s12201_s1 + $0x24] sm:$0xf] }
  0x95   :  { %626 = vmatmul.bf16.gmra.mxu2 %v205_v17 }
  0x96   :  { %705 = vmatmul.bf16.gmra.mxu3 %v205_v17  ;;  %v194_v18 = vunpack.c.l.b16 %v102_v8  ;;  %v5918_v8 = vld [vmem:[%s12201_s1 + $0x40] sm:$0xf] }
  0x97   :  { %v5919_v28 = vor.u32 %v7301_v9, %v5918_v8  ;;  %v5904_v8 = vld [vmem:[%s12201_s1 + $0x28] sm:$0xf0] }
  0x98   :  { %v8247_v25 = vpack.c.b16 %v8235_v19, %v194_v18  ;;  %v209_v22 = vpack.c.b16 %v194_v18, %v8202_v61  ;;  %v5923_v61 = vor.u32 %v7300_v12, %v5920_v30  ;;  %v5910_v18 = vld [vmem:[%s12201_s1 + $0x30] sm:$0xf] }
  0x99   :  { %v5894_v12 = vld [vmem:[%s12201_s1 + $0x10] sm:$0xf] }
  0x9a   :  { %v5895_v30 = vor.u32 %v7295_v26, %v5894_v12  ;;  %v73_v12 = vld [vmem:[%s12202_s0 + $0xe8] sm:$0xff]  ;;  %v74_v26 = vld [vmem:[%s12202_s0 + $0xf0] sm:$0xff] }
  0xa0   :  { %v8168_v32 = vpop.f32.mrf.mxu0 }
  0xa1   :  { %v8170_v34 = vpop.f32.mrf.mxu1 }
  0xa3   :  { %353 = vmatmul.bf16.gmra.mxu0 %v205_v17 }
  0xa4   :  { %432 = vmatmul.bf16.gmra.mxu1 %v205_v17 }
  0xa5   :  { %631 = vmatmul.bf16.gmra.mxu2 %v206_v33 }
  0xa6   :  { %710 = vmatmul.bf16.gmra.mxu3 %v206_v33 }
  0xa8   :  { %v8174_v40 = vpop.f32.mrf.mxu2  ;;  %v8178_v42 = vpop.f32.mrf.mxu0 }
  0xa9   :  { %v8176_v41 = vpop.f32.mrf.mxu3  ;;  %v8180_v43 = vpop.f32.mrf.mxu1 }
  0xb0   :  { %v8194_v52 = vpop.f32.mrf.mxu2  ;;  %v8198_v55 = vpop.f32.mrf.mxu0 }
  0xb1   :  { %v8196_v54 = vpop.f32.mrf.mxu3  ;;  %v8200_v57 = vpop.f32.mrf.mxu1 }
  0xb3   :  { %358 = vmatmul.bf16.gmra.mxu0 %v206_v33 }
  0xb4   :  { %437 = vmatmul.bf16.gmra.mxu1 %v206_v33  ;;  %v7304_v33 = vld [vmem:[%s12201_s1 + $0x64] sm:$0xf] }
  0xb5   :  { %636 = vmatmul.bf16.gmra.mxu2 %v207_v56  ;;  %v5939_v53 = vor.u32 %v7304_v33, %v5936_v48  ;;  %v5911_v48 = vor.u32 %v7299_v46, %v5910_v18  ;;  %v5896_v18 = vld [vmem:[%s12201_s1 + $0x18] sm:$0xf0] }
  0xb6   :  { %715 = vmatmul.bf16.gmra.mxu3 %v207_v56 }
  0xb7   :  { %1192 = vmatpush.bf16.msrb.mxu3 %v5939_v53  ;;  %v72_v53 = vld [vmem:[%s12202_s0 + $0xe0] sm:$0xff] }
  0xb8   :  { %v8213_v3 = vpop.f32.mrf.mxu2  ;;  %v8217_v5 = vpop.f32.mrf.mxu0  ;;  %v104_v1 = vpack.c.bf16 %v72_v53, %v72_v53  ;;  %v7292_v53 = vld [vmem:[%s12201_s1 + $0x4] sm:$0xf] }
  0xb9   :  { %v8215_v4 = vpop.f32.mrf.mxu3  ;;  %v8219_v6 = vpop.f32.mrf.mxu1 }
  0xba   :  { %v8364_v46 = vunpack.c.l.b16 %v104_v1 }
  0xbb   :  { %1193 = vmatpush.bf16.msrb.mxu3 %v5931_v7 }
  0xbf   :  { %1194 = vmatpush.bf16.msrb.mxu3 %v5923_v61  ;;  %v7294_v61 = vld [vmem:[%s12201_s1 + $0x14] sm:$0xf] }
  0xc0   :  { %v8227_v10 = vpop.f32.mrf.mxu2  ;;  %v8231_v15 = vpop.f32.mrf.mxu0 }
  0xc1   :  { %v8229_v14 = vpop.f32.mrf.mxu3  ;;  %v8233_v17 = vpop.f32.mrf.mxu1 }
  0xc3   :  { %363 = vmatmul.bf16.gmra.mxu0 %v207_v56 }
  0xc4   :  { %442 = vmatmul.bf16.gmra.mxu1 %v207_v56  ;;  %v5926_v56 = vld [vmem:[%s12201_s1 + $0x50] sm:$0xf] }
  0xc5   :  { %641 = vmatmul.bf16.gmra.mxu2 %v208_v16  ;;  %v5927_v0 = vor.u32 %v7303_v59, %v5926_v56  ;;  %v5915_v56 = vor.u32 %v7298_v47, %v5912_v50  ;;  %v5902_v59 = vld [vmem:[%s12201_s1 + $0x20] sm:$0xf]  ;;  %v5899_v47 = vor.u32 %v7294_v61, %v5896_v18  ;;  %v7293_v50 = vld [vmem:[%s12201_s1 + $0x4] sm:$0xf0]  ;;  %v105_v18 = vpack.c.bf16 %v73_v12, %v73_v12 }
  0xc6   :  { %720 = vmatmul.bf16.gmra.mxu3 %v208_v16 }
  0xc7   :  { %1114 = vmatpush.bf16.msrb.mxu2 %v5927_v0  ;;  %1195 = vmatpush.bf16.msrb.mxu3 %v5915_v56 }
  0xc8   :  { %v8252_v29 = vpop.f32.mrf.mxu2  ;;  %v8265_v37 = vpop.f32.mrf.mxu0 }
  0xc9   :  { %v8263_v36 = vpop.f32.mrf.mxu3  ;;  %12244 = vst [vmem:[#allocation2_spill] sm:$0xff] %v8265_v37  ;;  %v8276_v49 = vpop.f32.mrf.mxu1 }
  0xca   :  { %12245 = vst [vmem:[#allocation3_spill] sm:$0xff] %v8276_v49 }
  0xcb   :  { %1115 = vmatpush.bf16.msrb.mxu2 %v5919_v28  ;;  %v5907_v28 = vor.u32 %v7296_v63, %v5904_v8  ;;  %v5888_v63 = vld [vmem:[%s12201_s1 + $0x8] sm:$0xf0] }
  0xcd   :  { %1196 = vmatpush.bf16.msrb.mxu3 %v5907_v28  ;;  %v6006_v28 = vld [vmem:[%s12201_s1 + $0x170] sm:$0xf] }
  0xcf   :  { %1116 = vmatpush.bf16.msrb.mxu2 %v5911_v48  ;;  %v5886_v48 = vld [vmem:[%s12201_s1] sm:$0xf] }
  0xd0   :  { %v8299_v20 = vpop.f32.mrf.mxu2  ;;  %v8301_v21 = vpop.f32.mrf.mxu0 }
  0xd1   :  { %12246 = vst [vmem:[#allocation4_spill] sm:$0xff] %v8299_v20  ;;  %v8313_v31 = vpop.f32.mrf.mxu3  ;;  %v8315_v33 = vpop.f32.mrf.mxu1  ;;  %1197 = vmatpush.bf16.msrb.mxu3 %v5899_v47  ;;  %v106_v47 = vpack.c.bf16 %v74_v26, %v74_v26 }
  0xd2   :  { %12247 = vst [vmem:[#allocation5_spill] sm:$0xff] %v8313_v31 }
  0xd3   :  { %368 = vmatmul.bf16.gmra.mxu0 %v208_v16 }
  0xd4   :  { %447 = vmatmul.bf16.gmra.mxu1 %v208_v16  ;;  %v7297_v16 = vld [vmem:[%s12201_s1 + $0x24] sm:$0xf0] }
  0xd5   :  { %646 = vmatmul.bf16.gmra.mxu2 %v209_v22  ;;  %v5903_v7 = vor.u32 %v7297_v16, %v5902_v59  ;;  %v210_v59 = vpack.c.b16 %v8364_v46, %v8235_v19  ;;  %v5887_v16 = vor.u32 %v7293_v50, %v5886_v48  ;;  %v7338_v50 = vld [vmem:[%s12201_s1 + $0x174] sm:$0xf] }
  0xd6   :  { %725 = vmatmul.bf16.gmra.mxu3 %v209_v22 }
  0xd7   :  { %1117 = vmatpush.bf16.msrb.mxu2 %v5903_v7  ;;  %v5891_v7 = vor.u32 %v7292_v53, %v5888_v63  ;;  %v6008_v53 = vld [vmem:[%s12201_s1 + $0x178] sm:$0xf0]  ;;  %v8410_v63 = vunpack.c.l.b16 %v105_v18  ;;  %v44_v18 = vld [vmem:[%s12202_s0] sm:$0xff] }
  0xd8   :  { %v8341_v0 = vpop.f32.mrf.mxu0  ;;  %v8354_v27 = vpop.f32.mrf.mxu2 }
  0xd9   :  { %12248 = vst [vmem:[#allocation6_spill] sm:$0xff] %v8341_v0  ;;  %v8346_v9 = vpop.f32.mrf.mxu1  ;;  %v8356_v44 = vpop.f32.mrf.mxu3  ;;  %1198 = vmatpush.bf16.msrb.mxu3 %v5891_v7  ;;  %v8412_v7 = vunpack.c.l.b16 %v106_v47  ;;  %v76_v47 = vpack.c.bf16 %v44_v18, %v44_v18 }
  0xda   :  { %12249 = vst [vmem:[#allocation7_spill] sm:$0xff] %v8346_v9 }
  0xdb   :  { %1118 = vmatpush.bf16.msrb.mxu2 %v5895_v30 }
  0xdf   :  { %1119 = vmatpush.bf16.msrb.mxu2 %v5887_v16  ;;  %v6011_v16 = vor.u32 %v7338_v50, %v6008_v53 }
  0xe0   :  { %v8375_v56 = vpop.f32.mrf.mxu0  ;;  %v8384_v8 = vpop.f32.mrf.mxu2 }
  0xe1   :  { %v8382_v1 = vpop.f32.mrf.mxu1  ;;  %12250 = vst [vmem:[#allocation8_spill] sm:$0xff] %v8384_v8  ;;  %v8389_v19 = vpop.f32.mrf.mxu3  ;;  %1429 = vmatpush.bf16.msra.mxu1 %v6011_v16  ;;  %v1027_v8 = vunpack.c.l.b16 %v76_v47  ;;  %v6000_v47 = vld [vmem:[%s12201_s1 + $0x168] sm:$0xf0] }
  0xe2   :  { %12251 = vst [vmem:[#allocation9_spill] sm:$0xff] %v8389_v19 }
  0xe3   :  { %373 = vmatmul.bf16.gmra.mxu0 %v209_v22  ;;  %v1028_v31 = vpack.c.b16 %v8019_v39, %v1027_v8  ;;  %v7336_v8 = vld [vmem:[%s12201_s1 + $0x164] sm:$0xf] }
  0xe4   :  { %452 = vmatmul.bf16.gmra.mxu1 %v209_v22  ;;  %v7339_v22 = vld [vmem:[%s12201_s1 + $0x174] sm:$0xf0] }
  0xe5   :  { %651 = vmatmul.bf16.gmra.mxu2 %v210_v59  ;;  %v6007_v30 = vor.u32 %v7339_v22, %v6006_v28  ;;  %v501_v22 = vpack.c.b16 %v8412_v7, %v8410_v63 }
  0xe6   :  { %730 = vmatmul.bf16.gmra.mxu3 %v210_v59 }
  0xe7   :  { %1350 = vmatpush.bf16.msra.mxu0 %v6007_v30 }
  0xe8   :  { %v8400_v61 = vpop.f32.mrf.mxu0  ;;  %v8414_v28 = vpop.f32.mrf.mxu2 }
  0xe9   :  { %12252 = vst [vmem:[#allocation10_spill] sm:$0xff] %v8400_v61  ;;  %v8402_v48 = vpop.f32.mrf.mxu1  ;;  %v8416_v12 = vpop.f32.mrf.mxu3 }
  0xea   :  { %12253 = vst [vmem:[#allocation11_spill] sm:$0xff] %v8402_v48 }
  0xf0   :  { %v8418_v26 = vpop.f32.mrf.mxu0  ;;  %v8427_v50 = vpop.f32.mrf.mxu2 }
  0xf1   :  { %v8422_v30 = vpop.f32.mrf.mxu1  ;;  %12254 = vst [vmem:[#allocation12_spill] sm:$0xff] %v8427_v50  ;;  %v8431_v16 = vpop.f32.mrf.mxu3 }
  0xf2   :  { %12256 = vst [vmem:[#allocation14_spill] sm:$0xff] %v8431_v16 }
  0xf3   :  { %378 = vmatmul.bf16.gmra.mxu0 %v210_v59 }
  0xf4   :  { %457 = vmatmul.bf16.gmra.mxu1 %v210_v59  ;;  %v5998_v59 = vld [vmem:[%s12201_s1 + $0x160] sm:$0xf] }
  0xf5   :  { %656 = vmatmul.bf16.gmra.mxu2 %v501_v22 }
  0xf6   :  { %735 = vmatmul.bf16.gmra.mxu3 %v501_v22  ;;  %v7337_v22 = vld [vmem:[%s12201_s1 + $0x164] sm:$0xf0] }
  0xf7   :  { %v5999_v50 = vor.u32 %v7337_v22, %v5998_v59  ;;  %v6003_v22 = vor.u32 %v7336_v8, %v6000_v47 }
  0xf8   :  { %v8429_v53 = vpop.f32.mrf.mxu0 }
  0xf9   :  { %12255 = vst [vmem:[#allocation13_spill] sm:$0xff] %v8429_v53  ;;  %v8433_v19 = vpop.f32.mrf.mxu1  ;;  %v8446_v53 = vpop.f32.mrf.mxu2  ;;  %1351 = vmatpush.bf16.msra.mxu0 %v5999_v50  ;;  %1430 = vmatpush.bf16.msra.mxu1 %v6003_v22 }
  0xfa   :  { %12257 = vst [vmem:[#allocation15_spill] sm:$0xff] %v8433_v19  ;;  %v8448_v16 = vpop.f32.mrf.mxu3 }
 0x100   :  { %v8436_v20 = vpop.f32.mrf.mxu0 }
 0x101   :  { %v8444_v18 = vpop.f32.mrf.mxu1  ;;  %v8462_v19 = vpop.f32.mrf.mxu2 }
 0x102   :  { %12258 = vst [vmem:[#allocation16_spill] sm:$0xff] %v8444_v18  ;;  %v8464_v48 = vpop.f32.mrf.mxu3 }
 0x103   :  { %876 = vmatmul.bf16.vlgmr.msrb.gmra.mxu0 %v8042_v58  ;;  %12261 = vst [vmem:[#allocation19_spill] sm:$0xff] %v8462_v19  ;;  %v7335_v19 = vld [vmem:[%s12201_s1 + $0x154] sm:$0xf0] }
 0x104   :  { %955 = vmatmul.bf16.vlgmr.msrb.gmra.mxu1 %v8042_v58  ;;  %12262 = vst [vmem:[#allocation20_spill] sm:$0xff] %v8464_v48  ;;  %v5990_v48 = vld [vmem:[%s12201_s1 + $0x150] sm:$0xf] }
 0x105   :  { %1120 = vmatmul.bf16.vlgmr.msrb.gmra.mxu2 %v1028_v31 }
 0x106   :  { %1199 = vmatmul.bf16.vlgmr.msrb.gmra.mxu3 %v1028_v31 }
 0x108   :  { %v8452_v39 = vpop.f32.mrf.mxu0 }
 0x109   :  { %12259 = vst [vmem:[#allocation17_spill] sm:$0xff] %v8452_v39  ;;  %v8460_v59 = vpop.f32.mrf.mxu1  ;;  %v8474_v39 = vpop.f32.mrf.mxu2 }
 0x10a   :  { %12260 = vst [vmem:[#allocation18_spill] sm:$0xff] %v8460_v59  ;;  %v8476_v8 = vpop.f32.mrf.mxu3  ;;  %v5991_v59 = vor.u32 %v7335_v19, %v5990_v48  ;;  %v7334_v19 = vld [vmem:[%s12201_s1 + $0x154] sm:$0xf]  ;;  %v5992_v48 = vld [vmem:[%s12201_s1 + $0x158] sm:$0xf0] }
 0x10b   :  { %12265 = vst [vmem:[#allocation23_spill] sm:$0xff] %v8474_v39 }
 0x10c   :  { %12266 = vst [vmem:[#allocation24_spill] sm:$0xff] %v8476_v8  ;;  %1352 = vmatpush.bf16.msra.mxu0 %v5991_v59  ;;  %v5995_v59 = vor.u32 %v7334_v19, %v5992_v48 }
 0x10e   :  { %1431 = vmatpush.bf16.msra.mxu1 %v5995_v59  ;;  %v5982_v59 = vld [vmem:[%s12201_s1 + $0x140] sm:$0xf] }
 0x110   :  { %v8466_v31 = vpop.f32.mrf.mxu0 }
 0x111   :  { %12263 = vst [vmem:[#allocation21_spill] sm:$0xff] %v8466_v31  ;;  %v8468_v50 = vpop.f32.mrf.mxu1  ;;  %v8488_v61 = vpop.f32.mrf.mxu2 }
 0x112   :  { %12264 = vst [vmem:[#allocation22_spill] sm:$0xff] %v8468_v50  ;;  %v8492_v0 = vpop.f32.mrf.mxu3 }
 0x113   :  { %881 = vmatmul.bf16.gmra.mxu0 %v8050_v2  ;;  %12269 = vst [vmem:[#allocation27_spill] sm:$0xff] %v8488_v61 }
 0x114   :  { %960 = vmatmul.bf16.gmra.mxu1 %v8050_v2  ;;  %12271 = vst [vmem:[#allocation29_spill] sm:$0xff] %v8492_v0 }
 0x115   :  { %1125 = vmatmul.bf16.gmra.mxu2 %v8030_v45 }
 0x116   :  { %1204 = vmatmul.bf16.gmra.mxu3 %v8030_v45 }
 0x118   :  { %v8478_v47 = vpop.f32.mrf.mxu0 }
 0x119   :  { %12267 = vst [vmem:[#allocation25_spill] sm:$0xff] %v8478_v47  ;;  %v8480_v22 = vpop.f32.mrf.mxu1 }
 0x11a   :  { %12268 = vst [vmem:[#allocation26_spill] sm:$0xff] %v8480_v22  ;;  %v8510_v22 = vpop.f32.mrf.mxu2  ;;  %v8512_v47 = vpop.f32.mrf.mxu3 }
 0x11b   :  { %12275 = vst [vmem:[#allocation33_spill] sm:$0xff] %v8510_v22 }
 0x11c   :  { %12276 = vst [vmem:[#allocation34_spill] sm:$0xff] %v8512_v47  ;;  %v5984_v47 = vld [vmem:[%s12201_s1 + $0x148] sm:$0xf0] }
 0x120   :  { %v8490_v9 = vpop.f32.mrf.mxu0 }
 0x121   :  { %12270 = vst [vmem:[#allocation28_spill] sm:$0xff] %v8490_v9  ;;  %v8494_v49 = vpop.f32.mrf.mxu1 }
 0x122   :  { %12272 = vst [vmem:[#allocation30_spill] sm:$0xff] %v8494_v49  ;;  %v8519_v9 = vpop.f32.mrf.mxu2  ;;  %v8523_v19 = vpop.f32.mrf.mxu3 }
 0x123   :  { %886 = vmatmul.bf16.gmra.mxu0 %v8064_v13  ;;  %12279 = vst [vmem:[#allocation37_spill] sm:$0xff] %v8519_v9 }
 0x124   :  { %965 = vmatmul.bf16.gmra.mxu1 %v8064_v13  ;;  %12280 = vst [vmem:[#allocation38_spill] sm:$0xff] %v8523_v19 }
 0x125   :  { %1130 = vmatmul.bf16.gmra.mxu2 %v8042_v58 }
 0x126   :  { %1209 = vmatmul.bf16.gmra.mxu3 %v8042_v58 }
 0x128   :  { %v8506_v0 = vpop.f32.mrf.mxu0 }
 0x129   :  { %12273 = vst [vmem:[#allocation31_spill] sm:$0xff] %v8506_v0  ;;  %v8508_v61 = vpop.f32.mrf.mxu1 }
 0x12a   :  { %12274 = vst [vmem:[#allocation32_spill] sm:$0xff] %v8508_v61  ;;  %v8536_v61 = vpop.f32.mrf.mxu2  ;;  %v8538_v0 = vpop.f32.mrf.mxu3 }
 0x12b   :  { %12283 = vst [vmem:[#allocation41_spill] sm:$0xff] %v8536_v61 }
 0x12c   :  { %12284 = vst [vmem:[#allocation42_spill] sm:$0xff] %v8538_v0 }
 0x130   :  { %v8514_v37 = vpop.f32.mrf.mxu0 }
 0x131   :  { %12277 = vst [vmem:[#allocation35_spill] sm:$0xff] %v8514_v37  ;;  %v8516_v49 = vpop.f32.mrf.mxu1 }
 0x132   :  { %12278 = vst [vmem:[#allocation36_spill] sm:$0xff] %v8516_v49  ;;  %v7333_v49 = vld [vmem:[%s12201_s1 + $0x144] sm:$0xf0] }
 0x133   :  { %891 = vmatmul.bf16.gmra.mxu0 %v8078_v24  ;;  %v5983_v9 = vor.u32 %v7333_v49, %v5982_v59  ;;  %v8554_v49 = vpop.f32.mrf.mxu2  ;;  %v8558_v59 = vpop.f32.mrf.mxu3 }
 0x134   :  { %970 = vmatmul.bf16.gmra.mxu1 %v8078_v24  ;;  %12287 = vst [vmem:[#allocation45_spill] sm:$0xff] %v8554_v49  ;;  %v7331_v49 = vld [vmem:[%s12201_s1 + $0x134] sm:$0xf0] }
 0x135   :  { %1135 = vmatmul.bf16.gmra.mxu2 %v8050_v2  ;;  %1353 = vmatpush.bf16.msra.mxu0 %v5983_v9  ;;  %12289 = vst [vmem:[#allocation47_spill] sm:$0xff] %v8558_v59  ;;  %v5974_v59 = vld [vmem:[%s12201_s1 + $0x130] sm:$0xf] }
 0x136   :  { %1214 = vmatmul.bf16.gmra.mxu3 %v8050_v2 }
 0x138   :  { %v8526_v48 = vpop.f32.mrf.mxu0 }
 0x139   :  { %12281 = vst [vmem:[#allocation39_spill] sm:$0xff] %v8526_v48  ;;  %v8534_v37 = vpop.f32.mrf.mxu1  ;;  %v7332_v48 = vld [vmem:[%s12201_s1 + $0x144] sm:$0xf] }
 0x13a   :  { %12282 = vst [vmem:[#allocation40_spill] sm:$0xff] %v8534_v37  ;;  %v5987_v22 = vor.u32 %v7332_v48, %v5984_v47 }
 0x13b   :  { %v8566_v48 = vpop.f32.mrf.mxu2 }
 0x13c   :  { %1432 = vmatpush.bf16.msra.mxu1 %v5987_v22  ;;  %12293 = vst [vmem:[#allocation51_spill] sm:$0xff] %v8566_v48  ;;  %v8568_v22 = vpop.f32.mrf.mxu3 }
 0x13d   :  { %12294 = vst [vmem:[#allocation52_spill] sm:$0xff] %v8568_v22 }
 0x140   :  { %v8540_v19 = vpop.f32.mrf.mxu0 }
 0x141   :  { %12285 = vst [vmem:[#allocation43_spill] sm:$0xff] %v8540_v19  ;;  %v8548_v50 = vpop.f32.mrf.mxu1 }
 0x142   :  { %12286 = vst [vmem:[#allocation44_spill] sm:$0xff] %v8548_v50 }
 0x143   :  { %896 = vmatmul.bf16.gmra.mxu0 %v8092_v35  ;;  %v8590_v50 = vpop.f32.mrf.mxu2 }
 0x144   :  { %975 = vmatmul.bf16.gmra.mxu1 %v8092_v35  ;;  %12297 = vst [vmem:[#allocation55_spill] sm:$0xff] %v8590_v50  ;;  %v8592_v0 = vpop.f32.mrf.mxu3 }
 0x145   :  { %1140 = vmatmul.bf16.gmra.mxu2 %v8064_v13  ;;  %12298 = vst [vmem:[#allocation56_spill] sm:$0xff] %v8592_v0 }
 0x146   :  { %1219 = vmatmul.bf16.gmra.mxu3 %v8064_v13 }
 0x148   :  { %v8556_v9 = vpop.f32.mrf.mxu0 }
 0x149   :  { %12288 = vst [vmem:[#allocation46_spill] sm:$0xff] %v8556_v9  ;;  %v8560_v19 = vpop.f32.mrf.mxu1 }
 0x14a   :  { %12290 = vst [vmem:[#allocation48_spill] sm:$0xff] %v8560_v19  ;;  %v5976_v19 = vld [vmem:[%s12201_s1 + $0x138] sm:$0xf0] }
 0x150   :  { %v8562_v37 = vpop.f32.mrf.mxu0 }
 0x151   :  { %12291 = vst [vmem:[#allocation49_spill] sm:$0xff] %v8562_v37  ;;  %v8564_v47 = vpop.f32.mrf.mxu1  ;;  %v7330_v37 = vld [vmem:[%s12201_s1 + $0x134] sm:$0xf] }
 0x152   :  { %12292 = vst [vmem:[#allocation50_spill] sm:$0xff] %v8564_v47  ;;  %v5975_v47 = vor.u32 %v7331_v49, %v5974_v59  ;;  %v5979_v9 = vor.u32 %v7330_v37, %v5976_v19  ;;  %v8604_v37 = vpop.f32.mrf.mxu3 }
 0x153   :  { %901 = vmatmul.bf16.gmra.mxu0 %v8112_v51  ;;  %12302 = vst [vmem:[#allocation60_spill] sm:$0xff] %v8604_v37  ;;  %v7329_v37 = vld [vmem:[%s12201_s1 + $0x124] sm:$0xf0] }
 0x154   :  { %980 = vmatmul.bf16.gmra.mxu1 %v8112_v51  ;;  %1354 = vmatpush.bf16.msra.mxu0 %v5975_v47  ;;  %v8602_v47 = vpop.f32.mrf.mxu2 }
 0x155   :  { %1145 = vmatmul.bf16.gmra.mxu2 %v8078_v24  ;;  %1433 = vmatpush.bf16.msra.mxu1 %v5979_v9  ;;  %12301 = vst [vmem:[#allocation59_spill] sm:$0xff] %v8602_v47 }
 0x156   :  { %1224 = vmatmul.bf16.gmra.mxu3 %v8078_v24 }
 0x158   :  { %v8580_v48 = vpop.f32.mrf.mxu0 }
 0x159   :  { %12295 = vst [vmem:[#allocation53_spill] sm:$0xff] %v8580_v48  ;;  %v8582_v22 = vpop.f32.mrf.mxu1 }
 0x15a   :  { %12296 = vst [vmem:[#allocation54_spill] sm:$0xff] %v8582_v22  ;;  %v5966_v22 = vld [vmem:[%s12201_s1 + $0x120] sm:$0xf] }
 0x15b   :  { %v5967_v47 = vor.u32 %v7329_v37, %v5966_v22  ;;  %v5968_v22 = vld [vmem:[%s12201_s1 + $0x128] sm:$0xf0] }
 0x15c   :  { %v8610_v0 = vpop.f32.mrf.mxu2 }
 0x15d   :  { %12305 = vst [vmem:[#allocation63_spill] sm:$0xff] %v8610_v0  ;;  %1355 = vmatpush.bf16.msra.mxu0 %v5967_v47 }
 0x160   :  { %v8594_v49 = vpop.f32.mrf.mxu0 }
 0x161   :  { %12299 = vst [vmem:[#allocation57_spill] sm:$0xff] %v8594_v49  ;;  %v8596_v59 = vpop.f32.mrf.mxu1 }
 0x162   :  { %12300 = vst [vmem:[#allocation58_spill] sm:$0xff] %v8596_v59  ;;  %v8614_v59 = vpop.f32.mrf.mxu3 }
 0x163   :  { %906 = vmatmul.bf16.gmra.mxu0 %v8120_v60  ;;  %12307 = vst [vmem:[#allocation65_spill] sm:$0xff] %v8614_v59 }
 0x164   :  { %985 = vmatmul.bf16.gmra.mxu1 %v8120_v60  ;;  %v8638_v37 = vpop.f32.mrf.mxu2 }
 0x165   :  { %1150 = vmatmul.bf16.gmra.mxu2 %v8092_v35  ;;  %12311 = vst [vmem:[#allocation69_spill] sm:$0xff] %v8638_v37 }
 0x166   :  { %1229 = vmatmul.bf16.gmra.mxu3 %v8092_v35 }
 0x168   :  { %v8606_v19 = vpop.f32.mrf.mxu0 }
 0x169   :  { %12303 = vst [vmem:[#allocation61_spill] sm:$0xff] %v8606_v19  ;;  %v8608_v9 = vpop.f32.mrf.mxu1 }
 0x16a   :  { %12304 = vst [vmem:[#allocation62_spill] sm:$0xff] %v8608_v9  ;;  %v8640_v9 = vpop.f32.mrf.mxu3 }
 0x16b   :  { %12312 = vst [vmem:[#allocation70_spill] sm:$0xff] %v8640_v9 }
 0x170   :  { %v8612_v50 = vpop.f32.mrf.mxu0 }
 0x171   :  { %12306 = vst [vmem:[#allocation64_spill] sm:$0xff] %v8612_v50  ;;  %v8616_v49 = vpop.f32.mrf.mxu1 }
 0x172   :  { %12308 = vst [vmem:[#allocation66_spill] sm:$0xff] %v8616_v49  ;;  %v7328_v49 = vld [vmem:[%s12201_s1 + $0x124] sm:$0xf] }
 0x173   :  { %911 = vmatmul.bf16.gmra.mxu0 %v8140_v11  ;;  %v5971_v50 = vor.u32 %v7328_v49, %v5968_v22 }
 0x174   :  { %990 = vmatmul.bf16.gmra.mxu1 %v8140_v11 }
 0x175   :  { %1155 = vmatmul.bf16.gmra.mxu2 %v8112_v51  ;;  %1434 = vmatpush.bf16.msra.mxu1 %v5971_v50  ;;  %v5958_v50 = vld [vmem:[%s12201_s1 + $0x110] sm:$0xf] }
 0x176   :  { %1234 = vmatmul.bf16.gmra.mxu3 %v8112_v51 }
 0x178   :  { %v8628_v59 = vpop.f32.mrf.mxu0 }
 0x179   :  { %12309 = vst [vmem:[#allocation67_spill] sm:$0xff] %v8628_v59  ;;  %v8630_v0 = vpop.f32.mrf.mxu1  ;;  %v8651_v59 = vpop.f32.mrf.mxu3 }
 0x17a   :  { %12310 = vst [vmem:[#allocation68_spill] sm:$0xff] %v8630_v0  ;;  %v8647_v0 = vpop.f32.mrf.mxu2 }
 0x17b   :  { %12315 = vst [vmem:[#allocation73_spill] sm:$0xff] %v8647_v0  ;;  %v7327_v0 = vld [vmem:[%s12201_s1 + $0x114] sm:$0xf0] }
 0x17c   :  { %12316 = vst [vmem:[#allocation74_spill] sm:$0xff] %v8651_v59  ;;  %v5959_v9 = vor.u32 %v7327_v0, %v5958_v50  ;;  %v7326_v0 = vld [vmem:[%s12201_s1 + $0x114] sm:$0xf] }
 0x17e   :  { %1356 = vmatpush.bf16.msra.mxu0 %v5959_v9  ;;  %v5960_v9 = vld [vmem:[%s12201_s1 + $0x118] sm:$0xf0] }
 0x17f   :  { %v5963_v50 = vor.u32 %v7326_v0, %v5960_v9 }
 0x180   :  { %v8642_v19 = vpop.f32.mrf.mxu0 }
 0x181   :  { %12313 = vst [vmem:[#allocation71_spill] sm:$0xff] %v8642_v19  ;;  %v8644_v47 = vpop.f32.mrf.mxu1  ;;  %v8666_v48 = vpop.f32.mrf.mxu3  ;;  %1435 = vmatpush.bf16.msra.mxu1 %v5963_v50  ;;  %v5950_v50 = vld [vmem:[%s12201_s1 + $0x100] sm:$0xf] }
 0x182   :  { %12314 = vst [vmem:[#allocation72_spill] sm:$0xff] %v8644_v47  ;;  %v8664_v37 = vpop.f32.mrf.mxu2 }
 0x183   :  { %916 = vmatmul.bf16.gmra.mxu0 %v8154_v23  ;;  %12319 = vst [vmem:[#allocation77_spill] sm:$0xff] %v8664_v37 }
 0x184   :  { %995 = vmatmul.bf16.gmra.mxu1 %v8154_v23  ;;  %12320 = vst [vmem:[#allocation78_spill] sm:$0xff] %v8666_v48 }
 0x185   :  { %1160 = vmatmul.bf16.gmra.mxu2 %v8120_v60 }
 0x186   :  { %1239 = vmatmul.bf16.gmra.mxu3 %v8120_v60 }
 0x188   :  { %v8654_v49 = vpop.f32.mrf.mxu0 }
 0x189   :  { %12317 = vst [vmem:[#allocation75_spill] sm:$0xff] %v8654_v49  ;;  %v8656_v22 = vpop.f32.mrf.mxu1 }
 0x18a   :  { %12318 = vst [vmem:[#allocation76_spill] sm:$0xff] %v8656_v22  ;;  %v8682_v48 = vpop.f32.mrf.mxu2 }
 0x18b   :  { %12323 = vst [vmem:[#allocation81_spill] sm:$0xff] %v8682_v48 }
 0x190   :  { %v8668_v59 = vpop.f32.mrf.mxu0 }
 0x191   :  { %12321 = vst [vmem:[#allocation79_spill] sm:$0xff] %v8668_v59  ;;  %v8670_v47 = vpop.f32.mrf.mxu1 }
 0x192   :  { %12322 = vst [vmem:[#allocation80_spill] sm:$0xff] %v8670_v47  ;;  %v8686_v47 = vpop.f32.mrf.mxu3  ;;  %v8694_v19 = vpop.f32.mrf.mxu2 }
 0x193   :  { %921 = vmatmul.bf16.gmra.mxu0 %v8172_v38  ;;  %12325 = vst [vmem:[#allocation83_spill] sm:$0xff] %v8686_v47 }
 0x194   :  { %1000 = vmatmul.bf16.gmra.mxu1 %v8172_v38  ;;  %12329 = vst [vmem:[#allocation87_spill] sm:$0xff] %v8694_v19 }
 0x195   :  { %1165 = vmatmul.bf16.gmra.mxu2 %v8140_v11 }
 0x196   :  { %1244 = vmatmul.bf16.gmra.mxu3 %v8140_v11 }
 0x198   :  { %v8684_v37 = vpop.f32.mrf.mxu0 }
 0x199   :  { %12324 = vst [vmem:[#allocation82_spill] sm:$0xff] %v8684_v37  ;;  %v8688_v59 = vpop.f32.mrf.mxu1 }
 0x19a   :  { %12326 = vst [vmem:[#allocation84_spill] sm:$0xff] %v8688_v59  ;;  %v8696_v61 = vpop.f32.mrf.mxu3  ;;  %v8712_v47 = vpop.f32.mrf.mxu2 }
 0x19b   :  { %12330 = vst [vmem:[#allocation88_spill] sm:$0xff] %v8696_v61  ;;  %v7325_v61 = vld [vmem:[%s12201_s1 + $0x104] sm:$0xf0] }
 0x19c   :  { %v5951_v19 = vor.u32 %v7325_v61, %v5950_v50  ;;  %12333 = vst [vmem:[#allocation91_spill] sm:$0xff] %v8712_v47 }
 0x19e   :  { %1357 = vmatpush.bf16.msra.mxu0 %v5951_v19 }
 0x1a0   :  { %v8690_v22 = vpop.f32.mrf.mxu0 }
 0x1a1   :  { %12327 = vst [vmem:[#allocation85_spill] sm:$0xff] %v8690_v22  ;;  %v8692_v49 = vpop.f32.mrf.mxu1 }
 0x1a2   :  { %12328 = vst [vmem:[#allocation86_spill] sm:$0xff] %v8692_v49  ;;  %v8714_v48 = vpop.f32.mrf.mxu3  ;;  %v8730_v61 = vpop.f32.mrf.mxu2 }
 0x1a3   :  { %926 = vmatmul.bf16.gmra.mxu0 %v8205_v62  ;;  %12334 = vst [vmem:[#allocation92_spill] sm:$0xff] %v8714_v48 }
 0x1a4   :  { %1005 = vmatmul.bf16.gmra.mxu1 %v8205_v62 }
 0x1a5   :  { %1170 = vmatmul.bf16.gmra.mxu2 %v8154_v23 }
 0x1a6   :  { %1249 = vmatmul.bf16.gmra.mxu3 %v8154_v23 }
 0x1a8   :  { %v8702_v0 = vpop.f32.mrf.mxu0 }
 0x1a9   :  { %12331 = vst [vmem:[#allocation89_spill] sm:$0xff] %v8702_v0  ;;  %v8704_v9 = vpop.f32.mrf.mxu1  ;;  %v5952_v0 = vld [vmem:[%s12201_s1 + $0x108] sm:$0xf0] }
 0x1aa   :  { %12332 = vst [vmem:[#allocation90_spill] sm:$0xff] %v8704_v9  ;;  %v7324_v9 = vld [vmem:[%s12201_s1 + $0x104] sm:$0xf]  ;;  %v8732_v19 = vpop.f32.mrf.mxu3 }
 0x1ab   :  { %v5955_v59 = vor.u32 %v7324_v9, %v5952_v0  ;;  %v8740_v0 = vpack.c.b16 %v8410_v63, %v8364_v46  ;;  %v8742_v9 = vpop.f32.mrf.mxu2 }
 0x1ad   :  { %1436 = vmatpush.bf16.msra.mxu1 %v5955_v59  ;;  %v75_v59 = vld [vmem:[%s12202_s0 + $0xf8] sm:$0xff]  ;;  %s7736_s0 = smov 8  }
 0x1ae   :  { %v107_v46 = vpack.c.bf16 %v75_v59, %v75_v59 }
 0x1b0   :  { %v8716_v49 = vpop.f32.mrf.mxu0 }
 0x1b1   :  { %12335 = vst [vmem:[#allocation93_spill] sm:$0xff] %v8716_v49  ;;  %v8718_v22 = vpop.f32.mrf.mxu1 }
 0x1b2   :  { %12336 = vst [vmem:[#allocation94_spill] sm:$0xff] %v8718_v22  ;;  %v8746_v22 = vpop.f32.mrf.mxu3 }
 0x1b3   :  { %931 = vmatmul.bf16.gmra.mxu0 %v8247_v25 }
 0x1b4   :  { %1010 = vmatmul.bf16.gmra.mxu1 %v8247_v25 }
 0x1b5   :  { %1175 = vmatmul.bf16.gmra.mxu2 %v8172_v38 }
 0x1b6   :  { %1254 = vmatmul.bf16.gmra.mxu3 %v8172_v38 }
 0x1b8   :  { %v8734_v50 = vpop.f32.mrf.mxu0 }
 0x1b9   :  { %12337 = vst [vmem:[#allocation95_spill] sm:$0xff] %v8734_v50  ;;  %v8736_v48 = vpop.f32.mrf.mxu1  ;;  %v759_v50 = vunpack.c.l.b16 %v107_v46 }
 0x1ba   :  { %12338 = vst [vmem:[#allocation96_spill] sm:$0xff] %v8736_v48  ;;  %v8761_v48 = vpop.f32.mrf.mxu2 }
 0x1bb   :  { %v773_v37 = vpack.c.b16 %v759_v50, %v8412_v7 }
 0x1c0   :  { %v8744_v47 = vpop.f32.mrf.mxu0 }
 0x1c1   :  { %12339 = vst [vmem:[#allocation97_spill] sm:$0xff] %v8744_v47  ;;  %v8748_v49 = vpop.f32.mrf.mxu1 }
 0x1c2   :  { %12340 = vst [vmem:[#allocation98_spill] sm:$0xff] %v8748_v49  ;;  %v8763_v49 = vpop.f32.mrf.mxu3  ;;  %v8770_v18 = vpop.f32.mrf.mxu2 }
 0x1c3   :  { %936 = vmatmul.bf16.gmra.mxu0 %v8740_v0 }
 0x1c4   :  { %1015 = vmatmul.bf16.gmra.mxu1 %v8740_v0 }
 0x1c5   :  { %1180 = vmatmul.bf16.gmra.mxu2 %v8205_v62 }
 0x1c6   :  { %1259 = vmatmul.bf16.gmra.mxu3 %v8205_v62 }
 0x1c8   :  { %v8757_v63 = vpop.f32.mrf.mxu0 }
 0x1c9   :  { %12341 = vst [vmem:[#allocation99_spill] sm:$0xff] %v8757_v63  ;;  %v8759_v47 = vpop.f32.mrf.mxu1 }
 0x1ca   :  { %12342 = vst [vmem:[#allocation100_spill] sm:$0xff] %v8759_v47  ;;  %v8773_v59 = vpop.f32.mrf.mxu3 }
 0x1d0   :  { %v8766_v31 = vpop.f32.mrf.mxu0 }
 0x1d1   :  { %12343 = vst [vmem:[#allocation101_spill] sm:$0xff] %v8766_v31  ;;  %v8768_v8 = vpop.f32.mrf.mxu1 }
 0x1d2   :  { %12344 = vst [vmem:[#allocation102_spill] sm:$0xff] %v8768_v8 }
 0x1d3   :  { %941 = vmatmul.bf16.gmra.mxu0 %v773_v37 }
 0x1d4   :  { %1020 = vmatmul.bf16.gmra.mxu1 %v773_v37 }
 0x1d5   :  { %1185 = vmatmul.bf16.gmra.mxu2 %v8247_v25 }
 0x1d6   :  { %1264 = vmatmul.bf16.gmra.mxu3 %v8247_v25 }
 0x1d8   :  { %v8776_v47 = vpop.f32.mrf.mxu0 }
 0x1d9   :  { %12345 = vst [vmem:[#allocation103_spill] sm:$0xff] %v8776_v47  ;;  %v8778_v63 = vpop.f32.mrf.mxu1 }
 0x1da   :  { %12346 = vst [vmem:[#allocation104_spill] sm:$0xff] %v8778_v63 }
 0x1e0   :  { %v8780_v46 = vpop.f32.mrf.mxu0 }
 0x1e1   :  { %12347 = vst [vmem:[#allocation105_spill] sm:$0xff] %v8780_v46  ;;  %v8782_v7 = vpop.f32.mrf.mxu1 }
 0x1e2   :  { %12348 = vst [vmem:[#allocation106_spill] sm:$0xff] %v8782_v7 }
 0x1e3   :  { %1358 = vmatmul.bf16.vlgmr.msra.gmra.mxu0 %v8030_v45 }
 0x1e4   :  { %1437 = vmatmul.bf16.vlgmr.msra.gmra.mxu1 %v8030_v45 }
 0x1e8   :  { %v8786_v50 = vpop.f32.mrf.mxu0 }
 0x1e9   :  { %12349 = vst [vmem:[#allocation107_spill] sm:$0xff] %v8786_v50  ;;  %v8788_v37 = vpop.f32.mrf.mxu1 }
 0x1ea   :  { %12350 = vst [vmem:[#allocation108_spill] sm:$0xff] %v8788_v37 }
 0x1f0   :  { %v8790_v8 = vpop.f32.mrf.mxu0 }
 0x1f1   :  { %12351 = vst [vmem:[#allocation109_spill] sm:$0xff] %v8790_v8  ;;  %v8792_v31 = vpop.f32.mrf.mxu1 }
 0x1f2   :  { %12352 = vst [vmem:[#allocation110_spill] sm:$0xff] %v8792_v31 }
 0x1f3   :  { %1363 = vmatmul.bf16.gmra.mxu0 %v8042_v58 }
 0x1f4   :  { %1442 = vmatmul.bf16.gmra.mxu1 %v8042_v58 }
 0x1f8   :  { %v8796_v63 = vpop.f32.mrf.mxu0 }
 0x1f9   :  { %12353 = vst [vmem:[#allocation111_spill] sm:$0xff] %v8796_v63  ;;  %v8798_v46 = vpop.f32.mrf.mxu1 }
 0x1fa   :  { %12354 = vst [vmem:[#allocation112_spill] sm:$0xff] %v8798_v46 }
 0x200   :  { %v8800_v7 = vpop.f32.mrf.mxu0 }
 0x201   :  { %12355 = vst [vmem:[#allocation113_spill] sm:$0xff] %v8800_v7  ;;  %v8802_v47 = vpop.f32.mrf.mxu1 }
 0x202   :  { %12356 = vst [vmem:[#allocation114_spill] sm:$0xff] %v8802_v47 }
 0x203   :  { %1368 = vmatmul.bf16.gmra.mxu0 %v8050_v2 }
 0x204   :  { %1447 = vmatmul.bf16.gmra.mxu1 %v8050_v2 }
 0x208   :  { %v8806_v45 = vpop.f32.mrf.mxu0 }
 0x209   :  { %12357 = vst [vmem:[#allocation115_spill] sm:$0xff] %v8806_v45  ;;  %v8808_v8 = vpop.f32.mrf.mxu1 }
 0x20a   :  { %12358 = vst [vmem:[#allocation116_spill] sm:$0xff] %v8808_v8  ;;  %v8832_v8 = vpop.f32.mrf.mxu3 }
 0x210   :  { %v8810_v31 = vpop.f32.mrf.mxu0 }
 0x211   :  { %12359 = vst [vmem:[#allocation117_spill] sm:$0xff] %v8810_v31  ;;  %v8812_v37 = vpop.f32.mrf.mxu1 }
 0x212   :  { %12360 = vst [vmem:[#allocation118_spill] sm:$0xff] %v8812_v37  ;;  %v8830_v37 = vpop.f32.mrf.mxu2 }
 0x213   :  { %1373 = vmatmul.bf16.gmra.mxu0 %v8064_v13 }
 0x214   :  { %1452 = vmatmul.bf16.gmra.mxu1 %v8064_v13 }
 0x218   :  { %v8816_v58 = vpop.f32.mrf.mxu0 }
 0x219   :  { %12361 = vst [vmem:[#allocation119_spill] sm:$0xff] %v8816_v58  ;;  %v8818_v7 = vpop.f32.mrf.mxu1 }
 0x21a   :  { %12362 = vst [vmem:[#allocation120_spill] sm:$0xff] %v8818_v7 }
 0x220   :  { %v8820_v47 = vpop.f32.mrf.mxu0 }
 0x221   :  { %12363 = vst [vmem:[#allocation121_spill] sm:$0xff] %v8820_v47  ;;  %v8822_v46 = vpop.f32.mrf.mxu1  ;;  %v8839_v47 = vpop.f32.mrf.mxu2 }
 0x222   :  { %12364 = vst [vmem:[#allocation122_spill] sm:$0xff] %v8822_v46 }
 0x223   :  { %1378 = vmatmul.bf16.gmra.mxu0 %v8078_v24  ;;  %12369 = vst [vmem:[#allocation127_spill] sm:$0xff] %v8839_v47 }
 0x224   :  { %1457 = vmatmul.bf16.gmra.mxu1 %v8078_v24  ;;  %v8844_v24 = vpop.f32.mrf.mxu3 }
 0x225   :  { %12371 = vst [vmem:[#allocation129_spill] sm:$0xff] %v8844_v24 }
 0x228   :  { %v8826_v2 = vpop.f32.mrf.mxu0 }
 0x229   :  { %12365 = vst [vmem:[#allocation123_spill] sm:$0xff] %v8826_v2  ;;  %v8828_v31 = vpop.f32.mrf.mxu1 }
 0x22a   :  { %12366 = vst [vmem:[#allocation124_spill] sm:$0xff] %v8828_v31  ;;  %v8848_v31 = vpop.f32.mrf.mxu2 }
 0x230   :  { %v8834_v13 = vpop.f32.mrf.mxu0 }
 0x231   :  { %12367 = vst [vmem:[#allocation125_spill] sm:$0xff] %v8834_v13  ;;  %v8836_v58 = vpop.f32.mrf.mxu1  ;;  %v8854_v13 = vpop.f32.mrf.mxu3 }
 0x232   :  { %12368 = vst [vmem:[#allocation126_spill] sm:$0xff] %v8836_v58  ;;  %v8858_v58 = vpop.f32.mrf.mxu2 }
 0x233   :  { %1383 = vmatmul.bf16.gmra.mxu0 %v8092_v35  ;;  %12375 = vst [vmem:[#allocation133_spill] sm:$0xff] %v8858_v58 }
 0x234   :  { %1462 = vmatmul.bf16.gmra.mxu1 %v8092_v35 }
 0x238   :  { %v8842_v46 = vpop.f32.mrf.mxu0 }
 0x239   :  { %12370 = vst [vmem:[#allocation128_spill] sm:$0xff] %v8842_v46  ;;  %v8846_v2 = vpop.f32.mrf.mxu1  ;;  %v8864_v63 = vpop.f32.mrf.mxu3 }
 0x23a   :  { %12372 = vst [vmem:[#allocation130_spill] sm:$0xff] %v8846_v2 }
 0x23b   :  { %12378 = vst [vmem:[#allocation136_spill] sm:$0xff] %v8864_v63 }
 0x240   :  { %v8850_v7 = vpop.f32.mrf.mxu0 }
 0x241   :  { %12373 = vst [vmem:[#allocation131_spill] sm:$0xff] %v8850_v7  ;;  %v8852_v45 = vpop.f32.mrf.mxu1  ;;  %v8870_v7 = vpop.f32.mrf.mxu2 }
 0x242   :  { %12374 = vst [vmem:[#allocation132_spill] sm:$0xff] %v8852_v45  ;;  %v8874_v45 = vpop.f32.mrf.mxu3 }
 0x243   :  { %1388 = vmatmul.bf16.gmra.mxu0 %v8112_v51 }
 0x244   :  { %1467 = vmatmul.bf16.gmra.mxu1 %v8112_v51 }
 0x248   :  { %v8860_v35 = vpop.f32.mrf.mxu0 }
 0x249   :  { %12376 = vst [vmem:[#allocation134_spill] sm:$0xff] %v8860_v35  ;;  %v8862_v46 = vpop.f32.mrf.mxu1  ;;  %v8880_v35 = vpop.f32.mrf.mxu2 }
 0x24a   :  { %12377 = vst [vmem:[#allocation135_spill] sm:$0xff] %v8862_v46  ;;  %v8884_v63 = vpop.f32.mrf.mxu3 }
 0x250   :  { %v8866_v2 = vpop.f32.mrf.mxu0 }
 0x251   :  { %12379 = vst [vmem:[#allocation137_spill] sm:$0xff] %v8866_v2  ;;  %v8868_v50 = vpop.f32.mrf.mxu1  ;;  %v1122_v2 = vadd.f32 %v8730_v61, %v8168_v32 }
 0x252   :  { %12380 = vst [vmem:[#allocation138_spill] sm:$0xff] %v8868_v50 }
 0x253   :  { %1393 = vmatmul.bf16.gmra.mxu0 %v8120_v60 }
 0x254   :  { %1472 = vmatmul.bf16.gmra.mxu1 %v8120_v60  ;;  %v1201_v60 = vadd.f32 %v8732_v19, %v8170_v34  ;;  %v1203_v34 = vadd.f32 %v8746_v22, %v8180_v43  ;;  %v8904_v19 = vpop.f32.mrf.mxu3  ;;  %v1206_v43 = vadd.f32 %v8763_v49, %v8200_v57  ;;  %v1208_v57 = vadd.f32 %v8773_v59, %v8219_v6 }
 0x255   :  { %v1211_v6 = vadd.f32 %v8832_v8, %v8233_v17 }
 0x258   :  { %v8876_v51 = vpop.f32.mrf.mxu0 }
 0x259   :  { %12381 = vst [vmem:[#allocation139_spill] sm:$0xff] %v8876_v51  ;;  %v8878_v58 = vpop.f32.mrf.mxu1  ;;  %v8896_v51 = vpop.f32.mrf.mxu2 }
 0x25a   :  { %12382 = vst [vmem:[#allocation140_spill] sm:$0xff] %v8878_v58 }
 0x260   :  { %v1359_v46 = vpop.f32.mrf.mxu0 }
 0x261   :  { %v1360_v50 = vadd.f32 %v1359_v46, %v8174_v40  ;;  %v1438_v24 = vpop.f32.mrf.mxu1  ;;  %v1124_v40 = vadd.f32 %v8742_v9, %v8178_v42  ;;  %v1127_v42 = vadd.f32 %v8761_v48, %v8198_v55  ;;  %v1129_v55 = vadd.f32 %v8770_v18, %v8217_v5 }
 0x262   :  { %v1439_v47 = vadd.f32 %v1438_v24, %v8176_v41  ;;  %v1132_v5 = vadd.f32 %v8830_v37, %v8231_v15 }
 0x263   :  { %v8890_v39 = vadd.f32 %v1360_v50, %v1122_v2  ;;  %1398 = vmatmul.bf16.gmra.mxu0 %v8140_v11 }
 0x264   :  { %v8893_v58 = vadd.f32 %v1439_v47, %v1201_v60  ;;  %1477 = vmatmul.bf16.gmra.mxu1 %v8140_v11  ;;  %v8910_v11 = vpop.f32.mrf.mxu2  ;;  %v8924_v60 = vpop.f32.mrf.mxu3 }
 0x268   :  { %v1361_v32 = vpop.f32.mrf.mxu0 }
 0x269   :  { %v1362_v61 = vadd.f32 %v1361_v32, %v8194_v52  ;;  %v1440_v46 = vpop.f32.mrf.mxu1 }
 0x26a   :  { %v1441_v41 = vadd.f32 %v1440_v46, %v8196_v54 }
 0x26b   :  { %v8906_v47 = vadd.f32 %v1362_v61, %v1124_v40 }
 0x26c   :  { %v8908_v50 = vadd.f32 %v1441_v41, %v1203_v34 }
 0x270   :  { %v1364_v2 = vpop.f32.mrf.mxu0 }
 0x271   :  { %v1365_v52 = vadd.f32 %v1364_v2, %v8213_v3  ;;  %v1443_v9 = vpop.f32.mrf.mxu1 }
 0x272   :  { %v1444_v54 = vadd.f32 %v1443_v9, %v8215_v4  ;;  %v8931_v4 = vpop.f32.mrf.mxu2 }
 0x273   :  { %v8918_v22 = vadd.f32 %v1365_v52, %v1127_v42  ;;  %1403 = vmatmul.bf16.gmra.mxu0 %v8154_v23  ;;  %v1216_v52 = vadd.f32 %v8854_v13, %v8315_v33 }
 0x274   :  { %v8921_v24 = vadd.f32 %v1444_v54, %v1206_v43  ;;  %1482 = vmatmul.bf16.gmra.mxu1 %v8154_v23  ;;  %v8938_v23 = vpop.f32.mrf.mxu3 }
 0x278   :  { %v1366_v32 = vpop.f32.mrf.mxu0 }
 0x279   :  { %v1367_v3 = vadd.f32 %v1366_v32, %v8227_v10  ;;  %v1445_v48 = vpop.f32.mrf.mxu1 }
 0x27a   :  { %v1446_v49 = vadd.f32 %v1445_v48, %v8229_v14  ;;  %v8949_v14 = vpop.f32.mrf.mxu2 }
 0x27b   :  { %v8934_v40 = vadd.f32 %v1367_v3, %v1129_v55  ;;  %v1221_v3 = vadd.f32 %v8874_v45, %v8382_v1  ;;  %v1147_v1 = vadd.f32 %v8896_v51, %v8418_v26 }
 0x27c   :  { %v8936_v61 = vadd.f32 %v1446_v49, %v1208_v57  ;;  %v8956_v15 = vpop.f32.mrf.mxu3 }
 0x280   :  { %v1369_v46 = vpop.f32.mrf.mxu0 }
 0x281   :  { %v1370_v10 = vadd.f32 %v1369_v46, %v8252_v29  ;;  %v1448_v18 = vpop.f32.mrf.mxu1 }
 0x282   :  { %v1449_v59 = vadd.f32 %v1448_v18, %v8263_v36  ;;  %v1156_v37 = vpop.f32.mrf.mxu2  ;;  %v1137_v36 = vadd.f32 %v8848_v31, %v8301_v21  ;;  %v1226_v18 = vadd.f32 %v8904_v19, %v8422_v30  ;;  %v1152_v30 = vadd.f32 %v8931_v4, %v8436_v20  ;;  %v12390_v4 = vld [vmem:[#allocation21_spill] sm:$0xff] }
 0x283   :  { %v8946_v34 = vadd.f32 %v1370_v10, %v1132_v5  ;;  %1408 = vmatmul.bf16.gmra.mxu0 %v8172_v38 }
 0x284   :  { %v8951_v41 = vadd.f32 %v1449_v59, %v1211_v6  ;;  %1487 = vmatmul.bf16.gmra.mxu1 %v8172_v38  ;;  %v1235_v38 = vpop.f32.mrf.mxu3 }
 0x288   :  { %v8954_v2 = vpop.f32.mrf.mxu0 }
 0x289   :  { %v8958_v29 = vpop.f32.mrf.mxu1 }
 0x28a   :  { %v8972_v32 = vpop.f32.mrf.mxu2 }
 0x28c   :  { %v8978_v31 = vpop.f32.mrf.mxu3 }
 0x290   :  { %v1374_v17 = vpop.f32.mrf.mxu0 }
 0x291   :  { %v1375_v8 = vadd.f32 %v1374_v17, %v8354_v27  ;;  %v1453_v42 = vpop.f32.mrf.mxu1 }
 0x292   :  { %v1454_v9 = vadd.f32 %v1453_v42, %v8356_v44  ;;  %v1142_v44 = vadd.f32 %v8870_v7, %v8375_v56  ;;  %v1161_v48 = vpop.f32.mrf.mxu2 }
 0x293   :  { %v8966_v43 = vadd.f32 %v1375_v8, %v1137_v36  ;;  %1413 = vmatmul.bf16.gmra.mxu0 %v8205_v62 }
 0x294   :  { %v8969_v54 = vadd.f32 %v1454_v9, %v1216_v52  ;;  %1492 = vmatmul.bf16.gmra.mxu1 %v8205_v62  ;;  %v1240_v46 = vpop.f32.mrf.mxu3  ;;  %v12384_v52 = vld [vmem:[#allocation16_spill] sm:$0xff] }
 0x295   :  { %v1231_v9 = vadd.f32 %v8938_v23, %v12384_v52  ;;  %v12392_v23 = vld [vmem:[#allocation22_spill] sm:$0xff] }
 0x298   :  { %v8974_v21 = vpop.f32.mrf.mxu0 }
 0x299   :  { %v8976_v27 = vpop.f32.mrf.mxu1 }
 0x2a0   :  { %v1379_v33 = vpop.f32.mrf.mxu0 }
 0x2a1   :  { %v1380_v13 = vadd.f32 %v1379_v33, %v8414_v28  ;;  %v1458_v55 = vpop.f32.mrf.mxu1  ;;  %v8996_v28 = vpop.f32.mrf.mxu2  ;;  %v12385_v33 = vld [vmem:[#allocation24_spill] sm:$0xff] }
 0x2a2   :  { %v1459_v62 = vadd.f32 %v1458_v55, %v8416_v12  ;;  %v9000_v12 = vpop.f32.mrf.mxu3 }
 0x2a3   :  { %v8986_v57 = vadd.f32 %v1380_v13, %v1142_v44  ;;  %1418 = vmatmul.bf16.gmra.mxu0 %v8247_v25 }
 0x2a4   :  { %v8989_v49 = vadd.f32 %v1459_v62, %v1221_v3  ;;  %1497 = vmatmul.bf16.gmra.mxu1 %v8247_v25 }
 0x2a8   :  { %v8992_v5 = vpop.f32.mrf.mxu0 }
 0x2a9   :  { %v8994_v56 = vpop.f32.mrf.mxu1  ;;  %v1166_v17 = vpop.f32.mrf.mxu2 }
 0x2b0   :  { %v1384_v7 = vpop.f32.mrf.mxu0 }
 0x2b1   :  { %v1385_v45 = vadd.f32 %v1384_v7, %v8446_v53  ;;  %v1463_v10 = vpop.f32.mrf.mxu1  ;;  %v1245_v53 = vpop.f32.mrf.mxu3 }
 0x2b2   :  { %v1464_v25 = vadd.f32 %v1463_v10, %v8448_v16  ;;  %v1168_v36 = vpop.f32.mrf.mxu2  ;;  %v12383_v16 = vld [vmem:[#allocation23_spill] sm:$0xff]  ;;  %v12391_v10 = vld [vmem:[#allocation33_spill] sm:$0xff] }
 0x2b3   :  { %v9006_v6 = vadd.f32 %v1385_v45, %v1147_v1  ;;  %1423 = vmatmul.bf16.gmra.mxu0 %v8740_v0  ;;  %v1157_v45 = vadd.f32 %v1156_v37, %v12390_v4  ;;  %v12398_v37 = vld [vmem:[#allocation28_spill] sm:$0xff] }
 0x2b4   :  { %v9009_v59 = vadd.f32 %v1464_v25, %v1226_v18  ;;  %1502 = vmatmul.bf16.gmra.mxu1 %v8740_v0  ;;  %v1162_v4 = vadd.f32 %v1161_v48, %v12398_v37  ;;  %v12407_v48 = vld [vmem:[#allocation127_spill] sm:$0xff] }
 0x2b8   :  { %v9012_v26 = vpop.f32.mrf.mxu0 }
 0x2b9   :  { %v9014_v51 = vpop.f32.mrf.mxu1  ;;  %v1247_v55 = vpop.f32.mrf.mxu3 }
 0x2ba   :  { %v1171_v7 = vpop.f32.mrf.mxu2 }
 0x2c0   :  { %v1389_v8 = vpop.f32.mrf.mxu0 }
 0x2c1   :  { %v1390_v19 = vadd.f32 %v1389_v8, %v12383_v16  ;;  %v1468_v42 = vpop.f32.mrf.mxu1  ;;  %v1250_v1 = vpop.f32.mrf.mxu3  ;;  %v1236_v8 = vadd.f32 %v1235_v38, %v12392_v23  ;;  %v12393_v16 = vld [vmem:[#allocation34_spill] sm:$0xff] }
 0x2c2   :  { %v1469_v44 = vadd.f32 %v1468_v42, %v12385_v33  ;;  %v1173_v42 = vpop.f32.mrf.mxu2  ;;  %v12400_v38 = vld [vmem:[#allocation30_spill] sm:$0xff] }
 0x2c3   :  { %v9022_v0 = vadd.f32 %v1390_v19, %v1152_v30  ;;  %v1241_v23 = vadd.f32 %v1240_v46, %v12400_v38  ;;  %v12410_v46 = vld [vmem:[#allocation6_spill] sm:$0xff]  ;;  %v12411_v38 = vld [vmem:[#allocation133_spill] sm:$0xff] }
 0x2c4   :  { %v9024_v13 = vadd.f32 %v1469_v44, %v1231_v9 }
 0x2c5   :  { %12386 = vst [vmem:[#allocation23_spill] sm:$0xff] %v9022_v0 }
 0x2c6   :  { %12387 = vst [vmem:[#allocation16_spill] sm:$0xff] %v9024_v13 }
 0x2c8   :  { %v9026_v3 = vpop.f32.mrf.mxu0 }
 0x2c9   :  { %12388 = vst [vmem:[#allocation24_spill] sm:$0xff] %v9026_v3  ;;  %v9028_v62 = vpop.f32.mrf.mxu1  ;;  %v1252_v33 = vpop.f32.mrf.mxu3 }
 0x2ca   :  { %12389 = vst [vmem:[#allocation141_spill] sm:$0xff] %v9028_v62  ;;  %v1176_v13 = vpop.f32.mrf.mxu2 }
 0x2d0   :  { %v1394_v20 = vpop.f32.mrf.mxu0 }
 0x2d1   :  { %v1395_v18 = vadd.f32 %v1394_v20, %v12391_v10  ;;  %v1473_v25 = vpop.f32.mrf.mxu1  ;;  %v12399_v20 = vld [vmem:[#allocation41_spill] sm:$0xff] }
 0x2d2   :  { %v1474_v30 = vadd.f32 %v1473_v25, %v12393_v16  ;;  %v12401_v25 = vld [vmem:[#allocation42_spill] sm:$0xff] }
 0x2d3   :  { %v9034_v19 = vadd.f32 %v1395_v18, %v1157_v45  ;;  %v1255_v18 = vpop.f32.mrf.mxu3 }
 0x2d4   :  { %v9036_v52 = vadd.f32 %v1474_v30, %v1236_v8  ;;  %v1178_v30 = vpop.f32.mrf.mxu2 }
 0x2d5   :  { %12394 = vst [vmem:[#allocation21_spill] sm:$0xff] %v9034_v19 }
 0x2d6   :  { %12395 = vst [vmem:[#allocation33_spill] sm:$0xff] %v9036_v52 }
 0x2d8   :  { %v9038_v9 = vpop.f32.mrf.mxu0 }
 0x2d9   :  { %12396 = vst [vmem:[#allocation22_spill] sm:$0xff] %v9038_v9  ;;  %v9040_v44 = vpop.f32.mrf.mxu1  ;;  %v12406_v9 = vld [vmem:[#allocation2_spill] sm:$0xff] }
 0x2da   :  { %12397 = vst [vmem:[#allocation34_spill] sm:$0xff] %v9040_v44  ;;  %v1134_v37 = vadd.f32 %v12407_v48, %v12406_v9  ;;  %v12417_v48 = vld [vmem:[#allocation13_spill] sm:$0xff] }
 0x2db   :  { %v1257_v44 = vpop.f32.mrf.mxu3 }
 0x2e0   :  { %v1399_v0 = vpop.f32.mrf.mxu0 }
 0x2e1   :  { %v1400_v10 = vadd.f32 %v1399_v0, %v12399_v20  ;;  %v1478_v62 = vpop.f32.mrf.mxu1  ;;  %v12408_v0 = vld [vmem:[#allocation3_spill] sm:$0xff]  ;;  %v12409_v20 = vld [vmem:[#allocation129_spill] sm:$0xff] }
 0x2e2   :  { %v1479_v45 = vadd.f32 %v1478_v62, %v12401_v25  ;;  %v1213_v3 = vadd.f32 %v12409_v20, %v12408_v0  ;;  %v9060_v62 = vadd.f32 %v12411_v38, %v12410_v46  ;;  %v9078_v0 = vadd.f32 %v8910_v11, %v12417_v48  ;;  %v12418_v20 = vld [vmem:[#allocation15_spill] sm:$0xff]  ;;  %v12423_v11 = vld [vmem:[#allocation26_spill] sm:$0xff] }
 0x2e3   :  { %v9046_v16 = vadd.f32 %v1400_v10, %v1162_v4  ;;  %v12412_v4 = vld [vmem:[#allocation7_spill] sm:$0xff]  ;;  %v12413_v10 = vld [vmem:[#allocation136_spill] sm:$0xff]  ;;  %v9082_v46 = vadd.f32 %v8924_v60, %v12418_v20  ;;  %v9100_v48 = vadd.f32 %v8978_v31, %v12423_v11  ;;  %v1181_v60 = vpop.f32.mrf.mxu2 }
 0x2e4   :  { %v9048_v8 = vadd.f32 %v1479_v45, %v1241_v23  ;;  %v9064_v23 = vadd.f32 %v12413_v10, %v12412_v4  ;;  %v12415_v45 = vld [vmem:[#allocation10_spill] sm:$0xff]  ;;  %v12420_v4 = vld [vmem:[#allocation17_spill] sm:$0xff]  ;;  %v12424_v20 = vld [vmem:[#allocation31_spill] sm:$0xff] }
 0x2e5   :  { %12402 = vst [vmem:[#allocation28_spill] sm:$0xff] %v9046_v16  ;;  %v12416_v16 = vld [vmem:[#allocation11_spill] sm:$0xff]  ;;  %v9088_v10 = vadd.f32 %v8949_v14, %v12420_v4  ;;  %v12429_v31 = vld [vmem:[#allocation40_spill] sm:$0xff] }
 0x2e6   :  { %12403 = vst [vmem:[#allocation41_spill] sm:$0xff] %v9048_v8  ;;  %v9070_v8 = vadd.f32 %v8880_v35, %v12415_v45  ;;  %v9074_v9 = vadd.f32 %v8884_v63, %v12416_v16  ;;  %v12421_v35 = vld [vmem:[#allocation18_spill] sm:$0xff]  ;;  %v12422_v63 = vld [vmem:[#allocation25_spill] sm:$0xff]  ;;  %v12426_v4 = vld [vmem:[#allocation35_spill] sm:$0xff]  ;;  %v9120_v11 = vadd.f32 %v1247_v55, %v12429_v31 }
 0x2e7   :  { %v9092_v45 = vadd.f32 %v8956_v15, %v12421_v35  ;;  %v9096_v16 = vadd.f32 %v8972_v32, %v12422_v63  ;;  %v9111_v15 = vadd.f32 %v1166_v17, %v12426_v4  ;;  %v12427_v35 = vld [vmem:[#allocation36_spill] sm:$0xff]  ;;  %v12428_v32 = vld [vmem:[#allocation39_spill] sm:$0xff] }
 0x2e8   :  { %v9050_v52 = vpop.f32.mrf.mxu0  ;;  %v9117_v63 = vadd.f32 %v1168_v36, %v12428_v32  ;;  %v12435_v4 = vld [vmem:[#allocation44_spill] sm:$0xff] }
 0x2e9   :  { %12404 = vst [vmem:[#allocation30_spill] sm:$0xff] %v9050_v52  ;;  %v9052_v19 = vpop.f32.mrf.mxu1  ;;  %v12430_v52 = vld [vmem:[#allocation71_spill] sm:$0xff]  ;;  %v12439_v55 = vld [vmem:[#allocation76_spill] sm:$0xff] }
 0x2ea   :  { %12405 = vst [vmem:[#allocation42_spill] sm:$0xff] %v9052_v19  ;;  %v9114_v19 = vadd.f32 %v1245_v53, %v12427_v35  ;;  %v9134_v53 = vadd.f32 %v1250_v1, %v12435_v4  ;;  %v12437_v35 = vld [vmem:[#allocation72_spill] sm:$0xff]  ;;  %v9142_v32 = vadd.f32 %v8908_v50, %v12439_v55  ;;  %v12448_v4 = vld [vmem:[#allocation49_spill] sm:$0xff]  ;;  %v1260_v50 = vpop.f32.mrf.mxu3 }
 0x2eb   :  { %v9138_v36 = vadd.f32 %v8893_v58, %v12437_v35  ;;  %v12443_v31 = vld [vmem:[#allocation48_spill] sm:$0xff]  ;;  %v9157_v58 = vadd.f32 %v1176_v13, %v12448_v4  ;;  %v12450_v35 = vld [vmem:[#allocation50_spill] sm:$0xff] }
 0x2ec   :  { %12436 = vst [vmem:[#allocation6_spill] sm:$0xff] %v9134_v53  ;;  %v12447_v1 = vld [vmem:[#allocation4_spill] sm:$0xff]  ;;  %v9160_v53 = vadd.f32 %v1255_v18, %v12450_v35  ;;  %v12459_v35 = vld [vmem:[#allocation82_spill] sm:$0xff] }
 0x2ed   :  { %12438 = vst [vmem:[#allocation133_spill] sm:$0xff] %v9138_v36  ;;  %v12452_v55 = vld [vmem:[#allocation80_spill] sm:$0xff] }
 0x2ee   :  { %12440 = vst [vmem:[#allocation7_spill] sm:$0xff] %v9142_v32 }
 0x2ef   :  { %12449 = vst [vmem:[#allocation13_spill] sm:$0xff] %v9157_v58 }
 0x2f0   :  { %v9066_v25 = vpop.f32.mrf.mxu0  ;;  %12451 = vst [vmem:[#allocation15_spill] sm:$0xff] %v9160_v53  ;;  %v12465_v53 = vld [vmem:[#allocation57_spill] sm:$0xff] }
 0x2f1   :  { %12414 = vst [vmem:[#allocation2_spill] sm:$0xff] %v9066_v25  ;;  %v9084_v38 = vpop.f32.mrf.mxu1  ;;  %v12425_v25 = vld [vmem:[#allocation32_spill] sm:$0xff]  ;;  %v9207_v58 = vadd.f32 %v1181_v60, %v12465_v53 }
 0x2f2   :  { %12419 = vst [vmem:[#allocation127_spill] sm:$0xff] %v9084_v38  ;;  %v9104_v38 = vadd.f32 %v8996_v28, %v12424_v20  ;;  %v9108_v14 = vadd.f32 %v9000_v12, %v12425_v25  ;;  %v9124_v28 = vadd.f32 %v8890_v39, %v12430_v52  ;;  %v12432_v20 = vld [vmem:[#allocation75_spill] sm:$0xff]  ;;  %v12441_v39 = vld [vmem:[#allocation46_spill] sm:$0xff] }
 0x2f3   :  { %v9128_v12 = vadd.f32 %v8906_v47, %v12432_v20  ;;  %v12434_v25 = vld [vmem:[#allocation43_spill] sm:$0xff]  ;;  %v9145_v52 = vadd.f32 %v1173_v42, %v12441_v39  ;;  %v9148_v47 = vadd.f32 %v1252_v33, %v12443_v31  ;;  %v9164_v42 = vadd.f32 %v8921_v24, %v12452_v55  ;;  %v12454_v33 = vld [vmem:[#allocation5_spill] sm:$0xff] }
 0x2f4   :  { %12431 = vst [vmem:[#allocation3_spill] sm:$0xff] %v9124_v28  ;;  %v9131_v17 = vadd.f32 %v1171_v7, %v12434_v25  ;;  %v12445_v20 = vld [vmem:[#allocation79_spill] sm:$0xff]  ;;  %v1372_v25 = vadd.f32 %v8954_v2, %v12447_v1  ;;  %v1451_v39 = vadd.f32 %v8958_v29, %v12454_v33  ;;  %v12455_v31 = vld [vmem:[#allocation53_spill] sm:$0xff]  ;;  %v1727_v2 = vmul.f32 %v9124_v28, %v9124_v28  ;;  %v12461_v33 = vld [vmem:[#allocation84_spill] sm:$0xff] }
 0x2f5   :  { %12433 = vst [vmem:[#allocation129_spill] sm:$0xff] %v9128_v12  ;;  %v9152_v7 = vadd.f32 %v8918_v22, %v12445_v20  ;;  %v9169_v22 = vadd.f32 %v1178_v30, %v12455_v31  ;;  %v12457_v20 = vld [vmem:[#allocation54_spill] sm:$0xff]  ;;  %v1729_v13 = vmul.f32 %v9128_v12, %v9128_v12  ;;  %v1728_v24 = vmul.f32 %v9138_v36, %v9138_v36 }
 0x2f6   :  { %12442 = vst [vmem:[#allocation136_spill] sm:$0xff] %v9145_v52  ;;  %v1622_v29 = vadd.f32 %v9128_v12, %v9124_v28  ;;  %v1655_v30 = vadd.f32 %v9142_v32, %v9138_v36  ;;  %v9194_v55 = vadd.f32 %v8934_v40, %v12459_v35  ;;  %v9198_v31 = vadd.f32 %v8936_v61, %v12461_v33  ;;  %v12463_v28 = vld [vmem:[#allocation8_spill] sm:$0xff]  ;;  %v1183_v40 = vpop.f32.mrf.mxu2  ;;  %v12466_v52 = vld [vmem:[#allocation85_spill] sm:$0xff] }
 0x2f7   :  { %12444 = vst [vmem:[#allocation10_spill] sm:$0xff] %v9148_v47  ;;  %v9172_v47 = vadd.f32 %v1257_v44, %v12457_v20  ;;  %v1730_v44 = vmul.f32 %v9142_v32, %v9142_v32  ;;  %v1731_v4 = vmul.f32 %v9152_v7, %v9152_v7  ;;  %v1518_v20 = vadd.f32 %v1372_v25, %v1134_v37  ;;  %v12467_v37 = vld [vmem:[#allocation86_spill] sm:$0xff] }
 0x2f8   :  { %12446 = vst [vmem:[#allocation11_spill] sm:$0xff] %v9152_v7  ;;  %v9178_v18 = vpop.f32.mrf.mxu0  ;;  %v1732_v12 = vmul.f32 %v9164_v42, %v9164_v42  ;;  %v1519_v36 = vadd.f32 %v1451_v39, %v1213_v3  ;;  %v1377_v32 = vadd.f32 %v8974_v21, %v12463_v28  ;;  %v1783_v35 = vadd.f32 %v1729_v13, %v1727_v2  ;;  %v12468_v3 = vld [vmem:[#allocation58_spill] sm:$0xff] }
 0x2f9   :  { %12453 = vst [vmem:[#allocation17_spill] sm:$0xff] %v9164_v42  ;;  %v9188_v1 = vpop.f32.mrf.mxu1  ;;  %v9211_v61 = vadd.f32 %v8946_v34, %v12466_v52  ;;  %v9215_v25 = vadd.f32 %v8951_v41, %v12467_v37  ;;  %v9218_v39 = vadd.f32 %v1260_v50, %v12468_v3  ;;  %v1816_v21 = vadd.f32 %v1730_v44, %v1728_v24  ;;  %v12469_v52 = vld [vmem:[#allocation89_spill] sm:$0xff]  ;;  %v12470_v2 = vld [vmem:[#allocation90_spill] sm:$0xff] }
 0x2fa   :  { %12456 = vst [vmem:[#allocation18_spill] sm:$0xff] %v9169_v22  ;;  %v1623_v28 = vadd.f32 %v1622_v29, %v9152_v7  ;;  %v1784_v60 = vadd.f32 %v1783_v35, %v1731_v4  ;;  %v1733_v53 = vmul.f32 %v9194_v55, %v9194_v55  ;;  %v1734_v34 = vmul.f32 %v9198_v31, %v9198_v31  ;;  %v12471_v4 = vld [vmem:[#allocation12_spill] sm:$0xff]  ;;  %v12472_v35 = vld [vmem:[#allocation93_spill] sm:$0xff] }
 0x2fb   :  { %12458 = vst [vmem:[#allocation25_spill] sm:$0xff] %v9172_v47  ;;  %v12464_v47 = vld [vmem:[#allocation9_spill] sm:$0xff]  ;;  %v1817_v41 = vadd.f32 %v1816_v21, %v1732_v12  ;;  %v9230_v13 = vadd.f32 %v1519_v36, %v12470_v2  ;;  %v1522_v50 = vadd.f32 %v1377_v32, %v9060_v62  ;;  %v1736_v44 = vmul.f32 %v9215_v25, %v9215_v25  ;;  %v1262_v12 = vpop.f32.mrf.mxu3  ;;  %v12475_v2 = vld [vmem:[#allocation95_spill] sm:$0xff]  ;;  %v12515_v7 = vld [vmem:[#allocation108_spill] sm:$0xff] }
 0x2fc   :  { %12460 = vst [vmem:[#allocation26_spill] sm:$0xff] %v9194_v55  ;;  %v1456_v22 = vadd.f32 %v8976_v27, %v12464_v47  ;;  %v1656_v27 = vadd.f32 %v1655_v30, %v9164_v42  ;;  %v9227_v47 = vadd.f32 %v1518_v20, %v12469_v52  ;;  %v1624_v29 = vadd.f32 %v1623_v28, %v9194_v55 }
 0x2fd   :  { %12462 = vst [vmem:[#allocation31_spill] sm:$0xff] %v9198_v31  ;;  %v1735_v30 = vmul.f32 %v9211_v61, %v9211_v61  ;;  %v1382_v33 = vadd.f32 %v8992_v5, %v12471_v4  ;;  %v9246_v62 = vadd.f32 %v8966_v43, %v12472_v35  ;;  %v1785_v21 = vadd.f32 %v1784_v60, %v1733_v53  ;;  %v12476_v4 = vld [vmem:[#allocation96_spill] sm:$0xff] }
 0x2fe   :  { %v1523_v24 = vadd.f32 %v1456_v22, %v9064_v23  ;;  %v1657_v36 = vadd.f32 %v1656_v27, %v9198_v31  ;;  %v12473_v23 = vld [vmem:[#allocation94_spill] sm:$0xff]  ;;  %v1818_v5 = vadd.f32 %v1817_v41, %v1734_v34  ;;  %v1625_v28 = vadd.f32 %v1624_v29, %v9211_v61 }
 0x2ff   :  { %v9250_v32 = vadd.f32 %v8969_v54, %v12473_v23  ;;  %v12474_v22 = vld [vmem:[#allocation14_spill] sm:$0xff]  ;;  %v1737_v27 = vmul.f32 %v9227_v47, %v9227_v47  ;;  %v1738_v43 = vmul.f32 %v9230_v13, %v9230_v13  ;;  %v9263_v54 = vadd.f32 %v1522_v50, %v12475_v2 }
 0x300   :  { %v9241_v20 = vpop.f32.mrf.mxu0  ;;  %v1461_v37 = vadd.f32 %v8994_v56, %v12474_v22  ;;  %v1658_v52 = vadd.f32 %v1657_v36, %v9215_v25  ;;  %v9266_v35 = vadd.f32 %v1523_v24, %v12476_v4  ;;  %v1786_v56 = vadd.f32 %v1785_v21, %v1735_v30  ;;  %v12477_v36 = vld [vmem:[#allocation19_spill] sm:$0xff]  ;;  %v1186_v22 = vpop.f32.mrf.mxu2 }
 0x301   :  { %v9254_v3 = vpop.f32.mrf.mxu1  ;;  %v1819_v23 = vadd.f32 %v1818_v5, %v1736_v44  ;;  %v1626_v60 = vadd.f32 %v1625_v28, %v9227_v47  ;;  %v1526_v53 = vadd.f32 %v1382_v33, %v9070_v8  ;;  %v1739_v34 = vmul.f32 %v9246_v62, %v9246_v62  ;;  %v12478_v44 = vld [vmem:[#allocation97_spill] sm:$0xff]  ;;  %v12480_v8 = vld [vmem:[#allocation20_spill] sm:$0xff]  ;;  %v12484_v4 = vld [vmem:[#allocation99_spill] sm:$0xff] }
 0x302   :  { %v1740_v41 = vmul.f32 %v9250_v32, %v9250_v32  ;;  %v1527_v29 = vadd.f32 %v1461_v37, %v9074_v9  ;;  %v1387_v50 = vadd.f32 %v9012_v26, %v12477_v36  ;;  %v1787_v24 = vadd.f32 %v1786_v56, %v1737_v27  ;;  %v12481_v37 = vld [vmem:[#allocation98_spill] sm:$0xff]  ;;  %v12483_v27 = vld [vmem:[#allocation61_spill] sm:$0xff]  ;;  %v12486_v36 = vld [vmem:[#allocation100_spill] sm:$0xff] }
 0x303   :  { %v1659_v30 = vadd.f32 %v1658_v52, %v9230_v13  ;;  %v9280_v21 = vadd.f32 %v8986_v57, %v12478_v44  ;;  %v1466_v33 = vadd.f32 %v9014_v51, %v12480_v8  ;;  %v1820_v5 = vadd.f32 %v1819_v23, %v1738_v43 }
 0x304   :  { %v1741_v28 = vmul.f32 %v9263_v54, %v9263_v54  ;;  %v1742_v9 = vmul.f32 %v9266_v35, %v9266_v35  ;;  %v9290_v26 = vadd.f32 %v8989_v49, %v12481_v37  ;;  %v9293_v52 = vadd.f32 %v1183_v40, %v12483_v27  ;;  %v1265_v37 = vpop.f32.mrf.mxu3 }
 0x305   :  { %12479 = vst [vmem:[#allocation32_spill] sm:$0xff] %v9280_v21  ;;  %v1627_v57 = vadd.f32 %v1626_v60, %v9246_v62  ;;  %v1660_v2 = vadd.f32 %v1659_v30, %v9250_v32  ;;  %v9298_v51 = vadd.f32 %v1526_v53, %v12484_v4  ;;  %v1788_v56 = vadd.f32 %v1787_v24, %v1739_v34  ;;  %v12490_v24 = vld [vmem:[#allocation102_spill] sm:$0xff] }
 0x306   :  { %12482 = vst [vmem:[#allocation35_spill] sm:$0xff] %v9290_v26  ;;  %v1821_v23 = vadd.f32 %v1820_v5, %v1740_v41  ;;  %v9303_v44 = vadd.f32 %v1527_v29, %v12486_v36  ;;  %v1530_v49 = vadd.f32 %v1387_v50, %v9078_v0  ;;  %v1743_v30 = vmul.f32 %v9280_v21, %v9280_v21  ;;  %v12488_v29 = vld [vmem:[#allocation101_spill] sm:$0xff] }
 0x307   :  { %12485 = vst [vmem:[#allocation36_spill] sm:$0xff] %v9298_v51  ;;  %v1628_v40 = vadd.f32 %v1627_v57, %v9263_v54  ;;  %v1661_v60 = vadd.f32 %v1660_v2, %v9266_v35  ;;  %v1531_v53 = vadd.f32 %v1466_v33, %v9082_v46  ;;  %v1789_v27 = vadd.f32 %v1788_v56, %v1741_v28  ;;  %v12492_v57 = vld [vmem:[#allocation27_spill] sm:$0xff]  ;;  %v12493_v2 = vld [vmem:[#allocation24_spill] sm:$0xff]  ;;  %v12494_v33 = vld [vmem:[#allocation29_spill] sm:$0xff] }
 0x308   :  { %v9300_v43 = vpop.f32.mrf.mxu0  ;;  %12487 = vst [vmem:[#allocation39_spill] sm:$0xff] %v9303_v44  ;;  %v1822_v34 = vadd.f32 %v1821_v23, %v1742_v9  ;;  %v1744_v41 = vmul.f32 %v9290_v26, %v9290_v26  ;;  %v9317_v0 = vadd.f32 %v9006_v6, %v12488_v29  ;;  %v1745_v50 = vmul.f32 %v9298_v51, %v9298_v51  ;;  %v12495_v28 = vld [vmem:[#allocation141_spill] sm:$0xff]  ;;  %v12496_v23 = vld [vmem:[#allocation103_spill] sm:$0xff]  ;;  %v12498_v29 = vld [vmem:[#allocation62_spill] sm:$0xff] }
 0x309   :  { %v9306_v8 = vpop.f32.mrf.mxu1  ;;  %v9323_v5 = vadd.f32 %v9009_v59, %v12490_v24  ;;  %v1392_v46 = vadd.f32 %v12493_v2, %v12492_v57  ;;  %v1471_v9 = vadd.f32 %v12495_v28, %v12494_v33  ;;  %v1629_v4 = vadd.f32 %v1628_v40, %v9280_v21  ;;  %v12499_v59 = vld [vmem:[#allocation64_spill] sm:$0xff] }
 0x30a   :  { %12489 = vst [vmem:[#allocation40_spill] sm:$0xff] %v9317_v0  ;;  %v1662_v56 = vadd.f32 %v1661_v60, %v9290_v26  ;;  %v1746_v6 = vmul.f32 %v9303_v44, %v9303_v44  ;;  %v9334_v36 = vadd.f32 %v1530_v49, %v12496_v23  ;;  %v9337_v31 = vadd.f32 %v1262_v12, %v12498_v29  ;;  %v12500_v2 = vld [vmem:[#allocation104_spill] sm:$0xff]  ;;  %v1188_v49 = vpop.f32.mrf.mxu2  ;;  %v12504_v29 = vld [vmem:[#allocation106_spill] sm:$0xff] }
 0x30b   :  { %12491 = vst [vmem:[#allocation71_spill] sm:$0xff] %v9323_v5  ;;  %v9340_v24 = vadd.f32 %v1186_v22, %v12499_v59  ;;  %v1790_v57 = vadd.f32 %v1789_v27, %v1743_v30  ;;  %v9343_v55 = vadd.f32 %v1531_v53, %v12500_v2  ;;  %v1823_v33 = vadd.f32 %v1822_v34, %v1744_v41  ;;  %v12502_v41 = vld [vmem:[#allocation105_spill] sm:$0xff]  ;;  %v12505_v59 = vld [vmem:[#allocation16_spill] sm:$0xff]  ;;  %v12509_v2 = vld [vmem:[#allocation38_spill] sm:$0xff] }
 0x30c   :  { %12497 = vst [vmem:[#allocation75_spill] sm:$0xff] %v9334_v36  ;;  %v1630_v40 = vadd.f32 %v1629_v4, %v9298_v51  ;;  %v1663_v60 = vadd.f32 %v1662_v56, %v9303_v44  ;;  %v1747_v28 = vmul.f32 %v9317_v0, %v9317_v0  ;;  %v1748_v12 = vmul.f32 %v9323_v5, %v9323_v5  ;;  %v12503_v4 = vld [vmem:[#allocation23_spill] sm:$0xff]  ;;  %v12511_v51 = vld [vmem:[#allocation66_spill] sm:$0xff] }
 0x30d   :  { %12501 = vst [vmem:[#allocation43_spill] sm:$0xff] %v9343_v55  ;;  %v1791_v23 = vadd.f32 %v1790_v57, %v1745_v50  ;;  %v1534_v22 = vadd.f32 %v1392_v46, %v9088_v10  ;;  %v1535_v30 = vadd.f32 %v1471_v9, %v9092_v45  ;;  %v1824_v53 = vadd.f32 %v1823_v33, %v1746_v6  ;;  %v12507_v46 = vld [vmem:[#allocation37_spill] sm:$0xff]  ;;  %v12508_v9 = vld [vmem:[#allocation22_spill] sm:$0xff] }
 0x30e   :  { %v1749_v34 = vmul.f32 %v9334_v36, %v9334_v36  ;;  %v9359_v56 = vadd.f32 %v12503_v4, %v12502_v41  ;;  %v9363_v50 = vadd.f32 %v12505_v59, %v12504_v29  ;;  %v1631_v10 = vadd.f32 %v1630_v40, %v9317_v0  ;;  %v12510_v33 = vld [vmem:[#allocation34_spill] sm:$0xff]  ;;  %v12512_v4 = vld [vmem:[#allocation67_spill] sm:$0xff] }
 0x30f   :  { %v1750_v45 = vmul.f32 %v9343_v55, %v9343_v55  ;;  %v1397_v6 = vadd.f32 %v12508_v9, %v12507_v46  ;;  %v1476_v44 = vadd.f32 %v12510_v33, %v12509_v2  ;;  %v9375_v41 = vadd.f32 %v1265_v37, %v12511_v51  ;;  %v12513_v0 = vld [vmem:[#allocation107_spill] sm:$0xff]  ;;  %v1267_v9 = vpop.f32.mrf.mxu3  ;;  %v12523_v33 = vld [vmem:[#allocation30_spill] sm:$0xff] }
 0x310   :  { %v9353_v27 = vpop.f32.mrf.mxu0  ;;  %12506 = vst [vmem:[#allocation44_spill] sm:$0xff] %v9363_v50  ;;  %v9378_v26 = vadd.f32 %v1188_v49, %v12512_v4  ;;  %v1792_v29 = vadd.f32 %v1791_v23, %v1747_v28  ;;  %v1664_v59 = vadd.f32 %v1663_v60, %v9323_v5  ;;  %v1825_v21 = vadd.f32 %v1824_v53, %v1748_v12  ;;  %v12517_v12 = vld [vmem:[#allocation109_spill] sm:$0xff]  ;;  %v12534_v5 = vld [vmem:[#allocation127_spill] sm:$0xff] }
 0x311   :  { %v9365_v57 = vpop.f32.mrf.mxu1  ;;  %v1632_v40 = vadd.f32 %v1631_v10, %v9334_v36  ;;  %v9383_v42 = vadd.f32 %v1534_v22, %v12513_v0  ;;  %v9386_v46 = vadd.f32 %v1535_v30, %v12515_v7  ;;  %v1751_v37 = vmul.f32 %v9359_v56, %v9359_v56  ;;  %v12518_v7 = vld [vmem:[#allocation21_spill] sm:$0xff]  ;;  %v12519_v30 = vld [vmem:[#allocation110_spill] sm:$0xff]  ;;  %v12533_v36 = vld [vmem:[#allocation52_spill] sm:$0xff] }
 0x312   :  { %v1793_v2 = vadd.f32 %v1792_v29, %v1749_v34  ;;  %v1665_v51 = vadd.f32 %v1664_v59, %v9343_v55  ;;  %v1752_v28 = vmul.f32 %v9363_v50, %v9363_v50  ;;  %v1826_v60 = vadd.f32 %v1825_v21, %v1750_v45  ;;  %v12520_v53 = vld [vmem:[#allocation33_spill] sm:$0xff]  ;;  %v12524_v29 = vld [vmem:[#allocation47_spill] sm:$0xff]  ;;  %v12525_v59 = vld [vmem:[#allocation42_spill] sm:$0xff] }
 0x313   :  { %12514 = vst [vmem:[#allocation72_spill] sm:$0xff] %v9383_v42  ;;  %v1633_v49 = vadd.f32 %v1632_v40, %v9359_v56  ;;  %v1538_v23 = vadd.f32 %v1397_v6, %v9096_v16  ;;  %v1539_v0 = vadd.f32 %v1476_v44, %v9100_v48  ;;  %v9398_v22 = vadd.f32 %v12518_v7, %v12517_v12  ;;  %v12522_v10 = vld [vmem:[#allocation45_spill] sm:$0xff]  ;;  %v12526_v45 = vld [vmem:[#allocation68_spill] sm:$0xff] }
 0x314   :  { %12516 = vst [vmem:[#allocation76_spill] sm:$0xff] %v9386_v46  ;;  %v9402_v34 = vadd.f32 %v12520_v53, %v12519_v30  ;;  %v1402_v4 = vadd.f32 %v12523_v33, %v12522_v10  ;;  %v1481_v21 = vadd.f32 %v12525_v59, %v12524_v29  ;;  %v9409_v40 = vadd.f32 %v1267_v9, %v12526_v45  ;;  %v12527_v53 = vld [vmem:[#allocation51_spill] sm:$0xff]  ;;  %v12528_v10 = vld [vmem:[#allocation2_spill] sm:$0xff]  ;;  %v12531_v45 = vld [vmem:[#allocation112_spill] sm:$0xff] }
 0x315   :  { %v1666_v16 = vadd.f32 %v1665_v51, %v9363_v50  ;;  %v1753_v48 = vmul.f32 %v9383_v42, %v9383_v42  ;;  %v1754_v44 = vmul.f32 %v9386_v46, %v9386_v46  ;;  %v1794_v12 = vadd.f32 %v1793_v2, %v1751_v37  ;;  %v12529_v51 = vld [vmem:[#allocation111_spill] sm:$0xff] }
 0x316   :  { %12521 = vst [vmem:[#allocation46_spill] sm:$0xff] %v9402_v34  ;;  %v1827_v7 = vadd.f32 %v1826_v60, %v1752_v28  ;;  %v1634_v30 = vadd.f32 %v1633_v49, %v9383_v42  ;;  %v1405_v33 = vadd.f32 %v12528_v10, %v12527_v53  ;;  %v9425_v59 = vadd.f32 %v1538_v23, %v12529_v51  ;;  %v12535_v23 = vld [vmem:[#allocation113_spill] sm:$0xff]  ;;  %v12536_v53 = vld [vmem:[#allocation28_spill] sm:$0xff]  ;;  %v12539_v42 = vld [vmem:[#allocation55_spill] sm:$0xff] }
 0x317   :  { %v1667_v9 = vadd.f32 %v1666_v16, %v9386_v46  ;;  %v9428_v55 = vadd.f32 %v1539_v0, %v12531_v45  ;;  %v1484_v50 = vadd.f32 %v12534_v5, %v12533_v36  ;;  %v1755_v2 = vmul.f32 %v9398_v22, %v9398_v22  ;;  %v12537_v0 = vld [vmem:[#allocation114_spill] sm:$0xff]  ;;  %v12538_v51 = vld [vmem:[#allocation41_spill] sm:$0xff] }
 0x318   :  { %v9416_v6 = vpop.f32.mrf.mxu0  ;;  %12530 = vst [vmem:[#allocation48_spill] sm:$0xff] %v9425_v59  ;;  %v1756_v37 = vmul.f32 %v9402_v34, %v9402_v34  ;;  %v1542_v28 = vadd.f32 %v1402_v4, %v9104_v38  ;;  %v1543_v60 = vadd.f32 %v1481_v21, %v9108_v14  ;;  %v1795_v49 = vadd.f32 %v1794_v12, %v1753_v48  ;;  %v12540_v48 = vld [vmem:[#allocation56_spill] sm:$0xff] }
 0x319   :  { %v9421_v29 = vpop.f32.mrf.mxu1  ;;  %12532 = vst [vmem:[#allocation79_spill] sm:$0xff] %v9428_v55  ;;  %v1828_v16 = vadd.f32 %v1827_v7, %v1754_v44  ;;  %v9440_v10 = vadd.f32 %v12536_v53, %v12535_v23  ;;  %v9444_v45 = vadd.f32 %v12538_v51, %v12537_v0  ;;  %v1635_v5 = vadd.f32 %v1634_v30, %v9398_v22  ;;  %v12541_v30 = vld [vmem:[#allocation115_spill] sm:$0xff] }
 0x31a   :  { %v1668_v36 = vadd.f32 %v1667_v9, %v9402_v34  ;;  %v1544_v46 = vadd.f32 %v1405_v33, %v9111_v15  ;;  %v1407_v38 = vadd.f32 %v9178_v18, %v12539_v42  ;;  %v1757_v14 = vmul.f32 %v9425_v59, %v9425_v59  ;;  %v12542_v15 = vld [vmem:[#allocation116_spill] sm:$0xff]  ;;  %v12543_v23 = vld [vmem:[#allocation59_spill] sm:$0xff] }
 0x31b   :  { %v1758_v4 = vmul.f32 %v9428_v55, %v9428_v55  ;;  %v1545_v21 = vadd.f32 %v1484_v50, %v9114_v19  ;;  %v1486_v44 = vadd.f32 %v9188_v1, %v12540_v48  ;;  %v1796_v12 = vadd.f32 %v1795_v49, %v1755_v2  ;;  %v12544_v50 = vld [vmem:[#allocation60_spill] sm:$0xff]  ;;  %v12545_v49 = vld [vmem:[#allocation117_spill] sm:$0xff]  ;;  %v12546_v48 = vld [vmem:[#allocation118_spill] sm:$0xff] }
 0x31c   :  { %v1829_v7 = vadd.f32 %v1828_v16, %v1756_v37  ;;  %v9459_v9 = vadd.f32 %v1542_v28, %v12541_v30  ;;  %v9462_v33 = vadd.f32 %v1543_v60, %v12542_v15  ;;  %v1759_v42 = vmul.f32 %v9440_v10, %v9440_v10 }
 0x31d   :  { %v1760_v18 = vmul.f32 %v9444_v45, %v9444_v45  ;;  %v1410_v19 = vadd.f32 %v9241_v20, %v12543_v23  ;;  %v1489_v1 = vadd.f32 %v9254_v3, %v12544_v50  ;;  %v1636_v37 = vadd.f32 %v1635_v5, %v9425_v59  ;;  %v12569_v59 = vld [vmem:[#allocation83_spill] sm:$0xff] }
 0x31e   :  { %v1669_v28 = vadd.f32 %v1668_v36, %v9428_v55  ;;  %v9475_v60 = vadd.f32 %v1544_v46, %v12545_v49  ;;  %v1546_v16 = vadd.f32 %v1407_v38, %v9117_v63  ;;  %v1797_v0 = vadd.f32 %v1796_v12, %v1757_v14  ;;  %v12547_v14 = vld [vmem:[#allocation6_spill] sm:$0xff] }
 0x31f   :  { %v1830_v51 = vadd.f32 %v1829_v7, %v1758_v4  ;;  %v9479_v30 = vadd.f32 %v1545_v21, %v12546_v48  ;;  %v1547_v20 = vadd.f32 %v1486_v44, %v9120_v11  ;;  %v1637_v3 = vadd.f32 %v1636_v37, %v9440_v10  ;;  %v12548_v44 = vld [vmem:[#allocation119_spill] sm:$0xff] }
 0x320   :  { %v1419_v2 = vpop.f32.mrf.mxu0  ;;  %v1670_v15 = vadd.f32 %v1669_v28, %v9444_v45  ;;  %v1761_v5 = vmul.f32 %v9459_v9, %v9459_v9  ;;  %v1762_v46 = vmul.f32 %v9462_v33, %v9462_v33  ;;  %v1798_v36 = vadd.f32 %v1797_v0, %v1759_v42  ;;  %v12549_v7 = vld [vmem:[#allocation63_spill] sm:$0xff] }
 0x321   :  { %v1498_v53 = vpop.f32.mrf.mxu1  ;;  %v1831_v63 = vadd.f32 %v1830_v51, %v1760_v18  ;;  %v1548_v38 = vadd.f32 %v1410_v19, %v9131_v17  ;;  %v1549_v4 = vadd.f32 %v1489_v1, %v12547_v14  ;;  %v1638_v21 = vadd.f32 %v1637_v3, %v9459_v9  ;;  %v12550_v18 = vld [vmem:[#allocation120_spill] sm:$0xff]  ;;  %v12551_v19 = vld [vmem:[#allocation65_spill] sm:$0xff]  ;;  %v12554_v3 = vld [vmem:[#allocation122_spill] sm:$0xff] }
 0x322   :  { %v1763_v11 = vmul.f32 %v9475_v60, %v9475_v60  ;;  %v9494_v12 = vadd.f32 %v1546_v16, %v12548_v44  ;;  %v1412_v23 = vadd.f32 %v9300_v43, %v12549_v7  ;;  %v1671_v50 = vadd.f32 %v1670_v15, %v9462_v33  ;;  %v12552_v16 = vld [vmem:[#allocation69_spill] sm:$0xff] }
 0x323   :  { %v1764_v42 = vmul.f32 %v9479_v30, %v9479_v30  ;;  %v9502_v17 = vadd.f32 %v1547_v20, %v12550_v18  ;;  %v1491_v1 = vadd.f32 %v9306_v8, %v12551_v19  ;;  %v1799_v37 = vadd.f32 %v1798_v36, %v1761_v5  ;;  %v12553_v51 = vld [vmem:[#allocation121_spill] sm:$0xff]  ;;  %v12555_v20 = vld [vmem:[#allocation70_spill] sm:$0xff] }
 0x324   :  { %v1832_v28 = vadd.f32 %v1831_v63, %v1762_v46  ;;  %v1639_v49 = vadd.f32 %v1638_v21, %v9475_v60  ;;  %v1415_v0 = vadd.f32 %v9353_v27, %v12552_v16  ;;  %v1672_v43 = vadd.f32 %v1671_v50, %v9479_v30  ;;  %v12556_v46 = vld [vmem:[#allocation136_spill] sm:$0xff]  ;;  %v12557_v63 = vld [vmem:[#allocation73_spill] sm:$0xff]  ;;  %v12559_v18 = vld [vmem:[#allocation74_spill] sm:$0xff] }
 0x325   :  { %v9511_v48 = vadd.f32 %v1548_v38, %v12553_v51  ;;  %v9514_v15 = vadd.f32 %v1549_v4, %v12554_v3  ;;  %v1494_v14 = vadd.f32 %v9365_v57, %v12555_v20  ;;  %v1800_v8 = vadd.f32 %v1799_v37, %v1763_v11  ;;  %v12558_v4 = vld [vmem:[#allocation10_spill] sm:$0xff]  ;;  %v12560_v37 = vld [vmem:[#allocation13_spill] sm:$0xff] }
 0x326   :  { %v1765_v5 = vmul.f32 %v9494_v12, %v9494_v12  ;;  %v1550_v36 = vadd.f32 %v1412_v23, %v12556_v46  ;;  %v1417_v27 = vadd.f32 %v9416_v6, %v12557_v63  ;;  %v1833_v7 = vadd.f32 %v1832_v28, %v1764_v42  ;;  %v12561_v23 = vld [vmem:[#allocation77_spill] sm:$0xff]  ;;  %v12562_v28 = vld [vmem:[#allocation15_spill] sm:$0xff] }
 0x327   :  { %v1766_v38 = vmul.f32 %v9502_v17, %v9502_v17  ;;  %v1551_v50 = vadd.f32 %v1491_v1, %v12558_v4  ;;  %v1496_v57 = vadd.f32 %v9421_v29, %v12559_v18  ;;  %v1640_v11 = vadd.f32 %v1639_v49, %v9494_v12  ;;  %v12563_v1 = vld [vmem:[#allocation78_spill] sm:$0xff]  ;;  %v12564_v29 = vld [vmem:[#allocation123_spill] sm:$0xff]  ;;  %v12566_v4 = vld [vmem:[#allocation81_spill] sm:$0xff] }
 0x328   :  { %v1421_v44 = vpop.f32.mrf.mxu0  ;;  %v1673_v19 = vadd.f32 %v1672_v43, %v9502_v17  ;;  %v1552_v16 = vadd.f32 %v1415_v0, %v12560_v37  ;;  %v1420_v51 = vadd.f32 %v1419_v2, %v12561_v23  ;;  %v1767_v6 = vmul.f32 %v9511_v48, %v9511_v48  ;;  %v12565_v49 = vld [vmem:[#allocation18_spill] sm:$0xff]  ;;  %v12567_v2 = vld [vmem:[#allocation124_spill] sm:$0xff]  ;;  %v12568_v23 = vld [vmem:[#allocation25_spill] sm:$0xff] }
 0x329   :  { %v1500_v21 = vpop.f32.mrf.mxu1  ;;  %v1768_v42 = vmul.f32 %v9514_v15, %v9514_v15  ;;  %v1553_v3 = vadd.f32 %v1494_v14, %v12562_v28  ;;  %v1499_v20 = vadd.f32 %v1498_v53, %v12563_v1  ;;  %v1801_v46 = vadd.f32 %v1800_v8, %v1765_v5  ;;  %v12570_v8 = vld [vmem:[#allocation125_spill] sm:$0xff] }
 0x32a   :  { %v9539_v63 = vadd.f32 %v1550_v36, %v12564_v29  ;;  %v1554_v43 = vadd.f32 %v1417_v27, %v12565_v49  ;;  %v1422_v0 = vadd.f32 %v1421_v44, %v12566_v4  ;;  %v1834_v18 = vadd.f32 %v1833_v7, %v1766_v38  ;;  %v12571_v44 = vld [vmem:[#allocation126_spill] sm:$0xff]  ;;  %v12576_v29 = vld [vmem:[#allocation131_spill] sm:$0xff]  ;;  %v12577_v4 = vld [vmem:[#allocation132_spill] sm:$0xff] }
 0x32b   :  { %v9544_v37 = vadd.f32 %v1551_v50, %v12567_v2  ;;  %v1555_v55 = vadd.f32 %v1496_v57, %v12568_v23  ;;  %v1501_v34 = vadd.f32 %v1500_v21, %v12569_v59  ;;  %v1641_v14 = vadd.f32 %v1640_v11, %v9511_v48  ;;  %v12572_v21 = vld [vmem:[#allocation128_spill] sm:$0xff]  ;;  %v12578_v23 = vld [vmem:[#allocation134_spill] sm:$0xff] }
 0x32c   :  { %v1674_v53 = vadd.f32 %v1673_v19, %v9514_v15  ;;  %v9551_v5 = vadd.f32 %v1552_v16, %v12570_v8  ;;  %v1556_v36 = vadd.f32 %v1420_v51, %v9207_v58  ;;  %v1802_v27 = vadd.f32 %v1801_v46, %v1767_v6  ;;  %v12573_v19 = vld [vmem:[#allocation87_spill] sm:$0xff]  ;;  %v12574_v51 = vld [vmem:[#allocation130_spill] sm:$0xff] }
 0x32d   :  { %v1835_v28 = vadd.f32 %v1834_v18, %v1768_v42  ;;  %v9555_v7 = vadd.f32 %v1553_v3, %v12571_v44  ;;  %v1557_v38 = vadd.f32 %v1499_v20, %v9218_v39  ;;  %v1769_v59 = vmul.f32 %v9539_v63, %v9539_v63  ;;  %v12575_v42 = vld [vmem:[#allocation88_spill] sm:$0xff] }
 0x32e   :  { %v9561_v57 = vadd.f32 %v1554_v43, %v12572_v21  ;;  %v1558_v11 = vadd.f32 %v1422_v0, %v9293_v52  ;;  %v1770_v58 = vmul.f32 %v9544_v37, %v9544_v37  ;;  %v9568_v6 = vadd.f32 %v1555_v55, %v12574_v51 }
 0x32f   :  { %v1559_v39 = vadd.f32 %v1501_v34, %v9337_v31  ;;  %v1642_v20 = vadd.f32 %v1641_v14, %v9539_v63  ;;  %v1771_v46 = vmul.f32 %v9551_v5, %v9551_v5  ;;  %v9576_v52 = vadd.f32 %v1556_v36, %v12576_v29  ;;  %v12579_v36 = vld [vmem:[#allocation135_spill] sm:$0xff] }
 0x330   :  { %v1424_v50 = vpop.f32.mrf.mxu0  ;;  %v1675_v43 = vadd.f32 %v1674_v53, %v9544_v37  ;;  %v1772_v55 = vmul.f32 %v9555_v7, %v9555_v7  ;;  %v9583_v0 = vadd.f32 %v1557_v38, %v12577_v4  ;;  %v1803_v34 = vadd.f32 %v1802_v27, %v1769_v59 }
 0x331   :  { %v1425_v16 = vadd.f32 %v1424_v50, %v12573_v19  ;;  %v1503_v1 = vpop.f32.mrf.mxu1  ;;  %v1643_v18 = vadd.f32 %v1642_v20, %v9551_v5  ;;  %v1773_v2 = vmul.f32 %v9561_v57, %v9561_v57  ;;  %v9590_v14 = vadd.f32 %v1558_v11, %v12578_v23  ;;  %v12580_v50 = vld [vmem:[#allocation137_spill] sm:$0xff]  ;;  %v12582_v19 = vld [vmem:[#allocation138_spill] sm:$0xff] }
 0x332   :  { %v1504_v3 = vadd.f32 %v1503_v1, %v12575_v42  ;;  %v1676_v53 = vadd.f32 %v1675_v43, %v9555_v7  ;;  %v1774_v8 = vmul.f32 %v9568_v6, %v9568_v6  ;;  %v9596_v44 = vadd.f32 %v1559_v39, %v12579_v36  ;;  %v12584_v42 = vld [vmem:[#allocation91_spill] sm:$0xff]  ;;  %v12585_v43 = vld [vmem:[#allocation92_spill] sm:$0xff] }
 0x333   :  { %v1560_v49 = vadd.f32 %v1425_v16, %v9340_v24  ;;  %v1836_v24 = vadd.f32 %v1835_v28, %v1770_v58  ;;  %v1804_v38 = vadd.f32 %v1803_v34, %v1771_v46  ;;  %v1775_v27 = vmul.f32 %v9576_v52, %v9576_v52  ;;  %v12586_v36 = vld [vmem:[#allocation139_spill] sm:$0xff] }
 0x334   :  { %v1561_v31 = vadd.f32 %v1504_v3, %v9375_v41  ;;  %v1644_v41 = vadd.f32 %v1643_v18, %v9561_v57  ;;  %v1677_v28 = vadd.f32 %v1676_v53, %v9568_v6  ;;  %v1776_v11 = vmul.f32 %v9583_v0, %v9583_v0 }
 0x335   :  { %v9602_v59 = vadd.f32 %v1560_v49, %v12580_v50  ;;  %v1837_v21 = vadd.f32 %v1836_v24, %v1772_v55  ;;  %v1805_v58 = vadd.f32 %v1804_v38, %v1773_v2  ;;  %v1777_v39 = vmul.f32 %v9590_v14, %v9590_v14 }
 0x336   :  { %v9608_v16 = vadd.f32 %v1561_v31, %v12582_v19  ;;  %v1645_v51 = vadd.f32 %v1644_v41, %v9576_v52  ;;  %v1678_v29 = vadd.f32 %v1677_v28, %v9583_v0  ;;  %v1778_v49 = vmul.f32 %v9596_v44, %v9596_v44 }
 0x337   :  { %12581 = vst [vmem:[#allocation4_spill] sm:$0xff] %v9602_v59  ;;  %v1838_v46 = vadd.f32 %v1837_v21, %v1774_v8  ;;  %v1806_v4 = vadd.f32 %v1805_v58, %v1775_v27  ;;  %v1779_v34 = vmul.f32 %v9602_v59, %v9602_v59  ;;  %v12588_v21 = vld [vmem:[#allocation140_spill] sm:$0xff] }
 0x338   :  { %12583 = vst [vmem:[#allocation49_spill] sm:$0xff] %v9608_v16  ;;  %v1426_v1 = vpop.f32.mrf.mxu0  ;;  %v1646_v31 = vadd.f32 %v1645_v51, %v9590_v14  ;;  %v1679_v23 = vadd.f32 %v1678_v29, %v9596_v44  ;;  %v1780_v24 = vmul.f32 %v9608_v16, %v9608_v16 }
 0x339   :  { %v1427_v3 = vadd.f32 %v1426_v1, %v12584_v42  ;;  %v1505_v20 = vpop.f32.mrf.mxu1  ;;  %v1839_v2 = vadd.f32 %v1838_v46, %v1776_v11  ;;  %v1807_v41 = vadd.f32 %v1806_v4, %v1777_v39 }
 0x33a   :  { %v1506_v55 = vadd.f32 %v1505_v20, %v12585_v43  ;;  %v1647_v8 = vadd.f32 %v1646_v31, %v9602_v59  ;;  %v1680_v50 = vadd.f32 %v1679_v23, %v9608_v16 }
 0x33b   :  { %v1562_v18 = vadd.f32 %v1427_v3, %v9378_v26  ;;  %v1840_v27 = vadd.f32 %v1839_v2, %v1778_v49  ;;  %v1808_v19 = vadd.f32 %v1807_v41, %v1779_v34 }
 0x33c   :  { %v1563_v53 = vadd.f32 %v1506_v55, %v9409_v40 }
 0x33d   :  { %v9628_v38 = vadd.f32 %v1562_v18, %v12586_v36  ;;  %v1841_v1 = vadd.f32 %v1840_v27, %v1780_v24 }
 0x33e   :  { %v9632_v28 = vadd.f32 %v1563_v53, %v12588_v21 }
 0x33f   :  { %12587 = vst [vmem:[#allocation50_spill] sm:$0xff] %v9628_v38  ;;  %v1648_v26 = vadd.f32 %v1647_v8, %v9628_v38  ;;  %v1781_v11 = vmul.f32 %v9628_v38, %v9628_v38 }
 0x340   :  { %12589 = vst [vmem:[#allocation80_spill] sm:$0xff] %v9632_v28  ;;  %v1782_v40 = vmul.f32 %v9632_v28, %v9632_v28  ;;  %v1681_v58 = vadd.f32 %v1680_v50, %v9632_v28 }
 0x341   :  { %v1649_v51 = vrot.slane %v1648_v26, 4  ;;  %v1809_v39 = vadd.f32 %v1808_v19, %v1781_v11  ;;  %v12237_v19 = vlaneseq }
 0x342   :  { %v1682_v42 = vrot.slane %v1681_v58, 4  ;;  %v1842_v3 = vadd.f32 %v1841_v1, %v1782_v40 }
 0x343   :  { %v1650_v20 = vadd.f32 %v1649_v51, %v1648_v26  ;;  %v1810_v46 = vrot.slane %v1809_v39, 4 }
 0x344   :  { %v1683_v29 = vadd.f32 %v1682_v42, %v1681_v58  ;;  %v1843_v49 = vrot.slane %v1842_v3, 4  ;;  %v9641_v58 = vand.u32 127, %v12237_v19 }
 0x345   :  { %v1651_v43 = vrot.slane %v1650_v20, 2  ;;  %v1811_v55 = vadd.f32 %v1810_v46, %v1809_v39 }
 0x346   :  { %v1844_v4 = vadd.f32 %v1843_v49, %v1842_v3  ;;  %v1684_v34 = vrot.slane %v1683_v29, 2  ;;  %12590 = vst [vmem:[#allocation5_spill] sm:$0xff] %v9641_v58  ;;  %vm1694_vm0 = vcmp.lt.s32.totalorder %v9641_v58, 8  ;;  %vm1703_vm1 = vcmp.lt.s32.totalorder %v9641_v58, 16 }
 0x347   :  { %v1652_v31 = vadd.f32 %v1651_v43, %v1650_v20  ;;  %v1812_v18 = vrot.slane %v1811_v55, 2  ;;  %vm1712_vm2 = vcmp.lt.s32.totalorder %v9641_v58, 32  ;;  %vm1721_vm3 = vcmp.lt.s32.totalorder %v9641_v58, 64 }
 0x348   :  { %v1845_v24 = vrot.slane %v1844_v4, 2  ;;  %v1685_v36 = vadd.f32 %v1684_v34, %v1683_v29 }
 0x349   :  { %v1653_v2 = vrot.slane %v1652_v31, 1  ;;  %v1813_v23 = vadd.f32 %v1812_v18, %v1811_v55 }
 0x34a   :  { %v1846_v27 = vadd.f32 %v1845_v24, %v1844_v4  ;;  %v1686_v50 = vrot.slane %v1685_v36, 1 }
 0x34b   :  { %v1654_v53 = vadd.f32 %v1653_v2, %v1652_v31  ;;  %v1814_v8 = vrot.slane %v1813_v23, 1 }
 0x34c   :  { %v1847_v21 = vrot.slane %v1846_v27, 1  ;;  %v1687_v26 = vadd.f32 %v1686_v50, %v1685_v36  ;;  %v6102_v50 = vld [vmem:[%s12203_s4 + $0x170] sm:$0xf] }
 0x34d   :  { %1688 = vrot.lane.b32.xlu0 %v1654_v53, %s7736_s0  ;;  %v1815_v41 = vadd.f32 %v1814_v8, %v1813_v23 }
 0x34e   :  { %v1848_v11 = vadd.f32 %v1847_v21, %v1846_v27  ;;  %v7419_v21 = vld [vmem:[%s12203_s4 + $0x174] sm:$0xf0] }
 0x34f   :  { %1849 = vrot.lane.b32.xlu1 %v1815_v41, %s7736_s0 }
 0x355   :  { %1690 = vrot.lane.b32.xlu0 %v1687_v26, %s7736_s0 }
 0x357   :  { %1851 = vrot.lane.b32.xlu1 %v1848_v11, %s7736_s0 }
 0x3bf   :  { %v1689_v1 = vpop.permute.xlu0 %1688 }
 0x3c1   :  { %v1850_v40 = vpop.permute.xlu1 %1849 }
 0x3c7   :  { %v1691_v51 = vpop.permute.xlu0 %1690 }
 0x3c8   :  { %v1696_v39 = vsel %vm1694_vm0, %v1691_v51, %v1689_v1  ;;  %v1695_v43 = vsel %vm1694_vm0, %v1689_v1, %v1691_v51  ;;  %v7435_v1 = vld [vmem:[%s12203_s4 + $0x1f4] sm:$0xf0] }
 0x3c9   :  { %v1852_v42 = vpop.permute.xlu1 %1851  ;;  %v1697_v3 = vadd.f32 %v1696_v39, %v1654_v53  ;;  %v1698_v55 = vadd.f32 %v1695_v43, %v1687_v26  ;;  %v6166_v26 = vld [vmem:[%s12203_s4 + $0x1f0] sm:$0xf] }
 0x3ca   :  { %v1853_v20 = vsel %vm1694_vm0, %v1850_v40, %v1852_v42  ;;  %v1854_v46 = vsel %vm1694_vm0, %v1852_v42, %v1850_v40  ;;  %v6167_v40 = vor.u32 %v7435_v1, %v6166_v26 }
 0x3cb   :  { %v1855_v29 = vadd.f32 %v1854_v46, %v1815_v41  ;;  %v1856_v49 = vadd.f32 %v1853_v20, %v1848_v11  ;;  %1699 = vrot.lane.b32.xlu2 %v1697_v3, %s7737_s17  ;;  %v6103_v11 = vor.u32 %v7419_v21, %v6102_v50 }
 0x3cc   :  { %2864 = vmatpush.bf16.msra.mxu3 %v6167_v40 }
 0x3cd   :  { %1859 = vrot.lane.b32.xlu1 %v1856_v49, %s7737_s17  ;;  %1857 = vrot.lane.b32.xlu0 %v1855_v29, %s7737_s17 }
 0x3ce   :  { %2830 = vmatpush.bf16.msra.mxu2 %v6103_v11 }
 0x3d3   :  { %1701 = vrot.lane.b32.xlu2 %v1698_v55, %s7737_s17 }
 0x425   :  { %v1700_v4 = vpop.permute.xlu2 %1699 }
 0x42d   :  { %v1702_v31 = vpop.permute.xlu2 %1701 }
 0x42e   :  { %v1704_v18 = vsel %vm1703_vm1, %v1700_v4, %v1702_v31  ;;  %v1705_v34 = vsel %vm1703_vm1, %v1702_v31, %v1700_v4 }
 0x42f   :  { %v1706_v2 = vadd.f32 %v1705_v34, %v1697_v3  ;;  %v1707_v23 = vadd.f32 %v1704_v18, %v1698_v55  ;;  %v6094_v18 = vld [vmem:[%s12203_s4 + $0x160] sm:$0xf]  ;;  %v7417_v34 = vld [vmem:[%s12203_s4 + $0x164] sm:$0xf0] }
 0x431   :  { %1708 = vrot.lane.b32.xlu2 %v1706_v2, %s7738_s18  ;;  %1710 = vrot.lane.b32.xlu0 %v1707_v23, %s7738_s18 }
 0x43f   :  { %v1860_v24 = vpop.permute.xlu1 %1859  ;;  %v1858_v53 = vpop.permute.xlu0 %1857 }
 0x440   :  { %v1861_v8 = vsel %vm1703_vm1, %v1858_v53, %v1860_v24  ;;  %v1862_v36 = vsel %vm1703_vm1, %v1860_v24, %v1858_v53  ;;  %v7433_v24 = vld [vmem:[%s12203_s4 + $0x1e4] sm:$0xf0] }
 0x441   :  { %v1863_v41 = vadd.f32 %v1862_v36, %v1855_v29  ;;  %v1864_v27 = vadd.f32 %v1861_v8, %v1856_v49 }
 0x443   :  { %1865 = vrot.lane.b32.xlu1 %v1863_v41, %s7738_s18  ;;  %1867 = vrot.lane.b32.xlu2 %v1864_v27, %s7738_s18 }
 0x48b   :  { %v1709_v51 = vpop.permute.xlu2 %1708 }
 0x49d   :  { %v1868_v29 = vpop.permute.xlu2 %1867 }
 0x4a3   :  { %v1711_v39 = vpop.permute.xlu0 %1710 }
 0x4a4   :  { %v1713_v42 = vsel %vm1712_vm2, %v1709_v51, %v1711_v39  ;;  %v1714_v3 = vsel %vm1712_vm2, %v1711_v39, %v1709_v51 }
 0x4a5   :  { %v1715_v20 = vadd.f32 %v1714_v3, %v1706_v2  ;;  %v1716_v46 = vadd.f32 %v1713_v42, %v1707_v23  ;;  %v6158_v2 = vld [vmem:[%s12203_s4 + $0x1e0] sm:$0xf]  ;;  %v6095_v23 = vor.u32 %v7417_v34, %v6094_v18 }
 0x4a6   :  { %v6159_v53 = vor.u32 %v7433_v24, %v6158_v2  ;;  %v7431_v2 = vld [vmem:[%s12203_s4 + $0x1d4] sm:$0xf0]  ;;  %v7413_v24 = vld [vmem:[%s12203_s4 + $0x144] sm:$0xf0] }
 0x4a7   :  { %1717 = vrot.lane.b32.xlu0 %v1715_v20, %s7739_s27  ;;  %1719 = vrot.lane.b32.xlu1 %v1716_v46, %s7739_s27 }
 0x4a8   :  { %2831 = vmatpush.bf16.msra.mxu2 %v6095_v23  ;;  %2865 = vmatpush.bf16.msra.mxu3 %v6159_v53  ;;  %v6078_v23 = vld [vmem:[%s12203_s4 + $0x140] sm:$0xf] }
 0x4b5   :  { %v1866_v49 = vpop.permute.xlu1 %1865 }
 0x4b6   :  { %v1869_v43 = vsel %vm1712_vm2, %v1866_v49, %v1868_v29  ;;  %v1870_v55 = vsel %vm1712_vm2, %v1868_v29, %v1866_v49 }
 0x4b7   :  { %v1871_v4 = vadd.f32 %v1870_v55, %v1863_v41  ;;  %v1872_v31 = vadd.f32 %v1869_v43, %v1864_v27 }
 0x4b9   :  { %1873 = vrot.lane.b32.xlu2 %v1871_v4, %s7739_s27  ;;  %1875 = vrot.lane.b32.xlu0 %v1872_v31, %s7739_s27 }
 0x513   :  { %v1874_v11 = vpop.permute.xlu2 %1873 }
 0x519   :  { %v1718_v8 = vpop.permute.xlu0 %1717  ;;  %v1720_v36 = vpop.permute.xlu1 %1719 }
 0x51a   :  { %v1722_v41 = vsel %vm1721_vm3, %v1718_v8, %v1720_v36  ;;  %v1723_v27 = vsel %vm1721_vm3, %v1720_v36, %v1718_v8  ;;  %v6142_v8 = vld [vmem:[%s12203_s4 + $0x1c0] sm:$0xf]  ;;  %v7429_v36 = vld [vmem:[%s12203_s4 + $0x1c4] sm:$0xf0] }
 0x51b   :  { %v1724_v50 = vadd.f32 %v1723_v27, %v1715_v20  ;;  %v1725_v21 = vadd.f32 %v1722_v41, %v1716_v46  ;;  %v6086_v20 = vld [vmem:[%s12203_s4 + $0x150] sm:$0xf]  ;;  %v7415_v46 = vld [vmem:[%s12203_s4 + $0x154] sm:$0xf0]  ;;  %v6079_v41 = vor.u32 %v7413_v24, %v6078_v23  ;;  %v6143_v27 = vor.u32 %v7429_v36, %v6142_v8  ;;  %v12591_v36 = vld [vmem:[#allocation11_spill] sm:$0xff] }
 0x51d   :  { %v1726_v26 = vadd.f32 %v1725_v21, %v1724_v50 }
 0x51f   :  { %v1882_v39 = vmul.f32 0.0006377551, %v1726_v26 }
 0x521   :  { %v1884_v43 = vmul.f32 %v1882_v39, %v1882_v39 }
 0x52b   :  { %v1876_v1 = vpop.permute.xlu0 %1875 }
 0x52c   :  { %v1877_v40 = vsel %vm1721_vm3, %v1874_v11, %v1876_v1  ;;  %v1878_v51 = vsel %vm1721_vm3, %v1876_v1, %v1874_v11 }
 0x52d   :  { %v1879_v42 = vadd.f32 %v1878_v51, %v1871_v4  ;;  %v1880_v3 = vadd.f32 %v1877_v40, %v1872_v31  ;;  %v6150_v4 = vld [vmem:[%s12203_s4 + $0x1d0] sm:$0xf]  ;;  %v6087_v31 = vor.u32 %v7415_v46, %v6086_v20 }
 0x52e   :  { %v6151_v53 = vor.u32 %v7431_v2, %v6150_v4 }
 0x52f   :  { %v1881_v29 = vadd.f32 %v1880_v3, %v1879_v42  ;;  %2832 = vmatpush.bf16.msra.mxu2 %v6087_v31  ;;  %v1620_v42 = vld [vmem:[%s12204_s2] sm:$0x3] }
 0x530   :  { %2866 = vmatpush.bf16.msra.mxu3 %v6151_v53 }
 0x531   :  { %v1883_v49 = vmul.f32 0.0006377551, %v1881_v29 }
 0x533   :  { %v1885_v55 = vsub.f32 %v1883_v49, %v1884_v43  ;;  %2833 = vmatpush.bf16.msra.mxu2 %v6079_v41  ;;  %v12592_v41 = vld [vmem:[#allocation17_spill] sm:$0xff] }
 0x534   :  { %2867 = vmatpush.bf16.msra.mxu3 %v6143_v27  ;;  %v12593_v27 = vld [vmem:[#allocation26_spill] sm:$0xff] }
 0x535   :  { %v1886_v18 = vmax.f32 %v1885_v55, 0.0 }
 0x537   :  { %v1887_v34 = vadd.f32 1e-05, %v1886_v18  ;;  %v6070_v18 = vld [vmem:[%s12203_s4 + $0x130] sm:$0xf] }
 0x539   :  { %7732 = vrsqrt.f32 %v1887_v34  ;;  %vm1894_vm5 = vweird.f32 %v1887_v34 }
 0x53f   :  { %v7733_v50 = vpop.eup %7732 }
 0x540   :  { %v1889_v21 = vmul.f32 %v7733_v50, %v1887_v34  ;;  %vm1895_vm4 = vweird.f32 %v7733_v50  ;;  %v7411_v34 = vld [vmem:[%s12203_s4 + $0x134] sm:$0xf0] }
 0x541   :  { %vm1896_vm6 = vmor %vm1894_vm5, %vm1895_vm4  ;;  %v6071_v20 = vor.u32 %v7411_v34, %v6070_v18  ;;  %v12599_v18 = vld [vmem:[#allocation71_spill] sm:$0xff] }
 0x542   :  { %v1890_v26 = vmul.f32 %v7733_v50, %v1889_v21 }
 0x543   :  { %2834 = vmatpush.bf16.msra.mxu2 %v6071_v20  ;;  %v12600_v20 = vld [vmem:[#allocation75_spill] sm:$0xff] }
 0x544   :  { %v1891_v11 = vmul.f32 0.5, %v1890_v26 }
 0x546   :  { %v1892_v1 = vsub.f32 1.5, %v1891_v11  ;;  %v12595_v11 = vld [vmem:[#allocation44_spill] sm:$0xff] }
 0x548   :  { %v1893_v40 = vmul.f32 %v7733_v50, %v1892_v1  ;;  %v12596_v1 = vld [vmem:[#allocation72_spill] sm:$0xff] }
 0x54a   :  { %v1897_v51 = vsel %vm1896_vm6, %v7733_v50, %v1893_v40  ;;  %v12594_v50 = vld [vmem:[#allocation31_spill] sm:$0xff] }
 0x54b   :  { %v1899_v3 = vrot.slane %v1897_v51, 7 }
 0x54d   :  { %v1901_v29 = vsel %vm1900_vm7, %v1897_v51, %v1899_v3  ;;  %v12597_v51 = vld [vmem:[#allocation76_spill] sm:$0xff] }
 0x54e   :  { %v1903_v49 = vmul.f32 %v1901_v29, %v1620_v42  ;;  %v12598_v29 = vld [vmem:[#allocation40_spill] sm:$0xff] }
 0x550   :  { %v9735_v43 = vperm.slane %v1903_v49, 0  ;;  %v9737_v55 = vperm.slane %v1903_v49, 1 }
 0x552   :  { %v1909_v46 = vmul.f32 %v9735_v43, %v1882_v39  ;;  %v1910_v4 = vmul.f32 %v9737_v55, %v1882_v39  ;;  %v1929_v31 = vmul.f32 %v9735_v43, %v9246_v62  ;;  %v1930_v2 = vmul.f32 %v9737_v55, %v9250_v32  ;;  %v1621_v62 = vld [vmem:[%s12205_s3] sm:$0x3]  ;;  %s7740_s3 = smov 120  }
 0x553   :  { %v1931_v23 = vmul.f32 %v9735_v43, %v9263_v54  ;;  %v1932_v24 = vmul.f32 %v9737_v55, %v9266_v35  ;;  %v1925_v53 = vmul.f32 %v9735_v43, %v9211_v61  ;;  %v1926_v8 = vmul.f32 %v9737_v55, %v9215_v25 }
 0x554   :  { %v1913_v39 = vrot.slane %v1910_v4, 7  ;;  %v1927_v32 = vmul.f32 %v9735_v43, %v9227_v47  ;;  %v1928_v54 = vmul.f32 %v9737_v55, %v9230_v13  ;;  %v1921_v35 = vmul.f32 %v9735_v43, %v12591_v36 }
 0x555   :  { %v1922_v61 = vmul.f32 %v9737_v55, %v12592_v41  ;;  %v1923_v25 = vmul.f32 %v9735_v43, %v12593_v27  ;;  %v1924_v21 = vmul.f32 %v9737_v55, %v12594_v50  ;;  %v1941_v26 = vmul.f32 %v9735_v43, %v9359_v56  ;;  %v12603_v41 = vld [vmem:[#allocation35_spill] sm:$0xff] }
 0x556   :  { %v1914_v47 = vsel %vm1900_vm7, %v1909_v46, %v1913_v39  ;;  %v1942_v13 = vmul.f32 %v9737_v55, %v12595_v11  ;;  %v1943_v40 = vmul.f32 %v9735_v43, %v12596_v1  ;;  %v1944_v42 = vmul.f32 %v9737_v55, %v12597_v51  ;;  %v12601_v46 = vld [vmem:[#allocation43_spill] sm:$0xff]  ;;  %v12602_v39 = vld [vmem:[#allocation32_spill] sm:$0xff] }
 0x557   :  { %v1916_v3 = vsub.f32 %v1621_v62, %v1914_v47  ;;  %v1937_v49 = vmul.f32 %v9735_v43, %v12598_v29  ;;  %v1938_v34 = vmul.f32 %v9737_v55, %v12599_v18  ;;  %v1939_v56 = vmul.f32 %v9735_v43, %v12600_v20  ;;  %v12604_v62 = vld [vmem:[#allocation36_spill] sm:$0xff]  ;;  %v12605_v1 = vld [vmem:[#allocation39_spill] sm:$0xff] }
 0x558   :  { %v1940_v4 = vmul.f32 %v9737_v55, %v12601_v46  ;;  %v1933_v36 = vmul.f32 %v9735_v43, %v12602_v39  ;;  %v9795_v27 = vmul.f32 %v9737_v55, %v12603_v41  ;;  %v9799_v50 = vmul.f32 %v9735_v43, %v12604_v62 }
 0x559   :  { %v9801_v47 = vperm.slane %v1916_v3, 0  ;;  %v9803_v11 = vperm.slane %v1916_v3, 1  ;;  %v9807_v51 = vmul.f32 %v9737_v55, %v12605_v1  ;;  %v9811_v29 = vmul.f32 %v9735_v43, %v9475_v60 }
 0x55a   :  { %v9815_v18 = vmul.f32 %v9737_v55, %v9479_v30  ;;  %v9819_v20 = vmul.f32 %v9735_v43, %v9494_v12  ;;  %v9823_v3 = vmul.f32 %v9737_v55, %v9502_v17  ;;  %v9827_v46 = vmul.f32 %v9735_v43, %v9440_v10 }
 0x55b   :  { %v1990_v39 = vadd.f32 %v9801_v47, %v1929_v31  ;;  %v1991_v60 = vadd.f32 %v9803_v11, %v1930_v2  ;;  %v1992_v41 = vadd.f32 %v9801_v47, %v1931_v23  ;;  %v1993_v30 = vadd.f32 %v9803_v11, %v1932_v24 }
 0x55c   :  { %v1986_v62 = vadd.f32 %v9801_v47, %v1925_v53  ;;  %v1987_v12 = vadd.f32 %v9803_v11, %v1926_v8  ;;  %v1988_v1 = vadd.f32 %v9801_v47, %v1927_v32  ;;  %v1989_v17 = vadd.f32 %v9803_v11, %v1928_v54 }
 0x55d   :  { %v2046_v19 = vmax.f32 %v1990_v39, 0.0  ;;  %v2047_v58 = vmax.f32 %v1991_v60, 0.0  ;;  %v2048_v10 = vmax.f32 %v1992_v41, 0.0  ;;  %v2049_v28 = vmax.f32 %v1993_v30, 0.0 }
 0x55e   :  { %v2042_v38 = vmax.f32 %v1986_v62, 0.0  ;;  %v2043_v31 = vmax.f32 %v1987_v12, 0.0  ;;  %v2044_v16 = vmax.f32 %v1988_v1, 0.0  ;;  %v2045_v2 = vmax.f32 %v1989_v17, 0.0 }
 0x55f   :  { %v9837_v59 = vmax.f32 %v2046_v19, %v2048_v10  ;;  %v9839_v23 = vmax.f32 %v2047_v58, %v2049_v28  ;;  %v1982_v24 = vadd.f32 %v9801_v47, %v1921_v35  ;;  %v1983_v53 = vadd.f32 %v9803_v11, %v1922_v61 }
 0x560   :  { %v9843_v8 = vmax.f32 %v2042_v38, %v2044_v16  ;;  %v9845_v32 = vmax.f32 %v2043_v31, %v2045_v2  ;;  %v1984_v54 = vadd.f32 %v9801_v47, %v1923_v25  ;;  %v1985_v39 = vadd.f32 %v9803_v11, %v1924_v21 }
 0x561   :  { %v7644_v60 = vpack.i.bf16 %v9839_v23, %v9837_v59  ;;  %v2038_v41 = vmax.f32 %v1982_v24, 0.0  ;;  %v2039_v19 = vmax.f32 %v1983_v53, 0.0  ;;  %v2002_v28 = vadd.f32 %v9801_v47, %v1941_v26 }
 0x562   :  { %v7639_v58 = vpack.i.bf16 %v9845_v32, %v9843_v8  ;;  %v2040_v35 = vmax.f32 %v1984_v54, 0.0  ;;  %v2041_v61 = vmax.f32 %v1985_v39, 0.0  ;;  %v2003_v16 = vadd.f32 %v9803_v11, %v1942_v13 }
 0x563   :  { %7645 = vrot.lane.b32.xlu0 %v7644_v60, %s7740_s3  ;;  %v2004_v38 = vadd.f32 %v9801_v47, %v1943_v40  ;;  %v2005_v25 = vadd.f32 %v9803_v11, %v1944_v42  ;;  %v2058_v21 = vmax.f32 %v2002_v28, 0.0  ;;  %v1998_v30 = vadd.f32 %v9801_v47, %v1937_v49 }
 0x564   :  { %7640 = vrot.lane.b32.xlu2 %v7639_v58, %s7740_s3  ;;  %v9860_v26 = vmax.f32 %v2038_v41, %v2040_v35  ;;  %v9862_v62 = vmax.f32 %v2039_v19, %v2041_v61  ;;  %v2059_v12 = vmax.f32 %v2003_v16, 0.0  ;;  %v1999_v1 = vadd.f32 %v9803_v11, %v1938_v34 }
 0x565   :  { %v2060_v13 = vmax.f32 %v2004_v38, 0.0  ;;  %v2061_v17 = vmax.f32 %v2005_v25, 0.0  ;;  %v2000_v10 = vadd.f32 %v9801_v47, %v1939_v56  ;;  %v2001_v40 = vadd.f32 %v9803_v11, %v1940_v4 }
 0x566   :  { %v7634_v42 = vpack.i.bf16 %v9862_v62, %v9860_v26  ;;  %v2054_v31 = vmax.f32 %v1998_v30, 0.0  ;;  %v2055_v49 = vmax.f32 %v1999_v1, 0.0  ;;  %v1994_v2 = vadd.f32 %v9801_v47, %v1933_v36 }
 0x567   :  { %v9870_v24 = vmax.f32 %v2058_v21, %v2060_v13  ;;  %v9872_v53 = vmax.f32 %v2059_v12, %v2061_v17  ;;  %v2056_v54 = vmax.f32 %v2000_v10, 0.0  ;;  %v2057_v39 = vmax.f32 %v2001_v40, 0.0 }
 0x568   :  { %7635 = vrot.lane.b32.xlu1 %v7634_v42, %s7740_s3  ;;  %v1995_v34 = vadd.f32 %v9803_v11, %v9795_v27  ;;  %v1996_v56 = vadd.f32 %v9801_v47, %v9799_v50  ;;  %v1997_v4 = vadd.f32 %v9803_v11, %v9807_v51  ;;  %v2050_v60 = vmax.f32 %v1994_v2, 0.0 }
 0x569   :  { %v7659_v36 = vpack.i.bf16 %v9872_v53, %v9870_v24  ;;  %v9883_v41 = vmax.f32 %v2054_v31, %v2056_v54  ;;  %v9885_v19 = vmax.f32 %v2055_v49, %v2057_v39  ;;  %v2014_v28 = vadd.f32 %v9801_v47, %v9811_v29  ;;  %v12606_v49 = vld [vmem:[#allocation46_spill] sm:$0xff]  ;;  %v12607_v54 = vld [vmem:[#allocation48_spill] sm:$0xff] }
 0x56a   :  { %v2051_v58 = vmax.f32 %v1995_v34, 0.0  ;;  %v2052_v35 = vmax.f32 %v1996_v56, 0.0  ;;  %v2053_v27 = vmax.f32 %v1997_v4, 0.0  ;;  %v2015_v50 = vadd.f32 %v9803_v11, %v9815_v18 }
 0x56b   :  { %7660 = vrot.lane.b32.xlu0 %v7659_v36, %s7740_s3  ;;  %v7654_v51 = vpack.i.bf16 %v9885_v19, %v9883_v41  ;;  %v2016_v61 = vadd.f32 %v9801_v47, %v9819_v20  ;;  %v2017_v16 = vadd.f32 %v9803_v11, %v9823_v3  ;;  %v2070_v38 = vmax.f32 %v2014_v28, 0.0 }
 0x56c   :  { %v9898_v25 = vmax.f32 %v2050_v60, %v2052_v35  ;;  %v9900_v29 = vmax.f32 %v2051_v58, %v2053_v27  ;;  %v2071_v21 = vmax.f32 %v2015_v50, 0.0  ;;  %v1950_v18 = vmul.f32 %v9737_v55, %v9444_v45  ;;  %v12608_v60 = vld [vmem:[#allocation79_spill] sm:$0xff] }
 0x56d   :  { %7655 = vrot.lane.b32.xlu2 %v7654_v51, %s7740_s3  ;;  %v2072_v30 = vmax.f32 %v2016_v61, 0.0  ;;  %v2073_v12 = vmax.f32 %v2017_v16, 0.0  ;;  %v1951_v1 = vmul.f32 %v9735_v43, %v9459_v9  ;;  %v1952_v20 = vmul.f32 %v9737_v55, %v9462_v33  ;;  %v6134_v33 = vld [vmem:[%s12203_s4 + $0x1b0] sm:$0xf] }
 0x56e   :  { %v7649_v3 = vpack.i.bf16 %v9900_v29, %v9898_v25  ;;  %v2010_v13 = vadd.f32 %v9801_v47, %v9827_v46  ;;  %v2011_v17 = vadd.f32 %v9803_v11, %v1950_v18  ;;  %v1945_v45 = vmul.f32 %v9735_v43, %v9398_v22  ;;  %v7427_v46 = vld [vmem:[%s12203_s4 + $0x1b4] sm:$0xf0] }
 0x56f   :  { %v9916_v10 = vmax.f32 %v2070_v38, %v2072_v30  ;;  %v9918_v40 = vmax.f32 %v2071_v21, %v2073_v12  ;;  %v2012_v9 = vadd.f32 %v9801_v47, %v1951_v1  ;;  %v2013_v42 = vadd.f32 %v9803_v11, %v1952_v20 }
 0x570   :  { %7650 = vrot.lane.b32.xlu1 %v7649_v3, %s7740_s3  ;;  %v2066_v31 = vmax.f32 %v2010_v13, 0.0  ;;  %v2067_v22 = vmax.f32 %v2011_v17, 0.0  ;;  %v1946_v2 = vmul.f32 %v9737_v55, %v12606_v49  ;;  %v1947_v39 = vmul.f32 %v9735_v43, %v12607_v54 }
 0x571   :  { %v7674_v34 = vpack.i.bf16 %v9918_v40, %v9916_v10  ;;  %v2068_v56 = vmax.f32 %v2012_v9, 0.0  ;;  %v2069_v4 = vmax.f32 %v2013_v42, 0.0  ;;  %v1948_v36 = vmul.f32 %v9737_v55, %v12608_v60 }
 0x572   :  { %v2006_v28 = vadd.f32 %v9801_v47, %v1945_v45  ;;  %v2007_v58 = vadd.f32 %v9803_v11, %v1946_v2  ;;  %v2008_v35 = vadd.f32 %v9801_v47, %v1947_v39  ;;  %v6135_v27 = vor.u32 %v7427_v46, %v6134_v33 }
 0x573   :  { %7675 = vrot.lane.b32.xlu0 %v7674_v34, %s7740_s3  ;;  %v9941_v50 = vmax.f32 %v2066_v31, %v2068_v56  ;;  %v9943_v51 = vmax.f32 %v2067_v22, %v2069_v4  ;;  %v2009_v61 = vadd.f32 %v9803_v11, %v1948_v36  ;;  %v1965_v16 = vmul.f32 %v9735_v43, %v9576_v52 }
 0x574   :  { %v2062_v38 = vmax.f32 %v2006_v28, 0.0  ;;  %v2063_v21 = vmax.f32 %v2007_v58, 0.0  ;;  %v2064_v18 = vmax.f32 %v2008_v35, 0.0  ;;  %2868 = vmatpush.bf16.msra.mxu3 %v6135_v27  ;;  %v1966_v30 = vmul.f32 %v9737_v55, %v9583_v0 }
 0x575   :  { %v7669_v12 = vpack.i.bf16 %v9943_v51, %v9941_v50  ;;  %v2065_v1 = vmax.f32 %v2009_v61, 0.0  ;;  %v1967_v20 = vmul.f32 %v9735_v43, %v9590_v14  ;;  %v1968_v3 = vmul.f32 %v9737_v55, %v9596_v44 }
 0x576   :  { %v9956_v13 = vmax.f32 %v2062_v38, %v2064_v18  ;;  %v2026_v52 = vadd.f32 %v9801_v47, %v1965_v16  ;;  %v2027_v17 = vadd.f32 %v9803_v11, %v1966_v30  ;;  %v1961_v45 = vmul.f32 %v9735_v43, %v9551_v5 }
 0x577   :  { %7670 = vrot.lane.b32.xlu2 %v7669_v12, %s7740_s3  ;;  %v9963_v0 = vmax.f32 %v2063_v21, %v2065_v1  ;;  %v2028_v9 = vadd.f32 %v9801_v47, %v1967_v20  ;;  %v2029_v14 = vadd.f32 %v9803_v11, %v1968_v3  ;;  %v1962_v44 = vmul.f32 %v9737_v55, %v9555_v7  ;;  %v12609_v21 = vld [vmem:[#allocation4_spill] sm:$0xff] }
 0x578   :  { %v2082_v42 = vmax.f32 %v2026_v52, 0.0  ;;  %v2083_v33 = vmax.f32 %v2027_v17, 0.0  ;;  %v1963_v46 = vmul.f32 %v9735_v43, %v9561_v57  ;;  %v1964_v31 = vmul.f32 %v9737_v55, %v9568_v6  ;;  %v12611_v52 = vld [vmem:[#allocation50_spill] sm:$0xff] }
 0x579   :  { %v7664_v5 = vpack.i.bf16 %v9963_v0, %v9956_v13  ;;  %v2084_v22 = vmax.f32 %v2028_v9, 0.0  ;;  %v2085_v49 = vmax.f32 %v2029_v14, 0.0  ;;  %v2022_v2 = vadd.f32 %v9801_v47, %v1961_v45  ;;  %v12612_v45 = vld [vmem:[#allocation80_spill] sm:$0xff] }
 0x57a   :  { %v2023_v54 = vadd.f32 %v9803_v11, %v1962_v44  ;;  %v2024_v39 = vadd.f32 %v9801_v47, %v1963_v46  ;;  %v2025_v7 = vadd.f32 %v9803_v11, %v1964_v31  ;;  %v1957_v34 = vmul.f32 %v9735_v43, %v9511_v48 }
 0x57b   :  { %7665 = vrot.lane.b32.xlu1 %v7664_v5, %s7740_s3  ;;  %v9982_v57 = vmax.f32 %v2082_v42, %v2084_v22  ;;  %v9984_v6 = vmax.f32 %v2083_v33, %v2085_v49  ;;  %v2078_v56 = vmax.f32 %v2022_v2, 0.0  ;;  %v1958_v4 = vmul.f32 %v9737_v55, %v9514_v15  ;;  %v12613_v33 = vld [vmem:[#allocation3_spill] sm:$0xff]  ;;  %v12614_v49 = vld [vmem:[#allocation133_spill] sm:$0xff] }
 0x57c   :  { %v2079_v60 = vmax.f32 %v2023_v54, 0.0  ;;  %v2080_v36 = vmax.f32 %v2024_v39, 0.0  ;;  %v2081_v28 = vmax.f32 %v2025_v7, 0.0  ;;  %v1959_v58 = vmul.f32 %v9735_v43, %v9539_v63  ;;  %v6062_v54 = vld [vmem:[%s12203_s4 + $0x120] sm:$0xf] }
 0x57d   :  { %v7689_v35 = vpack.i.bf16 %v9984_v6, %v9982_v57  ;;  %v1960_v48 = vmul.f32 %v9737_v55, %v9544_v37  ;;  %v2018_v27 = vadd.f32 %v9801_v47, %v1957_v34  ;;  %v2019_v61 = vadd.f32 %v9803_v11, %v1958_v4  ;;  %v12610_v37 = vld [vmem:[#allocation49_spill] sm:$0xff]  ;;  %v7409_v39 = vld [vmem:[%s12203_s4 + $0x124] sm:$0xf0]  ;;  %v6126_v7 = vld [vmem:[%s12203_s4 + $0x1a0] sm:$0xf] }
 0x57e   :  { %v9996_v16 = vmax.f32 %v2078_v56, %v2080_v36  ;;  %v9998_v38 = vmax.f32 %v2079_v60, %v2081_v28  ;;  %v2020_v15 = vadd.f32 %v9801_v47, %v1959_v58  ;;  %v1969_v18 = vmul.f32 %v9735_v43, %v12609_v21  ;;  %v12615_v60 = vld [vmem:[#allocation129_spill] sm:$0xff]  ;;  %v7425_v28 = vld [vmem:[%s12203_s4 + $0x1a4] sm:$0xf0]  ;;  %v7482_v58 = vld [vmem:[%s12203_s4 + $0x374] sm:$0xf] }
 0x57f   :  { %7690 = vrot.lane.b32.xlu0 %v7689_v35, %s7740_s3  ;;  %v2021_v63 = vadd.f32 %v9803_v11, %v1960_v48  ;;  %v2074_v30 = vmax.f32 %v2018_v27, 0.0  ;;  %v2075_v12 = vmax.f32 %v2019_v61, 0.0  ;;  %v1970_v1 = vmul.f32 %v9737_v55, %v12610_v37  ;;  %v12616_v27 = vld [vmem:[#allocation7_spill] sm:$0xff]  ;;  %v6296_v21 = vld [vmem:[%s12203_s4 + $0x378] sm:$0xf0] }
 0x580   :  { %v7684_v20 = vpack.i.bf16 %v9998_v38, %v9996_v16  ;;  %v2076_v3 = vmax.f32 %v2020_v15, 0.0  ;;  %v1971_v17 = vmul.f32 %v9735_v43, %v12611_v52  ;;  %v1972_v9 = vmul.f32 %v9737_v55, %v12612_v45  ;;  %v7498_v37 = vld [vmem:[%s12203_s4 + $0x3f4] sm:$0xf]  ;;  %v7423_v52 = vld [vmem:[%s12203_s4 + $0x194] sm:$0xf0] }
 0x581   :  { %v2077_v14 = vmax.f32 %v2021_v63, 0.0  ;;  %v2030_v44 = vadd.f32 %v9801_v47, %v1969_v18  ;;  %v2031_v42 = vadd.f32 %v9803_v11, %v1970_v1  ;;  %v1917_v46 = vmul.f32 %v9735_v43, %v12613_v33  ;;  %v6360_v1 = vld [vmem:[%s12203_s4 + $0x3f8] sm:$0xf0] }
 0x582   :  { %7685 = vrot.lane.b32.xlu2 %v7684_v20, %s7740_s3  ;;  %v10018_v31 = vmax.f32 %v2074_v30, %v2076_v3  ;;  %v2032_v5 = vadd.f32 %v9801_v47, %v1971_v17  ;;  %v2033_v22 = vadd.f32 %v9803_v11, %v1972_v9  ;;  %v1918_v2 = vmul.f32 %v9737_v55, %v12614_v49 }
 0x583   :  { %v10033_v34 = vmax.f32 %v2075_v12, %v2077_v14  ;;  %v2086_v56 = vmax.f32 %v2030_v44, 0.0  ;;  %v2087_v4 = vmax.f32 %v2031_v42, 0.0  ;;  %v1919_v36 = vmul.f32 %v9735_v43, %v12615_v60  ;;  %v6054_v43 = vld [vmem:[%s12203_s4 + $0x110] sm:$0xf]  ;;  %v7405_v60 = vld [vmem:[%s12203_s4 + $0x104] sm:$0xf0] }
 0x584   :  { %v2088_v35 = vmax.f32 %v2032_v5, 0.0  ;;  %v2089_v48 = vmax.f32 %v2033_v22, 0.0  ;;  %v1920_v61 = vmul.f32 %v9737_v55, %v12616_v27  ;;  %v1978_v15 = vadd.f32 %v9801_v47, %v1917_v46  ;;  %v7407_v55 = vld [vmem:[%s12203_s4 + $0x114] sm:$0xf0] }
 0x585   :  { %v7679_v18 = vpack.i.bf16 %v10033_v34, %v10018_v31  ;;  %v1979_v63 = vadd.f32 %v9803_v11, %v1918_v2  ;;  %v1980_v30 = vadd.f32 %v9801_v47, %v1919_v36  ;;  %v6063_v12 = vor.u32 %v7409_v39, %v6062_v54  ;;  %v6118_v47 = vld [vmem:[%s12203_s4 + $0x190] sm:$0xf]  ;;  %v7480_v39 = vld [vmem:[%s12203_s4 + $0x364] sm:$0xf] }
 0x586   :  { %v1981_v20 = vadd.f32 %v9803_v11, %v1920_v61  ;;  %v2034_v3 = vmax.f32 %v1978_v15, 0.0  ;;  %v6127_v9 = vor.u32 %v7425_v28, %v6126_v7  ;;  %v6299_v14 = vor.u32 %v7482_v58, %v6296_v21  ;;  %v6288_v7 = vld [vmem:[%s12203_s4 + $0x368] sm:$0xf0]  ;;  %v7496_v36 = vld [vmem:[%s12203_s4 + $0x3e4] sm:$0xf] }
 0x587   :  { %7680 = vrot.lane.b32.xlu1 %v7679_v18, %s7740_s3  ;;  %v2035_v17 = vmax.f32 %v1979_v63, 0.0  ;;  %v2036_v45 = vmax.f32 %v1980_v30, 0.0  ;;  %2835 = vmatpush.bf16.msra.mxu2 %v6063_v12  ;;  %v10073_v44 = vmax.f32 %v2086_v56, %v2088_v35  ;;  %v6055_v11 = vor.u32 %v7407_v55, %v6054_v43  ;;  %v6352_v58 = vld [vmem:[%s12203_s4 + $0x3e8] sm:$0xf0]  ;;  %v6110_v35 = vld [vmem:[%s12203_s4 + $0x180] sm:$0xf] }
 0x588   :  { %v2037_v42 = vmax.f32 %v1981_v20, 0.0  ;;  %v6363_v33 = vor.u32 %v7498_v37, %v6360_v1  ;;  %v10075_v46 = vmax.f32 %v2087_v4, %v2089_v48  ;;  %2869 = vmatpush.bf16.msra.mxu3 %v6127_v9  ;;  %3270 = vmatpush.bf16.msrb.mxu0 %v6299_v14  ;;  %v6119_v22 = vor.u32 %v7423_v52, %v6118_v47  ;;  %v6046_v4 = vld [vmem:[%s12203_s4 + $0x100] sm:$0xf]  ;;  %v7421_v48 = vld [vmem:[%s12203_s4 + $0x184] sm:$0xf0] }
 0x589   :  { %v10077_v5 = vmax.f32 %v2034_v3, %v2036_v45  ;;  %v6291_v56 = vor.u32 %v7480_v39, %v6288_v7  ;;  %v6047_v28 = vor.u32 %v7405_v60, %v6046_v4  ;;  %v6355_v27 = vor.u32 %v7496_v36, %v6352_v58  ;;  %v7478_v15 = vld [vmem:[%s12203_s4 + $0x354] sm:$0xf]  ;;  %v6280_v21 = vld [vmem:[%s12203_s4 + $0x358] sm:$0xf0]  ;;  %v7476_v37 = vld [vmem:[%s12203_s4 + $0x344] sm:$0xf] }
 0x58a   :  { %v10079_v49 = vmax.f32 %v2035_v17, %v2037_v42  ;;  %3304 = vmatpush.bf16.msrb.mxu1 %v6363_v33  ;;  %v7694_v54 = vpack.i.bf16 %v10075_v46, %v10073_v44  ;;  %v6111_v61 = vor.u32 %v7421_v48, %v6110_v35  ;;  %v7494_v43 = vld [vmem:[%s12203_s4 + $0x3d4] sm:$0xf]  ;;  %v6283_v18 = vor.u32 %v7478_v15, %v6280_v21  ;;  %v6344_v63 = vld [vmem:[%s12203_s4 + $0x3d8] sm:$0xf0]  ;;  %v6272_v1 = vld [vmem:[%s12203_s4 + $0x348] sm:$0xf0] }
 0x58b   :  { %2836 = vmatpush.bf16.msra.mxu2 %v6055_v11  ;;  %v6347_v30 = vor.u32 %v7494_v43, %v6344_v63  ;;  %v12617_v12 = vlaneseq  ;;  %v6275_v20 = vor.u32 %v7476_v37, %v6272_v1  ;;  %v7492_v3 = vld [vmem:[%s12203_s4 + $0x3c4] sm:$0xf]  ;;  %v6336_v47 = vld [vmem:[%s12203_s4 + $0x3c8] sm:$0xf0]  ;;  %v7474_v52 = vld [vmem:[%s12203_s4 + $0x334] sm:$0xf] }
 0x58c   :  { %v7699_v2 = vpack.i.bf16 %v10079_v49, %v10077_v5  ;;  %2870 = vmatpush.bf16.msra.mxu3 %v6119_v22  ;;  %3271 = vmatpush.bf16.msrb.mxu0 %v6291_v56  ;;  %v6339_v17 = vor.u32 %v7492_v3, %v6336_v47  ;;  %v6264_v45 = vld [vmem:[%s12203_s4 + $0x338] sm:$0xf0]  ;;  %v7490_v9 = vld [vmem:[%s12203_s4 + $0x3b4] sm:$0xf]  ;;  %v7472_v48 = vld [vmem:[%s12203_s4 + $0x324] sm:$0xf] }
 0x58d   :  { %v10124_v55 = vshrl.u32 %v12617_v12, 7  ;;  %v6267_v14 = vor.u32 %v7474_v52, %v6264_v45  ;;  %v6328_v42 = vld [vmem:[%s12203_s4 + $0x3b8] sm:$0xf0]  ;;  %v6320_v21 = vld [vmem:[%s12203_s4 + $0x3a8] sm:$0xf0] }
 0x58e   :  { %7700 = vrot.lane.b32.xlu2 %v7699_v2, %s7740_s3  ;;  %3305 = vmatpush.bf16.msrb.mxu1 %v6355_v27  ;;  %v6331_v22 = vor.u32 %v7490_v9, %v6328_v42  ;;  %v6256_v27 = vld [vmem:[%s12203_s4 + $0x328] sm:$0xf0]  ;;  %v7418_v43 = vld [vmem:[%s12203_s4 + $0x174] sm:$0xf]  ;;  %v6312_v45 = vld [vmem:[%s12203_s4 + $0x398] sm:$0xf0] }
 0x58f   :  { %7695 = vrot.lane.b32.xlu1 %v7694_v54, %s7740_s3  ;;  %2837 = vmatpush.bf16.msra.mxu2 %v6047_v28  ;;  %v2276_v11 = vadd.s32 16, %v10124_v55  ;;  %v2279_v2 = vadd.s32 40, %v10124_v55  ;;  %v10159_v28 = vadd.s32 64, %v10124_v55  ;;  %v2275_v58 = vadd.s32 8, %v10124_v55  ;;  %v7470_v1 = vld [vmem:[%s12203_s4 + $0x314] sm:$0xf] }
 0x590   :  { %2871 = vmatpush.bf16.msra.mxu3 %v6111_v61  ;;  %3272 = vmatpush.bf16.msrb.mxu0 %v6283_v18  ;;  %v6259_v15 = vor.u32 %v7472_v48, %v6256_v27  ;;  %v6104_v18 = vld [vmem:[%s12203_s4 + $0x178] sm:$0xf0]  ;;  %v7486_v3 = vld [vmem:[%s12203_s4 + $0x394] sm:$0xf] }
 0x591   :  { %v2306_v54 = vand.u32 7, %v2276_v11  ;;  %v2327_v56 = vand.u32 7, %v2279_v2  ;;  %v6107_v37 = vor.u32 %v7418_v43, %v6104_v18  ;;  %v7434_v9 = vld [vmem:[%s12203_s4 + $0x1f4] sm:$0xf]  ;;  %v2348_v42 = vand.u32 7, %v10159_v28 }
 0x592   :  { %3306 = vmatpush.bf16.msrb.mxu1 %v6347_v30  ;;  %v2299_v11 = vand.u32 7, %v2275_v58  ;;  %v6304_v58 = vld [vmem:[%s12203_s4 + $0x388] sm:$0xf0] }
 0x593   :  { %vm10152_vm9 = vcmp.lt.s32.totalorder %v2306_v54, 2  ;;  %vm10171_vm11 = vcmp.lt.s32.totalorder %v2327_v56, 2  ;;  %2898 = vmatpush.bf16.msrb.mxu2 %v6107_v37  ;;  %v7468_v54 = vld [vmem:[%s12203_s4 + $0x304] sm:$0xf]  ;;  %vm10253_vm14 = vcmp.lt.s32.totalorder %v2348_v42, 2 }
 0x594   :  { %3273 = vmatpush.bf16.msrb.mxu0 %v6275_v20  ;;  %v6248_v20 = vld [vmem:[%s12203_s4 + $0x318] sm:$0xf0]  ;;  %vm10236_vm12 = vcmp.lt.s32.totalorder %v2299_v11, 2 }
 0x596   :  { %3307 = vmatpush.bf16.msrb.mxu1 %v6339_v17  ;;  %v6251_v17 = vor.u32 %v7470_v1, %v6248_v20 }
 0x598   :  { %3274 = vmatpush.bf16.msrb.mxu0 %v6267_v14 }
 0x59a   :  { %3308 = vmatpush.bf16.msrb.mxu1 %v6331_v22  ;;  %v6168_v22 = vld [vmem:[%s12203_s4 + $0x1f8] sm:$0xf0] }
 0x59b   :  { %v6171_v2 = vor.u32 %v7434_v9, %v6168_v22 }
 0x59c   :  { %3275 = vmatpush.bf16.msrb.mxu0 %v6259_v15  ;;  %v2278_v15 = vadd.s32 32, %v10124_v55 }
 0x59d   :  { %2932 = vmatpush.bf16.msrb.mxu3 %v6171_v2 }
 0x5a0   :  { %3276 = vmatpush.bf16.msrb.mxu0 %v6251_v17 }
 0x5be   :  { %v7641_v33 = vpop.permute.xlu2 %7640 }
 0x5bf   :  { %v7643_v39 = vunpack.i.h.bf16 %v7641_v33  ;;  %v7642_v7 = vunpack.i.l.bf16 %v7641_v33  ;;  %v6315_v33 = vor.u32 %v7486_v3, %v6312_v45 }
 0x5c1   :  { %v2250_v60 = vmax.f32 %v9845_v32, %v7643_v39  ;;  %v2205_v36 = vsel %vm2202_vm8, %v7642_v7, %v7643_v39  ;;  %v7488_v32 = vld [vmem:[%s12203_s4 + $0x3a4] sm:$0xf]  ;;  %v6240_v39 = vld [vmem:[%s12203_s4 + $0x308] sm:$0xf0] }
 0x5c2   :  { %v2249_v63 = vmax.f32 %v9843_v8, %v2205_v36  ;;  %v6323_v12 = vor.u32 %v7488_v32, %v6320_v21  ;;  %v2277_v8 = vadd.s32 24, %v10124_v55  ;;  %v7484_v7 = vld [vmem:[%s12203_s4 + $0x384] sm:$0xf]  ;;  %v6243_v4 = vor.u32 %v7468_v54, %v6240_v39  ;;  %v6096_v21 = vld [vmem:[%s12203_s4 + $0x168] sm:$0xf0] }
 0x5c3   :  { %v2503_v47 = vsel %vm10152_vm9, %v2250_v60, 0.0 }
 0x5c4   :  { %3309 = vmatpush.bf16.msrb.mxu1 %v6323_v12  ;;  %v2529_v56 = vsel %vm2526_vm10, %v2503_v47, 0.0  ;;  %v2502_v60 = vsel %vm10152_vm9, %v2249_v63, 0.0  ;;  %v2313_v27 = vand.u32 7, %v2277_v8  ;;  %3277 = vmatpush.bf16.msrb.mxu0 %v6243_v4 }
 0x5c5   :  { %v10231_v12 = vpack.c.bf16 %v2529_v56, %v2502_v60 }
 0x5c6   :  { %vm10245_vm13 = vcmp.lt.s32.totalorder %v2313_v27, 2 }
 0x5c7   :  { %v7656_v35 = vpop.permute.xlu2 %7655  ;;  %v2632_v42 = vunpack.c.l.b16 %v10231_v12  ;;  %v2633_v39 = vunpack.c.h.b16 %v10231_v12 }
 0x5c8   :  { %v7658_v52 = vunpack.i.h.bf16 %v7656_v35  ;;  %v7657_v14 = vunpack.i.l.bf16 %v7656_v35  ;;  %v7416_v35 = vld [vmem:[%s12203_s4 + $0x164] sm:$0xf]  ;;  %3310 = vmatpush.bf16.msrb.mxu1 %v6315_v33  ;;  %v2320_v33 = vand.u32 7, %v2278_v15 }
 0x5c9   :  { %v6099_v1 = vor.u32 %v7416_v35, %v6096_v21 }
 0x5ca   :  { %v2256_v48 = vmax.f32 %v9885_v19, %v7658_v52  ;;  %v2208_v43 = vsel %vm2202_vm8, %v7657_v14, %v7658_v52  ;;  %v10234_v19 = vadd.s32 88, %v10124_v55  ;;  %v2280_v14 = vadd.s32 48, %v10124_v55 }
 0x5cb   :  { %v2255_v17 = vmax.f32 %v9883_v41, %v2208_v43  ;;  %2899 = vmatpush.bf16.msrb.mxu2 %v6099_v1  ;;  %vm10275_vm15 = vcmp.lt.s32.totalorder %v2320_v33, 2  ;;  %v7432_v43 = vld [vmem:[%s12203_s4 + $0x1e4] sm:$0xf] }
 0x5d1   :  { %v7671_v11 = vpop.permute.xlu2 %7670 }
 0x5d2   :  { %v7672_v35 = vunpack.i.l.bf16 %v7671_v11 }
 0x5d5   :  { %v7646_v30 = vpop.permute.xlu0 %7645 }
 0x5d6   :  { %v7648_v36 = vunpack.i.h.bf16 %v7646_v30  ;;  %v7647_v28 = vunpack.i.l.bf16 %v7646_v30  ;;  %v6307_v30 = vor.u32 %v7484_v7, %v6304_v58 }
 0x5d8   :  { %v2252_v20 = vmax.f32 %v9839_v23, %v7648_v36  ;;  %v2206_v3 = vsel %vm2202_vm8, %v7647_v28, %v7648_v36  ;;  %v2509_v23 = vsel %vm10171_vm11, %v2256_v48, 0.0  ;;  %3311 = vmatpush.bf16.msrb.mxu1 %v6307_v30  ;;  %v7673_v36 = vunpack.i.h.bf16 %v7671_v11  ;;  %v7414_v11 = vld [vmem:[%s12203_s4 + $0x154] sm:$0xf] }
 0x5d9   :  { %v2251_v22 = vmax.f32 %v9837_v59, %v2206_v3  ;;  %v2532_v60 = vsel %vm2526_vm10, %v2509_v23, 0.0  ;;  %v2508_v59 = vsel %vm10171_vm11, %v2255_v17, 0.0  ;;  %v2334_v28 = vand.u32 7, %v2280_v14 }
 0x5da   :  { %v7636_v32 = vpop.permute.xlu1 %7635  ;;  %v2505_v7 = vsel %vm10245_vm13, %v2252_v20, 0.0  ;;  %v2262_v20 = vmax.f32 %v9943_v51, %v7673_v36  ;;  %v2281_v14 = vadd.s32 56, %v10124_v55  ;;  %v10310_v23 = vpack.c.bf16 %v2532_v60, %v2508_v59 }
 0x5db   :  { %v7638_v18 = vunpack.i.h.bf16 %v7636_v32  ;;  %v7637_v63 = vunpack.i.l.bf16 %v7636_v32  ;;  %v2530_v15 = vsel %vm2526_vm10, %v2505_v7, 0.0  ;;  %v2504_v4 = vsel %vm10245_vm13, %v2251_v22, 0.0 }
 0x5dc   :  { %v10304_v17 = vpack.c.bf16 %v2530_v15, %v2504_v4  ;;  %vm10315_vm0 = vcmp.lt.s32.totalorder %v2334_v28, 2  ;;  %v2515_v7 = vsel %vm10253_vm14, %v2262_v20, 0.0  ;;  %v7430_v28 = vld [vmem:[%s12203_s4 + $0x1d4] sm:$0xf]  ;;  %v2341_v32 = vand.u32 7, %v2281_v14 }
 0x5dd   :  { %v2248_v47 = vmax.f32 %v9862_v62, %v7638_v18  ;;  %v2204_v52 = vsel %vm2202_vm8, %v7637_v63, %v7638_v18  ;;  %v7661_v8 = vpop.permute.xlu0 %7660  ;;  %v6160_v18 = vld [vmem:[%s12203_s4 + $0x1e8] sm:$0xf0]  ;;  %v7426_v62 = vld [vmem:[%s12203_s4 + $0x1b4] sm:$0xf] }
 0x5de   :  { %v2247_v9 = vmax.f32 %v9860_v26, %v2204_v52  ;;  %v2369_v26 = vand.u32 7, %v10234_v19  ;;  %v7663_v37 = vunpack.i.h.bf16 %v7661_v8  ;;  %v7662_v1 = vunpack.i.l.bf16 %v7661_v8  ;;  %v7424_v19 = vld [vmem:[%s12203_s4 + $0x1a4] sm:$0xf] }
 0x5df   :  { %v2501_v41 = vsel %vm10236_vm12, %v2248_v47, 0.0  ;;  %v2283_v52 = vadd.s32 72, %v10124_v55  ;;  %v6163_v8 = vor.u32 %v7432_v43, %v6160_v18  ;;  %v2635_v4 = vunpack.c.h.b16 %v10304_v17 }
 0x5e0   :  { %v2528_v2 = vsel %vm2526_vm10, %v2501_v41, 0.0  ;;  %v2500_v54 = vsel %vm10236_vm12, %v2247_v9, 0.0  ;;  %v6088_v41 = vld [vmem:[%s12203_s4 + $0x158] sm:$0xf0]  ;;  %v2258_v33 = vmax.f32 %v9872_v53, %v7663_v37  ;;  %v2209_v22 = vsel %vm2202_vm8, %v7662_v1, %v7663_v37 }
 0x5e1   :  { %v10268_v56 = vpack.c.bf16 %v2528_v2, %v2500_v54  ;;  %2933 = vmatpush.bf16.msrb.mxu3 %v6163_v8  ;;  %v6152_v53 = vld [vmem:[%s12203_s4 + $0x1d8] sm:$0xf0]  ;;  %v6091_v15 = vor.u32 %v7414_v11, %v6088_v41  ;;  %v10344_v37 = vsel %vm2526_vm10, %v2515_v7, 0.0  ;;  %vm10373_vm5 = vcmp.lt.s32.totalorder %v2341_v32, 2 }
 0x5e2   :  { %v7651_v58 = vpop.permute.xlu1 %7650  ;;  %v2511_v20 = vsel %vm10315_vm0, %v2258_v33, 0.0  ;;  %vm10440_vm6 = vcmp.lt.s32.totalorder %v2369_v26, 2  ;;  %v6128_v26 = vld [vmem:[%s12203_s4 + $0x1a8] sm:$0xf0] }
 0x5e3   :  { %v2630_v48 = vunpack.c.l.b16 %v10268_v56  ;;  %v2631_v27 = vunpack.c.h.b16 %v10268_v56  ;;  %v7653_v21 = vunpack.i.h.bf16 %v7651_v58  ;;  %v7652_v61 = vunpack.i.l.bf16 %v7651_v58  ;;  %2900 = vmatpush.bf16.msrb.mxu2 %v6091_v15  ;;  %v7410_v15 = vld [vmem:[%s12203_s4 + $0x134] sm:$0xf]  ;;  %v6486_v56 = vld [vmem:[%s12203_s4 + $0x4b0] sm:$0xf] }
 0x5e4   :  { %v2634_v58 = vunpack.c.l.b16 %v10304_v17  ;;  %v2533_v41 = vsel %vm2526_vm10, %v2511_v20, 0.0 }
 0x5e5   :  { %v10292_v63 = vpack.c.b16 %v2632_v42, %v2630_v48  ;;  %v10298_v30 = vpack.c.b16 %v2633_v39, %v2631_v27  ;;  %v2254_v3 = vmax.f32 %v9900_v29, %v7653_v21  ;;  %v2207_v47 = vsel %vm2202_vm8, %v7652_v61, %v7653_v21  ;;  %v7676_v9 = vpop.permute.xlu0 %7675  ;;  %v7686_v21 = vpop.permute.xlu2 %7685 }
 0x5e6   :  { %v2253_v45 = vmax.f32 %v9898_v25, %v2207_v47  ;;  %v10313_v29 = vsel %vm2202_vm8, %v7672_v35, %v7673_v36  ;;  %v7678_v59 = vunpack.i.h.bf16 %v7676_v9  ;;  %v7677_v36 = vunpack.i.l.bf16 %v7676_v9 }
 0x5e7   :  { %2838 = vmatmul.bf16.vlgmr.msra.gmra.mxu2 %v10292_v63  ;;  %2872 = vmatmul.bf16.vlgmr.msra.gmra.mxu3 %v10298_v30  ;;  %v2507_v25 = vsel %vm10275_vm15, %v2254_v3, 0.0  ;;  %v2355_v35 = vand.u32 7, %v2283_v52  ;;  %v2257_v61 = vmax.f32 %v9870_v24, %v2209_v22  ;;  %v2261_v1 = vmax.f32 %v9941_v50, %v10313_v29  ;;  %v7412_v52 = vld [vmem:[%s12203_s4 + $0x144] sm:$0xf]  ;;  %v6080_v24 = vld [vmem:[%s12203_s4 + $0x148] sm:$0xf0] }
 0x5e8   :  { %v2531_v2 = vsel %vm2526_vm10, %v2507_v25, 0.0  ;;  %v2506_v54 = vsel %vm10275_vm15, %v2253_v45, 0.0  ;;  %v6155_v47 = vor.u32 %v7430_v28, %v6152_v53  ;;  %v2264_v9 = vmax.f32 %v9918_v40, %v7678_v59  ;;  %v7428_v53 = vld [vmem:[%s12203_s4 + $0x1c4] sm:$0xf] }
 0x5e9   :  { %v2545_v60 = vpack.c.bf16 %v2531_v2, %v2506_v54  ;;  %v2212_v14 = vsel %vm2202_vm8, %v7677_v36, %v7678_v59  ;;  %v7688_v8 = vunpack.i.h.bf16 %v7686_v21  ;;  %vm10366_vm4 = vcmp.lt.s32.totalorder %v2355_v35, 2  ;;  %v7408_v22 = vld [vmem:[%s12203_s4 + $0x124] sm:$0xf] }
 0x5ea   :  { %2934 = vmatpush.bf16.msrb.mxu3 %v6155_v47  ;;  %v2510_v33 = vsel %vm10315_vm0, %v2257_v61, 0.0  ;;  %v6083_v40 = vor.u32 %v7412_v52, %v6080_v24  ;;  %v2263_v2 = vmax.f32 %v9916_v10, %v2212_v14  ;;  %v7687_v59 = vunpack.i.l.bf16 %v7686_v21  ;;  %v6144_v10 = vld [vmem:[%s12203_s4 + $0x1c8] sm:$0xf0]  ;;  %v6072_v21 = vld [vmem:[%s12203_s4 + $0x138] sm:$0xf0] }
 0x5eb   :  { %v2636_v43 = vunpack.c.l.b16 %v2545_v60  ;;  %v2637_v18 = vunpack.c.h.b16 %v2545_v60  ;;  %v2638_v60 = vunpack.c.l.b16 %v10310_v23  ;;  %v2517_v51 = vsel %vm10366_vm4, %v2264_v9, 0.0 }
 0x5ec   :  { %v2284_v28 = vadd.s32 80, %v10124_v55  ;;  %2901 = vmatpush.bf16.msrb.mxu2 %v6083_v40  ;;  %v2514_v61 = vsel %vm10253_vm14, %v2261_v1, 0.0  ;;  %v2268_v20 = vmax.f32 %v9998_v38, %v7688_v8  ;;  %v2536_v47 = vsel %vm2526_vm10, %v2517_v51, 0.0  ;;  %v6136_v38 = vld [vmem:[%s12203_s4 + $0x1b8] sm:$0xf0] }
 0x5ed   :  { %v7666_v3 = vpop.permute.xlu1 %7665  ;;  %v10358_v45 = vpack.c.b16 %v2636_v43, %v2634_v58  ;;  %v10362_v50 = vpack.c.b16 %v2637_v18, %v2635_v4  ;;  %v10397_v32 = vpack.c.b16 %v2638_v60, %v2636_v43  ;;  %v2516_v52 = vsel %vm10366_vm4, %v2263_v2, 0.0 }
 0x5ee   :  { %v7668_v25 = vunpack.i.h.bf16 %v7666_v3  ;;  %v7667_v11 = vunpack.i.l.bf16 %v7666_v3  ;;  %v2214_v1 = vsel %vm2202_vm8, %v7687_v59, %v7688_v8  ;;  %v2362_v14 = vand.u32 7, %v2284_v28  ;;  %v6064_v8 = vld [vmem:[%s12203_s4 + $0x128] sm:$0xf0] }
 0x5ef   :  { %3278 = vmatmul.bf16.vlgmr.msrb.gmra.mxu0 %v10358_v45  ;;  %3312 = vmatmul.bf16.vlgmr.msrb.gmra.mxu1 %v10362_v50  ;;  %v10436_v40 = vpack.c.bf16 %v2536_v47, %v2516_v52  ;;  %v6139_v2 = vor.u32 %v7426_v62, %v6136_v38  ;;  %v10453_v28 = vpack.c.bf16 %v10344_v37, %v2514_v61  ;;  %v6456_v47 = vld [vmem:[%s12203_s4 + $0x478] sm:$0xf0]  ;;  %v7530_v52 = vld [vmem:[%s12203_s4 + $0x4f4] sm:$0xf] }
 0x5f0   :  { %v2260_v54 = vmax.f32 %v9963_v0, %v7668_v25  ;;  %v2210_v7 = vsel %vm2202_vm8, %v7667_v11, %v7668_v25  ;;  %v2547_v0 = vpack.c.bf16 %v2533_v41, %v2510_v33  ;;  %v6147_v25 = vor.u32 %v7428_v53, %v6144_v10 }
 0x5f1   :  { %v2259_v36 = vmax.f32 %v9956_v13, %v2210_v7  ;;  %v2639_v13 = vunpack.c.h.b16 %v10310_v23  ;;  %v6075_v11 = vor.u32 %v7410_v15, %v6072_v21  ;;  %vm10462_vm9 = vcmp.lt.s32.totalorder %v2362_v14, 2  ;;  %v7406_v14 = vld [vmem:[%s12203_s4 + $0x114] sm:$0xf]  ;;  %v6512_v7 = vld [vmem:[%s12203_s4 + $0x4e8] sm:$0xf0] }
 0x5f2   :  { %v2513_v35 = vsel %vm10373_vm5, %v2260_v54, 0.0  ;;  %v2640_v29 = vunpack.c.l.b16 %v2547_v0  ;;  %2935 = vmatpush.bf16.msrb.mxu3 %v6147_v25  ;;  %v6067_v54 = vor.u32 %v7408_v22, %v6064_v8  ;;  %v10470_v37 = vpack.c.b16 %v2634_v58, %v2632_v42  ;;  %v6056_v25 = vld [vmem:[%s12203_s4 + $0x118] sm:$0xf0]  ;;  %v7528_v22 = vld [vmem:[%s12203_s4 + $0x4e4] sm:$0xf] }
 0x5f3   :  { %v2534_v3 = vsel %vm2526_vm10, %v2513_v35, 0.0  ;;  %v2512_v43 = vsel %vm10373_vm5, %v2259_v36, 0.0  ;;  %v10417_v9 = vpack.c.b16 %v2639_v13, %v2637_v18  ;;  %v2641_v18 = vunpack.c.h.b16 %v2547_v0  ;;  %2902 = vmatpush.bf16.msrb.mxu2 %v6075_v11 }
 0x5f4   :  { %v10415_v24 = vpack.c.bf16 %v2534_v3, %v2512_v43  ;;  %v2267_v0 = vmax.f32 %v9996_v16, %v2214_v1  ;;  %v10476_v15 = vpack.c.b16 %v2635_v4, %v2633_v39  ;;  %v2521_v21 = vsel %vm10440_vm6, %v2268_v20, 0.0  ;;  %v6520_v1 = vld [vmem:[%s12203_s4 + $0x4f8] sm:$0xf0] }
 0x5f5   :  { %v2646_v3 = vunpack.c.l.b16 %v10436_v40  ;;  %v6131_v58 = vor.u32 %v7424_v19, %v6128_v26  ;;  %v10488_v39 = vpack.c.b16 %v2640_v29, %v2638_v60  ;;  %v10490_v17 = vpack.c.b16 %v2641_v18, %v2639_v13  ;;  %v7514_v13 = vld [vmem:[%s12203_s4 + $0x474] sm:$0xf] }
 0x5f6   :  { %v2642_v41 = vunpack.c.l.b16 %v10415_v24  ;;  %v2643_v33 = vunpack.c.h.b16 %v10415_v24  ;;  %2936 = vmatpush.bf16.msrb.mxu3 %v6139_v2  ;;  %v2538_v4 = vsel %vm2526_vm10, %v2521_v21, 0.0  ;;  %v2520_v20 = vsel %vm10440_vm6, %v2267_v0, 0.0 }
 0x5f7   :  { %2843 = vmatmul.bf16.gmra.mxu2 %v10358_v45  ;;  %2877 = vmatmul.bf16.gmra.mxu3 %v10362_v50  ;;  %v2647_v60 = vunpack.c.h.b16 %v10436_v40  ;;  %v2645_v62 = vunpack.c.h.b16 %v10453_v28  ;;  %v6459_v38 = vor.u32 %v7514_v13, %v6456_v47  ;;  %v6523_v2 = vor.u32 %v7530_v52, %v6520_v1  ;;  %v7524_v13 = vld [vmem:[%s12203_s4 + $0x4c4] sm:$0xf]  ;;  %v6496_v47 = vld [vmem:[%s12203_s4 + $0x4c8] sm:$0xf0]  ;;  %v7481_v40 = vld [vmem:[%s12203_s4 + $0x364] sm:$0xf0] }
 0x5f8   :  { %v10446_v51 = vpack.c.b16 %v2642_v41, %v2640_v29  ;;  %v10450_v36 = vpack.c.b16 %v2643_v33, %v2641_v18  ;;  %2903 = vmatpush.bf16.msrb.mxu2 %v6067_v54  ;;  %v7512_v29 = vld [vmem:[%s12203_s4 + $0x464] sm:$0xf]  ;;  %v6448_v18 = vld [vmem:[%s12203_s4 + $0x468] sm:$0xf0]  ;;  %v6059_v54 = vor.u32 %v7406_v14, %v6056_v25  ;;  %v6515_v26 = vor.u32 %v7528_v22, %v6512_v7 }
 0x5f9   :  { %v7681_v59 = vpop.permute.xlu1 %7680  ;;  %v10540_v8 = vpack.c.b16 %v2647_v60, %v2645_v62  ;;  %3622 = vmatpush.bf16.msra.mxu0 %v6459_v38  ;;  %v6451_v19 = vor.u32 %v7512_v29, %v6448_v18  ;;  %3656 = vmatpush.bf16.msra.mxu1 %v6523_v2  ;;  %v7404_v38 = vld [vmem:[%s12203_s4 + $0x104] sm:$0xf]  ;;  %v6048_v1 = vld [vmem:[%s12203_s4 + $0x108] sm:$0xf0]  ;;  %v6499_v7 = vor.u32 %v7524_v13, %v6496_v47  ;;  %v2286_v24 = vadd.s32 96, %v10124_v55 }
 0x5fa   :  { %v7683_v53 = vunpack.i.h.bf16 %v7681_v59  ;;  %v7682_v10 = vunpack.i.l.bf16 %v7681_v59  ;;  %2937 = vmatpush.bf16.msrb.mxu3 %v6131_v58  ;;  %v7422_v59 = vld [vmem:[%s12203_s4 + $0x194] sm:$0xf]  ;;  %v7420_v14 = vld [vmem:[%s12203_s4 + $0x184] sm:$0xf]  ;;  %v6051_v29 = vor.u32 %v7404_v38, %v6048_v1  ;;  %v6112_v18 = vld [vmem:[%s12203_s4 + $0x188] sm:$0xf0] }
 0x5fb   :  { %v7526_v58 = vld [vmem:[%s12203_s4 + $0x4d4] sm:$0xf]  ;;  %v6115_v2 = vor.u32 %v7420_v14, %v6112_v18  ;;  %v7483_v13 = vld [vmem:[%s12203_s4 + $0x374] sm:$0xf0]  ;;  %v6408_v14 = vld [vmem:[%s12203_s4 + $0x418] sm:$0xf0] }
 0x5fc   :  { %v2266_v16 = vmax.f32 %v10033_v34, %v7683_v53  ;;  %v2213_v61 = vsel %vm2202_vm8, %v7682_v10, %v7683_v53  ;;  %v2644_v34 = vunpack.c.l.b16 %v10453_v28  ;;  %v6120_v53 = vld [vmem:[%s12203_s4 + $0x198] sm:$0xf0]  ;;  %v10551_v10 = vpack.c.bf16 %v2538_v4, %v2520_v20  ;;  %2904 = vmatpush.bf16.msrb.mxu2 %v6059_v54  ;;  %v7508_v4 = vld [vmem:[%s12203_s4 + $0x444] sm:$0xf]  ;;  %v7502_v47 = vld [vmem:[%s12203_s4 + $0x414] sm:$0xf] }
 0x5fd   :  { %v2265_v42 = vmax.f32 %v10018_v31, %v2213_v61  ;;  %v6123_v0 = vor.u32 %v7422_v59, %v6120_v53  ;;  %v6440_v61 = vld [vmem:[%s12203_s4 + $0x458] sm:$0xf0]  ;;  %3623 = vmatpush.bf16.msra.mxu0 %v6451_v19  ;;  %3657 = vmatpush.bf16.msra.mxu1 %v6515_v26  ;;  %v10615_v53 = vpack.c.b16 %v2645_v62, %v2643_v33  ;;  %v7506_v19 = vld [vmem:[%s12203_s4 + $0x434] sm:$0xf] }
 0x5fe   :  { %v2519_v12 = vsel %vm10462_vm9, %v2266_v16, 0.0  ;;  %v10505_v23 = vpack.c.b16 %v2646_v3, %v2644_v34  ;;  %v7510_v16 = vld [vmem:[%s12203_s4 + $0x454] sm:$0xf]  ;;  %v3034_v20 = vunpack.c.l.b16 %v10551_v10  ;;  %v3035_v52 = vunpack.c.h.b16 %v10551_v10  ;;  %v6424_v26 = vld [vmem:[%s12203_s4 + $0x438] sm:$0xf0] }
 0x5ff   :  { %v2537_v43 = vsel %vm2526_vm10, %v2519_v12, 0.0  ;;  %v2518_v31 = vsel %vm10462_vm9, %v2265_v42, 0.0  ;;  %3283 = vmatmul.bf16.gmra.mxu0 %v10488_v39  ;;  %3317 = vmatmul.bf16.gmra.mxu1 %v10490_v17  ;;  %v6443_v42 = vor.u32 %v7510_v16, %v6440_v61  ;;  %v6504_v12 = vld [vmem:[%s12203_s4 + $0x4d8] sm:$0xf0]  ;;  %v10611_v59 = vpack.c.b16 %v2644_v34, %v2642_v41  ;;  %v7522_v41 = vld [vmem:[%s12203_s4 + $0x4b4] sm:$0xf] }
 0x600   :  { %v10527_v11 = vpack.c.bf16 %v2537_v43, %v2518_v31  ;;  %2938 = vmatpush.bf16.msrb.mxu3 %v6123_v0  ;;  %v6507_v43 = vor.u32 %v7526_v58, %v6504_v12  ;;  %v6432_v31 = vld [vmem:[%s12203_s4 + $0x448] sm:$0xf0]  ;;  %2905 = vmatpush.bf16.msrb.mxu2 %v6051_v29  ;;  %v6427_v33 = vor.u32 %v7506_v19, %v6424_v26  ;;  %v6488_v28 = vld [vmem:[%s12203_s4 + $0x4b8] sm:$0xf0]  ;;  %v7504_v34 = vld [vmem:[%s12203_s4 + $0x424] sm:$0xf] }
 0x601   :  { %3624 = vmatpush.bf16.msra.mxu0 %v6443_v42  ;;  %v6435_v54 = vor.u32 %v7508_v4, %v6432_v31  ;;  %v6491_v62 = vor.u32 %v7522_v41, %v6488_v28  ;;  %v6416_v0 = vld [vmem:[%s12203_s4 + $0x428] sm:$0xf0]  ;;  %v7520_v16 = vld [vmem:[%s12203_s4 + $0x4a4] sm:$0xf]  ;;  %v7691_v42 = vpop.permute.xlu0 %7690  ;;  %v2376_v4 = vand.u32 7, %v2286_v24 }
 0x602   :  { %v2648_v35 = vunpack.c.l.b16 %v10527_v11  ;;  %v2649_v21 = vunpack.c.h.b16 %v10527_v11  ;;  %3658 = vmatpush.bf16.msra.mxu1 %v6507_v43  ;;  %v6480_v61 = vld [vmem:[%s12203_s4 + $0x4a8] sm:$0xf0]  ;;  %v6419_v58 = vor.u32 %v7504_v34, %v6416_v0  ;;  %v7693_v43 = vunpack.i.h.bf16 %v7691_v42  ;;  %v6294_v31 = vld [vmem:[%s12203_s4 + $0x370] sm:$0xf]  ;;  %v7518_v29 = vld [vmem:[%s12203_s4 + $0x494] sm:$0xf] }
 0x603   :  { %v6483_v12 = vor.u32 %v7520_v16, %v6480_v61  ;;  %v7692_v38 = vunpack.i.l.bf16 %v7691_v42  ;;  %v6295_v1 = vor.u32 %v7483_v13, %v6294_v31  ;;  %v6472_v18 = vld [vmem:[%s12203_s4 + $0x498] sm:$0xf0]  ;;  %v7499_v19 = vld [vmem:[%s12203_s4 + $0x3f4] sm:$0xf0]  ;;  %v7500_v26 = vld [vmem:[%s12203_s4 + $0x404] sm:$0xf] }
 0x604   :  { %v10596_v25 = vpack.c.b16 %v3034_v20, %v2648_v35  ;;  %v10605_v22 = vpack.c.b16 %v3035_v52, %v2649_v21  ;;  %2939 = vmatpush.bf16.msrb.mxu3 %v6115_v2  ;;  %v6411_v2 = vor.u32 %v7502_v47, %v6408_v14  ;;  %v6400_v24 = vld [vmem:[%s12203_s4 + $0x408] sm:$0xf0]  ;;  %v2270_v34 = vmax.f32 %v9984_v6, %v7693_v43  ;;  %v6278_v31 = vld [vmem:[%s12203_s4 + $0x350] sm:$0xf]  ;;  %v7479_v13 = vld [vmem:[%s12203_s4 + $0x354] sm:$0xf0] }
 0x605   :  { %3625 = vmatpush.bf16.msra.mxu0 %v6435_v54  ;;  %v6475_v54 = vor.u32 %v7518_v29, %v6472_v18  ;;  %3202 = vmatpush.bf16.msra.mxu2 %v6295_v1  ;;  %v6464_v28 = vld [vmem:[%s12203_s4 + $0x488] sm:$0xf0]  ;;  %vm10683_vm11 = vcmp.lt.s32.totalorder %v2376_v4, 2  ;;  %v2215_v0 = vsel %vm2202_vm8, %v7692_v38, %v7693_v43  ;;  %v6403_v16 = vor.u32 %v7500_v26, %v6400_v24  ;;  %v6342_v47 = vld [vmem:[%s12203_s4 + $0x3d0] sm:$0xf] }
 0x606   :  { %3659 = vmatpush.bf16.msra.mxu1 %v6499_v7  ;;  %v6358_v7 = vld [vmem:[%s12203_s4 + $0x3f0] sm:$0xf]  ;;  %v10692_v42 = vpack.c.b16 %v2648_v35, %v2646_v3  ;;  %v10698_v6 = vpack.c.b16 %v2649_v21, %v2647_v60  ;;  %v6286_v3 = vld [vmem:[%s12203_s4 + $0x360] sm:$0xf]  ;;  %v6279_v38 = vor.u32 %v7479_v13, %v6278_v31  ;;  %v7495_v1 = vld [vmem:[%s12203_s4 + $0x3d4] sm:$0xf0] }
 0x607   :  { %2848 = vmatmul.bf16.gmra.mxu2 %v10488_v39  ;;  %2882 = vmatmul.bf16.gmra.mxu3 %v10490_v17  ;;  %v6359_v41 = vor.u32 %v7499_v19, %v6358_v7  ;;  %v6350_v60 = vld [vmem:[%s12203_s4 + $0x3e0] sm:$0xf]  ;;  %v6287_v11 = vor.u32 %v7481_v40, %v6286_v3  ;;  %v6343_v14 = vor.u32 %v7495_v1, %v6342_v47  ;;  %v7477_v19 = vld [vmem:[%s12203_s4 + $0x344] sm:$0xf0]  ;;  %v6262_v26 = vld [vmem:[%s12203_s4 + $0x330] sm:$0xf] }
 0x608   :  { %v6270_v7 = vld [vmem:[%s12203_s4 + $0x340] sm:$0xf]  ;;  %v7475_v24 = vld [vmem:[%s12203_s4 + $0x334] sm:$0xf0]  ;;  %v6584_v3 = vld [vmem:[%s12203_s4 + $0x78] sm:$0xf0] }
 0x609   :  { %3626 = vmatpush.bf16.msra.mxu0 %v6427_v33  ;;  %v7516_v33 = vld [vmem:[%s12203_s4 + $0x484] sm:$0xf]  ;;  %3236 = vmatpush.bf16.msra.mxu3 %v6359_v41  ;;  %v6334_v10 = vld [vmem:[%s12203_s4 + $0x3c0] sm:$0xf]  ;;  %v7402_v40 = vld [vmem:[%s12203_s4 + $0xf4] sm:$0xf] }
 0x60a   :  { %3660 = vmatpush.bf16.msra.mxu1 %v6491_v62  ;;  %v6467_v61 = vor.u32 %v7516_v33, %v6464_v28  ;;  %3203 = vmatpush.bf16.msra.mxu2 %v6287_v11  ;;  %v7491_v33 = vld [vmem:[%s12203_s4 + $0x3b4] sm:$0xf0]  ;;  %v7473_v62 = vld [vmem:[%s12203_s4 + $0x324] sm:$0xf0]  ;;  %v6648_v11 = vld [vmem:[%s12203_s4 + $0xf8] sm:$0xf0] }
 0x60b   :  { %v7384_v31 = vld [vmem:[%s12203_s4 + $0x64] sm:$0xf]  ;;  %v6576_v13 = vld [vmem:[%s12203_s4 + $0x68] sm:$0xf0] }
 0x60c   :  { %v7400_v47 = vld [vmem:[%s12203_s4 + $0xe4] sm:$0xf]  ;;  %v6640_v1 = vld [vmem:[%s12203_s4 + $0xe8] sm:$0xf0] }
 0x60d   :  { %3627 = vmatpush.bf16.msra.mxu0 %v6419_v58  ;;  %v2523_v58 = vsel %vm10683_vm11, %v2270_v34, 0.0  ;;  %v6254_v34 = vld [vmem:[%s12203_s4 + $0x320] sm:$0xf] }
 0x60e   :  { %3661 = vmatpush.bf16.msra.mxu1 %v6483_v12  ;;  %v2269_v12 = vmax.f32 %v9982_v57, %v2215_v0  ;;  %v7497_v57 = vld [vmem:[%s12203_s4 + $0x3e4] sm:$0xf0]  ;;  %v2539_v21 = vsel %vm2526_vm10, %v2523_v58, 0.0  ;;  %3204 = vmatpush.bf16.msra.mxu2 %v6279_v38  ;;  %v6255_v0 = vor.u32 %v7473_v62, %v6254_v34  ;;  %v6579_v38 = vor.u32 %v7384_v31, %v6576_v13  ;;  %v7396_v34 = vld [vmem:[%s12203_s4 + $0xc4] sm:$0xf] }
 0x60f   :  { %3288 = vmatmul.bf16.gmra.mxu0 %v10611_v59  ;;  %3322 = vmatmul.bf16.gmra.mxu1 %v10615_v53  ;;  %v6351_v35 = vor.u32 %v7497_v57, %v6350_v60  ;;  %v6651_v57 = vor.u32 %v7402_v40, %v6648_v11  ;;  %v7485_v40 = vld [vmem:[%s12203_s4 + $0x384] sm:$0xf0] }
 0x610   :  { %v2522_v4 = vsel %vm10683_vm11, %v2269_v12, 0.0  ;;  %v7386_v12 = vld [vmem:[%s12203_s4 + $0x74] sm:$0xf] }
 0x611   :  { %3628 = vmatpush.bf16.msra.mxu0 %v6411_v2  ;;  %3237 = vmatpush.bf16.msra.mxu3 %v6351_v35  ;;  %v10720_v43 = vpack.c.bf16 %v2539_v21, %v2522_v4  ;;  %v6587_v60 = vor.u32 %v7386_v12, %v6584_v3  ;;  %v6246_v35 = vld [vmem:[%s12203_s4 + $0x310] sm:$0xf]  ;;  %v7471_v21 = vld [vmem:[%s12203_s4 + $0x314] sm:$0xf0]  ;;  %v6302_v3 = vld [vmem:[%s12203_s4 + $0x380] sm:$0xf] }
 0x612   :  { %3662 = vmatpush.bf16.msra.mxu1 %v6475_v54  ;;  %v6247_v4 = vor.u32 %v7471_v21, %v6246_v35  ;;  %v6303_v11 = vor.u32 %v7485_v40, %v6302_v3  ;;  %v7394_v35 = vld [vmem:[%s12203_s4 + $0xb4] sm:$0xf]  ;;  %v6616_v21 = vld [vmem:[%s12203_s4 + $0xb8] sm:$0xf0] }
 0x613   :  { %v3036_v29 = vunpack.c.l.b16 %v10720_v43  ;;  %v3037_v18 = vunpack.c.h.b16 %v10720_v43  ;;  %v6619_v31 = vor.u32 %v7394_v35, %v6616_v21 }
 0x615   :  { %3629 = vmatpush.bf16.msra.mxu0 %v6403_v16  ;;  %3238 = vmatpush.bf16.msra.mxu3 %v6343_v14  ;;  %v10742_v2 = vpack.c.b16 %v3036_v29, %v3034_v20  ;;  %v10748_v54 = vpack.c.b16 %v3037_v18, %v3035_v52  ;;  %v6271_v20 = vor.u32 %v7477_v19, %v6270_v7  ;;  %v7493_v52 = vld [vmem:[%s12203_s4 + $0x3c4] sm:$0xf0]  ;;  %v6318_v16 = vld [vmem:[%s12203_s4 + $0x3a0] sm:$0xf]  ;;  %v6310_v14 = vld [vmem:[%s12203_s4 + $0x390] sm:$0xf] }
 0x616   :  { %3663 = vmatpush.bf16.msra.mxu1 %v6467_v61  ;;  %v6335_v41 = vor.u32 %v7493_v52, %v6334_v10  ;;  %v7489_v61 = vld [vmem:[%s12203_s4 + $0x3a4] sm:$0xf0]  ;;  %v7487_v7 = vld [vmem:[%s12203_s4 + $0x394] sm:$0xf0]  ;;  %v6643_v19 = vor.u32 %v7400_v47, %v6640_v1  ;;  %v7382_v10 = vld [vmem:[%s12203_s4 + $0x54] sm:$0xf]  ;;  %v7696_v47 = vpop.permute.xlu1 %7695 }
 0x617   :  { %2853 = vmatmul.bf16.gmra.mxu2 %v10611_v59  ;;  %2887 = vmatmul.bf16.gmra.mxu3 %v10615_v53  ;;  %v6319_v58 = vor.u32 %v7489_v61, %v6318_v16  ;;  %v6568_v52 = vld [vmem:[%s12203_s4 + $0x58] sm:$0xf0]  ;;  %v6238_v16 = vld [vmem:[%s12203_s4 + $0x300] sm:$0xf]  ;;  %v7469_v61 = vld [vmem:[%s12203_s4 + $0x304] sm:$0xf0] }
 0x618   :  { %3205 = vmatpush.bf16.msra.mxu2 %v6271_v20  ;;  %v6311_v20 = vor.u32 %v7487_v7, %v6310_v14  ;;  %v6239_v12 = vor.u32 %v7469_v61, %v6238_v16  ;;  %v6544_v1 = vld [vmem:[%s12203_s4 + $0x28] sm:$0xf0]  ;;  %v7392_v14 = vld [vmem:[%s12203_s4 + $0xa4] sm:$0xf] }
 0x619   :  { %3239 = vmatpush.bf16.msra.mxu3 %v6335_v41  ;;  %3929 = vmatpush.bf16.msrb.mxu0 %v6587_v60  ;;  %v6571_v41 = vor.u32 %v7382_v10, %v6568_v52  ;;  %v7378_v60 = vld [vmem:[%s12203_s4 + $0x34] sm:$0xf]  ;;  %v7515_v10 = vld [vmem:[%s12203_s4 + $0x474] sm:$0xf0]  ;;  %v7698_v52 = vunpack.i.h.bf16 %v7696_v47 }
 0x61a   :  { %3963 = vmatpush.bf16.msrb.mxu1 %v6651_v57  ;;  %v6552_v57 = vld [vmem:[%s12203_s4 + $0x38] sm:$0xf0] }
 0x61b   :  { %v2272_v40 = vmax.f32 %v10075_v46, %v7698_v52  ;;  %v6528_v46 = vld [vmem:[%s12203_s4 + $0x8] sm:$0xf0] }
 0x61d   :  { %3930 = vmatpush.bf16.msrb.mxu0 %v6579_v38  ;;  %v7376_v38 = vld [vmem:[%s12203_s4 + $0x24] sm:$0xf] }
 0x61e   :  { %3964 = vmatpush.bf16.msrb.mxu1 %v6643_v19  ;;  %v6547_v7 = vor.u32 %v7376_v38, %v6544_v1  ;;  %v6608_v19 = vld [vmem:[%s12203_s4 + $0xa8] sm:$0xf0] }
 0x61f   :  { %3293 = vmatmul.bf16.gmra.mxu0 %v10692_v42  ;;  %3327 = vmatmul.bf16.gmra.mxu1 %v10698_v6  ;;  %v6592_v38 = vld [vmem:[%s12203_s4 + $0x88] sm:$0xf0] }
 0x621   :  { %3931 = vmatpush.bf16.msrb.mxu0 %v6571_v41  ;;  %v6611_v41 = vor.u32 %v7392_v14, %v6608_v19 }
 0x627   :  { %2858 = vmatmul.bf16.gmra.mxu2 %v10692_v42  ;;  %2892 = vmatmul.bf16.gmra.mxu3 %v10698_v6 }
 0x62f   :  { %3298 = vmatmul.bf16.gmra.mxu0 %v10742_v2  ;;  %3332 = vmatmul.bf16.gmra.mxu1 %v10748_v54 }
 0x637   :  { %2906 = vmatmul.bf16.vlgmr.msrb.gmra.mxu2 %v10292_v63  ;;  %2940 = vmatmul.bf16.vlgmr.msrb.gmra.mxu3 %v10298_v30  ;;  %v6263_v63 = vor.u32 %v7475_v24, %v6262_v26  ;;  %v6326_v30 = vld [vmem:[%s12203_s4 + $0x3b0] sm:$0xf]  ;;  %v7398_v26 = vld [vmem:[%s12203_s4 + $0xd4] sm:$0xf]  ;;  %v6632_v24 = vld [vmem:[%s12203_s4 + $0xd8] sm:$0xf0] }
 0x638   :  { %v6327_v28 = vor.u32 %v7491_v33, %v6326_v30  ;;  %v2287_v30 = vadd.s32 104, %v10124_v55  ;;  %v7380_v33 = vld [vmem:[%s12203_s4 + $0x44] sm:$0xf] }
 0x639   :  { %3206 = vmatpush.bf16.msra.mxu2 %v6263_v63  ;;  %v6635_v63 = vor.u32 %v7398_v26, %v6632_v24  ;;  %v7697_v26 = vunpack.i.l.bf16 %v7696_v47 }
 0x63a   :  { %3240 = vmatpush.bf16.msra.mxu3 %v6327_v28  ;;  %v6560_v28 = vld [vmem:[%s12203_s4 + $0x48] sm:$0xf0]  ;;  %v2383_v13 = vand.u32 7, %v2287_v30  ;;  %v6536_v30 = vld [vmem:[%s12203_s4 + $0x18] sm:$0xf0] }
 0x63b   :  { %3965 = vmatpush.bf16.msrb.mxu1 %v6635_v63  ;;  %v6563_v62 = vor.u32 %v7380_v33, %v6560_v28  ;;  %v7374_v63 = vld [vmem:[%s12203_s4 + $0x14] sm:$0xf] }
 0x63c   :  { %v7390_v33 = vld [vmem:[%s12203_s4 + $0x94] sm:$0xf]  ;;  %v6539_v28 = vor.u32 %v7374_v63, %v6536_v30  ;;  %vm10927_vm12 = vcmp.lt.s32.totalorder %v2383_v13, 2  ;;  %v7529_v63 = vld [vmem:[%s12203_s4 + $0x4e4] sm:$0xf0]  ;;  %v7701_v30 = vpop.permute.xlu2 %7700 }
 0x63d   :  { %3207 = vmatpush.bf16.msra.mxu2 %v6255_v0  ;;  %v6624_v0 = vld [vmem:[%s12203_s4 + $0xc8] sm:$0xf0]  ;;  %3932 = vmatpush.bf16.msrb.mxu0 %v6563_v62  ;;  %v6518_v62 = vld [vmem:[%s12203_s4 + $0x4f0] sm:$0xf]  ;;  %v2525_v1 = vsel %vm10927_vm12, %v2272_v40, 0.0 }
 0x63e   :  { %3241 = vmatpush.bf16.msra.mxu3 %v6319_v58  ;;  %v6627_v58 = vor.u32 %v7396_v34, %v6624_v0  ;;  %v6600_v34 = vld [vmem:[%s12203_s4 + $0x98] sm:$0xf0]  ;;  %v7531_v0 = vld [vmem:[%s12203_s4 + $0x4f4] sm:$0xf0] }
 0x63f   :  { %3630 = vmatmul.bf16.vlgmr.msra.gmra.mxu0 %v10397_v32  ;;  %3664 = vmatmul.bf16.vlgmr.msra.gmra.mxu1 %v10417_v9 }
 0x640   :  { %3966 = vmatpush.bf16.msrb.mxu1 %v6627_v58  ;;  %v6603_v58 = vor.u32 %v7390_v33, %v6600_v34 }
 0x641   :  { %3208 = vmatpush.bf16.msra.mxu2 %v6247_v4  ;;  %v6555_v4 = vor.u32 %v7378_v60, %v6552_v57  ;;  %v2216_v60 = vsel %vm2202_vm8, %v7697_v26, %v7698_v52  ;;  %v2540_v52 = vsel %vm2526_vm10, %v2525_v1, 0.0 }
 0x642   :  { %3242 = vmatpush.bf16.msra.mxu3 %v6311_v20  ;;  %v6454_v20 = vld [vmem:[%s12203_s4 + $0x470] sm:$0xf]  ;;  %v2271_v13 = vmax.f32 %v10073_v44, %v2216_v60  ;;  %v7513_v44 = vld [vmem:[%s12203_s4 + $0x464] sm:$0xf0] }
 0x643   :  { %3933 = vmatpush.bf16.msrb.mxu0 %v6555_v4  ;;  %v6455_v24 = vor.u32 %v7515_v10, %v6454_v20  ;;  %v7372_v4 = vld [vmem:[%s12203_s4 + $0x4] sm:$0xf] }
 0x644   :  { %3967 = vmatpush.bf16.msrb.mxu1 %v6619_v31  ;;  %v7388_v31 = vld [vmem:[%s12203_s4 + $0x84] sm:$0xf]  ;;  %v6531_v47 = vor.u32 %v7372_v4, %v6528_v46  ;;  %v2524_v26 = vsel %vm10927_vm12, %v2271_v13, 0.0  ;;  %v7511_v4 = vld [vmem:[%s12203_s4 + $0x454] sm:$0xf0] }
 0x645   :  { %3209 = vmatpush.bf16.msra.mxu2 %v6239_v12  ;;  %v6519_v12 = vor.u32 %v7531_v0, %v6518_v62  ;;  %v6595_v14 = vor.u32 %v7388_v31, %v6592_v38  ;;  %v2554_v62 = vpack.c.bf16 %v2540_v52, %v2524_v26 }
 0x646   :  { %3243 = vmatpush.bf16.msra.mxu3 %v6303_v11 }
 0x647   :  { %2911 = vmatmul.bf16.gmra.mxu2 %v10358_v45  ;;  %2945 = vmatmul.bf16.gmra.mxu3 %v10362_v50  ;;  %v3372_v60 = vunpack.c.l.b16 %v2554_v62  ;;  %v3373_v11 = vunpack.c.h.b16 %v2554_v62  ;;  %v6494_v62 = vld [vmem:[%s12203_s4 + $0x4c0] sm:$0xf] }
 0x648   :  { %3934 = vmatpush.bf16.msrb.mxu0 %v6547_v7  ;;  %3968 = vmatpush.bf16.msrb.mxu1 %v6611_v41  ;;  %v6446_v7 = vld [vmem:[%s12203_s4 + $0x460] sm:$0xf] }
 0x649   :  { %3554 = vmatpush.bf16.msrb.mxu2 %v6455_v24  ;;  %v6447_v19 = vor.u32 %v7513_v44, %v6446_v7  ;;  %v6510_v24 = vld [vmem:[%s12203_s4 + $0x4e0] sm:$0xf]  ;;  %v10994_v7 = vpack.c.b16 %v3373_v11, %v3037_v18  ;;  %v7527_v44 = vld [vmem:[%s12203_s4 + $0x4d4] sm:$0xf0] }
 0x64a   :  { %3588 = vmatpush.bf16.msrb.mxu3 %v6519_v12  ;;  %v6511_v33 = vor.u32 %v7529_v63, %v6510_v24 }
 0x64c   :  { %3935 = vmatpush.bf16.msrb.mxu0 %v6539_v28  ;;  %3969 = vmatpush.bf16.msrb.mxu1 %v6603_v58  ;;  %v2292_v58 = vand.u32 7, %v10124_v55 }
 0x64d   :  { %3555 = vmatpush.bf16.msrb.mxu2 %v6447_v19 }
 0x64e   :  { %3589 = vmatpush.bf16.msrb.mxu3 %v6511_v33  ;;  %vm10982_vm13 = vcmp.lt.s32.totalorder %v2292_v58, 2  ;;  %v6430_v33 = vld [vmem:[%s12203_s4 + $0x440] sm:$0xf] }
 0x64f   :  { %3635 = vmatmul.bf16.gmra.mxu0 %v10446_v51  ;;  %3669 = vmatmul.bf16.gmra.mxu1 %v10450_v36 }
 0x650   :  { %3936 = vmatpush.bf16.msrb.mxu0 %v6531_v47  ;;  %3970 = vmatpush.bf16.msrb.mxu1 %v6595_v14  ;;  %v10990_v14 = vpack.c.b16 %v3372_v60, %v3036_v29 }
 0x657   :  { %2916 = vmatmul.bf16.gmra.mxu2 %v10488_v39  ;;  %2950 = vmatmul.bf16.gmra.mxu3 %v10490_v17 }
 0x65f   :  { %3640 = vmatmul.bf16.gmra.mxu0 %v10505_v23  ;;  %3674 = vmatmul.bf16.gmra.mxu1 %v10540_v8 }
 0x667   :  { %2921 = vmatmul.bf16.gmra.mxu2 %v10611_v59  ;;  %2955 = vmatmul.bf16.gmra.mxu3 %v10615_v53 }
 0x66a   :  { %v2839_v16 = vpop.f32.mrf.mxu2  ;;  %v2873_v61 = vpop.f32.mrf.mxu3 }
 0x66b   :  { %v10923_v3 = vadd.f32 %v2873_v61, %v2839_v16  ;;  %v7703_v16 = vunpack.i.h.bf16 %v7701_v30  ;;  %v7702_v61 = vunpack.i.l.bf16 %v7701_v30 }
 0x66c   :  { %v3279_v57 = vpop.f32.mrf.mxu0  ;;  %v3313_v35 = vpop.f32.mrf.mxu1 }
 0x66d   :  { %v10931_v21 = vadd.f32 %v3313_v35, %v3279_v57  ;;  %v6438_v35 = vld [vmem:[%s12203_s4 + $0x450] sm:$0xf]  ;;  %v2246_v46 = vmax.f32 %v10079_v49, %v7703_v16  ;;  %v2203_v31 = vsel %vm2202_vm8, %v7702_v61, %v7703_v16  ;;  %v7525_v16 = vld [vmem:[%s12203_s4 + $0x4c4] sm:$0xf0] }
 0x66e   :  { %v6439_v13 = vor.u32 %v7511_v4, %v6438_v35  ;;  %v6502_v49 = vld [vmem:[%s12203_s4 + $0x4d0] sm:$0xf]  ;;  %v2245_v19 = vmax.f32 %v10077_v5, %v2203_v31  ;;  %v6495_v61 = vor.u32 %v7525_v16, %v6494_v62  ;;  %v6712_v62 = vld [vmem:[%s12203_s4 + $0x278] sm:$0xf0]  ;;  %v7466_v16 = vld [vmem:[%s12203_s4 + $0x2f4] sm:$0xf] }
 0x66f   :  { %3645 = vmatmul.bf16.gmra.mxu0 %v10596_v25  ;;  %3679 = vmatmul.bf16.gmra.mxu1 %v10605_v22  ;;  %v2499_v29 = vsel %vm10982_vm13, %v2246_v46, 0.0  ;;  %v6422_v31 = vld [vmem:[%s12203_s4 + $0x430] sm:$0xf] }
 0x670   :  { %3556 = vmatpush.bf16.msrb.mxu2 %v6439_v13  ;;  %v2498_v52 = vsel %vm10982_vm13, %v2245_v19, 0.0  ;;  %v7507_v13 = vld [vmem:[%s12203_s4 + $0x434] sm:$0xf0] }
 0x671   :  { %v6423_v55 = vor.u32 %v7507_v13, %v6422_v31  ;;  %v7503_v31 = vld [vmem:[%s12203_s4 + $0x414] sm:$0xf0] }
 0x672   :  { %v2841_v20 = vpop.f32.mrf.mxu2  ;;  %v2875_v10 = vpop.f32.mrf.mxu3 }
 0x673   :  { %v10959_v41 = vadd.f32 %v2875_v10, %v2841_v20  ;;  %v6503_v20 = vor.u32 %v7527_v44, %v6502_v49  ;;  %v2527_v10 = vsel %vm2526_vm10, %v2499_v29, 0.0  ;;  %v6414_v29 = vld [vmem:[%s12203_s4 + $0x420] sm:$0xf] }
 0x674   :  { %v3281_v28 = vpop.f32.mrf.mxu0  ;;  %v3315_v34 = vpop.f32.mrf.mxu1  ;;  %v2541_v63 = vpack.c.bf16 %v2527_v10, %v2498_v52 }
 0x675   :  { %12644 = vst [vmem:[#allocation53_spill] sm:$0xff] %v10959_v41  ;;  %v10967_v0 = vadd.f32 %v3315_v34, %v3281_v28  ;;  %3590 = vmatpush.bf16.msrb.mxu3 %v6503_v20  ;;  %v7509_v28 = vld [vmem:[%s12203_s4 + $0x444] sm:$0xf0] }
 0x676   :  { %v6431_v34 = vor.u32 %v7509_v28, %v6430_v33  ;;  %v3691_v58 = vunpack.c.l.b16 %v2541_v63 }
 0x677   :  { %2926 = vmatmul.bf16.gmra.mxu2 %v10692_v42  ;;  %2960 = vmatmul.bf16.gmra.mxu3 %v10698_v6 }
 0x678   :  { %3557 = vmatpush.bf16.msrb.mxu2 %v6431_v34  ;;  %v11032_v35 = vpack.c.b16 %v2630_v48, %v3691_v58  ;;  %v7523_v48 = vld [vmem:[%s12203_s4 + $0x4b4] sm:$0xf0]  ;;  %v7450_v34 = vld [vmem:[%s12203_s4 + $0x274] sm:$0xf]  ;;  %v6776_v58 = vld [vmem:[%s12203_s4 + $0x2f8] sm:$0xf0] }
 0x679   :  { %3591 = vmatpush.bf16.msrb.mxu3 %v6495_v61  ;;  %v6715_v61 = vor.u32 %v7450_v34, %v6712_v62 }
 0x67a   :  { %v2844_v12 = vpop.f32.mrf.mxu2  ;;  %v2878_v40 = vpop.f32.mrf.mxu3 }
 0x67b   :  { %v10972_v57 = vadd.f32 %v2878_v40, %v2844_v12  ;;  %v3692_v12 = vunpack.c.h.b16 %v2541_v63  ;;  %4225 = vmatpush.bf16.msra.mxu0 %v6715_v61 }
 0x67c   :  { %v3284_v47 = vpop.f32.mrf.mxu0  ;;  %v3318_v38 = vpop.f32.mrf.mxu1  ;;  %3558 = vmatpush.bf16.msrb.mxu2 %v6423_v55 }
 0x67d   :  { %v10986_v1 = vadd.f32 %v3318_v38, %v3284_v47  ;;  %v11036_v4 = vpack.c.b16 %v2631_v27, %v3692_v12  ;;  %v6487_v27 = vor.u32 %v7523_v48, %v6486_v56 }
 0x67f   :  { %3650 = vmatmul.bf16.gmra.mxu0 %v10990_v14  ;;  %3684 = vmatmul.bf16.gmra.mxu1 %v10994_v7 }
 0x680   :  { %3592 = vmatpush.bf16.msrb.mxu3 %v6487_v27  ;;  %v7448_v27 = vld [vmem:[%s12203_s4 + $0x264] sm:$0xf] }
 0x682   :  { %v2846_v43 = vpop.f32.mrf.mxu2  ;;  %v2880_v18 = vpop.f32.mrf.mxu3 }
 0x683   :  { %v11010_v26 = vadd.f32 %v2880_v18, %v2846_v43  ;;  %v7505_v43 = vld [vmem:[%s12203_s4 + $0x424] sm:$0xf0] }
 0x684   :  { %v3286_v24 = vpop.f32.mrf.mxu0  ;;  %v3320_v5 = vpop.f32.mrf.mxu1  ;;  %v6415_v18 = vor.u32 %v7505_v43, %v6414_v29  ;;  %v6470_v29 = vld [vmem:[%s12203_s4 + $0x490] sm:$0xf]  ;;  %v7519_v43 = vld [vmem:[%s12203_s4 + $0x494] sm:$0xf0] }
 0x685   :  { %12647 = vst [vmem:[#allocation54_spill] sm:$0xff] %v11010_v26  ;;  %v11012_v30 = vadd.f32 %v3320_v5, %v3286_v24 }
 0x686   :  { %3559 = vmatpush.bf16.msrb.mxu2 %v6415_v18 }
 0x687   :  { %3210 = vmatmul.bf16.vlgmr.msra.gmra.mxu2 %v10358_v45  ;;  %3244 = vmatmul.bf16.vlgmr.msra.gmra.mxu3 %v10362_v50 }
 0x68a   :  { %v2849_v40 = vpop.f32.mrf.mxu2  ;;  %v2883_v60 = vpop.f32.mrf.mxu3 }
 0x68b   :  { %v11028_v11 = vadd.f32 %v2883_v60, %v2849_v40  ;;  %v6779_v60 = vor.u32 %v7466_v16, %v6776_v58  ;;  %v7444_v58 = vld [vmem:[%s12203_s4 + $0x244] sm:$0xf] }
 0x68c   :  { %v3289_v45 = vpop.f32.mrf.mxu0  ;;  %v3323_v50 = vpop.f32.mrf.mxu1 }
 0x68d   :  { %v11038_v46 = vadd.f32 %v3323_v50, %v3289_v45  ;;  %v6406_v50 = vld [vmem:[%s12203_s4 + $0x410] sm:$0xf]  ;;  %4259 = vmatpush.bf16.msra.mxu1 %v6779_v60 }
 0x68e   :  { %v6407_v13 = vor.u32 %v7503_v31, %v6406_v50  ;;  %v6752_v50 = vld [vmem:[%s12203_s4 + $0x2c8] sm:$0xf0]  ;;  %v6398_v31 = vld [vmem:[%s12203_s4 + $0x400] sm:$0xf] }
 0x68f   :  { %3937 = vmatmul.bf16.vlgmr.msrb.gmra.mxu0 %v11032_v35  ;;  %3971 = vmatmul.bf16.vlgmr.msrb.gmra.mxu1 %v11036_v4 }
 0x690   :  { %3560 = vmatpush.bf16.msrb.mxu2 %v6407_v13  ;;  %v7501_v13 = vld [vmem:[%s12203_s4 + $0x404] sm:$0xf0] }
 0x692   :  { %v2851_v47 = vpop.f32.mrf.mxu2  ;;  %v2885_v38 = vpop.f32.mrf.mxu3 }
 0x693   :  { %v11054_v49 = vadd.f32 %v2885_v38, %v2851_v47  ;;  %v6704_v47 = vld [vmem:[%s12203_s4 + $0x268] sm:$0xf0]  ;;  %v7464_v38 = vld [vmem:[%s12203_s4 + $0x2e4] sm:$0xf] }
 0x694   :  { %v3291_v44 = vpop.f32.mrf.mxu0  ;;  %v3325_v19 = vpop.f32.mrf.mxu1 }
 0x695   :  { %v11056_v20 = vadd.f32 %v3325_v19, %v3291_v44  ;;  %v6707_v44 = vor.u32 %v7448_v27, %v6704_v47  ;;  %v6768_v19 = vld [vmem:[%s12203_s4 + $0x2e8] sm:$0xf0]  ;;  %v6462_v27 = vld [vmem:[%s12203_s4 + $0x480] sm:$0xf]  ;;  %v7517_v47 = vld [vmem:[%s12203_s4 + $0x484] sm:$0xf0] }
 0x696   :  { %v6771_v18 = vor.u32 %v7464_v38, %v6768_v19  ;;  %v7442_v38 = vld [vmem:[%s12203_s4 + $0x234] sm:$0xf]  ;;  %v6680_v19 = vld [vmem:[%s12203_s4 + $0x238] sm:$0xf0] }
 0x697   :  { %3215 = vmatmul.bf16.gmra.mxu2 %v10488_v39  ;;  %3249 = vmatmul.bf16.gmra.mxu3 %v10490_v17  ;;  %v6478_v39 = vld [vmem:[%s12203_s4 + $0x4a0] sm:$0xf]  ;;  %v7521_v17 = vld [vmem:[%s12203_s4 + $0x4a4] sm:$0xf0] }
 0x698   :  { %v6479_v5 = vor.u32 %v7521_v17, %v6478_v39  ;;  %4226 = vmatpush.bf16.msra.mxu0 %v6707_v44  ;;  %v6760_v17 = vld [vmem:[%s12203_s4 + $0x2d8] sm:$0xf0]  ;;  %4260 = vmatpush.bf16.msra.mxu1 %v6771_v18  ;;  %v6463_v44 = vor.u32 %v7517_v47, %v6462_v27  ;;  %v7403_v27 = vld [vmem:[%s12203_s4 + $0xf4] sm:$0xf0] }
 0x69a   :  { %v2854_v10 = vpop.f32.mrf.mxu2  ;;  %v2888_v52 = vpop.f32.mrf.mxu3  ;;  %3593 = vmatpush.bf16.msrb.mxu3 %v6479_v5 }
 0x69b   :  { %v11066_v24 = vadd.f32 %v2888_v52, %v2854_v10  ;;  %v6471_v10 = vor.u32 %v7519_v43, %v6470_v29  ;;  %v7462_v52 = vld [vmem:[%s12203_s4 + $0x2d4] sm:$0xf]  ;;  %v6744_v43 = vld [vmem:[%s12203_s4 + $0x2b8] sm:$0xf0] }
 0x69c   :  { %v3294_v63 = vpop.f32.mrf.mxu0  ;;  %v3328_v33 = vpop.f32.mrf.mxu1  ;;  %v7458_v29 = vld [vmem:[%s12203_s4 + $0x2b4] sm:$0xf] }
 0x69d   :  { %v11074_v28 = vadd.f32 %v3328_v33, %v3294_v63  ;;  %v6763_v33 = vor.u32 %v7462_v52, %v6760_v17 }
 0x69e   :  { %3594 = vmatpush.bf16.msrb.mxu3 %v6471_v10 }
 0x69f   :  { %3942 = vmatmul.bf16.gmra.mxu0 %v10470_v37  ;;  %3976 = vmatmul.bf16.gmra.mxu1 %v10476_v15 }
 0x6a0   :  { %4261 = vmatpush.bf16.msra.mxu1 %v6763_v33  ;;  %v6672_v33 = vld [vmem:[%s12203_s4 + $0x228] sm:$0xf0] }
 0x6a2   :  { %v2856_v12 = vpop.f32.mrf.mxu2  ;;  %v2890_v40 = vpop.f32.mrf.mxu3  ;;  %3595 = vmatpush.bf16.msrb.mxu3 %v6463_v44 }
 0x6a3   :  { %v11090_v45 = vadd.f32 %v2890_v40, %v2856_v12  ;;  %v6688_v12 = vld [vmem:[%s12203_s4 + $0x248] sm:$0xf0]  ;;  %v7460_v40 = vld [vmem:[%s12203_s4 + $0x2c4] sm:$0xf] }
 0x6a4   :  { %v3296_v55 = vpop.f32.mrf.mxu0  ;;  %v3330_v56 = vpop.f32.mrf.mxu1  ;;  %v6691_v60 = vor.u32 %v7444_v58, %v6688_v12  ;;  %v6736_v58 = vld [vmem:[%s12203_s4 + $0x2a8] sm:$0xf0]  ;;  %v6582_v12 = vld [vmem:[%s12203_s4 + $0x70] sm:$0xf] }
 0x6a5   :  { %12648 = vst [vmem:[#allocation82_spill] sm:$0xff] %v11090_v45  ;;  %v11098_v48 = vadd.f32 %v3330_v56, %v3296_v55  ;;  %v6755_v55 = vor.u32 %v7460_v40, %v6752_v50  ;;  %v6399_v56 = vor.u32 %v7501_v13, %v6398_v31  ;;  %v7387_v40 = vld [vmem:[%s12203_s4 + $0x74] sm:$0xf0]  ;;  %v7454_v31 = vld [vmem:[%s12203_s4 + $0x294] sm:$0xf] }
 0x6a6   :  { %v6583_v50 = vor.u32 %v7387_v40, %v6582_v12 }
 0x6a7   :  { %3220 = vmatmul.bf16.gmra.mxu2 %v10611_v59  ;;  %3254 = vmatmul.bf16.gmra.mxu3 %v10615_v53  ;;  %v7446_v59 = vld [vmem:[%s12203_s4 + $0x254] sm:$0xf]  ;;  %v6696_v53 = vld [vmem:[%s12203_s4 + $0x258] sm:$0xf0] }
 0x6a8   :  { %v6699_v39 = vor.u32 %v7446_v59, %v6696_v53  ;;  %4262 = vmatpush.bf16.msra.mxu1 %v6755_v55  ;;  %3561 = vmatpush.bf16.msrb.mxu2 %v6399_v56  ;;  %v6683_v59 = vor.u32 %v7442_v38, %v6680_v19  ;;  %v6747_v53 = vor.u32 %v7458_v29, %v6744_v43  ;;  %v6728_v55 = vld [vmem:[%s12203_s4 + $0x298] sm:$0xf0]  ;;  %v6646_v56 = vld [vmem:[%s12203_s4 + $0xf0] sm:$0xf] }
 0x6a9   :  { %v6731_v44 = vor.u32 %v7454_v31, %v6728_v55  ;;  %v6647_v19 = vor.u32 %v7403_v27, %v6646_v56 }
 0x6aa   :  { %v2859_v5 = vpop.f32.mrf.mxu2  ;;  %v2893_v63 = vpop.f32.mrf.mxu3  ;;  %4227 = vmatpush.bf16.msra.mxu0 %v6699_v39 }
 0x6ab   :  { %v11132_v34 = vadd.f32 %v2893_v63, %v2859_v5  ;;  %v7440_v63 = vld [vmem:[%s12203_s4 + $0x224] sm:$0xf]  ;;  %3895 = vmatpush.bf16.msra.mxu3 %v6647_v19 }
 0x6ac   :  { %v3299_v62 = vpop.f32.mrf.mxu0  ;;  %v3333_v16 = vpop.f32.mrf.mxu1  ;;  %4263 = vmatpush.bf16.msra.mxu1 %v6747_v53  ;;  %3861 = vmatpush.bf16.msra.mxu2 %v6583_v50  ;;  %v6656_v53 = vld [vmem:[%s12203_s4 + $0x208] sm:$0xf0]  ;;  %v6638_v50 = vld [vmem:[%s12203_s4 + $0xe0] sm:$0xf] }
 0x6ad   :  { %12649 = vst [vmem:[#allocation84_spill] sm:$0xff] %v11132_v34  ;;  %v11134_v61 = vadd.f32 %v3333_v16, %v3299_v62  ;;  %v7456_v62 = vld [vmem:[%s12203_s4 + $0x2a4] sm:$0xf]  ;;  %v6675_v16 = vor.u32 %v7440_v63, %v6672_v33  ;;  %v6720_v63 = vld [vmem:[%s12203_s4 + $0x288] sm:$0xf0] }
 0x6ae   :  { %4228 = vmatpush.bf16.msra.mxu0 %v6691_v60  ;;  %v6739_v60 = vor.u32 %v7456_v62, %v6736_v58  ;;  %v6574_v62 = vld [vmem:[%s12203_s4 + $0x60] sm:$0xf] }
 0x6af   :  { %3947 = vmatmul.bf16.gmra.mxu0 %v10397_v32  ;;  %3981 = vmatmul.bf16.gmra.mxu1 %v10417_v9 }
 0x6b0   :  { %4264 = vmatpush.bf16.msra.mxu1 %v6739_v60 }
 0x6b2   :  { %v2861_v18 = vpop.f32.mrf.mxu2  ;;  %v2895_v10 = vpop.f32.mrf.mxu3  ;;  %4229 = vmatpush.bf16.msra.mxu0 %v6683_v59  ;;  %v7436_v59 = vld [vmem:[%s12203_s4 + $0x204] sm:$0xf] }
 0x6b3   :  { %v11174_v52 = vadd.f32 %v2895_v10, %v2861_v18 }
 0x6b4   :  { %v3301_v39 = vpop.f32.mrf.mxu0  ;;  %v3335_v17 = vpop.f32.mrf.mxu1  ;;  %4265 = vmatpush.bf16.msra.mxu1 %v6731_v44  ;;  %v7383_v44 = vld [vmem:[%s12203_s4 + $0x54] sm:$0xf0] }
 0x6b5   :  { %12650 = vst [vmem:[#allocation8_spill] sm:$0xff] %v11174_v52  ;;  %v11176_v5 = vadd.f32 %v3335_v17, %v3301_v39  ;;  %v7452_v39 = vld [vmem:[%s12203_s4 + $0x284] sm:$0xf]  ;;  %v6659_v17 = vor.u32 %v7436_v59, %v6656_v53 }
 0x6b6   :  { %4230 = vmatpush.bf16.msra.mxu0 %v6675_v16  ;;  %v6723_v33 = vor.u32 %v7452_v39, %v6720_v63  ;;  %v7385_v16 = vld [vmem:[%s12203_s4 + $0x64] sm:$0xf0] }
 0x6b7   :  { %3225 = vmatmul.bf16.gmra.mxu2 %v10692_v42  ;;  %3259 = vmatmul.bf16.gmra.mxu3 %v10698_v6  ;;  %v7438_v42 = vld [vmem:[%s12203_s4 + $0x214] sm:$0xf]  ;;  %v6664_v6 = vld [vmem:[%s12203_s4 + $0x218] sm:$0xf0]  ;;  %v6575_v58 = vor.u32 %v7385_v16, %v6574_v62 }
 0x6b8   :  { %v6667_v13 = vor.u32 %v7438_v42, %v6664_v6  ;;  %4266 = vmatpush.bf16.msra.mxu1 %v6723_v33  ;;  %v7401_v42 = vld [vmem:[%s12203_s4 + $0xe4] sm:$0xf0] }
 0x6b9   :  { %3862 = vmatpush.bf16.msra.mxu2 %v6575_v58  ;;  %v6639_v6 = vor.u32 %v7401_v42, %v6638_v50  ;;  %v6558_v58 = vld [vmem:[%s12203_s4 + $0x40] sm:$0xf]  ;;  %v7397_v42 = vld [vmem:[%s12203_s4 + $0xc4] sm:$0xf0] }
 0x6ba   :  { %v2907_v47 = vpop.f32.mrf.mxu2  ;;  %v2941_v38 = vpop.f32.mrf.mxu3  ;;  %4231 = vmatpush.bf16.msra.mxu0 %v6667_v13  ;;  %v6622_v50 = vld [vmem:[%s12203_s4 + $0xc0] sm:$0xf] }
 0x6bb   :  { %v11216_v29 = vadd.f32 %v2941_v38, %v2907_v47  ;;  %3896 = vmatpush.bf16.msra.mxu3 %v6639_v6  ;;  %v6566_v38 = vld [vmem:[%s12203_s4 + $0x50] sm:$0xf]  ;;  %v6623_v6 = vor.u32 %v7397_v42, %v6622_v50  ;;  %v7377_v50 = vld [vmem:[%s12203_s4 + $0x24] sm:$0xf0] }
 0x6bc   :  { %v3631_v43 = vpop.f32.mrf.mxu0  ;;  %v3665_v18 = vpop.f32.mrf.mxu1  ;;  %v6567_v19 = vor.u32 %v7383_v44, %v6566_v38 }
 0x6bd   :  { %v11218_v10 = vadd.f32 %v3665_v18, %v3631_v43 }
 0x6be   :  { %4232 = vmatpush.bf16.msra.mxu0 %v6659_v17  ;;  %3863 = vmatpush.bf16.msra.mxu2 %v6567_v19  ;;  %v6550_v19 = vld [vmem:[%s12203_s4 + $0x30] sm:$0xf] }
 0x6bf   :  { %3952 = vmatmul.bf16.gmra.mxu0 %v10446_v51  ;;  %3986 = vmatmul.bf16.gmra.mxu1 %v10450_v36 }
 0x6c2   :  { %v2909_v12 = vpop.f32.mrf.mxu2  ;;  %v2943_v40 = vpop.f32.mrf.mxu3 }
 0x6c3   :  { %v11240_v60 = vadd.f32 %v2943_v40, %v2909_v12  ;;  %v7381_v12 = vld [vmem:[%s12203_s4 + $0x44] sm:$0xf0] }
 0x6c4   :  { %v3633_v31 = vpop.f32.mrf.mxu0  ;;  %v3667_v13 = vpop.f32.mrf.mxu1  ;;  %v6559_v40 = vor.u32 %v7381_v12, %v6558_v58 }
 0x6c5   :  { %v11248_v55 = vadd.f32 %v3667_v13, %v3633_v31 }
 0x6c6   :  { %3864 = vmatpush.bf16.msra.mxu2 %v6559_v40  ;;  %v6542_v40 = vld [vmem:[%s12203_s4 + $0x20] sm:$0xf] }
 0x6c7   :  { %3230 = vmatmul.bf16.gmra.mxu2 %v10742_v2  ;;  %3264 = vmatmul.bf16.gmra.mxu3 %v10748_v54  ;;  %v6630_v2 = vld [vmem:[%s12203_s4 + $0xd0] sm:$0xf]  ;;  %v7399_v54 = vld [vmem:[%s12203_s4 + $0xd4] sm:$0xf0]  ;;  %v6543_v42 = vor.u32 %v7377_v50, %v6542_v40 }
 0x6c8   :  { %v6631_v53 = vor.u32 %v7399_v54, %v6630_v2  ;;  %v6614_v2 = vld [vmem:[%s12203_s4 + $0xb0] sm:$0xf]  ;;  %v7395_v54 = vld [vmem:[%s12203_s4 + $0xb4] sm:$0xf0] }
 0x6ca   :  { %v2912_v56 = vpop.f32.mrf.mxu2  ;;  %v2946_v27 = vpop.f32.mrf.mxu3  ;;  %3897 = vmatpush.bf16.msra.mxu3 %v6631_v53  ;;  %v6615_v53 = vor.u32 %v7395_v54, %v6614_v2 }
 0x6cb   :  { %v11252_v47 = vadd.f32 %v2946_v27, %v2912_v56 }
 0x6cc   :  { %v3636_v43 = vpop.f32.mrf.mxu0  ;;  %v3670_v18 = vpop.f32.mrf.mxu1 }
 0x6cd   :  { %v11260_v59 = vadd.f32 %v3670_v18, %v3636_v43  ;;  %v7379_v43 = vld [vmem:[%s12203_s4 + $0x34] sm:$0xf0] }
 0x6ce   :  { %3898 = vmatpush.bf16.msra.mxu3 %v6623_v6  ;;  %v6551_v18 = vor.u32 %v7379_v43, %v6550_v19 }
 0x6cf   :  { %3957 = vmatmul.bf16.gmra.mxu0 %v10505_v23  ;;  %3991 = vmatmul.bf16.gmra.mxu1 %v10540_v8 }
 0x6d0   :  { %3865 = vmatpush.bf16.msra.mxu2 %v6551_v18 }
 0x6d2   :  { %v2914_v39 = vpop.f32.mrf.mxu2  ;;  %v2948_v17 = vpop.f32.mrf.mxu3  ;;  %3899 = vmatpush.bf16.msra.mxu3 %v6615_v53 }
 0x6d3   :  { %v11270_v63 = vadd.f32 %v2948_v17, %v2914_v39 }
 0x6d4   :  { %v3638_v33 = vpop.f32.mrf.mxu0  ;;  %v3672_v62 = vpop.f32.mrf.mxu1  ;;  %3866 = vmatpush.bf16.msra.mxu2 %v6543_v42  ;;  %v6598_v42 = vld [vmem:[%s12203_s4 + $0x90] sm:$0xf] }
 0x6d5   :  { %v11272_v16 = vadd.f32 %v3672_v62, %v3638_v33 }
 0x6d7   :  { %3562 = vmatmul.bf16.vlgmr.msrb.gmra.mxu2 %v10397_v32  ;;  %3596 = vmatmul.bf16.vlgmr.msrb.gmra.mxu3 %v10417_v9 }
 0x6da   :  { %v2917_v31 = vpop.f32.mrf.mxu2  ;;  %v2951_v13 = vpop.f32.mrf.mxu3 }
 0x6db   :  { %v11288_v56 = vadd.f32 %v2951_v13, %v2917_v31 }
 0x6dc   :  { %v3641_v27 = vpop.f32.mrf.mxu0  ;;  %v3675_v38 = vpop.f32.mrf.mxu1 }
 0x6dd   :  { %v11290_v44 = vadd.f32 %v3675_v38, %v3641_v27  ;;  %v6606_v27 = vld [vmem:[%s12203_s4 + $0xa0] sm:$0xf]  ;;  %v7393_v38 = vld [vmem:[%s12203_s4 + $0xa4] sm:$0xf0] }
 0x6de   :  { %v6607_v19 = vor.u32 %v7393_v38, %v6606_v27 }
 0x6df   :  { %4233 = vmatmul.bf16.vlgmr.msra.gmra.mxu0 %v10470_v37  ;;  %4267 = vmatmul.bf16.vlgmr.msra.gmra.mxu1 %v10476_v15 }
 0x6e0   :  { %3900 = vmatpush.bf16.msra.mxu3 %v6607_v19 }
 0x6e2   :  { %v2919_v39 = vpop.f32.mrf.mxu2  ;;  %v2953_v17 = vpop.f32.mrf.mxu3 }
 0x6e3   :  { %v11306_v33 = vadd.f32 %v2953_v17, %v2919_v39  ;;  %v6534_v17 = vld [vmem:[%s12203_s4 + $0x10] sm:$0xf] }
 0x6e4   :  { %v3643_v62 = vpop.f32.mrf.mxu0  ;;  %v3677_v58 = vpop.f32.mrf.mxu1 }
 0x6e5   :  { %v11308_v12 = vadd.f32 %v3677_v58, %v3643_v62  ;;  %v7375_v62 = vld [vmem:[%s12203_s4 + $0x14] sm:$0xf0] }
 0x6e6   :  { %v6535_v58 = vor.u32 %v7375_v62, %v6534_v17  ;;  %v7373_v17 = vld [vmem:[%s12203_s4 + $0x4] sm:$0xf0]  ;;  %v6590_v62 = vld [vmem:[%s12203_s4 + $0x80] sm:$0xf] }
 0x6e7   :  { %3567 = vmatmul.bf16.gmra.mxu2 %v10446_v51  ;;  %3601 = vmatmul.bf16.gmra.mxu3 %v10450_v36 }
 0x6e8   :  { %3867 = vmatpush.bf16.msra.mxu2 %v6535_v58 }
 0x6ea   :  { %v2922_v6 = vpop.f32.mrf.mxu2  ;;  %v2956_v31 = vpop.f32.mrf.mxu3 }
 0x6eb   :  { %v11318_v13 = vadd.f32 %v2956_v31, %v2922_v6  ;;  %v7391_v6 = vld [vmem:[%s12203_s4 + $0x94] sm:$0xf0] }
 0x6ec   :  { %v3646_v43 = vpop.f32.mrf.mxu0  ;;  %v3680_v18 = vpop.f32.mrf.mxu1  ;;  %v6599_v31 = vor.u32 %v7391_v6, %v6598_v42  ;;  %v7389_v42 = vld [vmem:[%s12203_s4 + $0x84] sm:$0xf0] }
 0x6ed   :  { %v11326_v2 = vadd.f32 %v3680_v18, %v3646_v43 }
 0x6ee   :  { %3901 = vmatpush.bf16.msra.mxu3 %v6599_v31 }
 0x6ef   :  { %4238 = vmatmul.bf16.gmra.mxu0 %v10397_v32  ;;  %4272 = vmatmul.bf16.gmra.mxu1 %v10417_v9 }
 0x6f2   :  { %v2924_v54 = vpop.f32.mrf.mxu2  ;;  %v2958_v53 = vpop.f32.mrf.mxu3 }
 0x6f3   :  { %v11330_v39 = vadd.f32 %v2958_v53, %v2924_v54  ;;  %v6526_v53 = vld [vmem:[%s12203_s4] sm:$0xf] }
 0x6f4   :  { %v11338_v40 = vpop.f32.mrf.mxu0  ;;  %v11340_v50 = vpop.f32.mrf.mxu1  ;;  %v6527_v58 = vor.u32 %v7373_v17, %v6526_v53  ;;  %v6710_v53 = vld [vmem:[%s12203_s4 + $0x270] sm:$0xf]  ;;  %v7451_v17 = vld [vmem:[%s12203_s4 + $0x274] sm:$0xf0] }
 0x6f6   :  { %3868 = vmatpush.bf16.msra.mxu2 %v6527_v58  ;;  %v6711_v58 = vor.u32 %v7451_v17, %v6710_v53  ;;  %v6702_v53 = vld [vmem:[%s12203_s4 + $0x260] sm:$0xf]  ;;  %v7449_v17 = vld [vmem:[%s12203_s4 + $0x264] sm:$0xf0] }
 0x6f7   :  { %3572 = vmatmul.bf16.gmra.mxu2 %v10505_v23  ;;  %3606 = vmatmul.bf16.gmra.mxu3 %v10540_v8 }
 0x6fa   :  { %v2927_v27 = vpop.f32.mrf.mxu2  ;;  %v2961_v38 = vpop.f32.mrf.mxu3  ;;  %4157 = vmatpush.bf16.msrb.mxu2 %v6711_v58 }
 0x6fb   :  { %v11350_v19 = vadd.f32 %v2961_v38, %v2927_v27  ;;  %v6591_v27 = vor.u32 %v7389_v42, %v6590_v62  ;;  %v6774_v62 = vld [vmem:[%s12203_s4 + $0x2f0] sm:$0xf]  ;;  %v7467_v42 = vld [vmem:[%s12203_s4 + $0x2f4] sm:$0xf0] }
 0x6fc   :  { %v3651_v43 = vpop.f32.mrf.mxu0  ;;  %v3685_v18 = vpop.f32.mrf.mxu1 }
 0x6fd   :  { %v11352_v54 = vadd.f32 %v3685_v18, %v3651_v43  ;;  %3902 = vmatpush.bf16.msra.mxu3 %v6591_v27  ;;  %v6775_v27 = vor.u32 %v7467_v42, %v6774_v62  ;;  %v6703_v62 = vor.u32 %v7449_v17, %v6702_v53 }
 0x6ff   :  { %4243 = vmatmul.bf16.gmra.mxu0 %v10446_v51  ;;  %4277 = vmatmul.bf16.gmra.mxu1 %v10450_v36 }
 0x700   :  { %4158 = vmatpush.bf16.msrb.mxu2 %v6703_v62 }
 0x701   :  { %4191 = vmatpush.bf16.msrb.mxu3 %v6775_v27 }
 0x702   :  { %v2929_v6 = vpop.f32.mrf.mxu2  ;;  %v2963_v31 = vpop.f32.mrf.mxu3 }
 0x703   :  { %v11368_v38 = vadd.f32 %v2963_v31, %v2929_v6 }
 0x704   :  { %v11370_v43 = vpop.f32.mrf.mxu0  ;;  %v11372_v18 = vpop.f32.mrf.mxu1 }
 0x707   :  { %3577 = vmatmul.bf16.gmra.mxu2 %v10596_v25  ;;  %3611 = vmatmul.bf16.gmra.mxu3 %v10605_v22 }
 0x70a   :  { %v3211_v6 = vpop.f32.mrf.mxu2  ;;  %v3245_v31 = vpop.f32.mrf.mxu3 }
 0x70b   :  { %v11388_v26 = vadd.f32 %v3245_v31, %v3211_v6 }
 0x70c   :  { %v3938_v41 = vpop.f32.mrf.mxu0  ;;  %v3972_v52 = vpop.f32.mrf.mxu1 }
 0x70d   :  { %12651 = vst [vmem:[#allocation9_spill] sm:$0xff] %v11388_v26  ;;  %v3939_v34 = vadd.f32 %v3938_v41, %v11216_v29  ;;  %v6766_v41 = vld [vmem:[%s12203_s4 + $0x2e0] sm:$0xf] }
 0x70f   :  { %v11391_v45 = vadd.f32 %v3972_v52, %v3939_v34  ;;  %4248 = vmatmul.bf16.gmra.mxu0 %v10505_v23  ;;  %4282 = vmatmul.bf16.gmra.mxu1 %v10540_v8  ;;  %v7465_v34 = vld [vmem:[%s12203_s4 + $0x2e4] sm:$0xf0] }
 0x710   :  { %v6767_v52 = vor.u32 %v7465_v34, %v6766_v41  ;;  %v7447_v41 = vld [vmem:[%s12203_s4 + $0x254] sm:$0xf0] }
 0x712   :  { %v3213_v58 = vpop.f32.mrf.mxu2  ;;  %v3247_v42 = vpop.f32.mrf.mxu3  ;;  %4192 = vmatpush.bf16.msrb.mxu3 %v6767_v52 }
 0x713   :  { %v11401_v6 = vadd.f32 %v3247_v42, %v3213_v58  ;;  %v6694_v42 = vld [vmem:[%s12203_s4 + $0x250] sm:$0xf] }
 0x714   :  { %v3940_v29 = vpop.f32.mrf.mxu0  ;;  %v3974_v31 = vpop.f32.mrf.mxu1 }
 0x715   :  { %12652 = vst [vmem:[#allocation57_spill] sm:$0xff] %v11401_v6  ;;  %v3941_v27 = vadd.f32 %v3940_v29, %v11240_v60  ;;  %v6695_v60 = vor.u32 %v7447_v41, %v6694_v42  ;;  %v6758_v29 = vld [vmem:[%s12203_s4 + $0x2d0] sm:$0xf] }
 0x717   :  { %3582 = vmatmul.bf16.gmra.mxu2 %v10990_v14  ;;  %3616 = vmatmul.bf16.gmra.mxu3 %v10994_v7  ;;  %v11412_v53 = vadd.f32 %v3974_v31, %v3941_v27  ;;  %v7463_v31 = vld [vmem:[%s12203_s4 + $0x2d4] sm:$0xf0] }
 0x718   :  { %4159 = vmatpush.bf16.msrb.mxu2 %v6695_v60  ;;  %v6759_v27 = vor.u32 %v7463_v31, %v6758_v29  ;;  %v6750_v29 = vld [vmem:[%s12203_s4 + $0x2c0] sm:$0xf] }
 0x71a   :  { %v3216_v17 = vpop.f32.mrf.mxu2  ;;  %v3250_v62 = vpop.f32.mrf.mxu3  ;;  %4193 = vmatpush.bf16.msrb.mxu3 %v6759_v27 }
 0x71b   :  { %v11414_v58 = vadd.f32 %v3250_v62, %v3216_v17 }
 0x71c   :  { %v3943_v34 = vpop.f32.mrf.mxu0  ;;  %v3977_v52 = vpop.f32.mrf.mxu1 }
 0x71d   :  { %12653 = vst [vmem:[#allocation85_spill] sm:$0xff] %v11414_v58  ;;  %v3944_v14 = vadd.f32 %v3943_v34, %v11252_v47 }
 0x71f   :  { %v11423_v7 = vadd.f32 %v3977_v52, %v3944_v14  ;;  %4253 = vmatmul.bf16.gmra.mxu0 %v10596_v25  ;;  %4287 = vmatmul.bf16.gmra.mxu1 %v10605_v22  ;;  %v6686_v52 = vld [vmem:[%s12203_s4 + $0x240] sm:$0xf]  ;;  %v7445_v14 = vld [vmem:[%s12203_s4 + $0x244] sm:$0xf0] }
 0x720   :  { %v6687_v31 = vor.u32 %v7445_v14, %v6686_v52  ;;  %v6678_v52 = vld [vmem:[%s12203_s4 + $0x230] sm:$0xf]  ;;  %v7443_v14 = vld [vmem:[%s12203_s4 + $0x234] sm:$0xf0] }
 0x722   :  { %v3218_v17 = vpop.f32.mrf.mxu2  ;;  %v3252_v62 = vpop.f32.mrf.mxu3  ;;  %4160 = vmatpush.bf16.msrb.mxu2 %v6687_v31  ;;  %v6679_v31 = vor.u32 %v7443_v14, %v6678_v52  ;;  %v6670_v14 = vld [vmem:[%s12203_s4 + $0x220] sm:$0xf] }
 0x723   :  { %v11433_v42 = vadd.f32 %v3252_v62, %v3218_v17 }
 0x724   :  { %v3945_v47 = vpop.f32.mrf.mxu0  ;;  %v3979_v41 = vpop.f32.mrf.mxu1 }
 0x725   :  { %12654 = vst [vmem:[#allocation86_spill] sm:$0xff] %v11433_v42  ;;  %v3946_v60 = vadd.f32 %v3945_v47, %v11270_v63  ;;  %v6662_v42 = vld [vmem:[%s12203_s4 + $0x210] sm:$0xf] }
 0x726   :  { %4161 = vmatpush.bf16.msrb.mxu2 %v6679_v31 }
 0x727   :  { %3869 = vmatmul.bf16.vlgmr.msra.gmra.mxu2 %v11032_v35  ;;  %3903 = vmatmul.bf16.vlgmr.msra.gmra.mxu3 %v11036_v4  ;;  %v11438_v34 = vadd.f32 %v3979_v41, %v3946_v60  ;;  %v7461_v35 = vld [vmem:[%s12203_s4 + $0x2c4] sm:$0xf0] }
 0x728   :  { %v6751_v27 = vor.u32 %v7461_v35, %v6750_v29  ;;  %v6742_v29 = vld [vmem:[%s12203_s4 + $0x2b0] sm:$0xf]  ;;  %v7459_v35 = vld [vmem:[%s12203_s4 + $0x2b4] sm:$0xf0] }
 0x72a   :  { %v3221_v4 = vpop.f32.mrf.mxu2  ;;  %v3255_v63 = vpop.f32.mrf.mxu3  ;;  %4194 = vmatpush.bf16.msrb.mxu3 %v6751_v27 }
 0x72b   :  { %v11452_v17 = vadd.f32 %v3255_v63, %v3221_v4  ;;  %v6743_v63 = vor.u32 %v7459_v35, %v6742_v29  ;;  %v7441_v29 = vld [vmem:[%s12203_s4 + $0x224] sm:$0xf0] }
 0x72c   :  { %v3948_v62 = vpop.f32.mrf.mxu0  ;;  %v3982_v47 = vpop.f32.mrf.mxu1  ;;  %v6671_v31 = vor.u32 %v7441_v29, %v6670_v14 }
 0x72d   :  { %12655 = vst [vmem:[#allocation58_spill] sm:$0xff] %v11452_v17  ;;  %v3949_v41 = vadd.f32 %v3948_v62, %v11288_v56 }
 0x72e   :  { %4195 = vmatpush.bf16.msrb.mxu3 %v6743_v63  ;;  %4162 = vmatpush.bf16.msrb.mxu2 %v6671_v31  ;;  %v7457_v63 = vld [vmem:[%s12203_s4 + $0x2a4] sm:$0xf0] }
 0x72f   :  { %v11455_v60 = vadd.f32 %v3982_v47, %v3949_v41 }
 0x732   :  { %v3223_v56 = vpop.f32.mrf.mxu2  ;;  %v3257_v4 = vpop.f32.mrf.mxu3 }
 0x733   :  { %v11469_v27 = vadd.f32 %v3257_v4, %v3223_v56 }
 0x734   :  { %v3950_v62 = vpop.f32.mrf.mxu0  ;;  %v3984_v47 = vpop.f32.mrf.mxu1 }
 0x735   :  { %12656 = vst [vmem:[#allocation89_spill] sm:$0xff] %v11469_v27  ;;  %v3951_v41 = vadd.f32 %v3950_v62, %v11306_v33  ;;  %v6734_v33 = vld [vmem:[%s12203_s4 + $0x2a0] sm:$0xf] }
 0x736   :  { %v6735_v62 = vor.u32 %v7457_v63, %v6734_v33  ;;  %v7439_v33 = vld [vmem:[%s12203_s4 + $0x214] sm:$0xf0] }
 0x737   :  { %3874 = vmatmul.bf16.gmra.mxu2 %v10470_v37  ;;  %3908 = vmatmul.bf16.gmra.mxu3 %v10476_v15  ;;  %v11474_v52 = vadd.f32 %v3984_v47, %v3951_v41 }
 0x738   :  { %4196 = vmatpush.bf16.msrb.mxu3 %v6735_v62 }
 0x73a   :  { %v3226_v35 = vpop.f32.mrf.mxu2  ;;  %v3260_v56 = vpop.f32.mrf.mxu3 }
 0x73b   :  { %v11482_v4 = vadd.f32 %v3260_v56, %v3226_v35 }
 0x73c   :  { %v3953_v47 = vpop.f32.mrf.mxu0  ;;  %v3987_v41 = vpop.f32.mrf.mxu1 }
 0x73d   :  { %12657 = vst [vmem:[#allocation90_spill] sm:$0xff] %v11482_v4  ;;  %v3954_v27 = vadd.f32 %v3953_v47, %v11318_v13  ;;  %v6663_v13 = vor.u32 %v7439_v33, %v6662_v42  ;;  %v7455_v42 = vld [vmem:[%s12203_s4 + $0x294] sm:$0xf0] }
 0x73f   :  { %v11491_v14 = vadd.f32 %v3987_v41, %v3954_v27  ;;  %4163 = vmatpush.bf16.msrb.mxu2 %v6663_v13 }
 0x742   :  { %v3228_v29 = vpop.f32.mrf.mxu2  ;;  %v3262_v35 = vpop.f32.mrf.mxu3 }
 0x743   :  { %v11493_v56 = vadd.f32 %v3262_v35, %v3228_v29 }
 0x744   :  { %v3955_v31 = vpop.f32.mrf.mxu0  ;;  %v3989_v4 = vpop.f32.mrf.mxu1 }
 0x745   :  { %12658 = vst [vmem:[#allocation12_spill] sm:$0xff] %v11493_v56  ;;  %v3956_v17 = vadd.f32 %v3955_v31, %v11330_v39  ;;  %v6726_v31 = vld [vmem:[%s12203_s4 + $0x290] sm:$0xf] }
 0x747   :  { %3879 = vmatmul.bf16.gmra.mxu2 %v10397_v32  ;;  %3913 = vmatmul.bf16.gmra.mxu3 %v10417_v9  ;;  %v11504_v27 = vadd.f32 %v3989_v4, %v3956_v17  ;;  %v6727_v17 = vor.u32 %v7455_v42, %v6726_v31  ;;  %v6718_v31 = vld [vmem:[%s12203_s4 + $0x280] sm:$0xf] }
 0x749   :  { %4197 = vmatpush.bf16.msrb.mxu3 %v6727_v17 }
 0x74a   :  { %v3231_v63 = vpop.f32.mrf.mxu2  ;;  %v3265_v62 = vpop.f32.mrf.mxu3 }
 0x74b   :  { %v11506_v47 = vadd.f32 %v3265_v62, %v3231_v63 }
 0x74c   :  { %v3958_v39 = vpop.f32.mrf.mxu0  ;;  %v3992_v41 = vpop.f32.mrf.mxu1 }
 0x74d   :  { %12659 = vst [vmem:[#allocation93_spill] sm:$0xff] %v11506_v47  ;;  %v3959_v29 = vadd.f32 %v3958_v39, %v11350_v19 }
 0x74f   :  { %v11509_v35 = vadd.f32 %v3992_v41, %v3959_v29  ;;  %v6654_v41 = vld [vmem:[%s12203_s4 + $0x200] sm:$0xf]  ;;  %v7437_v29 = vld [vmem:[%s12203_s4 + $0x204] sm:$0xf0] }
 0x750   :  { %v6655_v42 = vor.u32 %v7437_v29, %v6654_v41 }
 0x752   :  { %v3233_v4 = vpop.f32.mrf.mxu2  ;;  %v3267_v33 = vpop.f32.mrf.mxu3  ;;  %4164 = vmatpush.bf16.msrb.mxu2 %v6655_v42 }
 0x753   :  { %v11517_v13 = vadd.f32 %v3267_v33, %v3233_v4 }
 0x754   :  { %v3960_v63 = vpop.f32.mrf.mxu0  ;;  %v3994_v62 = vpop.f32.mrf.mxu1 }
 0x755   :  { %12660 = vst [vmem:[#allocation94_spill] sm:$0xff] %v11517_v13  ;;  %v3961_v19 = vadd.f32 %v3960_v63, %v11368_v38  ;;  %v7453_v38 = vld [vmem:[%s12203_s4 + $0x284] sm:$0xf0] }
 0x756   :  { %v6719_v33 = vor.u32 %v7453_v38, %v6718_v31 }
 0x757   :  { %3884 = vmatmul.bf16.gmra.mxu2 %v10446_v51  ;;  %3918 = vmatmul.bf16.gmra.mxu3 %v10450_v36  ;;  %v11522_v39 = vadd.f32 %v3994_v62, %v3961_v19 }
 0x758   :  { %4198 = vmatpush.bf16.msrb.mxu3 %v6719_v33 }
 0x75a   :  { %v3563_v17 = vpop.f32.mrf.mxu2  ;;  %v3597_v4 = vpop.f32.mrf.mxu3 }
 0x75b   :  { %v11536_v63 = vadd.f32 %v3597_v4, %v3563_v17 }
 0x75c   :  { %v4234_v62 = vpop.f32.mrf.mxu0  ;;  %v4268_v19 = vpop.f32.mrf.mxu1 }
 0x75d   :  { %v4235_v13 = vadd.f32 %v4234_v62, %v10931_v21 }
 0x75f   :  { %v4269_v47 = vadd.f32 %v4268_v19, %v4235_v13 }
 0x761   :  { %v4294_v56 = vadd.f32 %v4269_v47, %v11391_v45 }
 0x762   :  { %v3565_v58 = vpop.f32.mrf.mxu2  ;;  %v3599_v41 = vpop.f32.mrf.mxu3 }
 0x763   :  { %v11540_v29 = vadd.f32 %v3599_v41, %v3565_v58  ;;  %v11543_v6 = vadd.f32 %v4294_v56, %v11218_v10 }
 0x764   :  { %v4236_v26 = vpop.f32.mrf.mxu0  ;;  %v4270_v31 = vpop.f32.mrf.mxu1 }
 0x765   :  { %v4237_v38 = vadd.f32 %v4236_v26, %v10967_v0 }
 0x767   :  { %3889 = vmatmul.bf16.gmra.mxu2 %v10505_v23  ;;  %3923 = vmatmul.bf16.gmra.mxu3 %v10540_v8  ;;  %v4271_v42 = vadd.f32 %v4270_v31, %v4237_v38 }
 0x769   :  { %v4296_v21 = vadd.f32 %v4271_v42, %v11412_v53 }
 0x76a   :  { %v3568_v13 = vpop.f32.mrf.mxu2  ;;  %v3602_v45 = vpop.f32.mrf.mxu3 }
 0x76b   :  { %v11549_v47 = vadd.f32 %v3602_v45, %v3568_v13  ;;  %v11552_v58 = vadd.f32 %v4296_v21, %v11248_v55 }
 0x76c   :  { %v4239_v10 = vpop.f32.mrf.mxu0  ;;  %v4273_v56 = vpop.f32.mrf.mxu1 }
 0x76d   :  { %v4240_v17 = vadd.f32 %v4239_v10, %v10986_v1 }
 0x76f   :  { %v4274_v4 = vadd.f32 %v4273_v56, %v4240_v17 }
 0x771   :  { %v4298_v0 = vadd.f32 %v4274_v4, %v11423_v7 }
 0x772   :  { %v3570_v26 = vpop.f32.mrf.mxu2  ;;  %v3604_v33 = vpop.f32.mrf.mxu3 }
 0x773   :  { %v11556_v62 = vadd.f32 %v3604_v33, %v3570_v26  ;;  %v11559_v53 = vadd.f32 %v4298_v0, %v11260_v59 }
 0x774   :  { %v4241_v19 = vpop.f32.mrf.mxu0  ;;  %v4275_v41 = vpop.f32.mrf.mxu1 }
 0x775   :  { %v4242_v31 = vadd.f32 %v4241_v19, %v11012_v30 }
 0x777   :  { %4165 = vmatmul.bf16.vlgmr.msrb.gmra.mxu2 %v10470_v37  ;;  %4199 = vmatmul.bf16.vlgmr.msrb.gmra.mxu3 %v10476_v15  ;;  %v4276_v55 = vadd.f32 %v4275_v41, %v4242_v31 }
 0x779   :  { %v4300_v1 = vadd.f32 %v4276_v55, %v11438_v34 }
 0x77a   :  { %v3573_v38 = vpop.f32.mrf.mxu2  ;;  %v3607_v7 = vpop.f32.mrf.mxu3 }
 0x77b   :  { %v11565_v42 = vadd.f32 %v3607_v7, %v3573_v38  ;;  %v11568_v21 = vadd.f32 %v4300_v1, %v11272_v16 }
 0x77c   :  { %v4244_v59 = vpop.f32.mrf.mxu0  ;;  %v4278_v13 = vpop.f32.mrf.mxu1 }
 0x77d   :  { %v4245_v45 = vadd.f32 %v4244_v59, %v11038_v46 }
 0x77f   :  { %v4279_v10 = vadd.f32 %v4278_v13, %v4245_v45 }
 0x781   :  { %v4302_v30 = vadd.f32 %v4279_v10, %v11455_v60 }
 0x782   :  { %v3575_v37 = vpop.f32.mrf.mxu2  ;;  %v3609_v56 = vpop.f32.mrf.mxu3 }
 0x783   :  { %v11572_v15 = vadd.f32 %v3609_v56, %v3575_v37  ;;  %v11575_v34 = vadd.f32 %v4302_v30, %v11290_v44 }
 0x784   :  { %v4246_v17 = vpop.f32.mrf.mxu0  ;;  %v4280_v4 = vpop.f32.mrf.mxu1 }
 0x785   :  { %v4247_v0 = vadd.f32 %v4246_v17, %v11056_v20  ;;  %v3683_v17 = vadd.f32 %v11340_v50, %v11338_v40  ;;  %v3688_v50 = vadd.f32 %v11372_v18, %v11370_v43 }
 0x787   :  { %4170 = vmatmul.bf16.gmra.mxu2 %v10397_v32  ;;  %4204 = vmatmul.bf16.gmra.mxu3 %v10417_v9  ;;  %v4281_v16 = vadd.f32 %v4280_v4, %v4247_v0 }
 0x789   :  { %v4304_v46 = vadd.f32 %v4281_v16, %v11474_v52 }
 0x78a   :  { %v3578_v26 = vpop.f32.mrf.mxu2  ;;  %v3612_v60 = vpop.f32.mrf.mxu3 }
 0x78b   :  { %v11581_v33 = vadd.f32 %v3612_v60, %v3578_v26  ;;  %v11584_v19 = vadd.f32 %v4304_v46, %v11308_v12 }
 0x78c   :  { %v4249_v44 = vpop.f32.mrf.mxu0  ;;  %v4283_v41 = vpop.f32.mrf.mxu1 }
 0x78d   :  { %v4250_v31 = vadd.f32 %v4249_v44, %v11074_v28 }
 0x78f   :  { %v4284_v55 = vadd.f32 %v4283_v41, %v4250_v31 }
 0x791   :  { %v4306_v20 = vadd.f32 %v4284_v55, %v11491_v14 }
 0x792   :  { %v11588_v32 = vpop.f32.mrf.mxu2  ;;  %v11590_v9 = vpop.f32.mrf.mxu3 }
 0x793   :  { %v11593_v52 = vadd.f32 %v4306_v20, %v11326_v2  ;;  %v4350_v2 = vadd.f32 %v11552_v58, %v11543_v6 }
 0x794   :  { %v4251_v1 = vpop.f32.mrf.mxu0  ;;  %v4285_v38 = vpop.f32.mrf.mxu1 }
 0x795   :  { %v4252_v7 = vadd.f32 %v4251_v1, %v11098_v48  ;;  %v4351_v48 = vadd.f32 %v4350_v2, %v11559_v53 }
 0x797   :  { %4175 = vmatmul.bf16.gmra.mxu2 %v10446_v51  ;;  %4209 = vmatmul.bf16.gmra.mxu3 %v10450_v36  ;;  %v4286_v12 = vadd.f32 %v4285_v38, %v4252_v7  ;;  %v4352_v51 = vadd.f32 %v4351_v48, %v11568_v21 }
 0x799   :  { %v4308_v28 = vadd.f32 %v4286_v12, %v11504_v27  ;;  %v4353_v4 = vadd.f32 %v4352_v51, %v11575_v34 }
 0x79a   :  { %v3583_v59 = vpop.f32.mrf.mxu2  ;;  %v3617_v14 = vpop.f32.mrf.mxu3 }
 0x79b   :  { %v11599_v13 = vadd.f32 %v3617_v14, %v3583_v59  ;;  %v4354_v16 = vadd.f32 %v4353_v4, %v11584_v19  ;;  %v11618_v46 = vadd.f32 %v4308_v28, %v3683_v17 }
 0x79c   :  { %v4254_v45 = vpop.f32.mrf.mxu0  ;;  %v4288_v10 = vpop.f32.mrf.mxu1 }
 0x79d   :  { %v4255_v30 = vadd.f32 %v4254_v45, %v11134_v61  ;;  %v4355_v60 = vadd.f32 %v4354_v16, %v11593_v52 }
 0x79f   :  { %v4289_v37 = vadd.f32 %v4288_v10, %v4255_v30 }
 0x7a1   :  { %v4310_v36 = vadd.f32 %v4289_v37, %v11509_v35 }
 0x7a2   :  { %v11607_v56 = vpop.f32.mrf.mxu2  ;;  %v11609_v27 = vpop.f32.mrf.mxu3 }
 0x7a3   :  { %v11615_v0 = vadd.f32 %v4310_v36, %v11352_v54  ;;  %v4356_v54 = vadd.f32 %v4355_v60, %v11618_v46  ;;  %v12661_v60 = vld [vmem:[#allocation82_spill] sm:$0xff] }
 0x7a4   :  { %v4256_v61 = vpop.f32.mrf.mxu0  ;;  %v4290_v35 = vpop.f32.mrf.mxu1 }
 0x7a5   :  { %v4257_v26 = vadd.f32 %v4256_v61, %v11176_v5  ;;  %v4357_v5 = vadd.f32 %v4356_v54, %v11615_v0 }
 0x7a7   :  { %4180 = vmatmul.bf16.gmra.mxu2 %v10505_v23  ;;  %4214 = vmatmul.bf16.gmra.mxu3 %v10540_v8  ;;  %v4291_v40 = vadd.f32 %v4290_v35, %v4257_v26 }
 0x7a9   :  { %v4312_v44 = vadd.f32 %v4291_v40, %v11522_v39 }
 0x7aa   :  { %v3870_v41 = vpop.f32.mrf.mxu2  ;;  %v3904_v31 = vpop.f32.mrf.mxu3 }
 0x7ab   :  { %v3871_v55 = vadd.f32 %v3870_v41, %v10923_v3  ;;  %v11630_v20 = vadd.f32 %v4312_v44, %v3688_v50 }
 0x7ad   :  { %v3905_v23 = vadd.f32 %v3904_v31, %v3871_v55  ;;  %v4358_v8 = vadd.f32 %v4357_v5, %v11630_v20  ;;  %v12663_v5 = vld [vmem:[#allocation8_spill] sm:$0xff] }
 0x7af   :  { %v4359_v1 = vrot.slane %v4358_v8, 4 }
 0x7b1   :  { %v4360_v12 = vadd.f32 %v4359_v1, %v4358_v8 }
 0x7b2   :  { %v3872_v38 = vpop.f32.mrf.mxu2  ;;  %v3906_v7 = vpop.f32.mrf.mxu3 }
 0x7b3   :  { %v4361_v43 = vrot.slane %v4360_v12, 2 }
 0x7b5   :  { %v4362_v18 = vadd.f32 %v4361_v43, %v4360_v12  ;;  %v12664_v43 = vld [vmem:[#allocation9_spill] sm:$0xff] }
 0x7b7   :  { %4185 = vmatmul.bf16.gmra.mxu2 %v10596_v25  ;;  %4219 = vmatmul.bf16.gmra.mxu3 %v10605_v22  ;;  %v4363_v39 = vrot.slane %v4362_v18, 1 }
 0x7b9   :  { %v11635_v59 = vadd.f32 %v4363_v39, %v4362_v18 }
 0x7ba   :  { %v3875_v28 = vpop.f32.mrf.mxu2  ;;  %v3909_v3 = vpop.f32.mrf.mxu3 }
 0x7bb   :  { %v3876_v14 = vadd.f32 %v3875_v28, %v10972_v57  ;;  %4367 = vrot.lane.b32.xlu1 %v11635_v59, %s7737_s17 }
 0x7bd   :  { %v3910_v45 = vadd.f32 %v3909_v3, %v3876_v14  ;;  %v12665_v3 = vld [vmem:[#allocation53_spill] sm:$0xff] }
 0x7be   :  { %v3873_v14 = vadd.f32 %v3872_v38, %v12665_v3  ;;  %v12668_v38 = vld [vmem:[#allocation54_spill] sm:$0xff]  ;;  %v12671_v3 = vld [vmem:[#allocation89_spill] sm:$0xff] }
 0x7c2   :  { %v3877_v10 = vpop.f32.mrf.mxu2  ;;  %v3911_v2 = vpop.f32.mrf.mxu3 }
 0x7ca   :  { %v3880_v30 = vpop.f32.mrf.mxu2  ;;  %v3914_v48 = vpop.f32.mrf.mxu3 }
 0x7cb   :  { %v3881_v37 = vadd.f32 %v3880_v30, %v11028_v11  ;;  %v12662_v11 = vld [vmem:[#allocation84_spill] sm:$0xff] }
 0x7cd   :  { %v3915_v25 = vadd.f32 %v3914_v48, %v3881_v37 }
 0x7d2   :  { %v3882_v51 = vpop.f32.mrf.mxu2  ;;  %v3916_v22 = vpop.f32.mrf.mxu3 }
 0x7d3   :  { %v3883_v36 = vadd.f32 %v3882_v51, %v11054_v49  ;;  %v12666_v51 = vld [vmem:[#allocation57_spill] sm:$0xff] }
 0x7d5   :  { %v3917_v17 = vadd.f32 %v3916_v22, %v3883_v36  ;;  %v3907_v36 = vadd.f32 %v3906_v7, %v3873_v14 }
 0x7da   :  { %v3885_v4 = vpop.f32.mrf.mxu2  ;;  %v3919_v61 = vpop.f32.mrf.mxu3 }
 0x7db   :  { %v3886_v57 = vadd.f32 %v3885_v4, %v11066_v24 }
 0x7dd   :  { %v3920_v16 = vadd.f32 %v3919_v61, %v3886_v57 }
 0x7e2   :  { %v3887_v26 = vpop.f32.mrf.mxu2  ;;  %v3921_v35 = vpop.f32.mrf.mxu3 }
 0x7e3   :  { %v3888_v40 = vadd.f32 %v3887_v26, %v12661_v60  ;;  %v12667_v60 = vld [vmem:[#allocation85_spill] sm:$0xff] }
 0x7e5   :  { %v11644_v50 = vadd.f32 %v3921_v35, %v3888_v40 }
 0x7ea   :  { %v3890_v54 = vpop.f32.mrf.mxu2  ;;  %v3924_v44 = vpop.f32.mrf.mxu3 }
 0x7eb   :  { %v3891_v41 = vadd.f32 %v3890_v54, %v12662_v11 }
 0x7ed   :  { %v11647_v31 = vadd.f32 %v3924_v44, %v3891_v41  ;;  %v3878_v44 = vadd.f32 %v3877_v10, %v12668_v38 }
 0x7f2   :  { %v3892_v55 = vpop.f32.mrf.mxu2  ;;  %v3926_v49 = vpop.f32.mrf.mxu3 }
 0x7f3   :  { %v3893_v8 = vadd.f32 %v3892_v55, %v12663_v5  ;;  %v12669_v55 = vld [vmem:[#allocation86_spill] sm:$0xff] }
 0x7f5   :  { %v11650_v1 = vadd.f32 %v3926_v49, %v3893_v8  ;;  %v3912_v49 = vadd.f32 %v3911_v2, %v3878_v44  ;;  %v4399_v44 = vmul.f32 %v11575_v34, %v11575_v34 }
 0x7fa   :  { %v4166_v24 = vpop.f32.mrf.mxu2  ;;  %v4200_v12 = vpop.f32.mrf.mxu3 }
 0x7fb   :  { %v4167_v18 = vadd.f32 %v4166_v24, %v12664_v43  ;;  %v12670_v43 = vld [vmem:[#allocation58_spill] sm:$0xff] }
 0x7fd   :  { %v4201_v39 = vadd.f32 %v4200_v12, %v4167_v18 }
 0x7ff   :  { %v4293_v28 = vadd.f32 %v4201_v39, %v3905_v23 }
 0x801   :  { %v11655_v30 = vadd.f32 %v4293_v28, %v11536_v63 }
 0x802   :  { %v4168_v48 = vpop.f32.mrf.mxu2  ;;  %v4202_v37 = vpop.f32.mrf.mxu3 }
 0x803   :  { %v4169_v22 = vadd.f32 %v4168_v48, %v12666_v51 }
 0x805   :  { %v4203_v4 = vadd.f32 %v4202_v37, %v4169_v22  ;;  %v12672_v22 = vld [vmem:[#allocation90_spill] sm:$0xff] }
 0x807   :  { %v4295_v61 = vadd.f32 %v4203_v4, %v3907_v36 }
 0x809   :  { %v11659_v57 = vadd.f32 %v4295_v61, %v11540_v29 }
 0x80a   :  { %v4171_v26 = vpop.f32.mrf.mxu2  ;;  %v4205_v35 = vpop.f32.mrf.mxu3 }
 0x80b   :  { %v4172_v40 = vadd.f32 %v4171_v26, %v12667_v60  ;;  %v12673_v60 = vld [vmem:[#allocation12_spill] sm:$0xff] }
 0x80d   :  { %v4206_v23 = vadd.f32 %v4205_v35, %v4172_v40 }
 0x80f   :  { %v4297_v54 = vadd.f32 %v4206_v23, %v3910_v45 }
 0x811   :  { %v11664_v63 = vadd.f32 %v4297_v54, %v11549_v47 }
 0x812   :  { %v4173_v11 = vpop.f32.mrf.mxu2  ;;  %v4207_v41 = vpop.f32.mrf.mxu3 }
 0x813   :  { %v4174_v7 = vadd.f32 %v4173_v11, %v12669_v55  ;;  %v4392_v11 = vmul.f32 %v11659_v57, %v11659_v57  ;;  %v4401_v55 = vmul.f32 %v11584_v19, %v11584_v19 }
 0x815   :  { %v4208_v5 = vadd.f32 %v4207_v41, %v4174_v7  ;;  %v4390_v7 = vmul.f32 %v11655_v30, %v11655_v30 }
 0x817   :  { %v4299_v8 = vadd.f32 %v4208_v5, %v3912_v49  ;;  %v4394_v49 = vmul.f32 %v11664_v63, %v11664_v63 }
 0x819   :  { %v11668_v29 = vadd.f32 %v4299_v8, %v11556_v62 }
 0x81a   :  { %v4176_v24 = vpop.f32.mrf.mxu2  ;;  %v4210_v12 = vpop.f32.mrf.mxu3 }
 0x81b   :  { %v4177_v18 = vadd.f32 %v4176_v24, %v12670_v43  ;;  %v12674_v24 = vld [vmem:[#allocation93_spill] sm:$0xff] }
 0x81d   :  { %v4211_v45 = vadd.f32 %v4210_v12, %v4177_v18  ;;  %v4403_v18 = vmul.f32 %v11593_v52, %v11593_v52 }
 0x81f   :  { %v4301_v39 = vadd.f32 %v4211_v45, %v3915_v25  ;;  %v4410_v45 = vadd.f32 %v4392_v11, %v4390_v7 }
 0x821   :  { %v11672_v10 = vadd.f32 %v4301_v39, %v11565_v42  ;;  %v4393_v42 = vmul.f32 %v11552_v58, %v11552_v58  ;;  %v4396_v39 = vmul.f32 %v11668_v29, %v11668_v29 }
 0x822   :  { %v4178_v47 = vpop.f32.mrf.mxu2  ;;  %v4212_v28 = vpop.f32.mrf.mxu3 }
 0x823   :  { %v4179_v14 = vadd.f32 %v4178_v47, %v12671_v3 }
 0x825   :  { %v4213_v48 = vadd.f32 %v4212_v28, %v4179_v14  ;;  %v4405_v14 = vmul.f32 %v11618_v46, %v11618_v46 }
 0x827   :  { %v4303_v2 = vadd.f32 %v4213_v48, %v3917_v17  ;;  %v4395_v17 = vmul.f32 %v11559_v53, %v11559_v53  ;;  %v4411_v48 = vadd.f32 %v4410_v45, %v4394_v49 }
 0x829   :  { %v11676_v37 = vadd.f32 %v4303_v2, %v11572_v15  ;;  %v4391_v15 = vmul.f32 %v11543_v6, %v11543_v6  ;;  %v3615_v2 = vadd.f32 %v11590_v9, %v11588_v32 }
 0x82a   :  { %v4181_v62 = vpop.f32.mrf.mxu2  ;;  %v4215_v51 = vpop.f32.mrf.mxu3 }
 0x82b   :  { %v4182_v36 = vadd.f32 %v4181_v62, %v12672_v22  ;;  %v4425_v54 = vadd.f32 %v4393_v42, %v4391_v15 }
 0x82d   :  { %v4216_v4 = vadd.f32 %v4215_v51, %v4182_v36  ;;  %v4426_v38 = vadd.f32 %v4425_v54, %v4395_v17  ;;  %v4398_v51 = vmul.f32 %v11672_v10, %v11672_v10 }
 0x82f   :  { %v4305_v61 = vadd.f32 %v4216_v4, %v3920_v16  ;;  %v4397_v16 = vmul.f32 %v11568_v21, %v11568_v21  ;;  %v4407_v4 = vmul.f32 %v11615_v0, %v11615_v0 }
 0x831   :  { %v11680_v25 = vadd.f32 %v4305_v61, %v11581_v33  ;;  %v4427_v41 = vadd.f32 %v4426_v38, %v4397_v16  ;;  %v4412_v61 = vadd.f32 %v4411_v48, %v4396_v39 }
 0x832   :  { %v4183_v26 = vpop.f32.mrf.mxu2  ;;  %v4217_v35 = vpop.f32.mrf.mxu3 }
 0x833   :  { %v4184_v40 = vadd.f32 %v4183_v26, %v12673_v60  ;;  %v4428_v43 = vadd.f32 %v4427_v41, %v4399_v44  ;;  %v4400_v26 = vmul.f32 %v11676_v37, %v11676_v37  ;;  %v4409_v60 = vmul.f32 %v11630_v20, %v11630_v20 }
 0x834   :  { %v4402_v17 = vmul.f32 %v11680_v25, %v11680_v25  ;;  %v3620_v41 = vadd.f32 %v11609_v27, %v11607_v56 }
 0x835   :  { %v4218_v23 = vadd.f32 %v4217_v35, %v4184_v40  ;;  %v4429_v3 = vadd.f32 %v4428_v43, %v4401_v55  ;;  %v4413_v40 = vadd.f32 %v4412_v61, %v4398_v51 }
 0x837   :  { %v4307_v33 = vadd.f32 %v4218_v23, %v11644_v50  ;;  %v4335_v50 = vadd.f32 %v11659_v57, %v11655_v30  ;;  %v4430_v36 = vadd.f32 %v4429_v3, %v4403_v18  ;;  %v12675_v23 = vld [vmem:[#allocation94_spill] sm:$0xff] }
 0x839   :  { %v4336_v47 = vadd.f32 %v4335_v50, %v11664_v63  ;;  %v11723_v35 = vadd.f32 %v4307_v33, %v3615_v2  ;;  %v4431_v9 = vadd.f32 %v4430_v36, %v4405_v14  ;;  %v4414_v33 = vadd.f32 %v4413_v40, %v4400_v26 }
 0x83a   :  { %v4186_v5 = vpop.f32.mrf.mxu2  ;;  %v4220_v8 = vpop.f32.mrf.mxu3 }
 0x83b   :  { %v4187_v12 = vadd.f32 %v4186_v5, %v12674_v24  ;;  %v4337_v62 = vadd.f32 %v4336_v47, %v11668_v29  ;;  %v4432_v16 = vadd.f32 %v4431_v9, %v4407_v4  ;;  %v4415_v7 = vadd.f32 %v4414_v33, %v4402_v17 }
 0x83d   :  { %v4221_v28 = vadd.f32 %v4220_v8, %v4187_v12  ;;  %v4338_v42 = vadd.f32 %v4337_v62, %v11672_v10  ;;  %v4433_v55 = vadd.f32 %v4432_v16, %v4409_v60  ;;  %v4368_v60 = vpop.permute.xlu1 %4367 }
 0x83f   :  { %v4309_v22 = vadd.f32 %v4221_v28, %v11647_v31  ;;  %v4339_v15 = vadd.f32 %v4338_v42, %v11676_v37  ;;  %v4434_v27 = vrot.slane %v4433_v55, 4 }
 0x841   :  { %v11726_v32 = vadd.f32 %v4309_v22, %v11599_v13  ;;  %v4340_v44 = vadd.f32 %v4339_v15, %v11680_v25  ;;  %v4404_v13 = vmul.f32 %v11723_v35, %v11723_v35  ;;  %v4435_v3 = vadd.f32 %v4434_v27, %v4433_v55 }
 0x842   :  { %v4188_v31 = vpop.f32.mrf.mxu2  ;;  %v4222_v38 = vpop.f32.mrf.mxu3 }
 0x843   :  { %v4189_v54 = vadd.f32 %v4188_v31, %v12675_v23  ;;  %v4341_v49 = vadd.f32 %v4340_v44, %v11723_v35  ;;  %v4406_v5 = vmul.f32 %v11726_v32, %v11726_v32  ;;  %v4416_v50 = vadd.f32 %v4415_v7, %v4404_v13 }
 0x844   :  { %v4436_v62 = vrot.slane %v4435_v3, 2 }
 0x845   :  { %v4223_v11 = vadd.f32 %v4222_v38, %v4189_v54  ;;  %v4342_v24 = vadd.f32 %v4341_v49, %v11726_v32  ;;  %v4417_v43 = vadd.f32 %v4416_v50, %v4406_v5 }
 0x846   :  { %v4437_v61 = vadd.f32 %v4436_v62, %v4435_v3 }
 0x847   :  { %v4311_v8 = vadd.f32 %v4223_v11, %v11650_v1 }
 0x848   :  { %v4438_v26 = vrot.slane %v4437_v61, 1 }
 0x849   :  { %v11744_v12 = vadd.f32 %v4311_v8, %v3620_v41 }
 0x84a   :  { %v4439_v9 = vadd.f32 %v4438_v26, %v4437_v61 }
 0x84b   :  { %v4343_v18 = vadd.f32 %v4342_v24, %v11744_v12  ;;  %v4408_v56 = vmul.f32 %v11744_v12, %v11744_v12 }
 0x84d   :  { %v4344_v45 = vrot.slane %v4343_v18, 4  ;;  %v4418_v39 = vadd.f32 %v4417_v43, %v4408_v56 }
 0x84f   :  { %v4345_v47 = vadd.f32 %v4344_v45, %v4343_v18  ;;  %v4419_v28 = vrot.slane %v4418_v39, 4 }
 0x851   :  { %v4346_v14 = vrot.slane %v4345_v47, 2  ;;  %v4420_v48 = vadd.f32 %v4419_v28, %v4418_v39 }
 0x853   :  { %v4347_v1 = vadd.f32 %v4346_v14, %v4345_v47  ;;  %v4421_v2 = vrot.slane %v4420_v48, 2 }
 0x855   :  { %v4348_v51 = vrot.slane %v4347_v1, 1  ;;  %v4422_v22 = vadd.f32 %v4421_v2, %v4420_v48 }
 0x857   :  { %v4349_v36 = vadd.f32 %v4348_v51, %v4347_v1  ;;  %v4423_v4 = vrot.slane %v4422_v22, 1 }
 0x859   :  { %4365 = vrot.lane.b32.xlu0 %v4349_v36, %s7737_s17  ;;  %v4424_v42 = vadd.f32 %v4423_v4, %v4422_v22 }
 0x85b   :  { %4440 = vrot.lane.b32.xlu2 %v4424_v42, %s7737_s17 }
 0x861   :  { %4442 = vrot.lane.b32.xlu0 %v4439_v9, %s7737_s17 }
 0x8b5   :  { %v4441_v16 = vpop.permute.xlu2 %4440 }
 0x8cb   :  { %v4366_v31 = vpop.permute.xlu0 %4365 }
 0x8cc   :  { %v4369_v15 = vsel %vm1703_vm1, %v4366_v31, %v4368_v60  ;;  %v4370_v17 = vsel %vm1703_vm1, %v4368_v60, %v4366_v31 }
 0x8cd   :  { %v4371_v23 = vadd.f32 %v4370_v17, %v4349_v36  ;;  %v4372_v54 = vadd.f32 %v4369_v15, %v11635_v59 }
 0x8cf   :  { %4373 = vrot.lane.b32.xlu1 %v4371_v23, %s7738_s18  ;;  %4375 = vrot.lane.b32.xlu2 %v4372_v54, %s7738_s18 }
 0x8d3   :  { %v4443_v38 = vpop.permute.xlu0 %4442 }
 0x8d4   :  { %v4444_v33 = vsel %vm1703_vm1, %v4441_v16, %v4443_v38  ;;  %v4445_v44 = vsel %vm1703_vm1, %v4443_v38, %v4441_v16  ;;  %v4333_v38 = vld [vmem:[%s12206_s5] sm:$0x3] }
 0x8d5   :  { %v4446_v13 = vadd.f32 %v4445_v44, %v4424_v42  ;;  %v4447_v11 = vadd.f32 %v4444_v33, %v4439_v9 }
 0x8d7   :  { %4448 = vrot.lane.b32.xlu0 %v4446_v13, %s7738_s18  ;;  %4450 = vrot.lane.b32.xlu1 %v4447_v11, %s7738_s18 }
 0x929   :  { %v4376_v41 = vpop.permute.xlu2 %4375 }
 0x941   :  { %v4374_v59 = vpop.permute.xlu1 %4373 }
 0x942   :  { %v4377_v55 = vsel %vm1712_vm2, %v4374_v59, %v4376_v41  ;;  %v4378_v7 = vsel %vm1712_vm2, %v4376_v41, %v4374_v59  ;;  %v7555_v59 = vld [vmem:[%s12207_s7 + $0xb8] sm:$0xff] }
 0x943   :  { %v4379_v49 = vadd.f32 %v4378_v7, %v4371_v23  ;;  %v4380_v5 = vadd.f32 %v4377_v55, %v4372_v54  ;;  %v7563_v55 = vld [vmem:[%s12207_s7 + $0xf8] sm:$0xff]  ;;  %4809 = vmatpush.bf16.msra.mxu2 %v7555_v59 }
 0x944   :  { %4822 = vmatpush.bf16.msra.mxu3 %v7563_v55  ;;  %v7559_v55 = vld [vmem:[%s12207_s7 + $0xd8] sm:$0xff] }
 0x945   :  { %4381 = vrot.lane.b32.xlu2 %v4379_v49, %s7739_s27  ;;  %4383 = vrot.lane.b32.xlu0 %v4380_v5, %s7739_s27 }
 0x949   :  { %v4449_v8 = vpop.permute.xlu0 %4448  ;;  %v4451_v50 = vpop.permute.xlu1 %4450 }
 0x94a   :  { %v4452_v24 = vsel %vm1712_vm2, %v4449_v8, %v4451_v50  ;;  %v4453_v43 = vsel %vm1712_vm2, %v4451_v50, %v4449_v8  ;;  %v7611_v8 = vld [vmem:[%s12207_s7 + $0x278] sm:$0xff]  ;;  %v7562_v50 = vld [vmem:[%s12207_s7 + $0xf0] sm:$0xff] }
 0x94b   :  { %v4454_v18 = vadd.f32 %v4453_v43, %v4446_v13  ;;  %v4455_v56 = vadd.f32 %v4452_v24, %v4447_v11  ;;  %v4334_v24 = vld [vmem:[%s12208_s6] sm:$0x3]  ;;  %5179 = vmatpush.bf16.msrb.mxu1 %v7611_v8  ;;  %4823 = vmatpush.bf16.msra.mxu3 %v7562_v50  ;;  %v7599_v50 = vld [vmem:[%s12207_s7 + $0x218] sm:$0xff] }
 0x94d   :  { %4456 = vrot.lane.b32.xlu1 %v4454_v18, %s7739_s27  ;;  %4458 = vrot.lane.b32.xlu2 %v4455_v56, %s7739_s27 }
 0x99f   :  { %v4382_v27 = vpop.permute.xlu2 %4381 }
 0x9a7   :  { %v4459_v48 = vpop.permute.xlu2 %4458 }
 0x9b7   :  { %v4384_v45 = vpop.permute.xlu0 %4383 }
 0x9b8   :  { %v4385_v39 = vsel %vm1721_vm3, %v4382_v27, %v4384_v45  ;;  %v4386_v47 = vsel %vm1721_vm3, %v4384_v45, %v4382_v27  ;;  %v7602_v27 = vld [vmem:[%s12207_s7 + $0x230] sm:$0xff] }
 0x9b9   :  { %v4387_v28 = vadd.f32 %v4386_v47, %v4379_v49  ;;  %v4388_v3 = vadd.f32 %v4385_v39, %v4380_v5  ;;  %v7554_v49 = vld [vmem:[%s12207_s7 + $0xb0] sm:$0xff]  ;;  %v7603_v5 = vld [vmem:[%s12207_s7 + $0x238] sm:$0xff] }
 0x9ba   :  { %5166 = vmatpush.bf16.msrb.mxu0 %v7603_v5  ;;  %v7610_v45 = vld [vmem:[%s12207_s7 + $0x270] sm:$0xff]  ;;  %4810 = vmatpush.bf16.msra.mxu2 %v7554_v49 }
 0x9bb   :  { %v4389_v14 = vadd.f32 %v4388_v3, %v4387_v28  ;;  %5180 = vmatpush.bf16.msrb.mxu1 %v7610_v45 }
 0x9bd   :  { %v4465_v51 = vmul.f32 0.005, %v4389_v14 }
 0x9be   :  { %5167 = vmatpush.bf16.msrb.mxu0 %v7602_v27  ;;  %v7607_v27 = vld [vmem:[%s12207_s7 + $0x258] sm:$0xff] }
 0x9bf   :  { %v4457_v1 = vpop.permute.xlu1 %4456  ;;  %v4467_v61 = vmul.f32 %v4465_v51, %v4465_v51 }
 0x9c0   :  { %v4460_v2 = vsel %vm1721_vm3, %v4457_v1, %v4459_v48  ;;  %v4461_v62 = vsel %vm1721_vm3, %v4459_v48, %v4457_v1  ;;  %vm4604_vm3 = vcmask 916480  }
 0x9c1   :  { %v4462_v22 = vadd.f32 %v4461_v62, %v4454_v18  ;;  %v4463_v36 = vadd.f32 %v4460_v2, %v4455_v56  ;;  %v7553_v2 = vld [vmem:[%s12207_s7 + $0xa8] sm:$0xff] }
 0x9c2   :  { %4811 = vmatpush.bf16.msra.mxu2 %v7553_v2  ;;  %v7558_v2 = vld [vmem:[%s12207_s7 + $0xd0] sm:$0xff] }
 0x9c3   :  { %v4464_v4 = vadd.f32 %v4463_v36, %v4462_v22 }
 0x9c5   :  { %v4466_v42 = vmul.f32 0.005, %v4464_v4 }
 0x9c7   :  { %v4468_v26 = vsub.f32 %v4466_v42, %v4467_v61 }
 0x9c9   :  { %v4469_v9 = vmax.f32 %v4468_v26, 0.0 }
 0x9cb   :  { %v4470_v60 = vadd.f32 1e-05, %v4469_v9 }
 0x9cd   :  { %7734 = vrsqrt.f32 %v4470_v60  ;;  %vm4477_vm2 = vweird.f32 %v4470_v60 }
 0x9d3   :  { %v7735_v31 = vpop.eup %7734 }
 0x9d4   :  { %v4472_v15 = vmul.f32 %v7735_v31, %v4470_v60  ;;  %vm4478_vm1 = vweird.f32 %v7735_v31  ;;  %v7600_v60 = vld [vmem:[%s12207_s7 + $0x220] sm:$0xff] }
 0x9d5   :  { %vm4479_vm8 = vmor %vm4477_vm2, %vm4478_vm1 }
 0x9d6   :  { %v4473_v17 = vmul.f32 %v7735_v31, %v4472_v15 }
 0x9d8   :  { %v4474_v23 = vmul.f32 0.5, %v4473_v17 }
 0x9da   :  { %v4475_v54 = vsub.f32 1.5, %v4474_v23 }
 0x9dc   :  { %v4476_v16 = vmul.f32 %v7735_v31, %v4475_v54  ;;  %v7608_v54 = vld [vmem:[%s12207_s7 + $0x260] sm:$0xff] }
 0x9de   :  { %v4480_v40 = vsel %vm4479_vm8, %v7735_v31, %v4476_v16 }
 0x9df   :  { %v4482_v33 = vrot.slane %v4480_v40, 7 }
 0x9e1   :  { %v4483_v44 = vsel %vm1900_vm7, %v4480_v40, %v4482_v33 }
 0x9e2   :  { %v4485_v13 = vmul.f32 %v4483_v44, %v4333_v38  ;;  %v7551_v44 = vld [vmem:[%s12207_s7 + $0x98] sm:$0xff] }
 0x9e4   :  { %v4487_v11 = vperm.slane %v4485_v13, 0  ;;  %v4488_v41 = vperm.slane %v4485_v13, 1 }
 0x9e6   :  { %v4492_v7 = vmul.f32 %v4488_v41, %v4465_v51  ;;  %v4491_v43 = vmul.f32 %v4487_v11, %v4465_v51  ;;  %v4515_v56 = vmul.f32 %v4487_v11, %v11726_v32  ;;  %v4516_v39 = vmul.f32 %v4488_v41, %v11615_v0 }
 0x9e7   :  { %v4517_v47 = vmul.f32 %v4487_v11, %v11744_v12  ;;  %v4518_v28 = vmul.f32 %v4488_v41, %v11630_v20  ;;  %v4511_v3 = vmul.f32 %v4487_v11, %v11680_v25  ;;  %v4512_v14 = vmul.f32 %v4488_v41, %v11593_v52  ;;  %v7561_v52 = vld [vmem:[%s12207_s7 + $0xe8] sm:$0xff] }
 0x9e8   :  { %v4495_v18 = vrot.slane %v4492_v7, 7  ;;  %v4513_v48 = vmul.f32 %v4487_v11, %v11723_v35  ;;  %v4514_v1 = vmul.f32 %v4488_v41, %v11618_v46  ;;  %v4503_v12 = vmul.f32 %v4487_v11, %v11664_v63  ;;  %v7601_v63 = vld [vmem:[%s12207_s7 + $0x228] sm:$0xff]  ;;  %4824 = vmatpush.bf16.msra.mxu3 %v7561_v52 }
 0x9e9   :  { %v4504_v20 = vmul.f32 %v4488_v41, %v11559_v53  ;;  %v4505_v25 = vmul.f32 %v4487_v11, %v11668_v29  ;;  %v4506_v35 = vmul.f32 %v4488_v41, %v11568_v21  ;;  %v4507_v46 = vmul.f32 %v4487_v11, %v11672_v10  ;;  %v7609_v21 = vld [vmem:[%s12207_s7 + $0x268] sm:$0xff]  ;;  %5168 = vmatpush.bf16.msrb.mxu0 %v7601_v63 }
 0x9ea   :  { %v4496_v32 = vsel %vm1900_vm7, %v4491_v43, %v4495_v18  ;;  %v4508_v62 = vmul.f32 %v4488_v41, %v11575_v34  ;;  %v4509_v51 = vmul.f32 %v4487_v11, %v11676_v37  ;;  %v4510_v22 = vmul.f32 %v4488_v41, %v11584_v19  ;;  %v7552_v19 = vld [vmem:[%s12207_s7 + $0xa0] sm:$0xff]  ;;  %5181 = vmatpush.bf16.msrb.mxu1 %v7609_v21 }
 0x9eb   :  { %v4498_v0 = vsub.f32 %v4334_v24, %v4496_v32  ;;  %v4499_v34 = vmul.f32 %v4487_v11, %v11655_v30  ;;  %v11851_v10 = vmul.f32 %v4488_v41, %v11543_v6  ;;  %v11854_v36 = vmul.f32 %v4487_v11, %v11659_v57  ;;  %v7560_v57 = vld [vmem:[%s12207_s7 + $0xe0] sm:$0xff]  ;;  %4812 = vmatpush.bf16.msra.mxu2 %v7552_v19 }
 0x9ec   :  { %v11857_v4 = vmul.f32 %v4488_v41, %v11552_v58  ;;  %4825 = vmatpush.bf16.msra.mxu3 %v7560_v57  ;;  %v7597_v57 = vld [vmem:[%s12207_s7 + $0x208] sm:$0xff]  ;;  %vm4630_vm7 = vcmask 130048  }
 0x9ed   :  { %v11840_v53 = vperm.slane %v4498_v0, 0  ;;  %v11842_v29 = vperm.slane %v4498_v0, 1  ;;  %5169 = vmatpush.bf16.msrb.mxu0 %v7600_v60  ;;  %v7595_v60 = vld [vmem:[%s12207_s7 + $0x1f8] sm:$0xff] }
 0x9ee   :  { %5182 = vmatpush.bf16.msrb.mxu1 %v7608_v54  ;;  %v7586_v54 = vld [vmem:[%s12207_s7 + $0x1b0] sm:$0xff] }
 0x9ef   :  { %v4540_v37 = vadd.f32 %v11840_v53, %v4515_v56  ;;  %v4541_v61 = vadd.f32 %v11842_v29, %v4516_v39  ;;  %v4542_v30 = vadd.f32 %v11840_v53, %v4517_v47  ;;  %v4543_v6 = vadd.f32 %v11842_v29, %v4518_v28  ;;  %4813 = vmatpush.bf16.msra.mxu2 %v7551_v44  ;;  %v7593_v44 = vld [vmem:[%s12207_s7 + $0x1e8] sm:$0xff] }
 0x9f0   :  { %v4536_v58 = vadd.f32 %v11840_v53, %v4511_v3  ;;  %v4537_v42 = vadd.f32 %v11842_v29, %v4512_v14  ;;  %v4538_v26 = vadd.f32 %v11840_v53, %v4513_v48  ;;  %v4539_v9 = vadd.f32 %v11842_v29, %v4514_v1  ;;  %v7550_v3 = vld [vmem:[%s12207_s7 + $0x90] sm:$0xff]  ;;  %4826 = vmatpush.bf16.msra.mxu3 %v7559_v55  ;;  %v7584_v55 = vld [vmem:[%s12207_s7 + $0x1a0] sm:$0xff] }
 0x9f1   :  { %v4560_v31 = vmax.f32 %v4540_v37, 0.0  ;;  %v4561_v15 = vmax.f32 %v4541_v61, 0.0  ;;  %v4562_v17 = vmax.f32 %v4542_v30, 0.0  ;;  %v4563_v23 = vmax.f32 %v4543_v6, 0.0  ;;  %5170 = vmatpush.bf16.msrb.mxu0 %v7599_v50  ;;  %v7598_v37 = vld [vmem:[%s12207_s7 + $0x210] sm:$0xff]  ;;  %v7549_v30 = vld [vmem:[%s12207_s7 + $0x88] sm:$0xff] }
 0x9f2   :  { %v4556_v16 = vmax.f32 %v4536_v58, 0.0  ;;  %v4557_v40 = vmax.f32 %v4537_v42, 0.0  ;;  %v4558_v38 = vmax.f32 %v4538_v26, 0.0  ;;  %v4559_v33 = vmax.f32 %v4539_v9, 0.0  ;;  %5183 = vmatpush.bf16.msrb.mxu1 %v7607_v27  ;;  %v7606_v61 = vld [vmem:[%s12207_s7 + $0x250] sm:$0xff]  ;;  %v7557_v6 = vld [vmem:[%s12207_s7 + $0xc8] sm:$0xff] }
 0x9f3   :  { %v11882_v13 = vmax.f32 %v4560_v31, %v4562_v17  ;;  %v11884_v11 = vmax.f32 %v4561_v15, %v4563_v23  ;;  %v4528_v41 = vadd.f32 %v11840_v53, %v4503_v12  ;;  %v4529_v59 = vadd.f32 %v11842_v29, %v4504_v20  ;;  %4814 = vmatpush.bf16.msra.mxu2 %v7550_v3  ;;  %v7605_v58 = vld [vmem:[%s12207_s7 + $0x248] sm:$0xff]  ;;  %v7548_v42 = vld [vmem:[%s12207_s7 + $0x80] sm:$0xff]  ;;  %v7587_v9 = vld [vmem:[%s12207_s7 + $0x1b8] sm:$0xff] }
 0x9f4   :  { %v11891_v7 = vmax.f32 %v4556_v16, %v4558_v38  ;;  %v11893_v49 = vmax.f32 %v4557_v40, %v4559_v33  ;;  %v4530_v5 = vadd.f32 %v11840_v53, %v4505_v25  ;;  %v4531_v8 = vadd.f32 %v11842_v29, %v4506_v35  ;;  %4827 = vmatpush.bf16.msra.mxu3 %v7558_v2  ;;  %v7556_v26 = vld [vmem:[%s12207_s7 + $0xc0] sm:$0xff]  ;;  %v7571_v17 = vld [vmem:[%s12207_s7 + $0x138] sm:$0xff]  ;;  %v7594_v16 = vld [vmem:[%s12207_s7 + $0x1f0] sm:$0xff] }
 0x9f5   :  { %v7714_v24 = vpack.i.bf16 %v11884_v11, %v11882_v13  ;;  %v4548_v43 = vmax.f32 %v4528_v41, 0.0  ;;  %v4549_v18 = vmax.f32 %v4529_v59, 0.0  ;;  %v4532_v56 = vadd.f32 %v11840_v53, %v4507_v46  ;;  %5171 = vmatpush.bf16.msrb.mxu0 %v7598_v37  ;;  %v7596_v31 = vld [vmem:[%s12207_s7 + $0x200] sm:$0xff]  ;;  %v7579_v23 = vld [vmem:[%s12207_s7 + $0x178] sm:$0xff]  ;;  %v7570_v40 = vld [vmem:[%s12207_s7 + $0x130] sm:$0xff] }
 0x9f6   :  { %v7709_v45 = vpack.i.bf16 %v11893_v49, %v11891_v7  ;;  %v4550_v39 = vmax.f32 %v4530_v5, 0.0  ;;  %v4551_v47 = vmax.f32 %v4531_v8, 0.0  ;;  %v4533_v28 = vadd.f32 %v11842_v29, %v4508_v62  ;;  %5184 = vmatpush.bf16.msrb.mxu1 %v7606_v61  ;;  %v7604_v15 = vld [vmem:[%s12207_s7 + $0x240] sm:$0xff]  ;;  %v7578_v38 = vld [vmem:[%s12207_s7 + $0x170] sm:$0xff]  ;;  %v7585_v33 = vld [vmem:[%s12207_s7 + $0x1a8] sm:$0xff] }
 0x9f7   :  { %7715 = vrot.lane.b32.xlu2 %v7714_v24, %s7741_s19  ;;  %v4534_v32 = vadd.f32 %v11840_v53, %v4509_v51  ;;  %v4535_v14 = vadd.f32 %v11842_v29, %v4510_v22  ;;  %v4552_v48 = vmax.f32 %v4532_v56, 0.0  ;;  %v4524_v1 = vadd.f32 %v11840_v53, %v4499_v34  ;;  %4815 = vmatpush.bf16.msra.mxu2 %v7549_v30  ;;  %v7569_v41 = vld [vmem:[%s12207_s7 + $0x128] sm:$0xff]  ;;  %v7592_v5 = vld [vmem:[%s12207_s7 + $0x1e0] sm:$0xff]  ;;  %v7583_v8 = vld [vmem:[%s12207_s7 + $0x198] sm:$0xff] }
 0x9f8   :  { %7710 = vrot.lane.b32.xlu1 %v7709_v45, %s7741_s19  ;;  %v11920_v0 = vmax.f32 %v4548_v43, %v4550_v39  ;;  %v11922_v12 = vmax.f32 %v4549_v18, %v4551_v47  ;;  %v4553_v20 = vmax.f32 %v4533_v28, 0.0  ;;  %v4525_v25 = vadd.f32 %v11842_v29, %v11851_v10  ;;  %4828 = vmatpush.bf16.msra.mxu3 %v7557_v6  ;;  %v7577_v59 = vld [vmem:[%s12207_s7 + $0x168] sm:$0xff]  ;;  %v7591_v50 = vld [vmem:[%s12207_s7 + $0x1d8] sm:$0xff]  ;;  %v7568_v28 = vld [vmem:[%s12207_s7 + $0x120] sm:$0xff] }
 0x9f9   :  { %v4554_v52 = vmax.f32 %v4534_v32, 0.0  ;;  %v4555_v35 = vmax.f32 %v4535_v14, 0.0  ;;  %v4526_v46 = vadd.f32 %v11840_v53, %v11854_v36  ;;  %v4527_v62 = vadd.f32 %v11842_v29, %v11857_v4  ;;  %5172 = vmatpush.bf16.msrb.mxu0 %v7597_v57  ;;  %v7576_v3 = vld [vmem:[%s12207_s7 + $0x160] sm:$0xff]  ;;  %v7582_v32 = vld [vmem:[%s12207_s7 + $0x190] sm:$0xff] }
 0x9fa   :  { %v7704_v63 = vpack.i.bf16 %v11922_v12, %v11920_v0  ;;  %v4544_v51 = vmax.f32 %v4524_v1, 0.0  ;;  %v4545_v22 = vmax.f32 %v4525_v25, 0.0  ;;  %5185 = vmatpush.bf16.msrb.mxu1 %v7605_v58  ;;  %v7575_v1 = vld [vmem:[%s12207_s7 + $0x158] sm:$0xff]  ;;  %v7581_v25 = vld [vmem:[%s12207_s7 + $0x188] sm:$0xff] }
 0x9fb   :  { %v11932_v21 = vmax.f32 %v4552_v48, %v4554_v52  ;;  %v11934_v34 = vmax.f32 %v4553_v20, %v4555_v35  ;;  %v4546_v10 = vmax.f32 %v4526_v46, 0.0  ;;  %v4547_v19 = vmax.f32 %v4527_v62, 0.0  ;;  %4816 = vmatpush.bf16.msra.mxu2 %v7548_v42  ;;  %v7567_v48 = vld [vmem:[%s12207_s7 + $0x118] sm:$0xff]  ;;  %v7589_v52 = vld [vmem:[%s12207_s7 + $0x1c8] sm:$0xff]  ;;  %v7566_v35 = vld [vmem:[%s12207_s7 + $0x110] sm:$0xff] }
 0x9fc   :  { %7705 = vrot.lane.b32.xlu0 %v7704_v63, %s7741_s19  ;;  %4829 = vmatpush.bf16.msra.mxu3 %v7556_v26  ;;  %v7574_v46 = vld [vmem:[%s12207_s7 + $0x150] sm:$0xff]  ;;  %v7580_v62 = vld [vmem:[%s12207_s7 + $0x180] sm:$0xff] }
 0x9fd   :  { %v7724_v53 = vpack.i.bf16 %v11934_v34, %v11932_v21  ;;  %v11939_v29 = vmax.f32 %v4544_v51, %v4546_v10  ;;  %v11941_v36 = vmax.f32 %v4545_v22, %v4547_v19  ;;  %5173 = vmatpush.bf16.msrb.mxu0 %v7596_v31  ;;  %v7588_v63 = vld [vmem:[%s12207_s7 + $0x1c0] sm:$0xff]  ;;  %v7565_v51 = vld [vmem:[%s12207_s7 + $0x108] sm:$0xff] }
 0x9fe   :  { %5186 = vmatpush.bf16.msrb.mxu1 %v7604_v15  ;;  %v7573_v22 = vld [vmem:[%s12207_s7 + $0x148] sm:$0xff]  ;;  %v7564_v10 = vld [vmem:[%s12207_s7 + $0x100] sm:$0xff] }
 0x9ff   :  { %v7719_v4 = vpack.i.bf16 %v11941_v36, %v11939_v29  ;;  %5004 = vmatpush.bf16.msrb.mxu2 %v7587_v9  ;;  %v7572_v19 = vld [vmem:[%s12207_s7 + $0x140] sm:$0xff] }
 0xa00   :  { %7725 = vrot.lane.b32.xlu1 %v7724_v53, %s7741_s19  ;;  %5017 = vmatpush.bf16.msrb.mxu3 %v7595_v60 }
 0xa01   :  { %5424 = vmatpush.bf16.msra.mxu0 %v7571_v17 }
 0xa02   :  { %5437 = vmatpush.bf16.msra.mxu1 %v7579_v23 }
 0xa03   :  { %5005 = vmatpush.bf16.msrb.mxu2 %v7586_v54 }
 0xa04   :  { %7720 = vrot.lane.b32.xlu0 %v7719_v4, %s7741_s19  ;;  %5018 = vmatpush.bf16.msrb.mxu3 %v7594_v16 }
 0xa05   :  { %5425 = vmatpush.bf16.msra.mxu0 %v7570_v40 }
 0xa06   :  { %5438 = vmatpush.bf16.msra.mxu1 %v7578_v38  ;;  %v7547_v38 = vld [vmem:[%s12207_s7 + $0x78] sm:$0xff] }
 0xa07   :  { %5006 = vmatpush.bf16.msrb.mxu2 %v7585_v33 }
 0xa08   :  { %5019 = vmatpush.bf16.msrb.mxu3 %v7593_v44 }
 0xa09   :  { %5426 = vmatpush.bf16.msra.mxu0 %v7569_v41 }
 0xa0a   :  { %5439 = vmatpush.bf16.msra.mxu1 %v7577_v59 }
 0xa0b   :  { %5007 = vmatpush.bf16.msrb.mxu2 %v7584_v55 }
 0xa0c   :  { %5020 = vmatpush.bf16.msrb.mxu3 %v7592_v5 }
 0xa0d   :  { %5427 = vmatpush.bf16.msra.mxu0 %v7568_v28 }
 0xa0e   :  { %5440 = vmatpush.bf16.msra.mxu1 %v7576_v3 }
 0xa0f   :  { %5008 = vmatpush.bf16.msrb.mxu2 %v7583_v8  ;;  %v7546_v8 = vld [vmem:[%s12207_s7 + $0x70] sm:$0xff] }
 0xa10   :  { %5021 = vmatpush.bf16.msrb.mxu3 %v7591_v50 }
 0xa11   :  { %5428 = vmatpush.bf16.msra.mxu0 %v7567_v48 }
 0xa12   :  { %5441 = vmatpush.bf16.msra.mxu1 %v7575_v1 }
 0xa13   :  { %5009 = vmatpush.bf16.msrb.mxu2 %v7582_v32 }
 0xa15   :  { %5429 = vmatpush.bf16.msra.mxu0 %v7566_v35 }
 0xa16   :  { %5442 = vmatpush.bf16.msra.mxu1 %v7574_v46  ;;  %v7541_v46 = vld [vmem:[%s12207_s7 + $0x48] sm:$0xff] }
 0xa17   :  { %5010 = vmatpush.bf16.msrb.mxu2 %v7581_v25  ;;  %v7542_v25 = vld [vmem:[%s12207_s7 + $0x50] sm:$0xff] }
 0xa19   :  { %5430 = vmatpush.bf16.msra.mxu0 %v7565_v51 }
 0xa1a   :  { %5443 = vmatpush.bf16.msra.mxu1 %v7573_v22 }
 0xa1b   :  { %5011 = vmatpush.bf16.msrb.mxu2 %v7580_v62 }
 0xa1d   :  { %5431 = vmatpush.bf16.msra.mxu0 %v7564_v10 }
 0xa1e   :  { %5444 = vmatpush.bf16.msra.mxu1 %v7572_v19 }
 0xa51   :  { %v7716_v24 = vpop.permute.xlu2 %7715 }
 0xa52   :  { %v7718_v43 = vunpack.i.h.bf16 %v7716_v24  ;;  %v7717_v18 = vunpack.i.l.bf16 %v7716_v24 }
 0xa54   :  { %v4629_v56 = vmax.f32 %v11884_v11, %v7718_v43  ;;  %v4609_v27 = vsel %vm4604_vm3, %v7717_v18, %v7718_v43  ;;  %v7537_v18 = vld [vmem:[%s12207_s7 + $0x28] sm:$0xff] }
 0xa55   :  { %v4628_v45 = vmax.f32 %v11882_v13, %v4609_v27  ;;  %v7590_v13 = vld [vmem:[%s12207_s7 + $0x1d0] sm:$0xff] }
 0xa56   :  { %v4635_v39 = vsel %vm4630_vm7, %v4629_v56, 0.0  ;;  %5022 = vmatpush.bf16.msrb.mxu3 %v7590_v13  ;;  %v7545_v56 = vld [vmem:[%s12207_s7 + $0x68] sm:$0xff] }
 0xa57   :  { %v4640_v47 = vpack.c.bf16 %v4635_v39, %v4628_v45  ;;  %v7544_v39 = vld [vmem:[%s12207_s7 + $0x60] sm:$0xff] }
 0xa59   :  { %v5064_v11 = vunpack.c.l.b16 %v4640_v47  ;;  %v5065_v14 = vunpack.c.h.b16 %v4640_v47 }
 0xa5a   :  { %5023 = vmatpush.bf16.msrb.mxu3 %v7589_v52 }
 0xa5b   :  { %v5066_v2 = vpack.c.b16 %v5064_v11, %v5064_v11  ;;  %v5067_v20 = vpack.c.b16 %v5065_v14, %v5065_v14  ;;  %v7535_v11 = vld [vmem:[%s12207_s7 + $0x18] sm:$0xff] }
 0xa5c   :  { %v7543_v14 = vld [vmem:[%s12207_s7 + $0x58] sm:$0xff] }
 0xa5d   :  { %5174 = vmatmul.bf16.vlgmr.msrb.gmra.mxu0 %v5066_v2  ;;  %5187 = vmatmul.bf16.vlgmr.msrb.gmra.mxu1 %v5067_v20  ;;  %v7534_v20 = vld [vmem:[%s12207_s7 + $0x10] sm:$0xff] }
 0xa5e   :  { %5024 = vmatpush.bf16.msrb.mxu3 %v7588_v63  ;;  %v7532_v63 = vld [vmem:[%s12207_s7] sm:$0xff] }
 0xa6a   :  { %v7711_v53 = vpop.permute.xlu1 %7710 }
 0xa6b   :  { %v7713_v31 = vunpack.i.h.bf16 %v7711_v53  ;;  %v7712_v15 = vunpack.i.l.bf16 %v7711_v53 }
 0xa6d   :  { %v4608_v59 = vsel %vm4604_vm3, %v7712_v15, %v7713_v31 }
 0xa6e   :  { %v7706_v4 = vpop.permute.xlu0 %7705  ;;  %v4626_v50 = vmax.f32 %v11891_v7, %v4608_v59  ;;  %v7536_v7 = vld [vmem:[%s12207_s7 + $0x20] sm:$0xff] }
 0xa6f   :  { %v7708_v37 = vunpack.i.h.bf16 %v7706_v4  ;;  %v7707_v61 = vunpack.i.l.bf16 %v7706_v4 }
 0xa71   :  { %v4623_v30 = vmax.f32 %v11922_v12, %v7708_v37  ;;  %v4606_v6 = vsel %vm4604_vm3, %v7707_v61, %v7708_v37 }
 0xa72   :  { %v4622_v57 = vmax.f32 %v11920_v0, %v4606_v6  ;;  %v7726_v58 = vpop.permute.xlu1 %7725  ;;  %v7539_v0 = vld [vmem:[%s12207_s7 + $0x38] sm:$0xff] }
 0xa73   :  { %v4632_v42 = vsel %vm4630_vm7, %v4623_v30, 0.0  ;;  %v7728_v26 = vunpack.i.h.bf16 %v7726_v58  ;;  %v7727_v9 = vunpack.i.l.bf16 %v7726_v58  ;;  %v7619_v6 = vld [vmem:[%s12211_s9 + $0x38] sm:$0xff]  ;;  %v7617_v58 = vld [vmem:[%s12211_s9 + $0x28] sm:$0xff] }
 0xa74   :  { %v4637_v60 = vpack.c.bf16 %v4632_v42, %v4622_v57  ;;  %v7618_v57 = vld [vmem:[%s12211_s9 + $0x30] sm:$0xff]  ;;  %v7616_v42 = vld [vmem:[%s12211_s9 + $0x20] sm:$0xff] }
 0xa75   :  { %v4625_v17 = vmax.f32 %v11934_v34, %v7728_v26  ;;  %v4607_v23 = vsel %vm4604_vm3, %v7727_v9, %v7728_v26  ;;  %v4627_v34 = vmax.f32 %v11893_v49, %v7713_v31 }
 0xa76   :  { %v4707_v54 = vunpack.c.l.b16 %v4637_v60  ;;  %v4708_v16 = vunpack.c.h.b16 %v4637_v60  ;;  %v4624_v12 = vmax.f32 %v11932_v21, %v4607_v23  ;;  %v7538_v21 = vld [vmem:[%s12207_s7 + $0x30] sm:$0xff]  ;;  %v7721_v45 = vpop.permute.xlu0 %7720 }
 0xa77   :  { %v4633_v40 = vsel %vm4630_vm7, %v4625_v17, 0.0  ;;  %v4634_v43 = vsel %vm4630_vm7, %v4627_v34, 0.0  ;;  %v7723_v3 = vunpack.i.h.bf16 %v7721_v45  ;;  %v7722_v32 = vunpack.i.l.bf16 %v7721_v45  ;;  %v7612_v34 = vld [vmem:[%s12211_s9] sm:$0xff] }
 0xa78   :  { %v4709_v33 = vpack.c.b16 %v4707_v54, %v4707_v54  ;;  %v4710_v44 = vpack.c.b16 %v4708_v16, %v4708_v16  ;;  %v4638_v41 = vpack.c.bf16 %v4633_v40, %v4624_v12  ;;  %v4639_v27 = vpack.c.bf16 %v4634_v43, %v4626_v50  ;;  %v7615_v16 = vld [vmem:[%s12211_s9 + $0x18] sm:$0xff]  ;;  %v7614_v12 = vld [vmem:[%s12211_s9 + $0x10] sm:$0xff] }
 0xa79   :  { %v4621_v1 = vmax.f32 %v11941_v36, %v7723_v3  ;;  %v4605_v2 = vsel %vm4604_vm3, %v7722_v32, %v7723_v3  ;;  %v7533_v36 = vld [vmem:[%s12207_s7 + $0x8] sm:$0xff]  ;;  %v7627_v40 = vld [vmem:[%s12212_s11 + $0x38] sm:$0xff] }
 0xa7a   :  { %v5322_v55 = vunpack.c.l.b16 %v4638_v41  ;;  %v5323_v5 = vunpack.c.h.b16 %v4638_v41  ;;  %4817 = vmatmul.bf16.vlgmr.msra.gmra.mxu2 %v4709_v33  ;;  %4830 = vmatmul.bf16.vlgmr.msra.gmra.mxu3 %v4710_v44  ;;  %v4902_v47 = vunpack.c.l.b16 %v4639_v27  ;;  %v4903_v28 = vunpack.c.h.b16 %v4639_v27  ;;  %v7626_v33 = vld [vmem:[%s12212_s11 + $0x30] sm:$0xff]  ;;  %v7613_v44 = vld [vmem:[%s12211_s9 + $0x8] sm:$0xff] }
 0xa7b   :  { %5295 = vmatpush.bf16.msra.mxu2 %v7539_v0  ;;  %5308 = vmatpush.bf16.msra.mxu3 %v7547_v38  ;;  %v4620_v52 = vmax.f32 %v11939_v29, %v4605_v2  ;;  %v4631_v35 = vsel %vm4630_vm7, %v4621_v1, 0.0  ;;  %v7540_v29 = vld [vmem:[%s12207_s7 + $0x40] sm:$0xff]  ;;  %v7625_v41 = vld [vmem:[%s12212_s11 + $0x28] sm:$0xff] }
 0xa7c   :  { %v5324_v24 = vpack.c.b16 %v5322_v55, %v5322_v55  ;;  %v5325_v49 = vpack.c.b16 %v5323_v5, %v5323_v5  ;;  %v4904_v13 = vpack.c.b16 %v4902_v47, %v4902_v47  ;;  %v4905_v48 = vpack.c.b16 %v4903_v28, %v4903_v28  ;;  %v7624_v5 = vld [vmem:[%s12212_s11 + $0x20] sm:$0xff] }
 0xa7d   :  { %v4636_v62 = vpack.c.bf16 %v4631_v35, %v4620_v52  ;;  %v7730_v1 = vld [vmem:[%s12210_s10] ss:$0 sm:$0xff] }
 0xa7e   :  { %5432 = vmatmul.bf16.vlgmr.msra.gmra.mxu0 %v5324_v24  ;;  %5445 = vmatmul.bf16.vlgmr.msra.gmra.mxu1 %v5325_v49 }
 0xa7f   :  { %5296 = vmatpush.bf16.msra.mxu2 %v7538_v21  ;;  %5309 = vmatpush.bf16.msra.mxu3 %v7546_v8  ;;  %v5193_v51 = vunpack.c.l.b16 %v4636_v62  ;;  %v5194_v22 = vunpack.c.h.b16 %v4636_v62  ;;  %v7623_v8 = vld [vmem:[%s12212_s11 + $0x18] sm:$0xff] }
 0xa81   :  { %v5195_v10 = vpack.c.b16 %v5193_v51, %v5193_v51  ;;  %v5196_v19 = vpack.c.b16 %v5194_v22, %v5194_v22 }
 0xa83   :  { %5297 = vmatpush.bf16.msra.mxu2 %v7537_v18  ;;  %5310 = vmatpush.bf16.msra.mxu3 %v7545_v56  ;;  %v7622_v56 = vld [vmem:[%s12212_s11 + $0x10] sm:$0xff] }
 0xa87   :  { %5298 = vmatpush.bf16.msra.mxu2 %v7536_v7  ;;  %5311 = vmatpush.bf16.msra.mxu3 %v7544_v39  ;;  %v7729_v39 = vld [vmem:[%s12209_s8] ss:$0 sm:$0xff] }
 0xa8a   :  { %5012 = vmatmul.bf16.vlgmr.msrb.gmra.mxu2 %v4904_v13  ;;  %5025 = vmatmul.bf16.vlgmr.msrb.gmra.mxu3 %v4905_v48  ;;  %v7621_v13 = vld [vmem:[%s12212_s11 + $0x8] sm:$0xff]  ;;  %v7620_v48 = vld [vmem:[%s12212_s11] sm:$0xff] }
 0xa8b   :  { %5299 = vmatpush.bf16.msra.mxu2 %v7535_v11  ;;  %5312 = vmatpush.bf16.msra.mxu3 %v7543_v14 }
 0xa8f   :  { %5300 = vmatpush.bf16.msra.mxu2 %v7534_v20  ;;  %5313 = vmatpush.bf16.msra.mxu3 %v7542_v25 }
 0xa93   :  { %5301 = vmatpush.bf16.msra.mxu2 %v7533_v36  ;;  %5314 = vmatpush.bf16.msra.mxu3 %v7541_v46  ;;  %v7731_v36 = vld [vmem:[%s12213_s12] ss:$0 sm:$0xff] }
 0xa97   :  { %5302 = vmatpush.bf16.msra.mxu2 %v7532_v63  ;;  %5315 = vmatpush.bf16.msra.mxu3 %v7540_v29 }
 0xa9a   :  { %5303 = vmatmul.bf16.vlgmr.msra.gmra.mxu2 %v5195_v10  ;;  %5316 = vmatmul.bf16.vlgmr.msra.gmra.mxu3 %v5196_v19 }
 0xa9b   :  { %5527 = vmatpush.bf16.msrb.mxu2 %v7619_v6  ;;  %5610 = vmatpush.bf16.msrb.mxu3 %v7627_v40 }
 0xa9f   :  { %5528 = vmatpush.bf16.msrb.mxu2 %v7618_v57  ;;  %5611 = vmatpush.bf16.msrb.mxu3 %v7626_v33 }
 0xaa3   :  { %5529 = vmatpush.bf16.msrb.mxu2 %v7617_v58  ;;  %5612 = vmatpush.bf16.msrb.mxu3 %v7625_v41 }
 0xaa7   :  { %5530 = vmatpush.bf16.msrb.mxu2 %v7616_v42  ;;  %5613 = vmatpush.bf16.msrb.mxu3 %v7624_v5 }
 0xaab   :  { %5531 = vmatpush.bf16.msrb.mxu2 %v7615_v16  ;;  %5614 = vmatpush.bf16.msrb.mxu3 %v7623_v8 }
 0xaaf   :  { %5532 = vmatpush.bf16.msrb.mxu2 %v7614_v12  ;;  %5615 = vmatpush.bf16.msrb.mxu3 %v7622_v56 }
 0xab3   :  { %5533 = vmatpush.bf16.msrb.mxu2 %v7613_v44  ;;  %5616 = vmatpush.bf16.msrb.mxu3 %v7621_v13 }
 0xab7   :  { %5534 = vmatpush.bf16.msrb.mxu2 %v7612_v34  ;;  %5617 = vmatpush.bf16.msrb.mxu3 %v7620_v48 }
 0xada   :  { %v5175_v53 = vpop.f32.mrf.mxu0  ;;  %v5188_v4 = vpop.f32.mrf.mxu1 }
 0xadb   :  { %v5189_v37 = vadd.f32 %v5188_v4, %v5175_v53 }
 0xae2   :  { %v5177_v61 = vpop.f32.mrf.mxu0  ;;  %v5190_v30 = vpop.f32.mrf.mxu1 }
 0xafb   :  { %v5433_v26 = vpop.f32.mrf.mxu0  ;;  %v5446_v9 = vpop.f32.mrf.mxu1 }
 0xafd   :  { %v4818_v60 = vpop.f32.mrf.mxu2  ;;  %v4831_v31 = vpop.f32.mrf.mxu3 }
 0xafe   :  { %v4832_v50 = vadd.f32 %v4831_v31, %v4818_v60 }
 0xb03   :  { %v5435_v15 = vpop.f32.mrf.mxu0  ;;  %v5448_v17 = vpop.f32.mrf.mxu1 }
 0xb05   :  { %v4820_v23 = vpop.f32.mrf.mxu2  ;;  %v4833_v54 = vpop.f32.mrf.mxu3 }
 0xb0d   :  { %v5013_v0 = vpop.f32.mrf.mxu2  ;;  %v5026_v38 = vpop.f32.mrf.mxu3 }
 0xb0e   :  { %v5027_v21 = vadd.f32 %v5026_v38, %v5013_v0 }
 0xb10   :  { %v5434_v24 = vadd.f32 %v5433_v26, %v5027_v21 }
 0xb12   :  { %v5447_v45 = vadd.f32 %v5446_v9, %v5434_v24 }
 0xb15   :  { %v5015_v59 = vpop.f32.mrf.mxu2  ;;  %v5028_v55 = vpop.f32.mrf.mxu3 }
 0xb1d   :  { %v5304_v49 = vpop.f32.mrf.mxu2  ;;  %v5317_v43 = vpop.f32.mrf.mxu3 }
 0xb1e   :  { %v5305_v18 = vadd.f32 %v5304_v49, %v4832_v50 }
 0xb20   :  { %v5318_v27 = vadd.f32 %v5317_v43, %v5305_v18 }
 0xb22   :  { %v5450_v7 = vadd.f32 %v5447_v45, %v5318_v27 }
 0xb24   :  { %v5451_v47 = vadd.f32 %v5450_v7, %v5189_v37 }
 0xb25   :  { %v5306_v28 = vpop.f32.mrf.mxu2  ;;  %v5319_v3 = vpop.f32.mrf.mxu3 }
 0xb26   :  { %v5456_v32 = vadd.f32 %v7729_v39, %v5451_v47 }
 0xb28   :  { %v5457_v11 = vmax.f32 %v5456_v32, 0.0 }
 0xb2a   :  { %v5458_v14 = vpack.c.bf16 %v5457_v11, %v5457_v11 }
 0xb2c   :  { %5535 = vmatmul.bf16.vlgmr.msrb.gmra.mxu2 %v5458_v14 }
 0xbaf   :  { %v5536_v2 = vpop.f32.mrf.mxu2 }
 0xbb0   :  { %v5537_v20 = vadd.f32 %v7730_v1, %v5536_v2 }
 0xbb2   :  { %v5540_v25 = vmax.f32 %v5537_v20, 0.0 }
 0xbb4   :  { %v5541_v52 = vpack.c.bf16 %v5540_v25, %v5540_v25 }
 0xbb6   :  { %5618 = vmatmul.bf16.vlgmr.msrb.gmra.mxu3 %v5541_v52 }
 0xbb7   :  { %v5538_v35 = vpop.f32.mrf.mxu2 }
 0xc39   :  { %v5619_v46 = vpop.f32.mrf.mxu3 }
 0xc3a   :  { %v5620_v62 = vadd.f32 %v7731_v36, %v5619_v46 }
 0xc3c   :  { %5623 = vst [vmem:[%s12214_s13] sm:$0xff] %v5620_v62 }
 0xc41   :  { %v5621_v63 = vpop.f32.mrf.mxu3 }

</bundles_post_ra>
